<compile_context>
chip_gen: v6e
topology: v6e:2x2x1
jax: 0.10.0
libtpu: 0.0.40
codegen_flags: <defaults>
</compile_context>

<pallas_src>
import functools

import numpy as np
import jax
import jax.numpy as jnp
from jax.experimental import pallas as pl
from jax.experimental.pallas import tpu as pltpu


# (Cin, Cout, kernel_size) exactly as in the PyTorch __init__.
_LAYER_SHAPES = [
    (64, 32, 4),
    (32, 32, 5),
    (32, 32, 5),
    (32, 16, 5),
    (16, 8, 5),
    (8, 4, 5),
    (4, 1, 5),
]


def init_params(key):
    params = []
    for cin, cout, k in _LAYER_SHAPES:
        key, kw, kb = jax.random.split(key, 3)
        w = 0.05 * jax.random.normal(kw, (cin, cout, k, k), jnp.float32)
        b = 0.05 * jax.random.normal(kb, (cout,), jnp.float32)
        params.append((w, b))
    return params


# ------------------------- host-side weight packing -------------------------
def _build_layer_toeplitz(w_np, w_in):
    """Fold the k horizontal taps + Cin contraction of one ConvTranspose2d
    into k block-Toeplitz matrices acting on rows of the (H, W*Cin)-layout
    padded activation:
        T[i, (wo + j)*Cin + ci, wo*Cout + co] = w[ci, co, k-1-i, k-1-j]
    so that  out = sum_i  xpad[i : i+Ho, :] @ T[i].
    """
    cin, cout, k, _ = w_np.shape
    wo_n = w_in + k - 1
    wpad = w_in + 2 * (k - 1)
    wflip = w_np[:, :, ::-1, ::-1]                      # (Cin, Cout, k, k)
    T = np.zeros((k, wpad, cin, wo_n, cout), np.float32)
    for i in range(k):
        for j in range(k):
            for wo in range(wo_n):
                T[i, wo + j, :, wo, :] = wflip[:, :, i, j]
    return T.reshape(k, wpad * cin, wo_n * cout)


def prepare_packed_params(params):
    """Precompute (once, on host) everything the fused kernel needs."""
    h = w = 1                                           # latent spatial size
    t_mats, b_rows, dims = [], [], []
    for (wgt, bias) in params:
        w_np = np.asarray(jax.device_get(wgt), np.float32)
        b_np = np.asarray(jax.device_get(bias), np.float32)
        cin, cout, k, _ = w_np.shape
        ho, wo = h + k - 1, w + k - 1
        hpad, wpad = h + 2 * (k - 1), w + 2 * (k - 1)
        t_mats.append(jnp.asarray(_build_layer_toeplitz(w_np, w), jnp.bfloat16))
        b_rows.append(jnp.asarray(np.tile(b_np, wo).reshape(1, wo * cout),
                                  jnp.float32))
        dims.append((h, w, cin, cout, k, ho, wo, hpad, wpad))
        h, w = ho, wo
    return tuple(t_mats), tuple(b_rows), tuple(dims)


# ------------------------------- fused kernel -------------------------------
def _fused_generator_kernel(x_ref, *refs, layer_dims):
    n_layers = len(layer_dims)
    t_refs = refs[:n_layers]
    b_refs = refs[n_layers:2 * n_layers]
    o_ref = refs[2 * n_layers]
    pad_refs = refs[2 * n_layers + 1:]

    h = x_ref[...].astype(jnp.float32)                  # (1, W0*Cin0) latent row
    for l, (h_in, w_in, cin, cout, k, ho, wo, hpad, wpad) in enumerate(layer_dims):
        pad_ref = pad_refs[l]
        # Zero-pad by (k-1) on every side, in (H, W*C) layout (VMEM scratch).
        pad_ref[...] = jnp.zeros(pad_ref.shape, pad_ref.dtype)
        pad_ref[k - 1:k - 1 + h_in,
                (k - 1) * cin:(k - 1) * cin + w_in * cin] = h
        # ConvTranspose2d(stride=1, pad=0) == sum over k vertical taps of a
        # lane-dense 2-D matmul with the precomputed block-Toeplitz weights.
        acc = jnp.zeros((ho, wo * cout), jnp.float32)
        for i in range(k):
            lhs = pad_ref[i:i + ho, :].astype(jnp.bfloat16)     # (Ho, Wpad*Cin)
            acc = acc + jnp.dot(lhs, t_refs[l][i],              # (.., Wo*Cout)
                                preferred_element_type=jnp.float32)
        acc = acc + b_refs[l][...]
        h = jnp.tanh(acc) if l == n_layers - 1 else jnp.maximum(acc, 0.0)

    o_ref[...] = h                                      # (28, 28) image plane


def make_generator_forward(dims):
    n_layers = len(dims)
    kernel = functools.partial(_fused_generator_kernel, layer_dims=dims)
    cin0 = dims[0][2]
    ho_f, wo_f, cout_f = dims[-1][5], dims[-1][6], dims[-1][3]

    @jax.jit
    def forward(x_nchw, t_mats, b_rows):
        n = x_nchw.shape[0]
        # Latent (N, Cin0, 1, 1) NCHW -> (N, 1, Cin0) row in (H, W*C) layout.
        x_rows = x_nchw.reshape(n, 1, cin0)

        in_specs = [pl.BlockSpec((None, 1, cin0), lambda b: (b, 0, 0))]
        for t in t_mats:
            in_specs.append(pl.BlockSpec(t.shape, lambda b: (0, 0, 0)))
        for br in b_rows:
            in_specs.append(pl.BlockSpec(br.shape, lambda b: (0, 0)))

        scratch = [pltpu.VMEM((hpad, wpad * cin), jnp.float32)
                   for (_, _, cin, _, _, _, _, hpad, wpad) in dims]

        out = pl.pallas_call(
            kernel,
            out_shape=jax.ShapeDtypeStruct((n, ho_f, wo_f * cout_f), jnp.float32),
            grid=(n,),
            in_specs=in_specs,
            out_specs=pl.BlockSpec((None, ho_f, wo_f * cout_f),
                                   lambda b: (b, 0, 0)),
            scratch_shapes=scratch,
            compiler_params=pltpu.CompilerParams(
                dimension_semantics=("parallel",),
                vmem_limit_bytes=32 * 1024 * 1024),
        )(x_rows, *t_mats, *b_rows)

        # (N, 28, 28) in (H, W*Cout=1) layout -> NCHW (N, 1, 28, 28).
        return out[:, None, :, :]

    return forward


# -------------------- pure-JAX reference (for checking) ---------------------
def _deconv_ref(x_nchw, w, b):
    k = w.shape[-1]
    wf = jnp.transpose(w[:, :, ::-1, ::-1], (1, 0, 2, 3))     # (Cout, Cin, k, k)
    out = jax.lax.conv_general_dilated(
        x_nchw, wf, window_strides=(1, 1),
        padding=[(k - 1, k - 1), (k - 1, k - 1)],
        dimension_numbers=("NCHW", "OIHW", "NCHW"),
        precision=jax.lax.Precision.HIGHEST)
    return out + b.reshape(1, -1, 1, 1)


def generator_ref(x_nchw, params):
    x = x_nchw
    for idx, (w, b) in enumerate(params):
        x = _deconv_ref(x, w, b)
        x = jnp.tanh(x) if idx == len(params) - 1 else jax.nn.relu(x)
    return x


if __name__ == "__main__":
    key = jax.random.PRNGKey(0)
    kx, kp = jax.random.split(key)
    params = init_params(kp)
    t_mats, b_rows, dims = prepare_packed_params(params)
    forward = make_generator_forward(dims)

    # Latent input implied by the module: (N, latent_channels=64, 1, 1) NCHW.
    x = jax.random.normal(kx, (2, 64, 1, 1), jnp.float32)

    out = forward(x, t_mats, b_rows)
    out = jax.block_until_ready(out)
    assert out.shape == (2, 1, 28, 28), out.shape

    ref = generator_ref(x, params)
    err = float(jnp.max(jnp.abs(out - ref)))
    assert err < 2e-2, f"max abs error vs reference: {err}"

    print("KERNEL_OK")
</pallas_src>

<mosaic_0001>
module attributes {stable_mosaic.version = 11 : i64} {
  func.func @_fused_generator_kernel(%arg0: i32, %arg1: memref<1x1x64xf32, #tpu.memory_space<vmem>>, %arg2: memref<4x448x128xbf16, #tpu.memory_space<vmem>>, %arg3: memref<5x384x256xbf16, #tpu.memory_space<vmem>>, %arg4: memref<5x512x384xbf16, #tpu.memory_space<vmem>>, %arg5: memref<5x640x256xbf16, #tpu.memory_space<vmem>>, %arg6: memref<5x384x160xbf16, #tpu.memory_space<vmem>>, %arg7: memref<5x224x96xbf16, #tpu.memory_space<vmem>>, %arg8: memref<5x128x28xbf16, #tpu.memory_space<vmem>>, %arg9: memref<1x128xf32, #tpu.memory_space<vmem>>, %arg10: memref<1x256xf32, #tpu.memory_space<vmem>>, %arg11: memref<1x384xf32, #tpu.memory_space<vmem>>, %arg12: memref<1x256xf32, #tpu.memory_space<vmem>>, %arg13: memref<1x160xf32, #tpu.memory_space<vmem>>, %arg14: memref<1x96xf32, #tpu.memory_space<vmem>>, %arg15: memref<1x28xf32, #tpu.memory_space<vmem>>, %arg16: memref<1x28x28xf32, #tpu.memory_space<vmem>>, %arg17: memref<7x448xf32, #tpu.memory_space<vmem>>, %arg18: memref<12x384xf32, #tpu.memory_space<vmem>>, %arg19: memref<16x512xf32, #tpu.memory_space<vmem>>, %arg20: memref<20x640xf32, #tpu.memory_space<vmem>>, %arg21: memref<24x384xf32, #tpu.memory_space<vmem>>, %arg22: memref<28x224xf32, #tpu.memory_space<vmem>>, %arg23: memref<32x128xf32, #tpu.memory_space<vmem>>) attributes {dimension_semantics = [#tpu.dimension_semantics<parallel>], iteration_bounds = array<i64: 2>, scalar_prefetch = 0 : i64, scratch_operands = 7 : i64, tpu.core_type = #tpu.core_type<tc>, window_params = [{transform_indices = @transform_0, window_bounds = array<i64: 1, 1, 64>}, {pipeline_mode = #tpu.pipeline_mode<synchronous>, transform_indices = @transform_1, window_bounds = array<i64: 4, 448, 128>}, {pipeline_mode = #tpu.pipeline_mode<synchronous>, transform_indices = @transform_2, window_bounds = array<i64: 5, 384, 256>}, {pipeline_mode = #tpu.pipeline_mode<synchronous>, transform_indices = @transform_3, window_bounds = array<i64: 5, 512, 384>}, {pipeline_mode = #tpu.pipeline_mode<synchronous>, transform_indices = @transform_4, window_bounds = array<i64: 5, 640, 256>}, {pipeline_mode = #tpu.pipeline_mode<synchronous>, transform_indices = @transform_5, window_bounds = array<i64: 5, 384, 160>}, {pipeline_mode = #tpu.pipeline_mode<synchronous>, transform_indices = @transform_6, window_bounds = array<i64: 5, 224, 96>}, {pipeline_mode = #tpu.pipeline_mode<synchronous>, transform_indices = @transform_7, window_bounds = array<i64: 5, 128, 28>}, {pipeline_mode = #tpu.pipeline_mode<synchronous>, transform_indices = @transform_8, window_bounds = array<i64: 1, 128>}, {pipeline_mode = #tpu.pipeline_mode<synchronous>, transform_indices = @transform_9, window_bounds = array<i64: 1, 256>}, {pipeline_mode = #tpu.pipeline_mode<synchronous>, transform_indices = @transform_10, window_bounds = array<i64: 1, 384>}, {pipeline_mode = #tpu.pipeline_mode<synchronous>, transform_indices = @transform_11, window_bounds = array<i64: 1, 256>}, {pipeline_mode = #tpu.pipeline_mode<synchronous>, transform_indices = @transform_12, window_bounds = array<i64: 1, 160>}, {pipeline_mode = #tpu.pipeline_mode<synchronous>, transform_indices = @transform_13, window_bounds = array<i64: 1, 96>}, {pipeline_mode = #tpu.pipeline_mode<synchronous>, transform_indices = @transform_14, window_bounds = array<i64: 1, 28>}, {transform_indices = @transform_15, window_bounds = array<i64: 1, 28, 28>}]} {
    %c0 = arith.constant 0 : index
    %c0_0 = arith.constant 0 : index
    %c0_1 = arith.constant 0 : index
    %0 = vector.load %arg1[%c0, %c0_0, %c0_1] : memref<1x1x64xf32, #tpu.memory_space<vmem>>, vector<1x1x64xf32>
    %1 = vector.shape_cast %0 : vector<1x1x64xf32> to vector<1x64xf32>
    %cst = arith.constant 0.000000e+00 : f32
    %2 = vector.broadcast %cst : f32 to vector<7x448xf32>
    %c0_2 = arith.constant 0 : index
    %c0_3 = arith.constant 0 : index
    %3 = vector.load %arg17[%c0_2, %c0_3] : memref<7x448xf32, #tpu.memory_space<vmem>>, vector<7x448xf32>
    tpu.vector_store %arg17[%c0_2, %c0_3], %2 {strides = array<i32>} : memref<7x448xf32, #tpu.memory_space<vmem>>, vector<7x448xf32>,
    %c3 = arith.constant 3 : index
    %c192 = arith.constant 192 : index
    %4 = vector.load %arg17[%c3, %c192] : memref<7x448xf32, #tpu.memory_space<vmem>>, vector<1x64xf32>
    tpu.vector_store %arg17[%c3, %c192], %1 {strides = array<i32>} : memref<7x448xf32, #tpu.memory_space<vmem>>, vector<1x64xf32>,
    %cst_4 = arith.constant 0.000000e+00 : f32
    %5 = vector.broadcast %cst_4 : f32 to vector<4x128xf32>
    %c0_5 = arith.constant 0 : index
    %c0_6 = arith.constant 0 : index
    %6 = vector.load %arg17[%c0_5, %c0_6] : memref<7x448xf32, #tpu.memory_space<vmem>>, vector<4x448xf32>
    %7 = arith.truncf %6 : vector<4x448xf32> to vector<4x448xbf16>
    %c0_7 = arith.constant 0 : index
    %c0_8 = arith.constant 0 : index
    %c0_9 = arith.constant 0 : index
    %8 = vector.load %arg2[%c0_7, %c0_8, %c0_9] : memref<4x448x128xbf16, #tpu.memory_space<vmem>>, vector<1x448x128xbf16>
    %9 = vector.shape_cast %8 : vector<1x448x128xbf16> to vector<448x128xbf16>
    %cst_10 = arith.constant dense<0.000000e+00> : vector<4x128xf32>
    %10 = tpu.matmul %7, %9, %cst_10 {dimension_numbers = #tpu.dot_dimension_numbers<[1], [0], [0], [1], [0, 0, 1, 1], [], []>} : vector<4x448xbf16>, vector<448x128xbf16>, vector<4x128xf32> -> vector<4x128xf32>
    %11 = arith.addf %5, %10 : vector<4x128xf32>
    %c1 = arith.constant 1 : index
    %c0_11 = arith.constant 0 : index
    %12 = vector.load %arg17[%c1, %c0_11] : memref<7x448xf32, #tpu.memory_space<vmem>>, vector<4x448xf32>
    %13 = arith.truncf %12 : vector<4x448xf32> to vector<4x448xbf16>
    %c1_12 = arith.constant 1 : index
    %c0_13 = arith.constant 0 : index
    %c0_14 = arith.constant 0 : index
    %14 = vector.load %arg2[%c1_12, %c0_13, %c0_14] : memref<4x448x128xbf16, #tpu.memory_space<vmem>>, vector<1x448x128xbf16>
    %15 = vector.shape_cast %14 : vector<1x448x128xbf16> to vector<448x128xbf16>
    %cst_15 = arith.constant dense<0.000000e+00> : vector<4x128xf32>
    %16 = tpu.matmul %13, %15, %cst_15 {dimension_numbers = #tpu.dot_dimension_numbers<[1], [0], [0], [1], [0, 0, 1, 1], [], []>} : vector<4x448xbf16>, vector<448x128xbf16>, vector<4x128xf32> -> vector<4x128xf32>
    %17 = arith.addf %11, %16 : vector<4x128xf32>
    %c2 = arith.constant 2 : index
    %c0_16 = arith.constant 0 : index
    %18 = vector.load %arg17[%c2, %c0_16] : memref<7x448xf32, #tpu.memory_space<vmem>>, vector<4x448xf32>
    %19 = arith.truncf %18 : vector<4x448xf32> to vector<4x448xbf16>
    %c2_17 = arith.constant 2 : index
    %c0_18 = arith.constant 0 : index
    %c0_19 = arith.constant 0 : index
    %20 = vector.load %arg2[%c2_17, %c0_18, %c0_19] : memref<4x448x128xbf16, #tpu.memory_space<vmem>>, vector<1x448x128xbf16>
    %21 = vector.shape_cast %20 : vector<1x448x128xbf16> to vector<448x128xbf16>
    %cst_20 = arith.constant dense<0.000000e+00> : vector<4x128xf32>
    %22 = tpu.matmul %19, %21, %cst_20 {dimension_numbers = #tpu.dot_dimension_numbers<[1], [0], [0], [1], [0, 0, 1, 1], [], []>} : vector<4x448xbf16>, vector<448x128xbf16>, vector<4x128xf32> -> vector<4x128xf32>
    %23 = arith.addf %17, %22 : vector<4x128xf32>
    %c3_21 = arith.constant 3 : index
    %c0_22 = arith.constant 0 : index
    %24 = vector.load %arg17[%c3_21, %c0_22] : memref<7x448xf32, #tpu.memory_space<vmem>>, vector<4x448xf32>
    %25 = arith.truncf %24 : vector<4x448xf32> to vector<4x448xbf16>
    %c3_23 = arith.constant 3 : index
    %c0_24 = arith.constant 0 : index
    %c0_25 = arith.constant 0 : index
    %26 = vector.load %arg2[%c3_23, %c0_24, %c0_25] : memref<4x448x128xbf16, #tpu.memory_space<vmem>>, vector<1x448x128xbf16>
    %27 = vector.shape_cast %26 : vector<1x448x128xbf16> to vector<448x128xbf16>
    %cst_26 = arith.constant dense<0.000000e+00> : vector<4x128xf32>
    %28 = tpu.matmul %25, %27, %cst_26 {dimension_numbers = #tpu.dot_dimension_numbers<[1], [0], [0], [1], [0, 0, 1, 1], [], []>} : vector<4x448xbf16>, vector<448x128xbf16>, vector<4x128xf32> -> vector<4x128xf32>
    %29 = arith.addf %23, %28 : vector<4x128xf32>
    %c0_27 = arith.constant 0 : index
    %c0_28 = arith.constant 0 : index
    %30 = vector.load %arg9[%c0_27, %c0_28] : memref<1x128xf32, #tpu.memory_space<vmem>>, vector<1x128xf32>
    %31 = vector.broadcast %30 : vector<1x128xf32> to vector<4x128xf32>
    %32 = arith.addf %29, %31 : vector<4x128xf32>
    %cst_29 = arith.constant 0.000000e+00 : f32
    %33 = vector.broadcast %cst_29 : f32 to vector<4x128xf32>
    %34 = arith.maximumf %32, %33 : vector<4x128xf32>
    %cst_30 = arith.constant 0.000000e+00 : f32
    %35 = vector.broadcast %cst_30 : f32 to vector<12x384xf32>
    %c0_31 = arith.constant 0 : index
    %c0_32 = arith.constant 0 : index
    %36 = vector.load %arg18[%c0_31, %c0_32] : memref<12x384xf32, #tpu.memory_space<vmem>>, vector<12x384xf32>
    tpu.vector_store %arg18[%c0_31, %c0_32], %35 {strides = array<i32>} : memref<12x384xf32, #tpu.memory_space<vmem>>, vector<12x384xf32>,
    %c4 = arith.constant 4 : index
    %c128 = arith.constant 128 : index
    %37 = vector.load %arg18[%c4, %c128] : memref<12x384xf32, #tpu.memory_space<vmem>>, vector<4x128xf32>
    tpu.vector_store %arg18[%c4, %c128], %34 {strides = array<i32>} : memref<12x384xf32, #tpu.memory_space<vmem>>, vector<4x128xf32>,
    %cst_33 = arith.constant 0.000000e+00 : f32
    %38 = vector.broadcast %cst_33 : f32 to vector<8x256xf32>
    %c0_34 = arith.constant 0 : index
    %c0_35 = arith.constant 0 : index
    %39 = vector.load %arg18[%c0_34, %c0_35] : memref<12x384xf32, #tpu.memory_space<vmem>>, vector<8x384xf32>
    %40 = arith.truncf %39 : vector<8x384xf32> to vector<8x384xbf16>
    %c0_36 = arith.constant 0 : index
    %c0_37 = arith.constant 0 : index
    %c0_38 = arith.constant 0 : index
    %41 = vector.load %arg3[%c0_36, %c0_37, %c0_38] : memref<5x384x256xbf16, #tpu.memory_space<vmem>>, vector<1x384x256xbf16>
    %42 = vector.shape_cast %41 : vector<1x384x256xbf16> to vector<384x256xbf16>
    %cst_39 = arith.constant dense<0.000000e+00> : vector<8x256xf32>
    %43 = tpu.matmul %40, %42, %cst_39 {dimension_numbers = #tpu.dot_dimension_numbers<[1], [0], [0], [1], [0, 0, 1, 1], [], []>} : vector<8x384xbf16>, vector<384x256xbf16>, vector<8x256xf32> -> vector<8x256xf32>
    %44 = arith.addf %38, %43 : vector<8x256xf32>
    %c1_40 = arith.constant 1 : index
    %c0_41 = arith.constant 0 : index
    %45 = vector.load %arg18[%c1_40, %c0_41] : memref<12x384xf32, #tpu.memory_space<vmem>>, vector<8x384xf32>
    %46 = arith.truncf %45 : vector<8x384xf32> to vector<8x384xbf16>
    %c1_42 = arith.constant 1 : index
    %c0_43 = arith.constant 0 : index
    %c0_44 = arith.constant 0 : index
    %47 = vector.load %arg3[%c1_42, %c0_43, %c0_44] : memref<5x384x256xbf16, #tpu.memory_space<vmem>>, vector<1x384x256xbf16>
    %48 = vector.shape_cast %47 : vector<1x384x256xbf16> to vector<384x256xbf16>
    %cst_45 = arith.constant dense<0.000000e+00> : vector<8x256xf32>
    %49 = tpu.matmul %46, %48, %cst_45 {dimension_numbers = #tpu.dot_dimension_numbers<[1], [0], [0], [1], [0, 0, 1, 1], [], []>} : vector<8x384xbf16>, vector<384x256xbf16>, vector<8x256xf32> -> vector<8x256xf32>
    %50 = arith.addf %44, %49 : vector<8x256xf32>
    %c2_46 = arith.constant 2 : index
    %c0_47 = arith.constant 0 : index
    %51 = vector.load %arg18[%c2_46, %c0_47] : memref<12x384xf32, #tpu.memory_space<vmem>>, vector<8x384xf32>
    %52 = arith.truncf %51 : vector<8x384xf32> to vector<8x384xbf16>
    %c2_48 = arith.constant 2 : index
    %c0_49 = arith.constant 0 : index
    %c0_50 = arith.constant 0 : index
    %53 = vector.load %arg3[%c2_48, %c0_49, %c0_50] : memref<5x384x256xbf16, #tpu.memory_space<vmem>>, vector<1x384x256xbf16>
    %54 = vector.shape_cast %53 : vector<1x384x256xbf16> to vector<384x256xbf16>
    %cst_51 = arith.constant dense<0.000000e+00> : vector<8x256xf32>
    %55 = tpu.matmul %52, %54, %cst_51 {dimension_numbers = #tpu.dot_dimension_numbers<[1], [0], [0], [1], [0, 0, 1, 1], [], []>} : vector<8x384xbf16>, vector<384x256xbf16>, vector<8x256xf32> -> vector<8x256xf32>
    %56 = arith.addf %50, %55 : vector<8x256xf32>
    %c3_52 = arith.constant 3 : index
    %c0_53 = arith.constant 0 : index
    %57 = vector.load %arg18[%c3_52, %c0_53] : memref<12x384xf32, #tpu.memory_space<vmem>>, vector<8x384xf32>
    %58 = arith.truncf %57 : vector<8x384xf32> to vector<8x384xbf16>
    %c3_54 = arith.constant 3 : index
    %c0_55 = arith.constant 0 : index
    %c0_56 = arith.constant 0 : index
    %59 = vector.load %arg3[%c3_54, %c0_55, %c0_56] : memref<5x384x256xbf16, #tpu.memory_space<vmem>>, vector<1x384x256xbf16>
    %60 = vector.shape_cast %59 : vector<1x384x256xbf16> to vector<384x256xbf16>
    %cst_57 = arith.constant dense<0.000000e+00> : vector<8x256xf32>
    %61 = tpu.matmul %58, %60, %cst_57 {dimension_numbers = #tpu.dot_dimension_numbers<[1], [0], [0], [1], [0, 0, 1, 1], [], []>} : vector<8x384xbf16>, vector<384x256xbf16>, vector<8x256xf32> -> vector<8x256xf32>
    %62 = arith.addf %56, %61 : vector<8x256xf32>
    %c4_58 = arith.constant 4 : index
    %c0_59 = arith.constant 0 : index
    %63 = vector.load %arg18[%c4_58, %c0_59] : memref<12x384xf32, #tpu.memory_space<vmem>>, vector<8x384xf32>
    %64 = arith.truncf %63 : vector<8x384xf32> to vector<8x384xbf16>
    %c4_60 = arith.constant 4 : index
    %c0_61 = arith.constant 0 : index
    %c0_62 = arith.constant 0 : index
    %65 = vector.load %arg3[%c4_60, %c0_61, %c0_62] : memref<5x384x256xbf16, #tpu.memory_space<vmem>>, vector<1x384x256xbf16>
    %66 = vector.shape_cast %65 : vector<1x384x256xbf16> to vector<384x256xbf16>
    %cst_63 = arith.constant dense<0.000000e+00> : vector<8x256xf32>
    %67 = tpu.matmul %64, %66, %cst_63 {dimension_numbers = #tpu.dot_dimension_numbers<[1], [0], [0], [1], [0, 0, 1, 1], [], []>} : vector<8x384xbf16>, vector<384x256xbf16>, vector<8x256xf32> -> vector<8x256xf32>
    %68 = arith.addf %62, %67 : vector<8x256xf32>
    %c0_64 = arith.constant 0 : index
    %c0_65 = arith.constant 0 : index
    %69 = vector.load %arg10[%c0_64, %c0_65] : memref<1x256xf32, #tpu.memory_space<vmem>>, vector<1x256xf32>
    %70 = vector.broadcast %69 : vector<1x256xf32> to vector<8x256xf32>
    %71 = arith.addf %68, %70 : vector<8x256xf32>
    %cst_66 = arith.constant 0.000000e+00 : f32
    %72 = vector.broadcast %cst_66 : f32 to vector<8x256xf32>
    %73 = arith.maximumf %71, %72 : vector<8x256xf32>
    %cst_67 = arith.constant 0.000000e+00 : f32
    %74 = vector.broadcast %cst_67 : f32 to vector<16x512xf32>
    %c0_68 = arith.constant 0 : index
    %c0_69 = arith.constant 0 : index
    %75 = vector.load %arg19[%c0_68, %c0_69] : memref<16x512xf32, #tpu.memory_space<vmem>>, vector<16x512xf32>
    tpu.vector_store %arg19[%c0_68, %c0_69], %74 {strides = array<i32>} : memref<16x512xf32, #tpu.memory_space<vmem>>, vector<16x512xf32>,
    %c4_70 = arith.constant 4 : index
    %c128_71 = arith.constant 128 : index
    %76 = vector.load %arg19[%c4_70, %c128_71] : memref<16x512xf32, #tpu.memory_space<vmem>>, vector<8x256xf32>
    tpu.vector_store %arg19[%c4_70, %c128_71], %73 {strides = array<i32>} : memref<16x512xf32, #tpu.memory_space<vmem>>, vector<8x256xf32>,
    %cst_72 = arith.constant 0.000000e+00 : f32
    %77 = vector.broadcast %cst_72 : f32 to vector<12x384xf32>
    %c0_73 = arith.constant 0 : index
    %c0_74 = arith.constant 0 : index
    %78 = vector.load %arg19[%c0_73, %c0_74] : memref<16x512xf32, #tpu.memory_space<vmem>>, vector<12x512xf32>
    %79 = arith.truncf %78 : vector<12x512xf32> to vector<12x512xbf16>
    %c0_75 = arith.constant 0 : index
    %c0_76 = arith.constant 0 : index
    %c0_77 = arith.constant 0 : index
    %80 = vector.load %arg4[%c0_75, %c0_76, %c0_77] : memref<5x512x384xbf16, #tpu.memory_space<vmem>>, vector<1x512x384xbf16>
    %81 = vector.shape_cast %80 : vector<1x512x384xbf16> to vector<512x384xbf16>
    %cst_78 = arith.constant dense<0.000000e+00> : vector<12x384xf32>
    %82 = tpu.matmul %79, %81, %cst_78 {dimension_numbers = #tpu.dot_dimension_numbers<[1], [0], [0], [1], [0, 0, 1, 1], [], []>} : vector<12x512xbf16>, vector<512x384xbf16>, vector<12x384xf32> -> vector<12x384xf32>
    %83 = arith.addf %77, %82 : vector<12x384xf32>
    %c1_79 = arith.constant 1 : index
    %c0_80 = arith.constant 0 : index
    %84 = vector.load %arg19[%c1_79, %c0_80] : memref<16x512xf32, #tpu.memory_space<vmem>>, vector<12x512xf32>
    %85 = arith.truncf %84 : vector<12x512xf32> to vector<12x512xbf16>
    %c1_81 = arith.constant 1 : index
    %c0_82 = arith.constant 0 : index
    %c0_83 = arith.constant 0 : index
    %86 = vector.load %arg4[%c1_81, %c0_82, %c0_83] : memref<5x512x384xbf16, #tpu.memory_space<vmem>>, vector<1x512x384xbf16>
    %87 = vector.shape_cast %86 : vector<1x512x384xbf16> to vector<512x384xbf16>
    %cst_84 = arith.constant dense<0.000000e+00> : vector<12x384xf32>
    %88 = tpu.matmul %85, %87, %cst_84 {dimension_numbers = #tpu.dot_dimension_numbers<[1], [0], [0], [1], [0, 0, 1, 1], [], []>} : vector<12x512xbf16>, vector<512x384xbf16>, vector<12x384xf32> -> vector<12x384xf32>
    %89 = arith.addf %83, %88 : vector<12x384xf32>
    %c2_85 = arith.constant 2 : index
    %c0_86 = arith.constant 0 : index
    %90 = vector.load %arg19[%c2_85, %c0_86] : memref<16x512xf32, #tpu.memory_space<vmem>>, vector<12x512xf32>
    %91 = arith.truncf %90 : vector<12x512xf32> to vector<12x512xbf16>
    %c2_87 = arith.constant 2 : index
    %c0_88 = arith.constant 0 : index
    %c0_89 = arith.constant 0 : index
    %92 = vector.load %arg4[%c2_87, %c0_88, %c0_89] : memref<5x512x384xbf16, #tpu.memory_space<vmem>>, vector<1x512x384xbf16>
    %93 = vector.shape_cast %92 : vector<1x512x384xbf16> to vector<512x384xbf16>
    %cst_90 = arith.constant dense<0.000000e+00> : vector<12x384xf32>
    %94 = tpu.matmul %91, %93, %cst_90 {dimension_numbers = #tpu.dot_dimension_numbers<[1], [0], [0], [1], [0, 0, 1, 1], [], []>} : vector<12x512xbf16>, vector<512x384xbf16>, vector<12x384xf32> -> vector<12x384xf32>
    %95 = arith.addf %89, %94 : vector<12x384xf32>
    %c3_91 = arith.constant 3 : index
    %c0_92 = arith.constant 0 : index
    %96 = vector.load %arg19[%c3_91, %c0_92] : memref<16x512xf32, #tpu.memory_space<vmem>>, vector<12x512xf32>
    %97 = arith.truncf %96 : vector<12x512xf32> to vector<12x512xbf16>
    %c3_93 = arith.constant 3 : index
    %c0_94 = arith.constant 0 : index
    %c0_95 = arith.constant 0 : index
    %98 = vector.load %arg4[%c3_93, %c0_94, %c0_95] : memref<5x512x384xbf16, #tpu.memory_space<vmem>>, vector<1x512x384xbf16>
    %99 = vector.shape_cast %98 : vector<1x512x384xbf16> to vector<512x384xbf16>
    %cst_96 = arith.constant dense<0.000000e+00> : vector<12x384xf32>
    %100 = tpu.matmul %97, %99, %cst_96 {dimension_numbers = #tpu.dot_dimension_numbers<[1], [0], [0], [1], [0, 0, 1, 1], [], []>} : vector<12x512xbf16>, vector<512x384xbf16>, vector<12x384xf32> -> vector<12x384xf32>
    %101 = arith.addf %95, %100 : vector<12x384xf32>
    %c4_97 = arith.constant 4 : index
    %c0_98 = arith.constant 0 : index
    %102 = vector.load %arg19[%c4_97, %c0_98] : memref<16x512xf32, #tpu.memory_space<vmem>>, vector<12x512xf32>
    %103 = arith.truncf %102 : vector<12x512xf32> to vector<12x512xbf16>
    %c4_99 = arith.constant 4 : index
    %c0_100 = arith.constant 0 : index
    %c0_101 = arith.constant 0 : index
    %104 = vector.load %arg4[%c4_99, %c0_100, %c0_101] : memref<5x512x384xbf16, #tpu.memory_space<vmem>>, vector<1x512x384xbf16>
    %105 = vector.shape_cast %104 : vector<1x512x384xbf16> to vector<512x384xbf16>
    %cst_102 = arith.constant dense<0.000000e+00> : vector<12x384xf32>
    %106 = tpu.matmul %103, %105, %cst_102 {dimension_numbers = #tpu.dot_dimension_numbers<[1], [0], [0], [1], [0, 0, 1, 1], [], []>} : vector<12x512xbf16>, vector<512x384xbf16>, vector<12x384xf32> -> vector<12x384xf32>
    %107 = arith.addf %101, %106 : vector<12x384xf32>
    %c0_103 = arith.constant 0 : index
    %c0_104 = arith.constant 0 : index
    %108 = vector.load %arg11[%c0_103, %c0_104] : memref<1x384xf32, #tpu.memory_space<vmem>>, vector<1x384xf32>
    %109 = vector.broadcast %108 : vector<1x384xf32> to vector<12x384xf32>
    %110 = arith.addf %107, %109 : vector<12x384xf32>
    %cst_105 = arith.constant 0.000000e+00 : f32
    %111 = vector.broadcast %cst_105 : f32 to vector<12x384xf32>
    %112 = arith.maximumf %110, %111 : vector<12x384xf32>
    %cst_106 = arith.constant 0.000000e+00 : f32
    %113 = vector.broadcast %cst_106 : f32 to vector<20x640xf32>
    %c0_107 = arith.constant 0 : index
    %c0_108 = arith.constant 0 : index
    %114 = vector.load %arg20[%c0_107, %c0_108] : memref<20x640xf32, #tpu.memory_space<vmem>>, vector<20x640xf32>
    tpu.vector_store %arg20[%c0_107, %c0_108], %113 {strides = array<i32>} : memref<20x640xf32, #tpu.memory_space<vmem>>, vector<20x640xf32>,
    %c4_109 = arith.constant 4 : index
    %c128_110 = arith.constant 128 : index
    %115 = vector.load %arg20[%c4_109, %c128_110] : memref<20x640xf32, #tpu.memory_space<vmem>>, vector<12x384xf32>
    tpu.vector_store %arg20[%c4_109, %c128_110], %112 {strides = array<i32>} : memref<20x640xf32, #tpu.memory_space<vmem>>, vector<12x384xf32>,
    %cst_111 = arith.constant 0.000000e+00 : f32
    %116 = vector.broadcast %cst_111 : f32 to vector<16x256xf32>
    %c0_112 = arith.constant 0 : index
    %c0_113 = arith.constant 0 : index
    %117 = vector.load %arg20[%c0_112, %c0_113] : memref<20x640xf32, #tpu.memory_space<vmem>>, vector<16x640xf32>
    %118 = arith.truncf %117 : vector<16x640xf32> to vector<16x640xbf16>
    %c0_114 = arith.constant 0 : index
    %c0_115 = arith.constant 0 : index
    %c0_116 = arith.constant 0 : index
    %119 = vector.load %arg5[%c0_114, %c0_115, %c0_116] : memref<5x640x256xbf16, #tpu.memory_space<vmem>>, vector<1x640x256xbf16>
    %120 = vector.shape_cast %119 : vector<1x640x256xbf16> to vector<640x256xbf16>
    %cst_117 = arith.constant dense<0.000000e+00> : vector<16x256xf32>
    %121 = tpu.matmul %118, %120, %cst_117 {dimension_numbers = #tpu.dot_dimension_numbers<[1], [0], [0], [1], [0, 0, 1, 1], [], []>} : vector<16x640xbf16>, vector<640x256xbf16>, vector<16x256xf32> -> vector<16x256xf32>
    %122 = arith.addf %116, %121 : vector<16x256xf32>
    %c1_118 = arith.constant 1 : index
    %c0_119 = arith.constant 0 : index
    %123 = vector.load %arg20[%c1_118, %c0_119] : memref<20x640xf32, #tpu.memory_space<vmem>>, vector<16x640xf32>
    %124 = arith.truncf %123 : vector<16x640xf32> to vector<16x640xbf16>
    %c1_120 = arith.constant 1 : index
    %c0_121 = arith.constant 0 : index
    %c0_122 = arith.constant 0 : index
    %125 = vector.load %arg5[%c1_120, %c0_121, %c0_122] : memref<5x640x256xbf16, #tpu.memory_space<vmem>>, vector<1x640x256xbf16>
    %126 = vector.shape_cast %125 : vector<1x640x256xbf16> to vector<640x256xbf16>
    %cst_123 = arith.constant dense<0.000000e+00> : vector<16x256xf32>
    %127 = tpu.matmul %124, %126, %cst_123 {dimension_numbers = #tpu.dot_dimension_numbers<[1], [0], [0], [1], [0, 0, 1, 1], [], []>} : vector<16x640xbf16>, vector<640x256xbf16>, vector<16x256xf32> -> vector<16x256xf32>
    %128 = arith.addf %122, %127 : vector<16x256xf32>
    %c2_124 = arith.constant 2 : index
    %c0_125 = arith.constant 0 : index
    %129 = vector.load %arg20[%c2_124, %c0_125] : memref<20x640xf32, #tpu.memory_space<vmem>>, vector<16x640xf32>
    %130 = arith.truncf %129 : vector<16x640xf32> to vector<16x640xbf16>
    %c2_126 = arith.constant 2 : index
    %c0_127 = arith.constant 0 : index
    %c0_128 = arith.constant 0 : index
    %131 = vector.load %arg5[%c2_126, %c0_127, %c0_128] : memref<5x640x256xbf16, #tpu.memory_space<vmem>>, vector<1x640x256xbf16>
    %132 = vector.shape_cast %131 : vector<1x640x256xbf16> to vector<640x256xbf16>
    %cst_129 = arith.constant dense<0.000000e+00> : vector<16x256xf32>
    %133 = tpu.matmul %130, %132, %cst_129 {dimension_numbers = #tpu.dot_dimension_numbers<[1], [0], [0], [1], [0, 0, 1, 1], [], []>} : vector<16x640xbf16>, vector<640x256xbf16>, vector<16x256xf32> -> vector<16x256xf32>
    %134 = arith.addf %128, %133 : vector<16x256xf32>
    %c3_130 = arith.constant 3 : index
    %c0_131 = arith.constant 0 : index
    %135 = vector.load %arg20[%c3_130, %c0_131] : memref<20x640xf32, #tpu.memory_space<vmem>>, vector<16x640xf32>
    %136 = arith.truncf %135 : vector<16x640xf32> to vector<16x640xbf16>
    %c3_132 = arith.constant 3 : index
    %c0_133 = arith.constant 0 : index
    %c0_134 = arith.constant 0 : index
    %137 = vector.load %arg5[%c3_132, %c0_133, %c0_134] : memref<5x640x256xbf16, #tpu.memory_space<vmem>>, vector<1x640x256xbf16>
    %138 = vector.shape_cast %137 : vector<1x640x256xbf16> to vector<640x256xbf16>
    %cst_135 = arith.constant dense<0.000000e+00> : vector<16x256xf32>
    %139 = tpu.matmul %136, %138, %cst_135 {dimension_numbers = #tpu.dot_dimension_numbers<[1], [0], [0], [1], [0, 0, 1, 1], [], []>} : vector<16x640xbf16>, vector<640x256xbf16>, vector<16x256xf32> -> vector<16x256xf32>
    %140 = arith.addf %134, %139 : vector<16x256xf32>
    %c4_136 = arith.constant 4 : index
    %c0_137 = arith.constant 0 : index
    %141 = vector.load %arg20[%c4_136, %c0_137] : memref<20x640xf32, #tpu.memory_space<vmem>>, vector<16x640xf32>
    %142 = arith.truncf %141 : vector<16x640xf32> to vector<16x640xbf16>
    %c4_138 = arith.constant 4 : index
    %c0_139 = arith.constant 0 : index
    %c0_140 = arith.constant 0 : index
    %143 = vector.load %arg5[%c4_138, %c0_139, %c0_140] : memref<5x640x256xbf16, #tpu.memory_space<vmem>>, vector<1x640x256xbf16>
    %144 = vector.shape_cast %143 : vector<1x640x256xbf16> to vector<640x256xbf16>
    %cst_141 = arith.constant dense<0.000000e+00> : vector<16x256xf32>
    %145 = tpu.matmul %142, %144, %cst_141 {dimension_numbers = #tpu.dot_dimension_numbers<[1], [0], [0], [1], [0, 0, 1, 1], [], []>} : vector<16x640xbf16>, vector<640x256xbf16>, vector<16x256xf32> -> vector<16x256xf32>
    %146 = arith.addf %140, %145 : vector<16x256xf32>
    %c0_142 = arith.constant 0 : index
    %c0_143 = arith.constant 0 : index
    %147 = vector.load %arg12[%c0_142, %c0_143] : memref<1x256xf32, #tpu.memory_space<vmem>>, vector<1x256xf32>
    %148 = vector.broadcast %147 : vector<1x256xf32> to vector<16x256xf32>
    %149 = arith.addf %146, %148 : vector<16x256xf32>
    %cst_144 = arith.constant 0.000000e+00 : f32
    %150 = vector.broadcast %cst_144 : f32 to vector<16x256xf32>
    %151 = arith.maximumf %149, %150 : vector<16x256xf32>
    %cst_145 = arith.constant 0.000000e+00 : f32
    %152 = vector.broadcast %cst_145 : f32 to vector<24x384xf32>
    %c0_146 = arith.constant 0 : index
    %c0_147 = arith.constant 0 : index
    %153 = vector.load %arg21[%c0_146, %c0_147] : memref<24x384xf32, #tpu.memory_space<vmem>>, vector<24x384xf32>
    tpu.vector_store %arg21[%c0_146, %c0_147], %152 {strides = array<i32>} : memref<24x384xf32, #tpu.memory_space<vmem>>, vector<24x384xf32>,
    %c4_148 = arith.constant 4 : index
    %c64 = arith.constant 64 : index
    %154 = vector.load %arg21[%c4_148, %c64] : memref<24x384xf32, #tpu.memory_space<vmem>>, vector<16x256xf32>
    tpu.vector_store %arg21[%c4_148, %c64], %151 {strides = array<i32>} : memref<24x384xf32, #tpu.memory_space<vmem>>, vector<16x256xf32>,
    %cst_149 = arith.constant 0.000000e+00 : f32
    %155 = vector.broadcast %cst_149 : f32 to vector<20x160xf32>
    %c0_150 = arith.constant 0 : index
    %c0_151 = arith.constant 0 : index
    %156 = vector.load %arg21[%c0_150, %c0_151] : memref<24x384xf32, #tpu.memory_space<vmem>>, vector<20x384xf32>
    %157 = arith.truncf %156 : vector<20x384xf32> to vector<20x384xbf16>
    %c0_152 = arith.constant 0 : index
    %c0_153 = arith.constant 0 : index
    %c0_154 = arith.constant 0 : index
    %158 = vector.load %arg6[%c0_152, %c0_153, %c0_154] : memref<5x384x160xbf16, #tpu.memory_space<vmem>>, vector<1x384x160xbf16>
    %159 = vector.shape_cast %158 : vector<1x384x160xbf16> to vector<384x160xbf16>
    %cst_155 = arith.constant dense<0.000000e+00> : vector<20x160xf32>
    %160 = tpu.matmul %157, %159, %cst_155 {dimension_numbers = #tpu.dot_dimension_numbers<[1], [0], [0], [1], [0, 0, 1, 1], [], []>} : vector<20x384xbf16>, vector<384x160xbf16>, vector<20x160xf32> -> vector<20x160xf32>
    %161 = arith.addf %155, %160 : vector<20x160xf32>
    %c1_156 = arith.constant 1 : index
    %c0_157 = arith.constant 0 : index
    %162 = vector.load %arg21[%c1_156, %c0_157] : memref<24x384xf32, #tpu.memory_space<vmem>>, vector<20x384xf32>
    %163 = arith.truncf %162 : vector<20x384xf32> to vector<20x384xbf16>
    %c1_158 = arith.constant 1 : index
    %c0_159 = arith.constant 0 : index
    %c0_160 = arith.constant 0 : index
    %164 = vector.load %arg6[%c1_158, %c0_159, %c0_160] : memref<5x384x160xbf16, #tpu.memory_space<vmem>>, vector<1x384x160xbf16>
    %165 = vector.shape_cast %164 : vector<1x384x160xbf16> to vector<384x160xbf16>
    %cst_161 = arith.constant dense<0.000000e+00> : vector<20x160xf32>
    %166 = tpu.matmul %163, %165, %cst_161 {dimension_numbers = #tpu.dot_dimension_numbers<[1], [0], [0], [1], [0, 0, 1, 1], [], []>} : vector<20x384xbf16>, vector<384x160xbf16>, vector<20x160xf32> -> vector<20x160xf32>
    %167 = arith.addf %161, %166 : vector<20x160xf32>
    %c2_162 = arith.constant 2 : index
    %c0_163 = arith.constant 0 : index
    %168 = vector.load %arg21[%c2_162, %c0_163] : memref<24x384xf32, #tpu.memory_space<vmem>>, vector<20x384xf32>
    %169 = arith.truncf %168 : vector<20x384xf32> to vector<20x384xbf16>
    %c2_164 = arith.constant 2 : index
    %c0_165 = arith.constant 0 : index
    %c0_166 = arith.constant 0 : index
    %170 = vector.load %arg6[%c2_164, %c0_165, %c0_166] : memref<5x384x160xbf16, #tpu.memory_space<vmem>>, vector<1x384x160xbf16>
    %171 = vector.shape_cast %170 : vector<1x384x160xbf16> to vector<384x160xbf16>
    %cst_167 = arith.constant dense<0.000000e+00> : vector<20x160xf32>
    %172 = tpu.matmul %169, %171, %cst_167 {dimension_numbers = #tpu.dot_dimension_numbers<[1], [0], [0], [1], [0, 0, 1, 1], [], []>} : vector<20x384xbf16>, vector<384x160xbf16>, vector<20x160xf32> -> vector<20x160xf32>
    %173 = arith.addf %167, %172 : vector<20x160xf32>
    %c3_168 = arith.constant 3 : index
    %c0_169 = arith.constant 0 : index
    %174 = vector.load %arg21[%c3_168, %c0_169] : memref<24x384xf32, #tpu.memory_space<vmem>>, vector<20x384xf32>
    %175 = arith.truncf %174 : vector<20x384xf32> to vector<20x384xbf16>
    %c3_170 = arith.constant 3 : index
    %c0_171 = arith.constant 0 : index
    %c0_172 = arith.constant 0 : index
    %176 = vector.load %arg6[%c3_170, %c0_171, %c0_172] : memref<5x384x160xbf16, #tpu.memory_space<vmem>>, vector<1x384x160xbf16>
    %177 = vector.shape_cast %176 : vector<1x384x160xbf16> to vector<384x160xbf16>
    %cst_173 = arith.constant dense<0.000000e+00> : vector<20x160xf32>
    %178 = tpu.matmul %175, %177, %cst_173 {dimension_numbers = #tpu.dot_dimension_numbers<[1], [0], [0], [1], [0, 0, 1, 1], [], []>} : vector<20x384xbf16>, vector<384x160xbf16>, vector<20x160xf32> -> vector<20x160xf32>
    %179 = arith.addf %173, %178 : vector<20x160xf32>
    %c4_174 = arith.constant 4 : index
    %c0_175 = arith.constant 0 : index
    %180 = vector.load %arg21[%c4_174, %c0_175] : memref<24x384xf32, #tpu.memory_space<vmem>>, vector<20x384xf32>
    %181 = arith.truncf %180 : vector<20x384xf32> to vector<20x384xbf16>
    %c4_176 = arith.constant 4 : index
    %c0_177 = arith.constant 0 : index
    %c0_178 = arith.constant 0 : index
    %182 = vector.load %arg6[%c4_176, %c0_177, %c0_178] : memref<5x384x160xbf16, #tpu.memory_space<vmem>>, vector<1x384x160xbf16>
    %183 = vector.shape_cast %182 : vector<1x384x160xbf16> to vector<384x160xbf16>
    %cst_179 = arith.constant dense<0.000000e+00> : vector<20x160xf32>
    %184 = tpu.matmul %181, %183, %cst_179 {dimension_numbers = #tpu.dot_dimension_numbers<[1], [0], [0], [1], [0, 0, 1, 1], [], []>} : vector<20x384xbf16>, vector<384x160xbf16>, vector<20x160xf32> -> vector<20x160xf32>
    %185 = arith.addf %179, %184 : vector<20x160xf32>
    %c0_180 = arith.constant 0 : index
    %c0_181 = arith.constant 0 : index
    %186 = vector.load %arg13[%c0_180, %c0_181] : memref<1x160xf32, #tpu.memory_space<vmem>>, vector<1x160xf32>
    %187 = vector.broadcast %186 : vector<1x160xf32> to vector<20x160xf32>
    %188 = arith.addf %185, %187 : vector<20x160xf32>
    %cst_182 = arith.constant 0.000000e+00 : f32
    %189 = vector.broadcast %cst_182 : f32 to vector<20x160xf32>
    %190 = arith.maximumf %188, %189 : vector<20x160xf32>
    %cst_183 = arith.constant 0.000000e+00 : f32
    %191 = vector.broadcast %cst_183 : f32 to vector<28x224xf32>
    %c0_184 = arith.constant 0 : index
    %c0_185 = arith.constant 0 : index
    %192 = vector.load %arg22[%c0_184, %c0_185] : memref<28x224xf32, #tpu.memory_space<vmem>>, vector<28x224xf32>
    tpu.vector_store %arg22[%c0_184, %c0_185], %191 {strides = array<i32>} : memref<28x224xf32, #tpu.memory_space<vmem>>, vector<28x224xf32>,
    %c4_186 = arith.constant 4 : index
    %c32 = arith.constant 32 : index
    %193 = vector.load %arg22[%c4_186, %c32] : memref<28x224xf32, #tpu.memory_space<vmem>>, vector<20x160xf32>
    tpu.vector_store %arg22[%c4_186, %c32], %190 {strides = array<i32>} : memref<28x224xf32, #tpu.memory_space<vmem>>, vector<20x160xf32>,
    %cst_187 = arith.constant 0.000000e+00 : f32
    %194 = vector.broadcast %cst_187 : f32 to vector<24x96xf32>
    %c0_188 = arith.constant 0 : index
    %c0_189 = arith.constant 0 : index
    %195 = vector.load %arg22[%c0_188, %c0_189] : memref<28x224xf32, #tpu.memory_space<vmem>>, vector<24x224xf32>
    %196 = arith.truncf %195 : vector<24x224xf32> to vector<24x224xbf16>
    %c0_190 = arith.constant 0 : index
    %c0_191 = arith.constant 0 : index
    %c0_192 = arith.constant 0 : index
    %197 = vector.load %arg7[%c0_190, %c0_191, %c0_192] : memref<5x224x96xbf16, #tpu.memory_space<vmem>>, vector<1x224x96xbf16>
    %198 = vector.shape_cast %197 : vector<1x224x96xbf16> to vector<224x96xbf16>
    %cst_193 = arith.constant dense<0.000000e+00> : vector<24x96xf32>
    %199 = tpu.matmul %196, %198, %cst_193 {dimension_numbers = #tpu.dot_dimension_numbers<[1], [0], [0], [1], [0, 0, 1, 1], [], []>} : vector<24x224xbf16>, vector<224x96xbf16>, vector<24x96xf32> -> vector<24x96xf32>
    %200 = arith.addf %194, %199 : vector<24x96xf32>
    %c1_194 = arith.constant 1 : index
    %c0_195 = arith.constant 0 : index
    %201 = vector.load %arg22[%c1_194, %c0_195] : memref<28x224xf32, #tpu.memory_space<vmem>>, vector<24x224xf32>
    %202 = arith.truncf %201 : vector<24x224xf32> to vector<24x224xbf16>
    %c1_196 = arith.constant 1 : index
    %c0_197 = arith.constant 0 : index
    %c0_198 = arith.constant 0 : index
    %203 = vector.load %arg7[%c1_196, %c0_197, %c0_198] : memref<5x224x96xbf16, #tpu.memory_space<vmem>>, vector<1x224x96xbf16>
    %204 = vector.shape_cast %203 : vector<1x224x96xbf16> to vector<224x96xbf16>
    %cst_199 = arith.constant dense<0.000000e+00> : vector<24x96xf32>
    %205 = tpu.matmul %202, %204, %cst_199 {dimension_numbers = #tpu.dot_dimension_numbers<[1], [0], [0], [1], [0, 0, 1, 1], [], []>} : vector<24x224xbf16>, vector<224x96xbf16>, vector<24x96xf32> -> vector<24x96xf32>
    %206 = arith.addf %200, %205 : vector<24x96xf32>
    %c2_200 = arith.constant 2 : index
    %c0_201 = arith.constant 0 : index
    %207 = vector.load %arg22[%c2_200, %c0_201] : memref<28x224xf32, #tpu.memory_space<vmem>>, vector<24x224xf32>
    %208 = arith.truncf %207 : vector<24x224xf32> to vector<24x224xbf16>
    %c2_202 = arith.constant 2 : index
    %c0_203 = arith.constant 0 : index
    %c0_204 = arith.constant 0 : index
    %209 = vector.load %arg7[%c2_202, %c0_203, %c0_204] : memref<5x224x96xbf16, #tpu.memory_space<vmem>>, vector<1x224x96xbf16>
    %210 = vector.shape_cast %209 : vector<1x224x96xbf16> to vector<224x96xbf16>
    %cst_205 = arith.constant dense<0.000000e+00> : vector<24x96xf32>
    %211 = tpu.matmul %208, %210, %cst_205 {dimension_numbers = #tpu.dot_dimension_numbers<[1], [0], [0], [1], [0, 0, 1, 1], [], []>} : vector<24x224xbf16>, vector<224x96xbf16>, vector<24x96xf32> -> vector<24x96xf32>
    %212 = arith.addf %206, %211 : vector<24x96xf32>
    %c3_206 = arith.constant 3 : index
    %c0_207 = arith.constant 0 : index
    %213 = vector.load %arg22[%c3_206, %c0_207] : memref<28x224xf32, #tpu.memory_space<vmem>>, vector<24x224xf32>
    %214 = arith.truncf %213 : vector<24x224xf32> to vector<24x224xbf16>
    %c3_208 = arith.constant 3 : index
    %c0_209 = arith.constant 0 : index
    %c0_210 = arith.constant 0 : index
    %215 = vector.load %arg7[%c3_208, %c0_209, %c0_210] : memref<5x224x96xbf16, #tpu.memory_space<vmem>>, vector<1x224x96xbf16>
    %216 = vector.shape_cast %215 : vector<1x224x96xbf16> to vector<224x96xbf16>
    %cst_211 = arith.constant dense<0.000000e+00> : vector<24x96xf32>
    %217 = tpu.matmul %214, %216, %cst_211 {dimension_numbers = #tpu.dot_dimension_numbers<[1], [0], [0], [1], [0, 0, 1, 1], [], []>} : vector<24x224xbf16>, vector<224x96xbf16>, vector<24x96xf32> -> vector<24x96xf32>
    %218 = arith.addf %212, %217 : vector<24x96xf32>
    %c4_212 = arith.constant 4 : index
    %c0_213 = arith.constant 0 : index
    %219 = vector.load %arg22[%c4_212, %c0_213] : memref<28x224xf32, #tpu.memory_space<vmem>>, vector<24x224xf32>
    %220 = arith.truncf %219 : vector<24x224xf32> to vector<24x224xbf16>
    %c4_214 = arith.constant 4 : index
    %c0_215 = arith.constant 0 : index
    %c0_216 = arith.constant 0 : index
    %221 = vector.load %arg7[%c4_214, %c0_215, %c0_216] : memref<5x224x96xbf16, #tpu.memory_space<vmem>>, vector<1x224x96xbf16>
    %222 = vector.shape_cast %221 : vector<1x224x96xbf16> to vector<224x96xbf16>
    %cst_217 = arith.constant dense<0.000000e+00> : vector<24x96xf32>
    %223 = tpu.matmul %220, %222, %cst_217 {dimension_numbers = #tpu.dot_dimension_numbers<[1], [0], [0], [1], [0, 0, 1, 1], [], []>} : vector<24x224xbf16>, vector<224x96xbf16>, vector<24x96xf32> -> vector<24x96xf32>
    %224 = arith.addf %218, %223 : vector<24x96xf32>
    %c0_218 = arith.constant 0 : index
    %c0_219 = arith.constant 0 : index
    %225 = vector.load %arg14[%c0_218, %c0_219] : memref<1x96xf32, #tpu.memory_space<vmem>>, vector<1x96xf32>
    %226 = vector.broadcast %225 : vector<1x96xf32> to vector<24x96xf32>
    %227 = arith.addf %224, %226 : vector<24x96xf32>
    %cst_220 = arith.constant 0.000000e+00 : f32
    %228 = vector.broadcast %cst_220 : f32 to vector<24x96xf32>
    %229 = arith.maximumf %227, %228 : vector<24x96xf32>
    %cst_221 = arith.constant 0.000000e+00 : f32
    %230 = vector.broadcast %cst_221 : f32 to vector<32x128xf32>
    %c0_222 = arith.constant 0 : index
    %c0_223 = arith.constant 0 : index
    %231 = vector.load %arg23[%c0_222, %c0_223] : memref<32x128xf32, #tpu.memory_space<vmem>>, vector<32x128xf32>
    tpu.vector_store %arg23[%c0_222, %c0_223], %230 {strides = array<i32>} : memref<32x128xf32, #tpu.memory_space<vmem>>, vector<32x128xf32>,
    %c4_224 = arith.constant 4 : index
    %c16 = arith.constant 16 : index
    %232 = vector.load %arg23[%c4_224, %c16] : memref<32x128xf32, #tpu.memory_space<vmem>>, vector<24x96xf32>
    tpu.vector_store %arg23[%c4_224, %c16], %229 {strides = array<i32>} : memref<32x128xf32, #tpu.memory_space<vmem>>, vector<24x96xf32>,
    %cst_225 = arith.constant 0.000000e+00 : f32
    %233 = vector.broadcast %cst_225 : f32 to vector<28x28xf32>
    %c0_226 = arith.constant 0 : index
    %c0_227 = arith.constant 0 : index
    %234 = vector.load %arg23[%c0_226, %c0_227] : memref<32x128xf32, #tpu.memory_space<vmem>>, vector<28x128xf32>
    %235 = arith.truncf %234 : vector<28x128xf32> to vector<28x128xbf16>
    %c0_228 = arith.constant 0 : index
    %c0_229 = arith.constant 0 : index
    %c0_230 = arith.constant 0 : index
    %236 = vector.load %arg8[%c0_228, %c0_229, %c0_230] : memref<5x128x28xbf16, #tpu.memory_space<vmem>>, vector<1x128x28xbf16>
    %237 = vector.shape_cast %236 : vector<1x128x28xbf16> to vector<128x28xbf16>
    %cst_231 = arith.constant dense<0.000000e+00> : vector<28x28xf32>
    %238 = tpu.matmul %235, %237, %cst_231 {dimension_numbers = #tpu.dot_dimension_numbers<[1], [0], [0], [1], [0, 0, 1, 1], [], []>} : vector<28x128xbf16>, vector<128x28xbf16>, vector<28x28xf32> -> vector<28x28xf32>
    %239 = arith.addf %233, %238 : vector<28x28xf32>
    %c1_232 = arith.constant 1 : index
    %c0_233 = arith.constant 0 : index
    %240 = vector.load %arg23[%c1_232, %c0_233] : memref<32x128xf32, #tpu.memory_space<vmem>>, vector<28x128xf32>
    %241 = arith.truncf %240 : vector<28x128xf32> to vector<28x128xbf16>
    %c1_234 = arith.constant 1 : index
    %c0_235 = arith.constant 0 : index
    %c0_236 = arith.constant 0 : index
    %242 = vector.load %arg8[%c1_234, %c0_235, %c0_236] : memref<5x128x28xbf16, #tpu.memory_space<vmem>>, vector<1x128x28xbf16>
    %243 = vector.shape_cast %242 : vector<1x128x28xbf16> to vector<128x28xbf16>
    %cst_237 = arith.constant dense<0.000000e+00> : vector<28x28xf32>
    %244 = tpu.matmul %241, %243, %cst_237 {dimension_numbers = #tpu.dot_dimension_numbers<[1], [0], [0], [1], [0, 0, 1, 1], [], []>} : vector<28x128xbf16>, vector<128x28xbf16>, vector<28x28xf32> -> vector<28x28xf32>
    %245 = arith.addf %239, %244 : vector<28x28xf32>
    %c2_238 = arith.constant 2 : index
    %c0_239 = arith.constant 0 : index
    %246 = vector.load %arg23[%c2_238, %c0_239] : memref<32x128xf32, #tpu.memory_space<vmem>>, vector<28x128xf32>
    %247 = arith.truncf %246 : vector<28x128xf32> to vector<28x128xbf16>
    %c2_240 = arith.constant 2 : index
    %c0_241 = arith.constant 0 : index
    %c0_242 = arith.constant 0 : index
    %248 = vector.load %arg8[%c2_240, %c0_241, %c0_242] : memref<5x128x28xbf16, #tpu.memory_space<vmem>>, vector<1x128x28xbf16>
    %249 = vector.shape_cast %248 : vector<1x128x28xbf16> to vector<128x28xbf16>
    %cst_243 = arith.constant dense<0.000000e+00> : vector<28x28xf32>
    %250 = tpu.matmul %247, %249, %cst_243 {dimension_numbers = #tpu.dot_dimension_numbers<[1], [0], [0], [1], [0, 0, 1, 1], [], []>} : vector<28x128xbf16>, vector<128x28xbf16>, vector<28x28xf32> -> vector<28x28xf32>
    %251 = arith.addf %245, %250 : vector<28x28xf32>
    %c3_244 = arith.constant 3 : index
    %c0_245 = arith.constant 0 : index
    %252 = vector.load %arg23[%c3_244, %c0_245] : memref<32x128xf32, #tpu.memory_space<vmem>>, vector<28x128xf32>
    %253 = arith.truncf %252 : vector<28x128xf32> to vector<28x128xbf16>
    %c3_246 = arith.constant 3 : index
    %c0_247 = arith.constant 0 : index
    %c0_248 = arith.constant 0 : index
    %254 = vector.load %arg8[%c3_246, %c0_247, %c0_248] : memref<5x128x28xbf16, #tpu.memory_space<vmem>>, vector<1x128x28xbf16>
    %255 = vector.shape_cast %254 : vector<1x128x28xbf16> to vector<128x28xbf16>
    %cst_249 = arith.constant dense<0.000000e+00> : vector<28x28xf32>
    %256 = tpu.matmul %253, %255, %cst_249 {dimension_numbers = #tpu.dot_dimension_numbers<[1], [0], [0], [1], [0, 0, 1, 1], [], []>} : vector<28x128xbf16>, vector<128x28xbf16>, vector<28x28xf32> -> vector<28x28xf32>
    %257 = arith.addf %251, %256 : vector<28x28xf32>
    %c4_250 = arith.constant 4 : index
    %c0_251 = arith.constant 0 : index
    %258 = vector.load %arg23[%c4_250, %c0_251] : memref<32x128xf32, #tpu.memory_space<vmem>>, vector<28x128xf32>
    %259 = arith.truncf %258 : vector<28x128xf32> to vector<28x128xbf16>
    %c4_252 = arith.constant 4 : index
    %c0_253 = arith.constant 0 : index
    %c0_254 = arith.constant 0 : index
    %260 = vector.load %arg8[%c4_252, %c0_253, %c0_254] : memref<5x128x28xbf16, #tpu.memory_space<vmem>>, vector<1x128x28xbf16>
    %261 = vector.shape_cast %260 : vector<1x128x28xbf16> to vector<128x28xbf16>
    %cst_255 = arith.constant dense<0.000000e+00> : vector<28x28xf32>
    %262 = tpu.matmul %259, %261, %cst_255 {dimension_numbers = #tpu.dot_dimension_numbers<[1], [0], [0], [1], [0, 0, 1, 1], [], []>} : vector<28x128xbf16>, vector<128x28xbf16>, vector<28x28xf32> -> vector<28x28xf32>
    %263 = arith.addf %257, %262 : vector<28x28xf32>
    %c0_256 = arith.constant 0 : index
    %c0_257 = arith.constant 0 : index
    %264 = vector.load %arg15[%c0_256, %c0_257] : memref<1x28xf32, #tpu.memory_space<vmem>>, vector<1x28xf32>
    %265 = vector.broadcast %264 : vector<1x28xf32> to vector<28x28xf32>
    %266 = arith.addf %263, %265 : vector<28x28xf32>
    %267 = math.tanh %266 : vector<28x28xf32>
    %c0_258 = arith.constant 0 : index
    %c0_259 = arith.constant 0 : index
    %c0_260 = arith.constant 0 : index
    %268 = vector.load %arg16[%c0_258, %c0_259, %c0_260] : memref<1x28x28xf32, #tpu.memory_space<vmem>>, vector<1x28x28xf32>
    %269 = vector.shape_cast %268 : vector<1x28x28xf32> to vector<28x28xf32>
    %270 = vector.shape_cast %267 : vector<28x28xf32> to vector<1x28x28xf32>
    tpu.vector_store %arg16[%c0_258, %c0_259, %c0_260], %270 {strides = array<i32>} : memref<1x28x28xf32, #tpu.memory_space<vmem>>, vector<1x28x28xf32>,
    return
  }
  func.func @transform_0(%arg0: i32) -> (i32, i32, i32) {
    %c0_i32 = arith.constant 0 : i32
    %c0_i32_0 = arith.constant 0 : i32
    %c0_i32_1 = arith.constant 0 : i32
    return %arg0, %c0_i32, %c0_i32_0 : i32, i32, i32
  }
  func.func @transform_1(%arg0: i32) -> (i32, i32, i32) {
    %c0_i32 = arith.constant 0 : i32
    %c0_i32_0 = arith.constant 0 : i32
    %c0_i32_1 = arith.constant 0 : i32
    %c0_i32_2 = arith.constant 0 : i32
    return %c0_i32, %c0_i32_0, %c0_i32_1 : i32, i32, i32
  }
  func.func @transform_2(%arg0: i32) -> (i32, i32, i32) {
    %c0_i32 = arith.constant 0 : i32
    %c0_i32_0 = arith.constant 0 : i32
    %c0_i32_1 = arith.constant 0 : i32
    %c0_i32_2 = arith.constant 0 : i32
    return %c0_i32, %c0_i32_0, %c0_i32_1 : i32, i32, i32
  }
  func.func @transform_3(%arg0: i32) -> (i32, i32, i32) {
    %c0_i32 = arith.constant 0 : i32
    %c0_i32_0 = arith.constant 0 : i32
    %c0_i32_1 = arith.constant 0 : i32
    %c0_i32_2 = arith.constant 0 : i32
    return %c0_i32, %c0_i32_0, %c0_i32_1 : i32, i32, i32
  }
  func.func @transform_4(%arg0: i32) -> (i32, i32, i32) {
    %c0_i32 = arith.constant 0 : i32
    %c0_i32_0 = arith.constant 0 : i32
    %c0_i32_1 = arith.constant 0 : i32
    %c0_i32_2 = arith.constant 0 : i32
    return %c0_i32, %c0_i32_0, %c0_i32_1 : i32, i32, i32
  }
  func.func @transform_5(%arg0: i32) -> (i32, i32, i32) {
    %c0_i32 = arith.constant 0 : i32
    %c0_i32_0 = arith.constant 0 : i32
    %c0_i32_1 = arith.constant 0 : i32
    %c0_i32_2 = arith.constant 0 : i32
    return %c0_i32, %c0_i32_0, %c0_i32_1 : i32, i32, i32
  }
  func.func @transform_6(%arg0: i32) -> (i32, i32, i32) {
    %c0_i32 = arith.constant 0 : i32
    %c0_i32_0 = arith.constant 0 : i32
    %c0_i32_1 = arith.constant 0 : i32
    %c0_i32_2 = arith.constant 0 : i32
    return %c0_i32, %c0_i32_0, %c0_i32_1 : i32, i32, i32
  }
  func.func @transform_7(%arg0: i32) -> (i32, i32, i32) {
    %c0_i32 = arith.constant 0 : i32
    %c0_i32_0 = arith.constant 0 : i32
    %c0_i32_1 = arith.constant 0 : i32
    %c0_i32_2 = arith.constant 0 : i32
    return %c0_i32, %c0_i32_0, %c0_i32_1 : i32, i32, i32
  }
  func.func @transform_8(%arg0: i32) -> (i32, i32) {
    %c0_i32 = arith.constant 0 : i32
    %c0_i32_0 = arith.constant 0 : i32
    %c0_i32_1 = arith.constant 0 : i32
    return %c0_i32, %c0_i32_0 : i32, i32
  }
  func.func @transform_9(%arg0: i32) -> (i32, i32) {
    %c0_i32 = arith.constant 0 : i32
    %c0_i32_0 = arith.constant 0 : i32
    %c0_i32_1 = arith.constant 0 : i32
    return %c0_i32, %c0_i32_0 : i32, i32
  }
  func.func @transform_10(%arg0: i32) -> (i32, i32) {
    %c0_i32 = arith.constant 0 : i32
    %c0_i32_0 = arith.constant 0 : i32
    %c0_i32_1 = arith.constant 0 : i32
    return %c0_i32, %c0_i32_0 : i32, i32
  }
  func.func @transform_11(%arg0: i32) -> (i32, i32) {
    %c0_i32 = arith.constant 0 : i32
    %c0_i32_0 = arith.constant 0 : i32
    %c0_i32_1 = arith.constant 0 : i32
    return %c0_i32, %c0_i32_0 : i32, i32
  }
  func.func @transform_12(%arg0: i32) -> (i32, i32) {
    %c0_i32 = arith.constant 0 : i32
    %c0_i32_0 = arith.constant 0 : i32
    %c0_i32_1 = arith.constant 0 : i32
    return %c0_i32, %c0_i32_0 : i32, i32
  }
  func.func @transform_13(%arg0: i32) -> (i32, i32) {
    %c0_i32 = arith.constant 0 : i32
    %c0_i32_0 = arith.constant 0 : i32
    %c0_i32_1 = arith.constant 0 : i32
    return %c0_i32, %c0_i32_0 : i32, i32
  }
  func.func @transform_14(%arg0: i32) -> (i32, i32) {
    %c0_i32 = arith.constant 0 : i32
    %c0_i32_0 = arith.constant 0 : i32
    %c0_i32_1 = arith.constant 0 : i32
    return %c0_i32, %c0_i32_0 : i32, i32
  }
  func.func @transform_15(%arg0: i32) -> (i32, i32, i32) {
    %c0_i32 = arith.constant 0 : i32
    %c0_i32_0 = arith.constant 0 : i32
    %c0_i32_1 = arith.constant 0 : i32
    return %arg0, %c0_i32, %c0_i32_0 : i32, i32, i32
  }
}

</mosaic_0001>

<bundles_post_ra>
// kernel: forward.1
= control target key start
LH: loop header
LB: loop body
LE: loop exit
PB: predicated region body
PF: predicated region fallthrough
CT: control target
= control target key end

     0   :  { %20 = vsyncpa [#allocation10], 0  ;;  %s24299_s0 = inlined_call_operand.vmem [shape: f32[2,1,64], index: 0, kind: input, shape index: {}]   ;;  %s24300_s1 = inlined_call_operand.hbm [shape: bf16[4,448,128], index: 1, kind: input, shape index: {}]   ;;  %s24301_s2 = inlined_call_operand.hbm [shape: bf16[5,384,256], index: 2, kind: input, shape index: {}]   ;;  %s24302_s3 = inlined_call_operand.vmem [shape: bf16[5,512,384], index: 3, kind: input, shape index: {}]   ;;  %s24303_s4 = inlined_call_operand.hbm [shape: bf16[5,640,256], index: 4, kind: input, shape index: {}]   ;;  %s24304_s5 = inlined_call_operand.vmem [shape: bf16[5,384,160], index: 5, kind: input, shape index: {}]   ;;  %s24305_s6 = inlined_call_operand.vmem [shape: bf16[5,224,96], index: 6, kind: input, shape index: {}]   ;;  %s24306_s7 = inlined_call_operand.vmem [shape: bf16[5,128,28], index: 7, kind: input, shape index: {}]   ;;  %s24307_s8 = inlined_call_operand.vmem [shape: f32[1,128], index: 8, kind: input, shape index: {}]   ;;  %s24308_s9 = inlined_call_operand.vmem [shape: f32[1,256], index: 9, kind: input, shape index: {}]   ;;  %s24309_s10 = inlined_call_operand.vmem [shape: f32[1,384], index: 10, kind: input, shape index: {}]   ;;  %s24310_s11 = inlined_call_operand.vmem [shape: f32[1,256], index: 11, kind: input, shape index: {}]   ;;  %s24311_s12 = inlined_call_operand.vmem [shape: f32[1,160], index: 12, kind: input, shape index: {}]   ;;  %s24312_s13 = inlined_call_operand.vmem [shape: f32[1,96], index: 13, kind: input, shape index: {}]   ;;  %s24313_s14 = inlined_call_operand.vmem [shape: f32[1,28], index: 14, kind: input, shape index: {}]   ;;  %s24314_s15 = inlined_call_operand.vmem [shape: f32[2,28,28], index: 15, kind: output, shape index: {}]  }
   0x1   :  { %21 = vsyncpa [#allocation12], 0  ;;  %s21034_s18 = smov 0  }
   0x2 LB: > { %s20942_s19 = smov [#allocation11]   ;;  %s21040_s21 = sadd.s32 4294967295, %s20940_s18   ;;  %s20940_s18 = sphi %s21034_s18, %s27_s18  }
   0x3   : > { %s403_s20 = sshll.u32 %s20942_s19, 4  ;;  %p15647_p0 = scmp.ge.s32.totalorder %s20940_s18, 1  ;;  %s404_s20 = int_to_ptr.vmem [resolvable:$true] %s403_s20 }
   0x4   : > { %p378_p1 = scmp.lt.s32.totalorder %s20940_s18, 3  ;;  %p18621_p2 = scmp.eq.s32.totalorder %s21040_s21, 0 }
   0x5   : > { %s20943_s23 = smov [#allocation9]   ;;  %s20944_s26 = smov [#allocation13]  }
   0x6   : > { %p21045_p3 = pnand %p15647_p0, %p378_p1  ;;  %s390_s24 = sshll.u32 %s20943_s23, 4  ;;  %s21051_s24 = int_to_ptr.vmem [resolvable:$true] %s390_s24 }
   0x7   : > { %s21059_s27 = sshll.u32 %s20944_s26, 4  ;;  %s20859_s28 = scalar_lea.vmem %s404_s20, 30720  ;;  %s420_s27 = int_to_ptr.vmem [resolvable:$true] %s21059_s27 }
   0x8   : > { %p18611_p4 = pneg %p21045_p3  ;;  %p20860_p7 = scmp.ne.s32.totalorder %s404_s20, %s20859_s28 }
   0x9   : > { %p20867_p10 = scmp.lt.s32.totalorder %s404_s20, %s404_s20  ;;  %p20868_p11 = scmp.lt.s32.totalorder %s20859_s28, %s20859_s28 }
   0xa   : > { %p21055_p5 = pnand %p18621_p2, %p18611_p4 }
   0xb   : > { %p20869_p12 = por %p20868_p11, %p20867_p10 }
   0xc   : > { %p20850_p6 = pneg %p21055_p5 }
   0xe   : > { %p20862_p8 = pnand %p20860_p7, %p20850_p6 }
  0x10   : > { %p20863_p9 = pneg %p20862_p8 }
  0x12   : > { %p20870_p13 = pnand %p20869_p12, %p20863_p9 }
  0x14   : > { %20873 = shalt.err (!%p20870_p13)
}
  0x15   : > { %s20945_s29 = smov 128   ;;  %s20946_s30 = smov 8  }
  0x16   : > { %18617 = dma.hbm_to_vmem [thread:$0]  (!%p21055_p5), %s24301_s2, 30720, %s404_s20, [#allocation12], %s20945_s29, %s20945_s29, %s20946_s30  }
  0x17   : > { %s20885_s19 = scalar_lea.vmem %s21051_s24, 14336  ;;  %p20893_p7 = scmp.lt.s32.totalorder %s21051_s24, %s21051_s24 }
  0x18   : > { %p20886_p0 = scmp.ne.s32.totalorder %s21051_s24, %s20885_s19  ;;  %p20894_p8 = scmp.lt.s32.totalorder %s20885_s19, %s20885_s19 }
  0x1a   : > { %p20888_p1 = pnand %p20886_p0, %p20850_p6  ;;  %p20895_p9 = por %p20894_p8, %p20893_p7 }
  0x1c   : > { %p20889_p4 = pneg %p20888_p1 }
  0x1e   : > { %p20896_p10 = pnand %p20895_p9, %p20889_p4 }
  0x20   : > { %20899 = shalt.err (!%p20896_p10)
}
  0x21   : > { %s20947_s23 = smov 64   ;;  %s20948_s26 = smov 4  }
  0x22   : > { %18614 = dma.hbm_to_vmem [thread:$0]  (!%p21055_p5), %s24300_s1, 14336, %s21051_s24, [#allocation10], %s20947_s23, %s20947_s23, %s20948_s26  }
  0x23   : > { %s20911_s16 = scalar_lea.vmem %s420_s27, 51200  ;;  %p20919_p0 = scmp.lt.s32.totalorder %s420_s27, %s420_s27 }
  0x24   : > { %p20912_p11 = scmp.ne.s32.totalorder %s420_s27, %s20911_s16  ;;  %p20920_p1 = scmp.lt.s32.totalorder %s20911_s16, %s20911_s16 }
  0x26   : > { %p20914_p12 = pnand %p20912_p11, %p20850_p6  ;;  %p20921_p4 = por %p20920_p1, %p20919_p0 }
  0x28   : > { %p20915_p13 = pneg %p20914_p12 }
  0x2a   : > { %p20922_p7 = pnand %p20921_p4, %p20915_p13 }
  0x2c   : > { %20925 = shalt.err (!%p20922_p7)
}
  0x2d   : > { %18620 = dma.hbm_to_vmem [thread:$0]  (!%p21055_p5), %s24303_s4, 51200, %s420_s27, [#allocation12], %s20945_s29, %s20945_s29, %s20946_s30  }
  0x2e   : > { %471 = sbr.rel (%p21045_p3) target bundleno = 3514 (0xdba), region = 80 }
  0x33   : > { %20931 = dma.done.wait (%p18621_p2), [#allocation10], 14336  }
  0x34   : > { %20933 = vsyncadd (%p18621_p2), [#allocation10], 4294952960 }
  0x35   : > { %20935 = dma.done.wait (%p18621_p2), [#allocation12], 81920  }
  0x36   : > { %20937 = vsyncadd (%p18621_p2), [#allocation12], 4294885376  ;;  %p525_p6 = scmp.lt.s32.totalorder %s21040_s21, 1  ;;  %v24315_v0 = vmov 0   ;;  %vm538_vm0 = vcmask 522240   ;;  %v20950_v1 = vmov 0.0  }
  0x37   : > { %922 = vmatprep.subr.bf16.mxu1 %v24315_v0  ;;  %535 = vst [vmem:[#allocation2] sm:$0x7f] %v20950_v1  ;;  %536 = vst [vmem:[#allocation2 + $0x8] sm:$0x7f] %v20950_v1  ;;  %s20951_s27 = smov 64   ;;  %v18647_v3 = vld [vmem:[#allocation9 + $0x198] sm:$0xff]  }
  0x38   : > { %537 = vst [vmem:[#allocation2 + $0x10] sm:$0x7f] %v20950_v1  ;;  %1902 = vst [vmem:[#allocation3 + $0x28] sm:$0xff] %v20950_v1  ;;  %s24325_s21 = smov (!%p525_p6, %s21040_s21), 1  ;;  %923 = vmatpush1.bf16.msra.mxu1 %v18647_v3  ;;  %v18648_v4 = vld [vmem:[#allocation9 + $0x190] sm:$0xff]   ;;  %v18649_v5 = vld [vmem:[#allocation9 + $0x188] sm:$0xff]  }
  0x39   : > { %1903 = vst [vmem:[#allocation3 + $0x10] sm:$0xff] %v20950_v1  ;;  %1904 = vst [vmem:[#allocation3 + $0x8] sm:$0xff] %v20950_v1  ;;  %s527_s25 = scalar_lea.vmem %s24299_s0, %s24325_s21  ;;  %924 = vmatprep.subr.bf16.mxu1 %v24315_v0  ;;  %v18650_v6 = vld [vmem:[#allocation9 + $0x180] sm:$0xff]   ;;  %v18651_v9 = vld [vmem:[#allocation9 + $0x178] sm:$0xff]   ;;  %vm878_vm1 = vcmask 523264   ;;  %vm548_vm2 = vcmask 1040896  }
  0x3a   : > { %1905 = vst [vmem:[#allocation3] sm:$0xf] %v20950_v1  ;;  %1906 = vst [vmem:[#allocation3 + $0x18] sm:$0xf] %v20950_v1  ;;  %v15658_v2 = vld [vmem:[%s527_s25] ss:$0 sm:$0xff] }
  0x3b   : > { %1907 = vst [vmem:[#allocation3 + $0x20] sm:$0xf] %v20950_v1  ;;  %3899 = vst [vmem:[#allocation4] sm:$0xff] %v20950_v1  ;;  %545 = vrot.lane.b32.xlu0 %v15658_v2, %s20951_s27  ;;  %v18652_v13 = vld [vmem:[#allocation9 + $0x170] sm:$0xff]   ;;  %v18666_v15 = vld [vmem:[#allocation9 + $0x158] sm:$0xff]   ;;  %vm8181_vm3 = vcmask 1043456  }
  0x3c   : > { %3900 = vst [vmem:[#allocation4 + $0x8] sm:$0xff] %v20950_v1  ;;  %3901 = vst [vmem:[#allocation4 + $0x20] sm:$0xff] %v20950_v1  ;;  %925 = vmatpush1.bf16.msra.mxu1 %v18648_v4  ;;  %v18667_v16 = vld [vmem:[#allocation9 + $0x118] sm:$0xff]   ;;  %v18653_v17 = vld [vmem:[#allocation9 + $0x168] sm:$0xff]   ;;  %18141 = vmatprep.subr.bf16.mxu0 %v18666_v15  ;;  %vm8399_vm4 = vsmask.f32 7424 }
  0x3d   : > { %3902 = vst [vmem:[#allocation4 + $0x18] sm:$0xff] %v20950_v1  ;;  %3903 = vst [vmem:[#allocation4 + $0x28] sm:$0xff] %v20950_v1  ;;  %926 = vmatprep.subr.bf16.mxu1 %v24315_v0  ;;  %18142 = vmatpush3.bf16.msra.mxu0 %v18667_v16  ;;  %v18669_v18 = vld [vmem:[#allocation9 + $0x150] sm:$0xff]   ;;  %v18654_v20 = vld [vmem:[#allocation9 + $0x160] sm:$0xff]   ;;  %vm9634_vm5 = vcmask 1046528   ;;  %vm11024_vm7 = vcmask 1045504  }
  0x3e   : > { %3904 = vst [vmem:[#allocation4 + $0x30] sm:$0xff] %v20950_v1  ;;  %3905 = vst [vmem:[#allocation4 + $0x10] sm:$0xff] %v20950_v1  ;;  %v18670_v19 = vld [vmem:[#allocation9 + $0x110] sm:$0xff]   ;;  %18143 = vmatprep.subr.bf16.mxu0 %v18669_v18  ;;  %v18672_v21 = vld [vmem:[#allocation9 + $0x148] sm:$0xff]   ;;  %vm10289_vm6 = vsmask.f32 6400 }
  0x3f   : > { %3906 = vst [vmem:[#allocation4 + $0x38] sm:$0xff] %v20950_v1  ;;  %8160 = vst [vmem:[#allocation5 + $0x40] sm:$0xff] %v20950_v1  ;;  %v18673_v22 = vld [vmem:[#allocation9 + $0x108] sm:$0xff]   ;;  %v18655_v23 = vld [vmem:[#allocation9 + $0x1b8] sm:$0xff]   ;;  %vm11641_vm8 = vcmask 1048068   ;;  %vm11644_vm9 = vcmask 523268  }
  0x40   : > { %8161 = vst [vmem:[#allocation5 + $0x70] sm:$0xff] %v20950_v1  ;;  %8162 = vst [vmem:[#allocation5 + $0x28] sm:$0xff] %v20950_v1  ;;  %927 = vmatpush1.bf16.msra.mxu1 %v18649_v5  ;;  %v18675_v24 = vld [vmem:[#allocation9 + $0x140] sm:$0xff]   ;;  %v18678_v27 = vld [vmem:[#allocation9 + $0x138] sm:$0xff]   ;;  %vm11646_vm10 = vcmask 1048064   ;;  %vm11650_vm11 = vcmask 1043968  }
  0x41   : > { %8163 = vst [vmem:[#allocation5] sm:$0xff] %v20950_v1  ;;  %8164 = vst [vmem:[#allocation5 + $0x20] sm:$0xff] %v20950_v1  ;;  %928 = vmatprep.subr.bf16.mxu1 %v24315_v0  ;;  %18144 = vmatpush3.bf16.msra.mxu0 %v18670_v19  ;;  %v616_v25 = vld [vmem:[#allocation2 + $0x10] sm:$0x1e]  ;;  %v18656_v29 = vld [vmem:[#allocation9 + $0x1b0] sm:$0xff]   ;;  %vm11653_vm12 = vcmask 519168  }
  0x42   : > { %8170 = vst [vmem:[#allocation5 + $0x30] sm:$0xf] %v20950_v1  ;;  %8171 = vst [vmem:[#allocation5 + $0x68] sm:$0xf] %v20950_v1  ;;  %18145 = vmatprep.subr.bf16.mxu0 %v18672_v21  ;;  %v18676_v26 = vld [vmem:[#allocation9 + $0x100] sm:$0xff]   ;;  %v620_v28 = vpack.c.bf16 %v616_v25, %v616_v25  ;;  %v18679_v30 = vld [vmem:[#allocation9 + $0xf8] sm:$0xff]  }
  0x43   : > { %8172 = vst [vmem:[#allocation5 + $0x10] sm:$0xf] %v20950_v1  ;;  %8173 = vst [vmem:[#allocation5 + $0x60] sm:$0xf] %v20950_v1  ;;  %v18681_v31 = vld [vmem:[#allocation9 + $0x130] sm:$0xff]   ;;  %v18657_v33 = vld [vmem:[#allocation9 + $0x1a8] sm:$0xff]  }
  0x44   : > { %8174 = vst [vmem:[#allocation5 + $0x8] sm:$0xf] %v20950_v1  ;;  %11598 = vst [vmem:[#allocation6] sm:$0xff] %v20950_v1  ;;  %929 = vmatpush1.bf16.msra.mxu1 %v18650_v6  ;;  %v696_v32 = vshll.u32 %v620_v28, 16  ;;  %v18682_v34 = vld [vmem:[#allocation9 + $0xf0] sm:$0xff]   ;;  %v18658_v35 = vld [vmem:[#allocation9 + $0x1a0] sm:$0xff]  }
  0x45   : > { %11599 = vst [vmem:[#allocation6 + $0x8] sm:$0xff] %v20950_v1  ;;  %11600 = vst [vmem:[#allocation6 + $0x10] sm:$0xff] %v20950_v1  ;;  %930 = vmatprep.subr.bf16.mxu1 %v24315_v0  ;;  %18146 = vmatpush3.bf16.msra.mxu0 %v18673_v22  ;;  %v18685_v36 = vld [vmem:[#allocation9 + $0x128] sm:$0xff]   ;;  %v694_v37 = vshrl.u32 %v620_v28, 16  ;;  %v18689_v41 = vld [vmem:[#allocation9 + $0x120] sm:$0xff]   ;;  %vm13865_vm13 = vcmask 785408  }
  0x46   : > { %11601 = vst [vmem:[#allocation6 + $0x18] sm:$0xff] %v20950_v1  ;;  %11603 = vst [vmem:[#allocation6 + $0x28] sm:$0xff] %v20950_v1  ;;  %18147 = vmatprep.subr.bf16.mxu0 %v18675_v24  ;;  %v698_v38 = vrot.slane %v696_v32, 1  ;;  %v18686_v40 = vld [vmem:[#allocation9 + $0xe8] sm:$0xff]   ;;  %v18659_v43 = vld [vmem:[#allocation9 + $0xb8] sm:$0xff]   ;;  %s20952_s29 = smov 32  }
  0x47   : > { %11604 = vst [vmem:[#allocation6 + $0x30] sm:$0xff] %v20950_v1  ;;  %11605 = vst [vmem:[#allocation6 + $0x38] sm:$0xff] %v20950_v1  ;;  %v18690_v45 = vld [vmem:[#allocation9 + $0xe0] sm:$0xff]   ;;  %v18693_v46 = vld [vmem:[#allocation9 + $0x78] sm:$0xff]   ;;  %vm13872_vm14 = vcmask 781312   ;;  %vm13912_vm15 = vcmask 1047812  }
  0x48   : > { %11606 = vst [vmem:[#allocation6 + $0x40] sm:$0xff] %v20950_v1  ;;  %13864 = vst [vmem:[#allocation7] sm:$0xff] %v20950_v1  ;;  %931 = vmatpush1.bf16.msra.mxu1 %v18651_v9  ;;  %v699_v42 = vor.u32 %v698_v38, %v694_v37  ;;  %v18660_v47 = vld [vmem:[#allocation9 + $0xb0] sm:$0xff]   ;;  %v18661_v48 = vld [vmem:[#allocation9 + $0xa8] sm:$0xff]   ;;  %s20953_s24 = smov 16   ;;  %s18140_s22 = sshll.u32 %s24325_s21, 5 }
  0x49   : > { %13867 = vst [vmem:[#allocation7 + $0x10] sm:$0xff] %v20950_v1  ;;  %13869 = vst [vmem:[#allocation7 + $0x20] sm:$0xff] %v20950_v1  ;;  %932 = vmatprep.subr.bf16.mxu1 %v24315_v0  ;;  %18148 = vmatpush3.bf16.msra.mxu0 %v18676_v26  ;;  %v18662_v49 = vld [vmem:[#allocation9 + $0xa0] sm:$0xff]   ;;  %v18663_v50 = vld [vmem:[#allocation9 + $0x98] sm:$0xff]  }
  0x4a   : > { %13871 = vst [vmem:[#allocation7 + $0x30] sm:$0xf] %v20950_v1  ;;  %14910 = vst [vmem:[#allocation8] sm:$0xff] %v20950_v1  ;;  %18149 = vmatprep.subr.bf16.mxu0 %v18678_v27  ;;  %v18664_v51 = vld [vmem:[#allocation9 + $0x90] sm:$0xff]   ;;  %v18665_v52 = vld [vmem:[#allocation9 + $0x88] sm:$0xff]  }
  0x4b   : > { %14911 = vst [vmem:[#allocation8 + $0x8] sm:$0xff] %v20950_v1  ;;  %14912 = vst [vmem:[#allocation8 + $0x10] sm:$0xff] %v20950_v1  ;;  %v18668_v53 = vld [vmem:[#allocation9 + $0x80] sm:$0xff]   ;;  %v18671_v54 = vld [vmem:[#allocation9 + $0xd8] sm:$0xff]  }
  0x4c   : > { %14913 = vst [vmem:[#allocation8 + $0x18] sm:$0xff] %v20950_v1  ;;  %539 = vst.msk [vmem:[#allocation2 + $0x18] sm:$0x7f] %vm538_vm0, %v20950_v1  ;;  %933 = vmatpush1.bf16.msra.mxu1 %v18652_v13  ;;  %v18674_v55 = vld [vmem:[#allocation9 + $0xd0] sm:$0xff]   ;;  %v18677_v56 = vld [vmem:[#allocation9 + $0xc8] sm:$0xff]   ;;  %vm13902_vm0 = vcmask 261120  }
  0x4d   : > { %934 = vmatprep.subr.bf16.mxu1 %v24315_v0  ;;  %18150 = vmatpush3.bf16.msra.mxu0 %v18679_v30  ;;  %v18680_v57 = vld [vmem:[#allocation9 + $0xc0] sm:$0xff]   ;;  %v18683_v59 = vld [vmem:[#allocation9 + $0x318] sm:$0xff]   ;;  %v18687_v62 = vld [vmem:[#allocation9 + $0x310] sm:$0xff]  }
  0x4e   : > { %18151 = vmatprep.subr.bf16.mxu0 %v18681_v31  ;;  %v552_v58 = vld [vmem:[#allocation2 + $0x10] sm:$0xf]  ;;  %v18684_v61 = vld [vmem:[#allocation9 + $0x2d8] sm:$0xff]   ;;  %v18688_v63 = vld [vmem:[#allocation9 + $0x2d0] sm:$0xff]  }
  0x4f   : > { %v556_v60 = vpack.c.bf16 %v552_v58, %v552_v58  ;;  %v18691_v1 = vld [vmem:[#allocation9 + $0x308] sm:$0xff]   ;;  %v18695_v3 = vld [vmem:[#allocation9 + $0x300] sm:$0xff]   ;;  %v18699_v5 = vld [vmem:[#allocation9 + $0x2f8] sm:$0xff]  }
  0x50   : > { %935 = vmatpush1.bf16.msra.mxu1 %v18653_v17  ;;  %v18692_v2 = vld [vmem:[#allocation9 + $0x2c8] sm:$0xff]   ;;  %v18696_v4 = vld [vmem:[#allocation9 + $0x2c0] sm:$0xff]   ;;  %v18700_v6 = vld [vmem:[#allocation9 + $0x2b8] sm:$0xff]  }
  0x51   : > { %936 = vmatprep.subr.bf16.mxu1 %v24315_v0  ;;  %18152 = vmatpush3.bf16.msra.mxu0 %v18682_v34  ;;  %v18704_v9 = vld [vmem:[#allocation9 + $0x2b0] sm:$0xff]   ;;  %v18708_v15 = vld [vmem:[#allocation9 + $0x2a8] sm:$0xff]   ;;  %v18711_v17 = vld [vmem:[#allocation9 + $0x2e0] sm:$0xff]  }
  0x52   : > { %18153 = vmatprep.subr.bf16.mxu0 %v18685_v36  ;;  %v18706_v58 = vld [vmem:[#allocation9 + $0x20] sm:$0xff]  }
  0x53   : > { %v617_v7 = vld [vmem:[#allocation2 + $0x18] sm:$0x1e] }
  0x54   : > { %v621_v8 = vpack.c.bf16 %v617_v7, %v617_v7  ;;  %937 = vmatpush1.bf16.msra.mxu1 %v18654_v20  ;;  %v553_v39 = vld [vmem:[#allocation2 + $0x18] sm:$0xf]  ;;  %v18703_v7 = vld [vmem:[#allocation9 + $0x2f0] sm:$0xff]   ;;  %v18712_v20 = vld [vmem:[#allocation9 + $0x2a0] sm:$0xff]  }
  0x55   : > { %946 = vmatprep.subr.bf16.mxu1 %v24315_v0  ;;  %v557_v44 = vpack.c.bf16 %v553_v39, %v553_v39  ;;  %18154 = vmatpush3.bf16.msra.mxu0 %v18686_v40  ;;  %v1544_v13 = vld [vmem:[#allocation2 + $0x18] sm:$0x78] }
  0x56   : > { %v701_v10 = vshrl.u32 %v621_v8, 16  ;;  %v703_v11 = vshll.u32 %v621_v8, 16  ;;  %18155 = vmatprep.subr.bf16.mxu0 %v18689_v41  ;;  %v614_v8 = vld [vmem:[#allocation2] sm:$0x1e]  ;;  %v1548_v18 = vpack.c.bf16 %v1544_v13, %v1544_v13 }
  0x58   : > { %v705_v12 = vrot.slane %v703_v11, 1  ;;  %947 = vmatpush2.bf16.msra.mxu1 %v18655_v23  ;;  %v1631_v25 = vshrl.u32 %v1548_v18, 16  ;;  %v1634_v26 = vshll.u32 %v1548_v18, 16 }
  0x59   : > { %948 = vmatprep.subr.bf16.mxu1 %v24315_v0  ;;  %18156 = vmatpush3.bf16.msra.mxu0 %v18690_v45  ;;  %v18697_v45 = vld [vmem:[#allocation9 + $0x70] sm:$0xff]  }
  0x5a   : > { %v706_v14 = vor.u32 %v705_v12, %v701_v10  ;;  %18163 = vmatprep.subr.bf16.mxu0 %v18693_v46  ;;  %v1541_v10 = vld [vmem:[#allocation2] sm:$0x78]  ;;  %v18707_v12 = vld [vmem:[#allocation9 + $0x2e8] sm:$0xff]   ;;  %v1633_v38 = vrot.slane %v1631_v25, 1  ;;  %v1636_v39 = vrot.slane %v1634_v26, 2 }
  0x5b   : > { %v1545_v16 = vpack.c.bf16 %v1541_v10, %v1541_v10  ;;  %v18722_v10 = vld [vmem:[#allocation9 + $0x238] sm:$0xff]   ;;  %v18745_v25 = vld [vmem:[#allocation9 + $0x368] sm:$0xff]  }
  0x5c   : > { %15687 = vmatprep.mubr.msk.bf16.mxu1 %vm878_vm1, %v706_v14  ;;  %949 = vmatpush2.bf16.msra.mxu1 %v18656_v29  ;;  %v618_v14 = vpack.c.bf16 %v614_v8, %v614_v8  ;;  %v18720_v8 = vld [vmem:[#allocation9] sm:$0xff]  }
  0x5d   : > { %950 = vmatprep.subr.bf16.mxu1 %v24315_v0  ;;  %v1607_v21 = vshrl.u32 %v1545_v16, 16  ;;  %v1610_v22 = vshll.u32 %v1545_v16, 16  ;;  %v18739_v16 = vld [vmem:[#allocation9 + $0x378] sm:$0xff]  }
  0x5e   : > { %v682_v19 = vshll.u32 %v618_v14, 16  ;;  %v680_v29 = vshrl.u32 %v618_v14, 16 }
  0x5f   : > { %v1609_v31 = vrot.slane %v1607_v21, 1  ;;  %v1612_v32 = vrot.slane %v1610_v22, 2  ;;  %v18742_v21 = vld [vmem:[#allocation9 + $0x370] sm:$0xff]  }
  0x60   : > { %951 = vmatpush2.bf16.msra.mxu1 %v18657_v33  ;;  %v684_v30 = vrot.slane %v682_v19, 1  ;;  %v18726_v19 = vld [vmem:[#allocation9 + $0x1f0] sm:$0xff]  }
  0x61   : > { %952 = vmatprep.subr.bf16.mxu1 %v24315_v0  ;;  %v1613_v46 = vor.u32 %v1612_v32, %v1609_v31 }
  0x64   : > { %953 = vmatpush2.bf16.msra.mxu1 %v18658_v35 }
  0x65   : > { %1173 = vmatprep.subr.bf16.mxu1 %v24315_v0 }
  0x67   : > { %955 = vmatmul.mubr.bf16.vlgmr.msra.gmra.mxu1 %v699_v42 }
  0x68   : > { %1174 = vmatpush1.bf16.msra.mxu1 %v18659_v43  ;;  %15716 = vmatprep.mubr.msk.bf16.mxu1 %vm878_vm1, %v557_v44  ;;  %v18694_v43 = vld [vmem:[#allocation9 + $0x38] sm:$0xff]   ;;  %v685_v44 = vor.u32 %v684_v30, %v680_v29  ;;  %v18747_v30 = vld [vmem:[#allocation9 + $0x360] sm:$0xff]  }
  0x69   : > { %1175 = vmatprep.subr.bf16.mxu1 %v24315_v0  ;;  %v18734_v29 = vld [vmem:[#allocation9 + $0x218] sm:$0xff]  }
  0x6c   : > { %1176 = vmatpush1.bf16.msra.mxu1 %v18660_v47  ;;  %v18715_v47 = vld [vmem:[#allocation9 + $0x358] sm:$0xff]  }
  0x6d   : > { %1177 = vmatprep.subr.bf16.mxu1 %v24315_v0 }
  0x70   : > { %1178 = vmatpush1.bf16.msra.mxu1 %v18661_v48 }
  0x71   : > { %1179 = vmatprep.subr.bf16.mxu1 %v24315_v0 }
  0x74   : > { %1180 = vmatpush1.bf16.msra.mxu1 %v18662_v49 }
  0x75   : > { %1181 = vmatprep.subr.bf16.mxu1 %v24315_v0 }
  0x78   : > { %1182 = vmatpush1.bf16.msra.mxu1 %v18663_v50 }
  0x79   : > { %1183 = vmatprep.subr.bf16.mxu1 %v24315_v0 }
  0x7c   : > { %1184 = vmatpush1.bf16.msra.mxu1 %v18664_v51  ;;  %v18698_v51 = vld [vmem:[#allocation9 + $0x30] sm:$0xff]  }
  0x7d   : > { %1185 = vmatprep.subr.bf16.mxu1 %v24315_v0 }
  0x80   : > { %1186 = vmatpush1.bf16.msra.mxu1 %v18665_v52  ;;  %v1637_v52 = vor.u32 %v1636_v39, %v1633_v38  ;;  %v18741_v38 = vld [vmem:[#allocation9 + $0x1c8] sm:$0xff]   ;;  %v1213_v39 = vld [vmem:[#allocation2] sm:$0x3c] }
  0x81   : > { %1187 = vmatprep.subr.bf16.mxu1 %v24315_v0 }
  0x84   : > { %1188 = vmatpush1.bf16.msra.mxu1 %v18668_v53  ;;  %v18701_v53 = vld [vmem:[#allocation9 + $0x68] sm:$0xff]  }
  0x85   : > { %1197 = vmatprep.subr.bf16.mxu1 %v24315_v0 }
  0x88   : > { %1198 = vmatpush2.bf16.msra.mxu1 %v18671_v54  ;;  %v18718_v54 = vld [vmem:[#allocation9 + $0x350] sm:$0xff]  }
  0x89   : > { %1199 = vmatprep.subr.bf16.mxu1 %v24315_v0 }
  0x8c   : > { %1200 = vmatpush2.bf16.msra.mxu1 %v18674_v55  ;;  %v18702_v55 = vld [vmem:[#allocation9 + $0x28] sm:$0xff]  }
  0x8d   : > { %1201 = vmatprep.subr.bf16.mxu1 %v24315_v0 }
  0x90   : > { %1202 = vmatpush2.bf16.msra.mxu1 %v18677_v56  ;;  %v18705_v56 = vld [vmem:[#allocation9 + $0x60] sm:$0xff]  }
  0x91   : > { %1203 = vmatprep.subr.bf16.mxu1 %v24315_v0 }
  0x94   : > { %1204 = vmatpush2.bf16.msra.mxu1 %v18680_v57  ;;  %v18721_v57 = vld [vmem:[#allocation9 + $0x348] sm:$0xff]  }
  0x95   : > { %18207 = vmatprep.subr.bf16.mxu1 %v18683_v59  ;;  %v18709_v59 = vld [vmem:[#allocation9 + $0x58] sm:$0xff]  }
  0x97   : > { %1206 = vmatmul.mubr.bf16.vlgmr.msra.gmra.mxu1 %v556_v60  ;;  %v18724_v60 = vld [vmem:[#allocation9 + $0x340] sm:$0xff]  }
  0x98   : > { %18208 = vmatpush3.bf16.msra.mxu1 %v18684_v61  ;;  %v18710_v61 = vld [vmem:[#allocation9 + $0x18] sm:$0xff]  }
  0x99   : > { %18209 = vmatprep.subr.bf16.mxu1 %v18687_v62  ;;  %v18713_v62 = vld [vmem:[#allocation9 + $0x50] sm:$0xff]  }
  0x9c   : > { %18210 = vmatpush3.bf16.msra.mxu1 %v18688_v63  ;;  %v18727_v63 = vld [vmem:[#allocation9 + $0x338] sm:$0xff]  }
  0x9d   : > { %18211 = vmatprep.subr.bf16.mxu1 %v18691_v1  ;;  %v18714_v1 = vld [vmem:[#allocation9 + $0x10] sm:$0xff]  }
  0xa0   : > { %18212 = vmatpush3.bf16.msra.mxu1 %v18692_v2  ;;  %v18716_v2 = vld [vmem:[#allocation9 + $0x48] sm:$0xff]  }
  0xa1   : > { %18213 = vmatprep.subr.bf16.mxu1 %v18695_v3  ;;  %v18730_v3 = vld [vmem:[#allocation9 + $0x330] sm:$0xff]  }
  0xa4   : > { %18214 = vmatpush3.bf16.msra.mxu1 %v18696_v4  ;;  %v18717_v4 = vld [vmem:[#allocation9 + $0x8] sm:$0xff]  }
  0xa5   : > { %18215 = vmatprep.subr.bf16.mxu1 %v18699_v5  ;;  %v18719_v5 = vld [vmem:[#allocation9 + $0x40] sm:$0xff]  }
  0xa8   : > { %18216 = vmatpush3.bf16.msra.mxu1 %v18700_v6  ;;  %v18733_v6 = vld [vmem:[#allocation9 + $0x328] sm:$0xff]  }
  0xa9   : > { %18217 = vmatprep.subr.bf16.mxu1 %v18703_v7 }
  0xac   : > { %18218 = vmatpush3.bf16.msra.mxu1 %v18704_v9  ;;  %v550_v9 = vld [vmem:[#allocation2] sm:$0xf] }
  0xad   : > { %v546_v11 = vpop.permute.xlu0 %545  ;;  %18219 = vmatprep.subr.bf16.mxu1 %v18707_v12  ;;  %v18723_v12 = vld [vmem:[#allocation9 + $0x1f8] sm:$0xff]   ;;  %v554_v14 = vpack.c.bf16 %v550_v9, %v550_v9 }
  0xae   : > { %549 = vst.msk [vmem:[#allocation2 + $0xb] sm:$0x1] %vm548_vm2, %v546_v11  ;;  %v18736_v11 = vld [vmem:[#allocation9 + $0x320] sm:$0xff]   ;;  %v1968_v9 = vld [vmem:[#allocation3 + $0x8] sm:$0xfe]  ;;  %vm13915_vm2 = vcmask 1047808  }
  0xb0   : > { %18220 = vmatpush3.bf16.msra.mxu1 %v18708_v15  ;;  %v18725_v15 = vld [vmem:[#allocation9 + $0x230] sm:$0xff]  }
  0xb1   : > { %18221 = vmatprep.subr.bf16.mxu1 %v18711_v17  ;;  %v1543_v17 = vld [vmem:[#allocation2 + $0x10] sm:$0x78] }
  0xb2   : > { %v1547_v22 = vpack.c.bf16 %v1543_v17, %v1543_v17  ;;  %v18785_v17 = vld [vmem:[#allocation11 + $0x174] ss:$8 sps:$4 sm:$0xff]  }
  0xb4   : > { %18222 = vmatpush3.bf16.msra.mxu1 %v18712_v20  ;;  %v18728_v20 = vld [vmem:[#allocation9 + $0x228] sm:$0xff]   ;;  %v1623_v26 = vshrl.u32 %v1547_v22, 16 }
  0xb5   : > { %v615_v23 = vld [vmem:[#allocation2 + $0x8] sm:$0x1e]  ;;  %1852 = vmatprep.subr.bf16.mxu1 %v24315_v0 }
  0xb6   : > { %v1542_v24 = vld [vmem:[#allocation2 + $0x8] sm:$0x78]  ;;  %v619_v27 = vpack.c.bf16 %v615_v23, %v615_v23  ;;  %v18729_v23 = vld [vmem:[#allocation9 + $0x1e8] sm:$0xff]   ;;  %v1625_v31 = vrot.slane %v1623_v26, 1 }
  0xb7   : > { %v1546_v28 = vpack.c.bf16 %v1542_v24, %v1542_v24  ;;  %v551_v37 = vld [vmem:[#allocation2 + $0x8] sm:$0xf]  ;;  %v18731_v24 = vld [vmem:[#allocation9 + $0x220] sm:$0xff]   ;;  %v18791_v26 = vld [vmem:[#allocation11 + $0x154] ss:$8 sps:$4 sm:$0xff]  }
  0xb8   : > { %v689_v33 = vshll.u32 %v619_v27, 16  ;;  %v687_v36 = vshrl.u32 %v619_v27, 16  ;;  %v555_v50 = vpack.c.bf16 %v551_v37, %v551_v37  ;;  %v1214_v7 = vld [vmem:[#allocation2 + $0x8] sm:$0x3c]  ;;  %v1626_v27 = vshll.u32 %v1547_v22, 16  ;;  %v18740_v37 = vld [vmem:[#allocation9 + $0x208] sm:$0xff]  }
  0xb9   : > { %v1615_v34 = vshrl.u32 %v1546_v28, 16  ;;  %v1618_v35 = vshll.u32 %v1546_v28, 16  ;;  %v1218_v13 = vpack.c.bf16 %v1214_v7, %v1214_v7  ;;  %v18732_v28 = vld [vmem:[#allocation9 + $0x1e0] sm:$0xff]  }
  0xba   : > { %v691_v40 = vrot.slane %v689_v33, 1  ;;  %v1628_v32 = vrot.slane %v1626_v27, 2  ;;  %v18735_v33 = vld [vmem:[#allocation9 + $0x1d8] sm:$0xff]   ;;  %v1215_v7 = vld [vmem:[#allocation2 + $0x10] sm:$0x3c] }
  0xbb   : > { %v1617_v41 = vrot.slane %v1615_v34, 1  ;;  %v1620_v42 = vrot.slane %v1618_v35, 2  ;;  %v1283_v18 = vrot.slane %v1218_v13, 1  ;;  %v18737_v34 = vld [vmem:[#allocation9 + $0x210] sm:$0xff]   ;;  %v18782_v13 = vld [vmem:[#allocation11 + $0x284] ss:$8 sps:$4 sm:$0xff]  }
  0xbc   : > { %v692_v48 = vor.u32 %v691_v40, %v687_v36  ;;  %v1629_v35 = vor.u32 %v1628_v32, %v1625_v31  ;;  %v18738_v36 = vld [vmem:[#allocation9 + $0x1d0] sm:$0xff]   ;;  %v18743_v40 = vld [vmem:[#allocation9 + $0x200] sm:$0xff]  }
  0xbd   : > { %v1621_v49 = vor.u32 %v1620_v42, %v1617_v41  ;;  %v1216_v41 = vld [vmem:[#allocation2 + $0x18] sm:$0x3c]  ;;  %v18744_v42 = vld [vmem:[#allocation9 + $0x1c0] sm:$0xff]  }
  0xbe   : > { %914 = vmatprep.mubr.bf16.mxu0 %v692_v48  ;;  %v18748_v48 = vld [vmem:[#allocation9 + $0x270] sm:$0xff]   ;;  %v18788_v22 = vld [vmem:[#allocation11 + $0x164] ss:$8 sps:$4 sm:$0xff]   ;;  %v18792_v32 = vld [vmem:[#allocation11 + $0x140] ss:$8 sps:$4 sm:$0xff]  }
  0xbf   : > { %1844 = vmatprep.mubr.bf16.mxu1 %v1621_v49  ;;  %915 = vmatmul.mubr.bf16.vlgmr.msra.gmra.mxu0 %v685_v44  ;;  %v1220_v44 = vpack.c.bf16 %v1216_v41, %v1216_v41  ;;  %v18749_v49 = vld [vmem:[#allocation9 + $0x268] sm:$0xff]  }
  0xc0   : > { %1845 = vmatmul.mubr.bf16.vlgmr.msra.gmra.mxu1 %v1613_v46  ;;  %18164 = vmatpush3.bf16.msra.mxu0 %v18694_v43  ;;  %v1217_v43 = vpack.c.bf16 %v1213_v39, %v1213_v39  ;;  %v18801_v39 = vld [vmem:[#allocation11 + $0x110] ss:$8 sps:$4 sm:$0xff]   ;;  %v18804_v41 = vld [vmem:[#allocation11 + $0x100] ss:$8 sps:$4 sm:$0xff]  }
  0xc1   : > { %1165 = vmatprep.mubr.bf16.mxu0 %v555_v50  ;;  %18165 = vmatprep.subr.bf16.mxu0 %v18697_v45  ;;  %v18746_v45 = vld [vmem:[#allocation9 + $0x278] sm:$0xff]  }
  0xc2   : > { %1853 = vmatpush1.bf16.msra.mxu1 %v18715_v47  ;;  %15774 = vmatprep.mubr.msk.bf16.mxu1 %vm878_vm1, %v1637_v52  ;;  %v1282_v46 = vrot.slane %v1217_v43, 1  ;;  %v1285_v47 = vrot.slane %v1220_v44, 1  ;;  %v18759_v50 = vld [vmem:[#allocation11 + $0x2f0] ss:$8 sps:$4 sm:$0xff]   ;;  %v18764_v52 = vld [vmem:[#allocation11 + $0x2e4] ss:$8 sps:$4 sm:$0xff]  }
  0xc3   : > { %1854 = vmatprep.subr.bf16.mxu1 %v24315_v0  ;;  %v20837_v43 = vld [vmem:[#allocation3 + $0x28] sm:$0xff] }
  0xc4   : > { %18166 = vmatpush3.bf16.msra.mxu0 %v18698_v51  ;;  %v18761_v51 = vld [vmem:[#allocation11 + $0x2f4] ss:$8 sps:$4 sm:$0xff]   ;;  %v21171_v44 = vpack.c.bf16 %v20837_v43, %v20837_v43  ;;  %v18891_v43 = vld [vmem:[#allocation11 + $0x390] ss:$8 sps:$4 sm:$0xff]  }
  0xc5   : > { %18167 = vmatprep.subr.bf16.mxu0 %v18701_v53  ;;  %v18750_v53 = vld [vmem:[#allocation9 + $0x260] sm:$0xff]  }
  0xc6   : > { %1855 = vmatpush1.bf16.msra.mxu1 %v18718_v54  ;;  %v18762_v54 = vld [vmem:[#allocation11 + $0x2e0] ss:$8 sps:$4 sm:$0xff]  }
  0xc7   : > { %1856 = vmatprep.subr.bf16.mxu1 %v24315_v0 }
  0xc8   : > { %18168 = vmatpush3.bf16.msra.mxu0 %v18702_v55  ;;  %v18767_v55 = vld [vmem:[#allocation11 + $0x2d4] ss:$8 sps:$4 sm:$0xff]  }
  0xc9   : > { %18169 = vmatprep.subr.bf16.mxu0 %v18705_v56  ;;  %v18751_v56 = vld [vmem:[#allocation9 + $0x258] sm:$0xff]  }
  0xca   : > { %1857 = vmatpush1.bf16.msra.mxu1 %v18721_v57  ;;  %v18765_v57 = vld [vmem:[#allocation11 + $0x2d0] ss:$8 sps:$4 sm:$0xff]  }
  0xcb   : > { %1858 = vmatprep.subr.bf16.mxu1 %v24315_v0 }
  0xcc   : > { %18170 = vmatpush3.bf16.msra.mxu0 %v18706_v58  ;;  %v18770_v58 = vld [vmem:[#allocation11 + $0x2c4] ss:$8 sps:$4 sm:$0xff]  }
  0xcd   : > { %18171 = vmatprep.subr.bf16.mxu0 %v18709_v59  ;;  %v18752_v59 = vld [vmem:[#allocation9 + $0x250] sm:$0xff]  }
  0xce   : > { %1859 = vmatpush1.bf16.msra.mxu1 %v18724_v60  ;;  %v18768_v60 = vld [vmem:[#allocation11 + $0x2c0] ss:$8 sps:$4 sm:$0xff]  }
  0xcf   : > { %1860 = vmatprep.subr.bf16.mxu1 %v24315_v0 }
  0xd0   : > { %18172 = vmatpush3.bf16.msra.mxu0 %v18710_v61  ;;  %v18773_v61 = vld [vmem:[#allocation11 + $0x2b4] ss:$8 sps:$4 sm:$0xff]  }
  0xd1   : > { %18173 = vmatprep.subr.bf16.mxu0 %v18713_v62  ;;  %v18753_v62 = vld [vmem:[#allocation9 + $0x248] sm:$0xff]  }
  0xd2   : > { %1861 = vmatpush1.bf16.msra.mxu1 %v18727_v63  ;;  %v18771_v63 = vld [vmem:[#allocation11 + $0x2b0] ss:$8 sps:$4 sm:$0xff]  }
  0xd3   : > { %1862 = vmatprep.subr.bf16.mxu1 %v24315_v0 }
  0xd4   : > { %18174 = vmatpush3.bf16.msra.mxu0 %v18714_v1  ;;  %v18776_v1 = vld [vmem:[#allocation11 + $0x2a4] ss:$8 sps:$4 sm:$0xff]  }
  0xd5   : > { %18175 = vmatprep.subr.bf16.mxu0 %v18716_v2  ;;  %v18754_v2 = vld [vmem:[#allocation9 + $0x240] sm:$0xff]  }
  0xd6   : > { %1863 = vmatpush1.bf16.msra.mxu1 %v18730_v3  ;;  %v18774_v3 = vld [vmem:[#allocation11 + $0x2a0] ss:$8 sps:$4 sm:$0xff]  }
  0xd7   : > { %1864 = vmatprep.subr.bf16.mxu1 %v24315_v0 }
  0xd8   : > { %18176 = vmatpush3.bf16.msra.mxu0 %v18717_v4  ;;  %v18755_v4 = vld [vmem:[#allocation9 + $0x298] sm:$0xff]  }
  0xd9   : > { %18177 = vmatprep.subr.bf16.mxu0 %v18719_v5  ;;  %v18756_v5 = vld [vmem:[#allocation9 + $0x290] sm:$0xff]  }
  0xda   : > { %1865 = vmatpush1.bf16.msra.mxu1 %v18733_v6  ;;  %v18779_v6 = vld [vmem:[#allocation11 + $0x294] ss:$8 sps:$4 sm:$0xff]  }
  0xdb   : > { %1866 = vmatprep.subr.bf16.mxu1 %v24315_v0 }
  0xdc   : > { %18178 = vmatpush3.bf16.msra.mxu0 %v18720_v8  ;;  %v18777_v8 = vld [vmem:[#allocation11 + $0x290] ss:$8 sps:$4 sm:$0xff]  }
  0xdd   : > { %18185 = vmatprep.subr.bf16.mxu0 %v18722_v10  ;;  %v1971_v10 = vld [vmem:[#allocation3 + $0x20] sm:$0x1] }
  0xde   : > { %1867 = vmatpush1.bf16.msra.mxu1 %v18736_v11  ;;  %v1974_v11 = vpack.c.bf16 %v1971_v10, %v1968_v9  ;;  %v18843_v9 = vld [vmem:[#allocation11 + $0x310] ss:$8 sps:$4 sm:$0xff]   ;;  %v18854_v10 = vld [vmem:[#allocation11 + $0x184] ss:$8 sps:$4 sm:$0xff]  }
  0xdf   : > { %1876 = vmatprep.subr.bf16.mxu1 %v24315_v0  ;;  %1166 = vmatmul.mubr.bf16.vlgmr.msra.gmra.mxu0 %v554_v14  ;;  %v18780_v14 = vld [vmem:[#allocation11 + $0x280] ss:$8 sps:$4 sm:$0xff]  }
  0xe0   : > { %18186 = vmatpush3.bf16.msra.mxu0 %v18723_v12  ;;  %1492 = vmatprep.mubr.bf16.mxu0 %v1283_v18  ;;  %v18757_v12 = vld [vmem:[#allocation9 + $0x288] sm:$0xff]   ;;  %v2039_v18 = vshrl.u32 %v1974_v11, 16 }
  0xe1   : > { %18187 = vmatprep.subr.bf16.mxu0 %v18725_v15  ;;  %v2041_v15 = vshll.u32 %v1974_v11, 16  ;;  %v18851_v11 = vld [vmem:[#allocation11 + $0x304] ss:$8 sps:$4 sm:$0xff]  }
  0xe2   : > { %1877 = vmatpush2.bf16.msra.mxu1 %v18739_v16  ;;  %v1219_v16 = vpack.c.bf16 %v1215_v7, %v1215_v7  ;;  %v18846_v7 = vld [vmem:[#allocation11 + $0x190] ss:$8 sps:$4 sm:$0xff]  }
  0xe3   : > { %1878 = vmatprep.subr.bf16.mxu1 %v24315_v0 }
  0xe4   : > { %18188 = vmatpush3.bf16.msra.mxu0 %v18726_v19  ;;  %v2043_v19 = vrot.slane %v2041_v15, 1  ;;  %v18849_v15 = vld [vmem:[#allocation11 + $0x300] ss:$8 sps:$4 sm:$0xff]  }
  0xe5   : > { %18189 = vmatprep.subr.bf16.mxu0 %v18728_v20  ;;  %v18783_v20 = vld [vmem:[#allocation11 + $0x170] ss:$8 sps:$4 sm:$0xff]  }
  0xe6   : > { %1879 = vmatpush2.bf16.msra.mxu1 %v18742_v21  ;;  %v2044_v21 = vor.u32 %v2043_v19, %v2039_v18  ;;  %v18858_v19 = vld [vmem:[#allocation11 + $0x270] ss:$8 sps:$4 sm:$0xff]  }
  0xe7   : > { %1880 = vmatprep.subr.bf16.mxu1 %v24315_v0 }
  0xe8   : > { %18190 = vmatpush3.bf16.msra.mxu0 %v18729_v23  ;;  %v18758_v23 = vld [vmem:[#allocation9 + $0x280] sm:$0xff]  }
  0xe9   : > { %18191 = vmatprep.subr.bf16.mxu0 %v18731_v24  ;;  %v1284_v24 = vrot.slane %v1219_v16, 1  ;;  %v18860_v16 = vld [vmem:[#allocation11 + $0x274] ss:$8 sps:$4 sm:$0xff]  }
  0xea   : > { %1881 = vmatpush2.bf16.msra.mxu1 %v18745_v25  ;;  %v18786_v25 = vld [vmem:[#allocation11 + $0x160] ss:$8 sps:$4 sm:$0xff]  }
  0xeb   : > { %1882 = vmatprep.subr.bf16.mxu1 %v24315_v0 }
  0xec   : > { %18192 = vmatpush3.bf16.msra.mxu0 %v18732_v28  ;;  %v18789_v28 = vld [vmem:[#allocation11 + $0x150] ss:$8 sps:$4 sm:$0xff]  }
  0xed   : > { %18193 = vmatprep.subr.bf16.mxu0 %v18734_v29  ;;  %v18794_v29 = vld [vmem:[#allocation11 + $0x144] ss:$8 sps:$4 sm:$0xff]  }
  0xee   : > { %1883 = vmatpush2.bf16.msra.mxu1 %v18747_v30 }
  0xef   : > { %2329 = vmatprep.subr.bf16.mxu1 %v18761_v51  ;;  %v18813_v51 = vld [vmem:[#allocation11 + $0x360] ss:$8 sps:$4 sm:$0xff]  }
  0xf0   : > { %18194 = vmatpush3.bf16.msra.mxu0 %v18735_v33  ;;  %v18797_v33 = vld [vmem:[#allocation11 + $0x134] ss:$8 sps:$4 sm:$0xff]  }
  0xf1   : > { %1885 = vmatmul.mubr.bf16.vlgmr.msra.gmra.mxu1 %v1629_v35  ;;  %18195 = vmatprep.subr.bf16.mxu0 %v18737_v34  ;;  %v18795_v35 = vld [vmem:[#allocation11 + $0x130] ss:$8 sps:$4 sm:$0xff]  }
  0xf2   : > { %2361 = vmatprep.mubr.bf16.mxu1 %v24315_v0  ;;  %2330 = vmatpush1.bf16.msra.mxu1 %v18759_v50  ;;  %v18816_v50 = vld [vmem:[#allocation11 + $0x1e0] ss:$8 sps:$4 sm:$0xff]  }
  0xf3   : > { %2331 = vmatprep.subr.bf16.mxu1 %v18764_v52  ;;  %v18824_v52 = vld [vmem:[#allocation11 + $0x1d4] ss:$8 sps:$4 sm:$0xff]  }
  0xf4   : > { %18196 = vmatpush3.bf16.msra.mxu0 %v18738_v36  ;;  %v18800_v36 = vld [vmem:[#allocation11 + $0x124] ss:$8 sps:$4 sm:$0xff]  }
  0xf5   : > { %18197 = vmatprep.subr.bf16.mxu0 %v18740_v37  ;;  %v18798_v37 = vld [vmem:[#allocation11 + $0x120] ss:$8 sps:$4 sm:$0xff]  }
  0xf6   : > { %2332 = vmatpush1.bf16.msra.mxu1 %v18762_v54  ;;  %v18822_v54 = vld [vmem:[#allocation11 + $0x1d0] ss:$8 sps:$4 sm:$0xff]  }
  0xf7   : > { %2333 = vmatprep.subr.bf16.mxu1 %v18767_v55  ;;  %v18819_v55 = vld [vmem:[#allocation11 + $0x350] ss:$8 sps:$4 sm:$0xff]  }
  0xf8   : > { %18198 = vmatpush3.bf16.msra.mxu0 %v18741_v38  ;;  %v18803_v38 = vld [vmem:[#allocation11 + $0x114] ss:$8 sps:$4 sm:$0xff]  }
  0xf9   : > { %18199 = vmatprep.subr.bf16.mxu0 %v18743_v40  ;;  %v18806_v40 = vld [vmem:[#allocation11 + $0x104] ss:$8 sps:$4 sm:$0xff]  }
  0xfa   : > { %2334 = vmatpush1.bf16.msra.mxu1 %v18765_v57  ;;  %v18827_v57 = vld [vmem:[#allocation11 + $0x344] ss:$8 sps:$4 sm:$0xff]  }
  0xfb   : > { %2335 = vmatprep.subr.bf16.mxu1 %v18770_v58  ;;  %v18825_v58 = vld [vmem:[#allocation11 + $0x340] ss:$8 sps:$4 sm:$0xff]  }
  0xfc   : > { %18200 = vmatpush3.bf16.msra.mxu0 %v18744_v42  ;;  %v18809_v42 = vld [vmem:[#allocation11 + $0x374] ss:$8 sps:$4 sm:$0xff]  }
  0xfd   : > { %1500 = vmatprep.subr.bf16.mxu0 %v24315_v0 }
  0xfe   : > { %2336 = vmatpush1.bf16.msra.mxu1 %v18768_v60  ;;  %v18833_v60 = vld [vmem:[#allocation11 + $0x334] ss:$8 sps:$4 sm:$0xff]  }
  0xff   : > { %1493 = vmatmul.mubr.bf16.vlgmr.msra.gmra.mxu0 %v1282_v46  ;;  %2337 = vmatprep.subr.bf16.mxu1 %v18773_v61  ;;  %v18807_v46 = vld [vmem:[#allocation11 + $0x370] ss:$8 sps:$4 sm:$0xff]   ;;  %v18836_v61 = vld [vmem:[#allocation11 + $0x1b4] ss:$8 sps:$4 sm:$0xff]  }
 0x100   : > { %1501 = vmatpush1.bf16.msra.mxu0 %v18746_v45  ;;  %15745 = vmatprep.mubr.msk.bf16.mxu0 %vm878_vm1, %v1285_v47  ;;  %v18810_v45 = vld [vmem:[#allocation11 + $0x1f0] ss:$8 sps:$4 sm:$0xff]   ;;  %v18812_v47 = vld [vmem:[#allocation11 + $0x1f4] ss:$8 sps:$4 sm:$0xff]  }
 0x101   : > { %1502 = vmatprep.subr.bf16.mxu0 %v24315_v0 }
 0x102   : > { %2338 = vmatpush1.bf16.msra.mxu1 %v18771_v63  ;;  %v18831_v63 = vld [vmem:[#allocation11 + $0x330] ss:$8 sps:$4 sm:$0xff]  }
 0x103   : > { %2339 = vmatprep.subr.bf16.mxu1 %v18776_v1  ;;  %v18842_v1 = vld [vmem:[#allocation11 + $0x1a4] ss:$8 sps:$4 sm:$0xff]  }
 0x104   : > { %1503 = vmatpush1.bf16.msra.mxu0 %v18748_v48  ;;  %v18815_v48 = vld [vmem:[#allocation11 + $0x364] ss:$8 sps:$4 sm:$0xff]  }
 0x105   : > { %1504 = vmatprep.subr.bf16.mxu0 %v24315_v0 }
 0x106   : > { %2340 = vmatpush1.bf16.msra.mxu1 %v18774_v3  ;;  %v18840_v3 = vld [vmem:[#allocation11 + $0x1a0] ss:$8 sps:$4 sm:$0xff]  }
 0x107   : > { %2341 = vmatprep.subr.bf16.mxu1 %v18779_v6  ;;  %v18845_v6 = vld [vmem:[#allocation11 + $0x314] ss:$8 sps:$4 sm:$0xff]  }
 0x108   : > { %1505 = vmatpush1.bf16.msra.mxu0 %v18749_v49  ;;  %v18818_v49 = vld [vmem:[#allocation11 + $0x1e4] ss:$8 sps:$4 sm:$0xff]  }
 0x109   : > { %1506 = vmatprep.subr.bf16.mxu0 %v24315_v0 }
 0x10a   : > { %2342 = vmatpush1.bf16.msra.mxu1 %v18777_v8 }
 0x10b   : > { %2343 = vmatprep.subr.bf16.mxu1 %v18782_v13  ;;  %v18852_v13 = vld [vmem:[#allocation11 + $0x180] ss:$8 sps:$4 sm:$0xff]  }
 0x10c   : > { %1507 = vmatpush1.bf16.msra.mxu0 %v18750_v53  ;;  %v18821_v53 = vld [vmem:[#allocation11 + $0x354] ss:$8 sps:$4 sm:$0xff]  }
 0x10d   : > { %1508 = vmatprep.subr.bf16.mxu0 %v24315_v0 }
 0x10e   : > { %2344 = vmatpush1.bf16.msra.mxu1 %v18780_v14 }
 0x10f   : > { %2651 = vmatprep.subr.bf16.mxu1 %v18785_v17  ;;  %v18857_v17 = vld [vmem:[#allocation11 + $0x3f4] ss:$8 sps:$4 sm:$0xff]  }
 0x110   : > { %1509 = vmatpush1.bf16.msra.mxu0 %v18751_v56  ;;  %v18830_v56 = vld [vmem:[#allocation11 + $0x1c4] ss:$8 sps:$4 sm:$0xff]  }
 0x111   : > { %1510 = vmatprep.subr.bf16.mxu0 %v24315_v0  ;;  %2362 = vmatmul.mubr.bf16.vlgmr.msra.gmra.mxu1 %v2044_v21  ;;  %v18863_v21 = vld [vmem:[#allocation11 + $0x3e4] ss:$8 sps:$4 sm:$0xff]  }
 0x112   : > { %2652 = vmatpush1.bf16.msra.mxu1 %v18783_v20  ;;  %2683 = vmatprep.mubr.bf16.mxu1 %v24315_v0  ;;  %v18855_v20 = vld [vmem:[#allocation11 + $0x3f0] ss:$8 sps:$4 sm:$0xff]  }
 0x113   : > { %2653 = vmatprep.subr.bf16.mxu1 %v18788_v22  ;;  %v18861_v22 = vld [vmem:[#allocation11 + $0x3e0] ss:$8 sps:$4 sm:$0xff]  }
 0x114   : > { %1511 = vmatpush1.bf16.msra.mxu0 %v18752_v59  ;;  %v18828_v59 = vld [vmem:[#allocation11 + $0x1c0] ss:$8 sps:$4 sm:$0xff]  }
 0x115   : > { %1512 = vmatprep.subr.bf16.mxu0 %v24315_v0 }
 0x116   : > { %2654 = vmatpush1.bf16.msra.mxu1 %v18786_v25  ;;  %v18864_v25 = vld [vmem:[#allocation11 + $0x260] ss:$8 sps:$4 sm:$0xff]  }
 0x117   : > { %2655 = vmatprep.subr.bf16.mxu1 %v18791_v26  ;;  %v18867_v26 = vld [vmem:[#allocation11 + $0x3d0] ss:$8 sps:$4 sm:$0xff]  }
 0x118   : > { %1513 = vmatpush1.bf16.msra.mxu0 %v18753_v62  ;;  %v18834_v62 = vld [vmem:[#allocation11 + $0x1b0] ss:$8 sps:$4 sm:$0xff]  }
 0x119   : > { %1514 = vmatprep.subr.bf16.mxu0 %v24315_v0 }
 0x11a   : > { %2656 = vmatpush1.bf16.msra.mxu1 %v18789_v28  ;;  %v18872_v28 = vld [vmem:[#allocation11 + $0x254] ss:$8 sps:$4 sm:$0xff]  }
 0x11b   : > { %2657 = vmatprep.subr.bf16.mxu1 %v18794_v29  ;;  %v18875_v29 = vld [vmem:[#allocation11 + $0x3c4] ss:$8 sps:$4 sm:$0xff]  }
 0x11c   : > { %1515 = vmatpush1.bf16.msra.mxu0 %v18754_v2  ;;  %v18839_v2 = vld [vmem:[#allocation11 + $0x324] ss:$8 sps:$4 sm:$0xff]  }
 0x11d   : > { %1524 = vmatprep.subr.bf16.mxu0 %v24315_v0 }
 0x11e   : > { %2658 = vmatpush1.bf16.msra.mxu1 %v18792_v32  ;;  %v18878_v32 = vld [vmem:[#allocation11 + $0x244] ss:$8 sps:$4 sm:$0xff]  }
 0x11f   : > { %2659 = vmatprep.subr.bf16.mxu1 %v18797_v33  ;;  %v18881_v33 = vld [vmem:[#allocation11 + $0x3b4] ss:$8 sps:$4 sm:$0xff]  }
 0x120   : > { %1525 = vmatpush2.bf16.msra.mxu0 %v18755_v4  ;;  %v18837_v4 = vld [vmem:[#allocation11 + $0x320] ss:$8 sps:$4 sm:$0xff]  }
 0x121   : > { %1526 = vmatprep.subr.bf16.mxu0 %v24315_v0 }
 0x122   : > { %2660 = vmatpush1.bf16.msra.mxu1 %v18795_v35  ;;  %v18879_v35 = vld [vmem:[#allocation11 + $0x3b0] ss:$8 sps:$4 sm:$0xff]  }
 0x123   : > { %2661 = vmatprep.subr.bf16.mxu1 %v18800_v36  ;;  %v18884_v36 = vld [vmem:[#allocation11 + $0x234] ss:$8 sps:$4 sm:$0xff]  }
 0x124   : > { %1527 = vmatpush2.bf16.msra.mxu0 %v18756_v5  ;;  %v18848_v5 = vld [vmem:[#allocation11 + $0x194] ss:$8 sps:$4 sm:$0xff]  }
 0x125   : > { %1528 = vmatprep.subr.bf16.mxu0 %v24315_v0 }
 0x126   : > { %2662 = vmatpush1.bf16.msra.mxu1 %v18798_v37  ;;  %v18887_v37 = vld [vmem:[#allocation11 + $0x3a4] ss:$8 sps:$4 sm:$0xff]  }
 0x127   : > { %v21169_v27 = vpop.f32.mrf.mxu1  ;;  %2663 = vmatprep.subr.bf16.mxu1 %v18803_v38  ;;  %v18882_v38 = vld [vmem:[#allocation11 + $0x230] ss:$8 sps:$4 sm:$0xff]  }
 0x128   : > { %1529 = vmatpush2.bf16.msra.mxu0 %v18757_v12 }
 0x129   : > { %1530 = vmatprep.subr.bf16.mxu0 %v24315_v0  ;;  %v958_v30 = vpop.f32.mrf.mxu1 }
 0x12a   : > { %2664 = vmatpush1.bf16.msra.mxu1 %v18801_v39  ;;  %v18870_v30 = vld [vmem:[#allocation11 + $0x250] ss:$8 sps:$4 sm:$0xff]   ;;  %v18885_v39 = vld [vmem:[#allocation11 + $0x3a0] ss:$8 sps:$4 sm:$0xff]  }
 0x12b   : > { %v959_v31 = vpop.f32.mrf.mxu1  ;;  %2665 = vmatprep.subr.bf16.mxu1 %v18806_v40  ;;  %v18890_v40 = vld [vmem:[#allocation11 + $0x224] ss:$8 sps:$4 sm:$0xff]  }
 0x12c   : > { %1531 = vmatpush2.bf16.msra.mxu0 %v18758_v23  ;;  %v18866_v23 = vld [vmem:[#allocation11 + $0x264] ss:$8 sps:$4 sm:$0xff]   ;;  %v18873_v31 = vld [vmem:[#allocation11 + $0x3c0] ss:$8 sps:$4 sm:$0xff]  }
 0x12d   : > { %v960_v34 = vpop.f32.mrf.mxu1  ;;  %2288 = vmatprep.subr.bf16.mxu0 %v18812_v47 }
 0x12e   : > { %2666 = vmatpush1.bf16.msra.mxu1 %v18804_v41  ;;  %v18876_v34 = vld [vmem:[#allocation11 + $0x240] ss:$8 sps:$4 sm:$0xff]  }
 0x12f   : > { %1533 = vmatmul.mubr.bf16.vlgmr.msra.gmra.mxu0 %v1284_v24  ;;  %2999 = vmatprep.subr.bf16.mxu1 %v18809_v42  ;;  %v18869_v24 = vld [vmem:[#allocation11 + $0x3d4] ss:$8 sps:$4 sm:$0xff]   ;;  %v18888_v41 = vld [vmem:[#allocation11 + $0x220] ss:$8 sps:$4 sm:$0xff]  }
 0x130   : > { %2289 = vmatpush1.bf16.msra.mxu0 %v18810_v45  ;;  %v18893_v42 = vld [vmem:[#allocation11 + $0x394] ss:$8 sps:$4 sm:$0xff]  }
 0x131   : > { %2684 = vmatmul.mubr.bf16.vlgmr.msra.gmra.mxu1 %v21171_v44  ;;  %2290 = vmatprep.subr.bf16.mxu0 %v18818_v49  ;;  %v18896_v45 = vld [vmem:[#allocation11 + $0x214] ss:$8 sps:$4 sm:$0xff]   ;;  %v18899_v49 = vld [vmem:[#allocation11 + $0x384] ss:$8 sps:$4 sm:$0xff]  }
 0x132   : > { %3000 = vmatpush1.bf16.msra.mxu1 %v18807_v46 }
 0x133   : > { %3001 = vmatprep.subr.bf16.mxu1 %v18815_v48  ;;  %v18894_v48 = vld [vmem:[#allocation11 + $0x210] ss:$8 sps:$4 sm:$0xff]  }
 0x134   : > { %2291 = vmatpush1.bf16.msra.mxu0 %v18816_v50  ;;  %v18897_v50 = vld [vmem:[#allocation11 + $0x380] ss:$8 sps:$4 sm:$0xff]  }
 0x135   : > { %2292 = vmatprep.subr.bf16.mxu0 %v18824_v52 }
 0x136   : > { %3002 = vmatpush1.bf16.msra.mxu1 %v18813_v51  ;;  %v18902_v51 = vld [vmem:[#allocation11 + $0x204] ss:$8 sps:$4 sm:$0xff]  }
 0x137   : > { %3003 = vmatprep.subr.bf16.mxu1 %v18821_v53 }
 0x138   : > { %2293 = vmatpush1.bf16.msra.mxu0 %v18822_v54 }
 0x139   : > { %2294 = vmatprep.subr.bf16.mxu0 %v18830_v56 }
 0x13a   : > { %3004 = vmatpush1.bf16.msra.mxu1 %v18819_v55 }
 0x13b   : > { %3005 = vmatprep.subr.bf16.mxu1 %v18827_v57 }
 0x13c   : > { %2295 = vmatpush1.bf16.msra.mxu0 %v18828_v59 }
 0x13d   : > { %2296 = vmatprep.subr.bf16.mxu0 %v18836_v61  ;;  %v18905_v61 = vld [vmem:[#allocation11 + $0x5f4] ss:$8 sps:$4 sm:$0xff]  }
 0x13e   : > { %3006 = vmatpush1.bf16.msra.mxu1 %v18825_v58 }
 0x13f   : > { %3007 = vmatprep.subr.bf16.mxu1 %v18833_v60  ;;  %v18900_v60 = vld [vmem:[#allocation11 + $0x200] ss:$8 sps:$4 sm:$0xff]  }
 0x140   : > { %2297 = vmatpush1.bf16.msra.mxu0 %v18834_v62  ;;  %v18908_v62 = vld [vmem:[#allocation11 + $0x74] ss:$8 sps:$4 sm:$0xff]  }
 0x141   : > { %2298 = vmatprep.subr.bf16.mxu0 %v18842_v1 }
 0x142   : > { %3008 = vmatpush1.bf16.msra.mxu1 %v18831_v63 }
 0x143   : > { %3009 = vmatprep.subr.bf16.mxu1 %v18839_v2 }
 0x144   : > { %2299 = vmatpush1.bf16.msra.mxu0 %v18840_v3 }
 0x145   : > { %2300 = vmatprep.subr.bf16.mxu0 %v18848_v5 }
 0x146   : > { %3010 = vmatpush1.bf16.msra.mxu1 %v18837_v4 }
 0x147   : > { %3011 = vmatprep.subr.bf16.mxu1 %v18845_v6 }
 0x148   : > { %2301 = vmatpush1.bf16.msra.mxu0 %v18846_v7 }
 0x149   : > { %2302 = vmatprep.subr.bf16.mxu0 %v18854_v10 }
 0x14a   : > { %3012 = vmatpush1.bf16.msra.mxu1 %v18843_v9 }
 0x14b   : > { %3013 = vmatprep.subr.bf16.mxu1 %v18851_v11 }
 0x14c   : > { %2303 = vmatpush1.bf16.msra.mxu0 %v18852_v13 }
 0x14d   : > { %2304 = vmatprep.subr.bf16.mxu0 %v18860_v16 }
 0x14e   : > { %3014 = vmatpush1.bf16.msra.mxu1 %v18849_v15 }
 0x14f   : > { %3015 = vmatprep.subr.bf16.mxu1 %v18857_v17 }
 0x150   : > { %2305 = vmatpush2.bf16.msra.mxu0 %v18858_v19 }
 0x151   : > { %2306 = vmatprep.subr.bf16.mxu0 %v18866_v23 }
 0x152   : > { %3016 = vmatpush2.bf16.msra.mxu1 %v18855_v20 }
 0x153   : > { %3017 = vmatprep.subr.bf16.mxu1 %v18863_v21 }
 0x154   : > { %2307 = vmatpush2.bf16.msra.mxu0 %v18864_v25 }
 0x155   : > { %2308 = vmatprep.subr.bf16.mxu0 %v18872_v28  ;;  %v1966_v28 = vld [vmem:[#allocation3 + $0x28] sm:$0xfe] }
 0x156   : > { %3018 = vmatpush2.bf16.msra.mxu1 %v18861_v22  ;;  %v15775_v22 = vld [vmem:[%s24307_s8] ss:$0 sm:$0xff] }
 0x157   : > { %v21174_v8 = vpop.f32.mrf.mxu1  ;;  %3019 = vmatprep.subr.bf16.mxu1 %v18869_v24 }
 0x158   : > { %2309 = vmatpush2.bf16.msra.mxu0 %v18870_v30 }
 0x159   : > { %v1209_v12 = vpop.f32.mrf.mxu1  ;;  %2310 = vmatprep.subr.bf16.mxu0 %v18878_v32  ;;  %v2692_v32 = vld [vmem:[#allocation3 + $0x28] sm:$0xfc] }
 0x15a   : > { %3020 = vmatpush2.bf16.msra.mxu1 %v18867_v26 }
 0x15b   : > { %v1210_v14 = vpop.f32.mrf.mxu1  ;;  %3021 = vmatprep.subr.bf16.mxu1 %v18875_v29  ;;  %v1969_v29 = vld [vmem:[#allocation3] sm:$0x1] }
 0x15c   : > { %2311 = vmatpush2.bf16.msra.mxu0 %v18876_v34  ;;  %v1972_v34 = vpack.c.bf16 %v1969_v29, %v1966_v28  ;;  %v18945_v28 = vld [vmem:[#allocation11 + $0x580] ss:$8 sps:$4 sm:$0xff]   ;;  %v18950_v29 = vld [vmem:[#allocation11 + $0x4] ss:$8 sps:$4 sm:$0xff]  }
 0x15d   : > { %v1211_v18 = vpop.f32.mrf.mxu1  ;;  %2312 = vmatprep.subr.bf16.mxu0 %v18884_v36 }
 0x15e   : > { %3022 = vmatpush2.bf16.msra.mxu1 %v18873_v31 }
 0x15f   : > { %3023 = vmatprep.subr.bf16.mxu1 %v18881_v33  ;;  %v2695_v33 = vld [vmem:[#allocation3] sm:$0x3] }
 0x160   : > { %2313 = vmatpush2.bf16.msra.mxu0 %v18882_v38  ;;  %v2698_v36 = vpack.c.bf16 %v2695_v33, %v2692_v32  ;;  %v18948_v32 = vld [vmem:[#allocation11] ss:$8 sps:$4 sm:$0xff]  }
 0x161   : > { %2314 = vmatprep.subr.bf16.mxu0 %v18890_v40 }
 0x162   : > { %3024 = vmatpush2.bf16.msra.mxu1 %v18879_v35  ;;  %v1970_v35 = vld [vmem:[#allocation3 + $0x18] sm:$0x1] }
 0x163   : > { %3025 = vmatprep.subr.bf16.mxu1 %v18887_v37  ;;  %v2027_v37 = vshll.u32 %v1972_v34, 16 }
 0x164   : > { %2315 = vmatpush2.bf16.msra.mxu0 %v18888_v41  ;;  %v2753_v41 = vrot.slane %v2698_v36, 1 }
 0x165   : > { %2316 = vmatprep.subr.bf16.mxu0 %v18896_v45  ;;  %v2029_v45 = vrot.slane %v2027_v37, 1  ;;  %v18951_v37 = vld [vmem:[#allocation11 + $0xf0] ss:$8 sps:$4 sm:$0xff]  }
 0x166   : > { %3026 = vmatpush2.bf16.msra.mxu1 %v18885_v39 }
 0x167   : > { %3027 = vmatprep.subr.bf16.mxu1 %v18893_v42 }
 0x168   : > { %2317 = vmatpush2.bf16.msra.mxu0 %v18894_v48 }
 0x169   : > { %2318 = vmatprep.subr.bf16.mxu0 %v18902_v51 }
 0x16a   : > { %3028 = vmatpush2.bf16.msra.mxu1 %v18891_v43  ;;  %v2025_v43 = vshrl.u32 %v1972_v34, 16  ;;  %v18953_v34 = vld [vmem:[#allocation11 + $0xf4] ss:$8 sps:$4 sm:$0xff]  }
 0x16b   : > { %3029 = vmatprep.subr.bf16.mxu1 %v18899_v49  ;;  %v18911_v49 = vld [vmem:[#allocation11 + $0x5e4] ss:$8 sps:$4 sm:$0xff]  }
 0x16c   : > { %2319 = vmatpush2.bf16.msra.mxu0 %v18900_v60  ;;  %v18912_v60 = vld [vmem:[#allocation11 + $0x60] ss:$8 sps:$4 sm:$0xff]  }
 0x16d   : > { %2610 = vmatprep.subr.bf16.mxu0 %v18908_v62  ;;  %v18920_v62 = vld [vmem:[#allocation11 + $0x54] ss:$8 sps:$4 sm:$0xff]  }
 0x16e   : > { %3030 = vmatpush2.bf16.msra.mxu1 %v18897_v50 }
 0x16f   : > { %3449 = vmatprep.subr.bf16.mxu1 %v18905_v61  ;;  %v18915_v61 = vld [vmem:[#allocation11 + $0x5d0] ss:$8 sps:$4 sm:$0xff]  }
 0x17f   : > { %v18157_v46 = vpop.f32.mrf.mxu0 }
 0x180   : > { %v18223_v47 = vpop.f32.mrf.mxu1 }
 0x181   : > { %v18158_v52 = vpop.f32.mrf.mxu0 }
 0x182   : > { %v18224_v53 = vpop.f32.mrf.mxu1  ;;  %v18159_v54 = vadd.f32 %v18158_v52, %v18157_v46  ;;  %v18906_v52 = vld [vmem:[#allocation11 + $0x70] ss:$8 sps:$4 sm:$0xff]  }
 0x183   : > { %v18225_v55 = vadd.f32 %v18224_v53, %v18223_v47  ;;  %v18160_v56 = vpop.f32.mrf.mxu0  ;;  %v18903_v47 = vld [vmem:[#allocation11 + $0x5f0] ss:$8 sps:$4 sm:$0xff]   ;;  %v18909_v53 = vld [vmem:[#allocation11 + $0x5e0] ss:$8 sps:$4 sm:$0xff]  }
 0x184   : > { %v18226_v57 = vpop.f32.mrf.mxu1  ;;  %v957_v2 = vadd.f32 %v18159_v54, %v21169_v27  ;;  %v2030_v54 = vor.u32 %v2029_v45, %v2025_v43  ;;  %v19032_v43 = vld [vmem:[#allocation11 + $0x650] ss:$8 sps:$4 sm:$0xff]   ;;  %v19040_v45 = vld [vmem:[#allocation11 + $0x644] ss:$8 sps:$4 sm:$0xff]  }
 0x185   : > { %v18161_v58 = vpop.f32.mrf.mxu0  ;;  %v18914_v57 = vld [vmem:[#allocation11 + $0x64] ss:$8 sps:$4 sm:$0xff]  }
 0x186   : > { %v18227_v59 = vpop.f32.mrf.mxu1  ;;  %v18917_v58 = vld [vmem:[#allocation11 + $0x5d4] ss:$8 sps:$4 sm:$0xff]  }
 0x19f   : > { %v18179_v63 = vpop.f32.mrf.mxu0 }
 0x1a1   : > { %v18180_v1 = vpop.f32.mrf.mxu0 }
 0x1a2   : > { %v18181_v3 = vadd.f32 %v18180_v1, %v18179_v63  ;;  %v18923_v63 = vld [vmem:[#allocation11 + $0x5c4] ss:$8 sps:$4 sm:$0xff]   ;;  %v18918_v1 = vld [vmem:[#allocation11 + $0x50] ss:$8 sps:$4 sm:$0xff]  }
 0x1a3   : > { %v18182_v4 = vpop.f32.mrf.mxu0 }
 0x1a4   : > { %v1168_v5 = vadd.f32 %v18181_v3, %v957_v2  ;;  %v18921_v2 = vld [vmem:[#allocation11 + $0x5c0] ss:$8 sps:$4 sm:$0xff]   ;;  %v18926_v3 = vld [vmem:[#allocation11 + $0x44] ss:$8 sps:$4 sm:$0xff]   ;;  %v18929_v4 = vld [vmem:[#allocation11 + $0x5b4] ss:$8 sps:$4 sm:$0xff]  }
 0x1a5   : > { %v18183_v6 = vpop.f32.mrf.mxu0 }
 0x1a6   : > { %v1208_v19 = vadd.f32 %v21174_v8, %v1168_v5  ;;  %v2696_v8 = vld [vmem:[#allocation3 + $0x18] sm:$0x3]  ;;  %v3085_v5 = vld [vmem:[#allocation3 + $0x8] sm:$0xf8]  ;;  %v3088_v6 = vld [vmem:[#allocation3 + $0x20] sm:$0x7] }
 0x1b1   : > { %v1886_v7 = vpop.f32.mrf.mxu1 }
 0x1b2   : > { %v1887_v9 = vadd.f32 %v18225_v55, %v1886_v7  ;;  %v18924_v7 = vld [vmem:[#allocation11 + $0x40] ss:$8 sps:$4 sm:$0xff]  }
 0x1b3   : > { %v1888_v10 = vpop.f32.mrf.mxu1 }
 0x1b4   : > { %v18932_v10 = vld [vmem:[#allocation11 + $0x34] ss:$8 sps:$4 sm:$0xff]  }
 0x1b5   : > { %v1889_v11 = vpop.f32.mrf.mxu1 }
 0x1b6   : > { %v18935_v11 = vld [vmem:[#allocation11 + $0x5a4] ss:$8 sps:$4 sm:$0xff]  }
 0x1b7   : > { %v1890_v12 = vpop.f32.mrf.mxu1 }
 0x1b8   : > { %v3091_v12 = vpack.c.bf16 %v3088_v6, %v3085_v5  ;;  %v19068_v5 = vld [vmem:[#allocation11 + $0x6f0] ss:$8 sps:$4 sm:$0xff]  }
 0x1bf   : > { %v18201_v13 = vpop.f32.mrf.mxu0 }
 0x1c1   : > { %v18202_v14 = vpop.f32.mrf.mxu0 }
 0x1c2   : > { %v18203_v17 = vadd.f32 %v18202_v14, %v18201_v13  ;;  %v18930_v13 = vld [vmem:[#allocation11 + $0x30] ss:$8 sps:$4 sm:$0xff]   ;;  %v18933_v14 = vld [vmem:[#allocation11 + $0x5a0] ss:$8 sps:$4 sm:$0xff]  }
 0x1c3   : > { %v18204_v15 = vpop.f32.mrf.mxu0 }
 0x1c4   : > { %v18938_v15 = vld [vmem:[#allocation11 + $0x24] ss:$8 sps:$4 sm:$0xff]  }
 0x1c5   : > { %v18205_v16 = vpop.f32.mrf.mxu0 }
 0x1c6   : > { %v18941_v16 = vld [vmem:[#allocation11 + $0x594] ss:$8 sps:$4 sm:$0xff]  }
 0x1d1   : > { %v21182_v6 = vpop.f32.mrf.mxu1 }
 0x1ef   : > { %v1534_v18 = vpop.f32.mrf.mxu0 }
 0x1f0   : > { %v1535_v20 = vadd.f32 %v18203_v17, %v1534_v18  ;;  %v3158_v17 = vshrl.u32 %v3091_v12, 16  ;;  %v3161_v18 = vshll.u32 %v3091_v12, 16  ;;  %v19074_v12 = vld [vmem:[#allocation11 + $0x6e0] ss:$8 sps:$4 sm:$0xff]  }
 0x1f1   : > { %v1536_v21 = vpop.f32.mrf.mxu0 }
 0x1f2   : > { %v1540_v27 = vadd.f32 %v1535_v20, %v1208_v19  ;;  %v18936_v19 = vld [vmem:[#allocation11 + $0x20] ss:$8 sps:$4 sm:$0xff]   ;;  %v18939_v20 = vld [vmem:[#allocation11 + $0x590] ss:$8 sps:$4 sm:$0xff]   ;;  %v18944_v21 = vld [vmem:[#allocation11 + $0x14] ss:$8 sps:$4 sm:$0xff]  }
 0x1f3   : > { %v1537_v23 = vpop.f32.mrf.mxu0 }
 0x1f4   : > { %v1892_v24 = vadd.f32 %v1887_v9, %v1540_v27  ;;  %v18927_v9 = vld [vmem:[#allocation11 + $0x5b0] ss:$8 sps:$4 sm:$0xff]   ;;  %v18947_v27 = vld [vmem:[#allocation11 + $0x584] ss:$8 sps:$4 sm:$0xff]   ;;  %v3163_v23 = vrot.slane %v3161_v18, 2 }
 0x1f5   : > { %v1538_v25 = vpop.f32.mrf.mxu0  ;;  %v19080_v18 = vld [vmem:[#allocation11 + $0x6d0] ss:$8 sps:$4 sm:$0xff]  }
 0x1f6   : > { %v1900_v26 = vadd.f32 %v15775_v22, %v1892_v24  ;;  %v3160_v22 = vrot.slane %v3158_v17, 1  ;;  %v3496_v24 = vld [vmem:[#allocation3 + $0x18] sm:$0xf]  ;;  %v18942_v25 = vld [vmem:[#allocation11 + $0x10] ss:$8 sps:$4 sm:$0xff]  }
 0x1f7   : > { %v18983_v17 = vld [vmem:[#allocation11 + $0x454] ss:$8 sps:$4 sm:$0xff]  }
 0x1f8   : > { %v1901_v30 = vmax.f32 %v1900_v26, 0.0  ;;  %v3164_v33 = vor.u32 %v3163_v23, %v3160_v22  ;;  %v19094_v22 = vld [vmem:[#allocation11 + $0x6b4] ss:$8 sps:$4 sm:$0xff]  }
 0x1fa   : > { %v1909_v31 = vrot.slane %v1901_v30, 4  ;;  %v19022_v30 = vld [vmem:[#allocation11 + $0x674] ss:$8 sps:$4 sm:$0xff]  }
 0x1fc   : > { %1911 = vst [vmem:[#allocation3 + $0x10] sm:$0xf0] %v1909_v31 }
 0x203   : > { %v2693_v38 = vld [vmem:[#allocation3 + $0x10] sm:$0xfc] }
 0x204   : > { %v1967_v39 = vld [vmem:[#allocation3 + $0x10] sm:$0xfe]  ;;  %v2699_v40 = vpack.c.bf16 %v2696_v8, %v2693_v38  ;;  %v19020_v8 = vld [vmem:[#allocation11 + $0x670] ss:$8 sps:$4 sm:$0xff]  }
 0x205   : > { %v1973_v42 = vpack.c.bf16 %v1970_v35, %v1967_v39  ;;  %v1913_v56 = vld [vmem:[#allocation3 + $0x10] sm:$0xff] }
 0x206   : > { %v2754_v46 = vrot.slane %v2699_v40, 1  ;;  %v1916_v59 = vpack.c.bf16 %v1913_v56, %v1913_v56  ;;  %v3493_v26 = vld [vmem:[#allocation3 + $0x10] sm:$0xf0]  ;;  %v19026_v39 = vld [vmem:[#allocation11 + $0x660] ss:$8 sps:$4 sm:$0xff]  }
 0x207   : > { %v2034_v48 = vshll.u32 %v1973_v42, 16  ;;  %v2032_v50 = vshrl.u32 %v1973_v42, 16  ;;  %v3499_v31 = vpack.c.bf16 %v3496_v24, %v3493_v26  ;;  %v19028_v35 = vld [vmem:[#allocation11 + $0x664] ss:$8 sps:$4 sm:$0xff]   ;;  %v19034_v40 = vld [vmem:[#allocation11 + $0x654] ss:$8 sps:$4 sm:$0xff]  }
 0x208   : > { %3031 = vmatprep.mubr.bf16.mxu1 %v2754_v46  ;;  %v18956_v38 = vld [vmem:[#allocation11 + $0xe4] ss:$8 sps:$4 sm:$0xff]   ;;  %v18959_v42 = vld [vmem:[#allocation11 + $0xd4] ss:$8 sps:$4 sm:$0xff]   ;;  %v18957_v46 = vld [vmem:[#allocation11 + $0xd0] ss:$8 sps:$4 sm:$0xff]  }
 0x209   : > { %v2036_v51 = vrot.slane %v2034_v48, 1  ;;  %3032 = vmatmul.mubr.bf16.vlgmr.msra.gmra.mxu1 %v2753_v41  ;;  %v3554_v36 = vrot.slane %v3499_v31, 2  ;;  %v18954_v41 = vld [vmem:[#allocation11 + $0xe0] ss:$8 sps:$4 sm:$0xff]   ;;  %v18992_v31 = vld [vmem:[#allocation11 + $0x424] ss:$8 sps:$4 sm:$0xff]  }
 0x20a   : > { %3450 = vmatpush1.bf16.msra.mxu1 %v18903_v47  ;;  %3481 = vmatprep.mubr.bf16.mxu1 %v24315_v0  ;;  %v18962_v47 = vld [vmem:[#allocation11 + $0xc4] ss:$8 sps:$4 sm:$0xff]   ;;  %v19038_v48 = vld [vmem:[#allocation11 + $0x640] ss:$8 sps:$4 sm:$0xff]  }
 0x20b   : > { %v2037_v55 = vor.u32 %v2036_v51, %v2032_v50  ;;  %3451 = vmatprep.subr.bf16.mxu1 %v18911_v49  ;;  %v19046_v49 = vld [vmem:[#allocation11 + $0x634] ss:$8 sps:$4 sm:$0xff]   ;;  %v18960_v50 = vld [vmem:[#allocation11 + $0xc0] ss:$8 sps:$4 sm:$0xff]  }
 0x20c   : > { %v18965_v51 = vld [vmem:[#allocation11 + $0xb4] ss:$8 sps:$4 sm:$0xff]   ;;  %v19050_v56 = vld [vmem:[#allocation11 + $0x620] ss:$8 sps:$4 sm:$0xff]  }
 0x20d   : > { %2320 = vmatprep.mubr.bf16.mxu0 %v2037_v55  ;;  %v18968_v55 = vld [vmem:[#allocation11 + $0xa4] ss:$8 sps:$4 sm:$0xff]   ;;  %v18984_v24 = vld [vmem:[#allocation11 + $0x440] ss:$8 sps:$4 sm:$0xff]  }
 0x20e   : > { %2321 = vmatmul.mubr.bf16.vlgmr.msra.gmra.mxu0 %v2030_v54  ;;  %3452 = vmatpush1.bf16.msra.mxu1 %v18909_v53  ;;  %v19052_v53 = vld [vmem:[#allocation11 + $0x624] ss:$8 sps:$4 sm:$0xff]   ;;  %v18963_v54 = vld [vmem:[#allocation11 + $0xb0] ss:$8 sps:$4 sm:$0xff]  }
 0x20f   : > { %2611 = vmatpush1.bf16.msra.mxu0 %v18906_v52  ;;  %2642 = vmatprep.mubr.bf16.mxu0 %v1916_v59  ;;  %v19044_v52 = vld [vmem:[#allocation11 + $0x630] ss:$8 sps:$4 sm:$0xff]   ;;  %v18971_v59 = vld [vmem:[#allocation11 + $0x94] ss:$8 sps:$4 sm:$0xff]  }
 0x210   : > { %2612 = vmatprep.subr.bf16.mxu0 %v18914_v57  ;;  %3453 = vmatprep.subr.bf16.mxu1 %v18917_v58  ;;  %v19058_v57 = vld [vmem:[#allocation11 + $0x614] ss:$8 sps:$4 sm:$0xff]   ;;  %v18966_v58 = vld [vmem:[#allocation11 + $0xa0] ss:$8 sps:$4 sm:$0xff]  }
 0x212   : > { %3454 = vmatpush1.bf16.msra.mxu1 %v18915_v61  ;;  %v19064_v61 = vld [vmem:[#allocation11 + $0x604] ss:$8 sps:$4 sm:$0xff]  }
 0x213   : > { %2613 = vmatpush1.bf16.msra.mxu0 %v18912_v60  ;;  %3455 = vmatprep.subr.bf16.mxu1 %v18923_v63  ;;  %v19056_v60 = vld [vmem:[#allocation11 + $0x610] ss:$8 sps:$4 sm:$0xff]   ;;  %v18974_v63 = vld [vmem:[#allocation11 + $0x84] ss:$8 sps:$4 sm:$0xff]  }
 0x214   : > { %2614 = vmatprep.subr.bf16.mxu0 %v18920_v62  ;;  %v18969_v62 = vld [vmem:[#allocation11 + $0x90] ss:$8 sps:$4 sm:$0xff]  }
 0x216   : > { %3456 = vmatpush1.bf16.msra.mxu1 %v18921_v2  ;;  %v19070_v2 = vld [vmem:[#allocation11 + $0x6f4] ss:$8 sps:$4 sm:$0xff]  }
 0x217   : > { %2615 = vmatpush1.bf16.msra.mxu0 %v18918_v1  ;;  %3457 = vmatprep.subr.bf16.mxu1 %v18929_v4  ;;  %v19062_v1 = vld [vmem:[#allocation11 + $0x600] ss:$8 sps:$4 sm:$0xff]   ;;  %v18977_v4 = vld [vmem:[#allocation11 + $0x474] ss:$8 sps:$4 sm:$0xff]  }
 0x218   : > { %2616 = vmatprep.subr.bf16.mxu0 %v18926_v3  ;;  %v18972_v3 = vld [vmem:[#allocation11 + $0x80] ss:$8 sps:$4 sm:$0xff]  }
 0x21a   : > { %3458 = vmatpush1.bf16.msra.mxu1 %v18927_v9  ;;  %v19076_v9 = vld [vmem:[#allocation11 + $0x6e4] ss:$8 sps:$4 sm:$0xff]  }
 0x21b   : > { %2617 = vmatpush1.bf16.msra.mxu0 %v18924_v7  ;;  %3459 = vmatprep.subr.bf16.mxu1 %v18935_v11  ;;  %v18975_v7 = vld [vmem:[#allocation11 + $0x470] ss:$8 sps:$4 sm:$0xff]   ;;  %v18980_v11 = vld [vmem:[#allocation11 + $0x464] ss:$8 sps:$4 sm:$0xff]  }
 0x21c   : > { %2618 = vmatprep.subr.bf16.mxu0 %v18932_v10  ;;  %v21184_v10 = vpop.f32.mrf.mxu1 }
 0x21e   : > { %3460 = vmatpush1.bf16.msra.mxu1 %v18933_v14  ;;  %v2367_v14 = vpop.f32.mrf.mxu1 }
 0x21f   : > { %2619 = vmatpush1.bf16.msra.mxu0 %v18930_v13  ;;  %3461 = vmatprep.subr.bf16.mxu1 %v18941_v16  ;;  %v19082_v13 = vld [vmem:[#allocation11 + $0x6d4] ss:$8 sps:$4 sm:$0xff]   ;;  %v19023_v14 = vld [vmem:[#allocation11 + $0x480] ss:$8 sps:$4 sm:$0xff]  }
 0x220   : > { %2620 = vmatprep.subr.bf16.mxu0 %v18938_v15  ;;  %v18978_v15 = vld [vmem:[#allocation11 + $0x460] ss:$8 sps:$4 sm:$0xff]   ;;  %v2368_v16 = vpop.f32.mrf.mxu1 }
 0x221   : > { %v19029_v16 = vld [vmem:[#allocation11 + $0x570] ss:$8 sps:$4 sm:$0xff]  }
 0x222   : > { %3462 = vmatpush1.bf16.msra.mxu1 %v18939_v20  ;;  %v18981_v20 = vld [vmem:[#allocation11 + $0x450] ss:$8 sps:$4 sm:$0xff]   ;;  %v21188_v23 = vpop.f32.mrf.mxu1 }
 0x223   : > { %2621 = vmatpush1.bf16.msra.mxu0 %v18936_v19  ;;  %3463 = vmatprep.subr.bf16.mxu1 %v18947_v27  ;;  %v19088_v19 = vld [vmem:[#allocation11 + $0x6c4] ss:$8 sps:$4 sm:$0xff]   ;;  %v19086_v27 = vld [vmem:[#allocation11 + $0x6c0] ss:$8 sps:$4 sm:$0xff]  }
 0x224   : > { %2622 = vmatprep.subr.bf16.mxu0 %v18944_v21  ;;  %v18986_v21 = vld [vmem:[#allocation11 + $0x444] ss:$8 sps:$4 sm:$0xff]   ;;  %v21190_v26 = vpop.f32.mrf.mxu1 }
 0x226   : > { %3464 = vmatpush1.bf16.msra.mxu1 %v18945_v28  ;;  %v19100_v28 = vld [vmem:[#allocation11 + $0x6a4] ss:$8 sps:$4 sm:$0xff]  }
 0x227   : > { %2623 = vmatpush1.bf16.msra.mxu0 %v18942_v25  ;;  %3799 = vmatprep.subr.bf16.mxu1 %v19022_v30  ;;  %v19092_v25 = vld [vmem:[#allocation11 + $0x6b0] ss:$8 sps:$4 sm:$0xff]  }
 0x228   : > { %2624 = vmatprep.subr.bf16.mxu0 %v18950_v29  ;;  %v2689_v29 = vpop.f32.mrf.mxu1  ;;  %v18987_v30 = vld [vmem:[#allocation11 + $0x430] ss:$8 sps:$4 sm:$0xff]  }
 0x229   : > { %3482 = vmatmul.mubr.bf16.vlgmr.msra.gmra.mxu1 %v3164_v33  ;;  %v19059_v29 = vld [vmem:[#allocation11 + $0x520] ss:$8 sps:$4 sm:$0xff]  }
 0x22a   : > { %3831 = vmatprep.mubr.bf16.mxu1 %v3554_v36  ;;  %3800 = vmatpush1.bf16.msra.mxu1 %v19020_v8  ;;  %v2690_v33 = vpop.f32.mrf.mxu1  ;;  %v3084_v8 = vld [vmem:[#allocation3 + $0x10] sm:$0xf8] }
 0x22b   : > { %2625 = vmatpush1.bf16.msra.mxu0 %v18948_v32  ;;  %3801 = vmatprep.subr.bf16.mxu1 %v19028_v35  ;;  %v19098_v32 = vld [vmem:[#allocation11 + $0x6a0] ss:$8 sps:$4 sm:$0xff]   ;;  %v19073_v33 = vld [vmem:[#allocation11 + $0x504] ss:$8 sps:$4 sm:$0xff]  }
 0x22c   : > { %2626 = vmatprep.subr.bf16.mxu0 %v18953_v34  ;;  %v19106_v34 = vld [vmem:[#allocation11 + $0x694] ss:$8 sps:$4 sm:$0xff]   ;;  %v3087_v35 = vld [vmem:[#allocation3 + $0x18] sm:$0x7] }
 0x22d   : > { %v18990_v36 = vld [vmem:[#allocation11 + $0x420] ss:$8 sps:$4 sm:$0xff]  }
 0x22e   : > { %3802 = vmatpush1.bf16.msra.mxu1 %v19026_v39  ;;  %v3492_v39 = vld [vmem:[#allocation3 + $0x28] sm:$0xf0] }
 0x22f   : > { %2627 = vmatpush2.bf16.msra.mxu0 %v18951_v37  ;;  %3803 = vmatprep.subr.bf16.mxu1 %v19034_v40  ;;  %v18995_v37 = vld [vmem:[#allocation11 + $0x414] ss:$8 sps:$4 sm:$0xff]   ;;  %v3495_v40 = vld [vmem:[#allocation3] sm:$0xf] }
 0x230   : > { %2628 = vmatprep.subr.bf16.mxu0 %v18956_v38  ;;  %v19104_v38 = vld [vmem:[#allocation11 + $0x690] ss:$8 sps:$4 sm:$0xff]  }
 0x232   : > { %3804 = vmatpush1.bf16.msra.mxu1 %v19032_v43  ;;  %v2694_v43 = vld [vmem:[#allocation3 + $0x8] sm:$0xfc] }
 0x233   : > { %2629 = vmatpush2.bf16.msra.mxu0 %v18954_v41  ;;  %3805 = vmatprep.subr.bf16.mxu1 %v19040_v45  ;;  %v19112_v41 = vld [vmem:[#allocation11 + $0x684] ss:$8 sps:$4 sm:$0xff]   ;;  %v2697_v45 = vld [vmem:[#allocation3 + $0x20] sm:$0x3] }
 0x234   : > { %2630 = vmatprep.subr.bf16.mxu0 %v18959_v42  ;;  %v18993_v42 = vld [vmem:[#allocation11 + $0x410] ss:$8 sps:$4 sm:$0xff]  }
 0x236   : > { %3806 = vmatpush1.bf16.msra.mxu1 %v19038_v48  ;;  %v19110_v48 = vld [vmem:[#allocation11 + $0x680] ss:$8 sps:$4 sm:$0xff]  }
 0x237   : > { %2631 = vmatpush2.bf16.msra.mxu0 %v18957_v46  ;;  %3807 = vmatprep.subr.bf16.mxu1 %v19046_v49  ;;  %v3090_v46 = vpack.c.bf16 %v3087_v35, %v3084_v8  ;;  %v3498_v49 = vpack.c.bf16 %v3495_v40, %v3492_v39  ;;  %v19071_v35 = vld [vmem:[#allocation11 + $0x500] ss:$8 sps:$4 sm:$0xff]   ;;  %v19077_v39 = vld [vmem:[#allocation11 + $0x770] ss:$8 sps:$4 sm:$0xff]  }
 0x238   : > { %2632 = vmatprep.subr.bf16.mxu0 %v18962_v47  ;;  %v18998_v47 = vld [vmem:[#allocation11 + $0x404] ss:$8 sps:$4 sm:$0xff]  }
 0x23a   : > { %3808 = vmatpush1.bf16.msra.mxu1 %v19044_v52  ;;  %v3153_v52 = vshll.u32 %v3090_v46, 16 }
 0x23b   : > { %2633 = vmatpush2.bf16.msra.mxu0 %v18960_v50  ;;  %3809 = vmatprep.subr.bf16.mxu1 %v19052_v53  ;;  %v18996_v50 = vld [vmem:[#allocation11 + $0x400] ss:$8 sps:$4 sm:$0xff]   ;;  %v2700_v53 = vpack.c.bf16 %v2697_v45, %v2694_v43  ;;  %v19091_v43 = vld [vmem:[#allocation11 + $0x754] ss:$8 sps:$4 sm:$0xff]   ;;  %v19089_v45 = vld [vmem:[#allocation11 + $0x750] ss:$8 sps:$4 sm:$0xff]  }
 0x23c   : > { %2634 = vmatprep.subr.bf16.mxu0 %v18965_v51  ;;  %v3150_v51 = vshrl.u32 %v3090_v46, 16  ;;  %v19097_v46 = vld [vmem:[#allocation11 + $0x744] ss:$8 sps:$4 sm:$0xff]  }
 0x23e   : > { %3810 = vmatpush1.bf16.msra.mxu1 %v19050_v56  ;;  %v18999_v56 = vld [vmem:[#allocation11 + $0x4f0] ss:$8 sps:$4 sm:$0xff]  }
 0x23f   : > { %2635 = vmatpush2.bf16.msra.mxu0 %v18963_v54  ;;  %3811 = vmatprep.subr.bf16.mxu1 %v19058_v57  ;;  %v19001_v54 = vld [vmem:[#allocation11 + $0x4f4] ss:$8 sps:$4 sm:$0xff]   ;;  %v3152_v57 = vrot.slane %v3150_v51, 1  ;;  %v19101_v51 = vld [vmem:[#allocation11 + $0x730] ss:$8 sps:$4 sm:$0xff]  }
 0x240   : > { %2636 = vmatprep.subr.bf16.mxu0 %v18968_v55  ;;  %v3553_v55 = vrot.slane %v3498_v49, 2  ;;  %v19124_v49 = vld [vmem:[%s24302_s3 + $0x52c] ss:$12 sps:$4 sm:$0xff]  }
 0x242   : > { %3812 = vmatpush1.bf16.msra.mxu1 %v19056_v60  ;;  %v19004_v60 = vld [vmem:[#allocation11 + $0x4e4] ss:$8 sps:$4 sm:$0xff]  }
 0x243   : > { %2637 = vmatpush2.bf16.msra.mxu0 %v18966_v58  ;;  %3813 = vmatprep.subr.bf16.mxu1 %v19064_v61  ;;  %v3155_v58 = vrot.slane %v3153_v52, 2  ;;  %v19109_v52 = vld [vmem:[#allocation11 + $0x724] ss:$8 sps:$4 sm:$0xff]  }
 0x244   : > { %2638 = vmatprep.subr.bf16.mxu0 %v18971_v59  ;;  %v2755_v59 = vrot.slane %v2700_v53, 1  ;;  %v19107_v53 = vld [vmem:[#allocation11 + $0x720] ss:$8 sps:$4 sm:$0xff]  }
 0x245   : > { %v3156_v61 = vor.u32 %v3155_v58, %v3152_v57  ;;  %v3497_v57 = vld [vmem:[#allocation3 + $0x20] sm:$0xf]  ;;  %v19118_v58 = vld [vmem:[#allocation11 + $0x704] ss:$8 sps:$4 sm:$0xff]  }
 0x246   : > { %3814 = vmatpush1.bf16.msra.mxu1 %v19062_v1  ;;  %v19005_v1 = vld [vmem:[#allocation11 + $0x4d0] ss:$8 sps:$4 sm:$0xff]  }
 0x247   : > { %2639 = vmatpush2.bf16.msra.mxu0 %v18969_v62  ;;  %3815 = vmatprep.subr.bf16.mxu1 %v19070_v2  ;;  %v19002_v62 = vld [vmem:[#allocation11 + $0x4e0] ss:$8 sps:$4 sm:$0xff]   ;;  %v19010_v2 = vld [vmem:[#allocation11 + $0x4c4] ss:$8 sps:$4 sm:$0xff]  }
 0x248   : > { %2640 = vmatprep.subr.bf16.mxu0 %v18974_v63  ;;  %v19007_v63 = vld [vmem:[#allocation11 + $0x4d4] ss:$8 sps:$4 sm:$0xff]  }
 0x24a   : > { %3816 = vmatpush2.bf16.msra.mxu1 %v19068_v5  ;;  %v19011_v5 = vld [vmem:[#allocation11 + $0x4b0] ss:$8 sps:$4 sm:$0xff]  }
 0x24b   : > { %2641 = vmatpush2.bf16.msra.mxu0 %v18972_v3  ;;  %3817 = vmatprep.subr.bf16.mxu1 %v19076_v9  ;;  %v19008_v3 = vld [vmem:[#allocation11 + $0x4c0] ss:$8 sps:$4 sm:$0xff]  }
 0x24c   : > { %3040 = vmatprep.subr.bf16.mxu0 %v18977_v4  ;;  %v19013_v4 = vld [vmem:[#allocation11 + $0x4b4] ss:$8 sps:$4 sm:$0xff]   ;;  %v19014_v9 = vld [vmem:[#allocation11 + $0x4a0] ss:$8 sps:$4 sm:$0xff]  }
 0x24e   : > { %2643 = vmatmul.mubr.bf16.vlgmr.msra.gmra.mxu0 %v21171_v44  ;;  %3818 = vmatpush2.bf16.msra.mxu1 %v19074_v12  ;;  %v18989_v44 = vld [vmem:[#allocation11 + $0x434] ss:$8 sps:$4 sm:$0xff]   ;;  %v19017_v12 = vld [vmem:[#allocation11 + $0x490] ss:$8 sps:$4 sm:$0xff]  }
 0x24f   : > { %3041 = vmatpush1.bf16.msra.mxu0 %v18975_v7  ;;  %3072 = vmatprep.mubr.bf16.mxu0 %v24315_v0  ;;  %v19016_v7 = vld [vmem:[#allocation11 + $0x4a4] ss:$8 sps:$4 sm:$0xff]  }
 0x250   : > { %3042 = vmatprep.subr.bf16.mxu0 %v18980_v11  ;;  %3819 = vmatprep.subr.bf16.mxu1 %v19082_v13  ;;  %v19019_v11 = vld [vmem:[#allocation11 + $0x494] ss:$8 sps:$4 sm:$0xff]   ;;  %v19025_v13 = vld [vmem:[#allocation11 + $0x484] ss:$8 sps:$4 sm:$0xff]  }
 0x252   : > { %3820 = vmatpush2.bf16.msra.mxu1 %v19080_v18  ;;  %v19035_v18 = vld [vmem:[#allocation11 + $0x560] ss:$8 sps:$4 sm:$0xff]  }
 0x253   : > { %3043 = vmatpush1.bf16.msra.mxu0 %v18978_v15  ;;  %3821 = vmatprep.subr.bf16.mxu1 %v19088_v19  ;;  %v19031_v15 = vld [vmem:[#allocation11 + $0x574] ss:$8 sps:$4 sm:$0xff]  }
 0x254   : > { %3044 = vmatprep.subr.bf16.mxu0 %v18983_v17  ;;  %v19037_v17 = vld [vmem:[#allocation11 + $0x564] ss:$8 sps:$4 sm:$0xff]   ;;  %v19043_v19 = vld [vmem:[#allocation11 + $0x554] ss:$8 sps:$4 sm:$0xff]  }
 0x256   : > { %3822 = vmatpush2.bf16.msra.mxu1 %v19086_v27  ;;  %v19047_v27 = vld [vmem:[#allocation11 + $0x540] ss:$8 sps:$4 sm:$0xff]  }
 0x257   : > { %3045 = vmatpush1.bf16.msra.mxu0 %v18981_v20  ;;  %3823 = vmatprep.subr.bf16.mxu1 %v19094_v22  ;;  %v19041_v20 = vld [vmem:[#allocation11 + $0x550] ss:$8 sps:$4 sm:$0xff]   ;;  %v19055_v22 = vld [vmem:[#allocation11 + $0x534] ss:$8 sps:$4 sm:$0xff]  }
 0x258   : > { %3046 = vmatprep.subr.bf16.mxu0 %v18986_v21  ;;  %v19049_v21 = vld [vmem:[#allocation11 + $0x544] ss:$8 sps:$4 sm:$0xff]  }
 0x25a   : > { %3824 = vmatpush2.bf16.msra.mxu1 %v19092_v25  ;;  %v3086_v25 = vld [vmem:[#allocation3] sm:$0x7] }
 0x25b   : > { %3047 = vmatpush1.bf16.msra.mxu0 %v18984_v24  ;;  %3825 = vmatprep.subr.bf16.mxu1 %v19100_v28  ;;  %v19053_v24 = vld [vmem:[#allocation11 + $0x530] ss:$8 sps:$4 sm:$0xff]   ;;  %v19061_v28 = vld [vmem:[#allocation11 + $0x524] ss:$8 sps:$4 sm:$0xff]  }
 0x25c   : > { %3048 = vmatprep.subr.bf16.mxu0 %v18989_v44  ;;  %v3083_v44 = vld [vmem:[#allocation3 + $0x28] sm:$0xf8] }
 0x25e   : > { %3826 = vmatpush2.bf16.msra.mxu1 %v19098_v32  ;;  %v19065_v32 = vld [vmem:[#allocation11 + $0x510] ss:$8 sps:$4 sm:$0xff]  }
 0x25f   : > { %3049 = vmatpush1.bf16.msra.mxu0 %v18987_v30  ;;  %3827 = vmatprep.subr.bf16.mxu1 %v19106_v34  ;;  %v19067_v30 = vld [vmem:[#allocation11 + $0x514] ss:$8 sps:$4 sm:$0xff]  }
 0x260   : > { %3050 = vmatprep.subr.bf16.mxu0 %v18992_v31  ;;  %v3089_v31 = vpack.c.bf16 %v3086_v25, %v3083_v44  ;;  %v19137_v44 = vld [vmem:[%s24302_s3 + $0x360] ss:$12 sps:$4 sm:$0xff]  }
 0x261   : > { %v19140_v25 = vld [vmem:[%s24302_s3 + $0x4e0] ss:$12 sps:$4 sm:$0xff]  }
 0x262   : > { %3828 = vmatpush2.bf16.msra.mxu1 %v19104_v38  ;;  %v3142_v34 = vshrl.u32 %v3089_v31, 16  ;;  %v3145_v8 = vshll.u32 %v3089_v31, 16  ;;  %v19079_v38 = vld [vmem:[#allocation11 + $0x774] ss:$8 sps:$4 sm:$0xff]  }
 0x263   : > { %3051 = vmatpush1.bf16.msra.mxu0 %v18990_v36  ;;  %3829 = vmatprep.subr.bf16.mxu1 %v19112_v41  ;;  %v19085_v41 = vld [vmem:[#allocation11 + $0x764] ss:$8 sps:$4 sm:$0xff]   ;;  %v19148_v31 = vld [vmem:[%s24302_s3 + $0x4cc] ss:$12 sps:$4 sm:$0xff]  }
 0x264   : > { %3052 = vmatprep.subr.bf16.mxu0 %v18995_v37  ;;  %v3144_v36 = vrot.slane %v3142_v34, 1  ;;  %v3147_v37 = vrot.slane %v3145_v8, 2  ;;  %v19154_v34 = vld [vmem:[%s24302_s3 + $0x4b4] ss:$12 sps:$4 sm:$0xff]   ;;  %v19149_v8 = vld [vmem:[%s24302_s3 + $0x330] ss:$12 sps:$4 sm:$0xff]  }
 0x266   : > { %3830 = vmatpush2.bf16.msra.mxu1 %v19110_v48  ;;  %v3148_v40 = vor.u32 %v3147_v37, %v3144_v36  ;;  %v19095_v48 = vld [vmem:[#allocation11 + $0x740] ss:$8 sps:$4 sm:$0xff]   ;;  %v19157_v36 = vld [vmem:[%s24302_s3 + $0x31c] ss:$12 sps:$4 sm:$0xff]  }
 0x267   : > { %3053 = vmatpush1.bf16.msra.mxu0 %v18993_v42  ;;  %v19083_v42 = vld [vmem:[#allocation11 + $0x760] ss:$8 sps:$4 sm:$0xff]   ;;  %4785 = vmatprep.subr.bf16.mxu1 %v19124_v49  ;;  %v19175_v49 = vld [vmem:[%s24302_s3 + $0x454] ss:$12 sps:$4 sm:$0xff]  }
 0x268   : > { %3054 = vmatprep.subr.bf16.mxu0 %v18998_v47  ;;  %v19122_v47 = vld [vmem:[%s24302_s3 + $0x528] ss:$12 sps:$4 sm:$0xff]   ;;  %v19155_v37 = vld [vmem:[%s24302_s3 + $0x318] ss:$12 sps:$4 sm:$0xff]  }
 0x269   : > { %3832 = vmatmul.mubr.bf16.vlgmr.msra.gmra.mxu1 %v3553_v55  ;;  %v19113_v55 = vld [vmem:[#allocation11 + $0x710] ss:$8 sps:$4 sm:$0xff]  }
 0x26a   : > { %4786 = vmatpush1.bf16.msra.mxu1 %v19122_v47  ;;  %v19167_v47 = vld [vmem:[%s24302_s3 + $0x468] ss:$12 sps:$4 sm:$0xff]  }
 0x26b   : > { %3055 = vmatpush1.bf16.msra.mxu0 %v18996_v50  ;;  %v19103_v50 = vld [vmem:[#allocation11 + $0x734] ss:$8 sps:$4 sm:$0xff]  }
 0x26c   : > { %3408 = vmatprep.subr.bf16.mxu0 %v19001_v54  ;;  %v19115_v54 = vld [vmem:[#allocation11 + $0x714] ss:$8 sps:$4 sm:$0xff]  }
 0x26e   : > { %3073 = vmatmul.mubr.bf16.vlgmr.msra.gmra.mxu0 %v2755_v59  ;;  %v19116_v59 = vld [vmem:[#allocation11 + $0x700] ss:$8 sps:$4 sm:$0xff]  }
 0x26f   : > { %3409 = vmatpush1.bf16.msra.mxu0 %v18999_v56  ;;  %3440 = vmatprep.mubr.bf16.mxu0 %v3156_v61  ;;  %v3494_v56 = vld [vmem:[#allocation3 + $0x8] sm:$0xf0] }
 0x270   : > { %3410 = vmatprep.subr.bf16.mxu0 %v19004_v60  ;;  %v3500_v60 = vpack.c.bf16 %v3497_v57, %v3494_v56  ;;  %v19121_v61 = vld [vmem:[%s24302_s3 + $0x3ac] ss:$12 sps:$4 sm:$0xff]   ;;  %v19181_v57 = vld [vmem:[%s24302_s3 + $0x43c] ss:$12 sps:$4 sm:$0xff]  }
 0x273   : > { %3411 = vmatpush1.bf16.msra.mxu0 %v19002_v62  ;;  %v19119_v62 = vld [vmem:[%s24302_s3 + $0x3a8] ss:$12 sps:$4 sm:$0xff]  }
 0x274   : > { %3412 = vmatprep.subr.bf16.mxu0 %v19007_v63  ;;  %v3555_v63 = vrot.slane %v3500_v60, 2 }
 0x277   : > { %3413 = vmatpush1.bf16.msra.mxu0 %v19005_v1 }
 0x278   : > { %3414 = vmatprep.subr.bf16.mxu0 %v19010_v2  ;;  %v19127_v2 = vld [vmem:[%s24302_s3 + $0x394] ss:$12 sps:$4 sm:$0xff]  }
 0x27b   : > { %3415 = vmatpush1.bf16.msra.mxu0 %v19008_v3 }
 0x27c   : > { %3416 = vmatprep.subr.bf16.mxu0 %v19013_v4  ;;  %v19125_v4 = vld [vmem:[%s24302_s3 + $0x390] ss:$12 sps:$4 sm:$0xff]  }
 0x27f   : > { %3417 = vmatpush1.bf16.msra.mxu0 %v19011_v5 }
 0x280   : > { %3418 = vmatprep.subr.bf16.mxu0 %v19016_v7 }
 0x283   : > { %3419 = vmatpush1.bf16.msra.mxu0 %v19014_v9 }
 0x284   : > { %3420 = vmatprep.subr.bf16.mxu0 %v19019_v11 }
 0x287   : > { %3421 = vmatpush1.bf16.msra.mxu0 %v19017_v12 }
 0x288   : > { %3422 = vmatprep.subr.bf16.mxu0 %v19025_v13 }
 0x28b   : > { %3423 = vmatpush1.bf16.msra.mxu0 %v19023_v14 }
 0x28c   : > { %3424 = vmatprep.subr.bf16.mxu0 %v19031_v15 }
 0x28f   : > { %3425 = vmatpush2.bf16.msra.mxu0 %v19029_v16  ;;  %v19130_v16 = vld [vmem:[%s24302_s3 + $0x514] ss:$12 sps:$4 sm:$0xff]  }
 0x290   : > { %3426 = vmatprep.subr.bf16.mxu0 %v19037_v17  ;;  %v19128_v17 = vld [vmem:[%s24302_s3 + $0x510] ss:$12 sps:$4 sm:$0xff]   ;;  %4787 = vmatprep.subr.bf16.mxu1 %v19130_v16  ;;  %v19199_v16 = vld [vmem:[%s24302_s3 + $0x3f4] ss:$12 sps:$4 sm:$0xff]  }
 0x291   : > { %4788 = vmatpush1.bf16.msra.mxu1 %v19128_v17  ;;  %v19200_v17 = vld [vmem:[%s24302_s3 + $0x570] ss:$12 sps:$4 sm:$0xff]  }
 0x293   : > { %3427 = vmatpush2.bf16.msra.mxu0 %v19035_v18 }
 0x294   : > { %3428 = vmatprep.subr.bf16.mxu0 %v19043_v19  ;;  %v19133_v19 = vld [vmem:[%s24302_s3 + $0x37c] ss:$12 sps:$4 sm:$0xff]  }
 0x297   : > { %3429 = vmatpush2.bf16.msra.mxu0 %v19041_v20 }
 0x298   : > { %3430 = vmatprep.subr.bf16.mxu0 %v19049_v21  ;;  %v19131_v21 = vld [vmem:[%s24302_s3 + $0x378] ss:$12 sps:$4 sm:$0xff]  }
 0x29b   : > { %3431 = vmatpush2.bf16.msra.mxu0 %v19047_v27  ;;  %v19136_v27 = vld [vmem:[%s24302_s3 + $0x4fc] ss:$12 sps:$4 sm:$0xff]  }
 0x29c   : > { %3432 = vmatprep.subr.bf16.mxu0 %v19055_v22  ;;  %v19134_v22 = vld [vmem:[%s24302_s3 + $0x4f8] ss:$12 sps:$4 sm:$0xff]   ;;  %4789 = vmatprep.subr.bf16.mxu1 %v19136_v27 }
 0x29d   : > { %4790 = vmatpush1.bf16.msra.mxu1 %v19134_v22  ;;  %v19206_v27 = vld [vmem:[%s24302_s3 + $0x558] ss:$12 sps:$4 sm:$0xff]  }
 0x29e   : > { %v19211_v22 = vld [vmem:[%s24302_s3 + $0x3c4] ss:$12 sps:$4 sm:$0xff]  }
 0x29f   : > { %3433 = vmatpush2.bf16.msra.mxu0 %v19053_v24  ;;  %v19139_v24 = vld [vmem:[%s24302_s3 + $0x364] ss:$12 sps:$4 sm:$0xff]  }
 0x2a0   : > { %3434 = vmatprep.subr.bf16.mxu0 %v19061_v28  ;;  %v19142_v28 = vld [vmem:[%s24302_s3 + $0x4e4] ss:$12 sps:$4 sm:$0xff]  }
 0x2a1   : > { %4791 = vmatprep.subr.bf16.mxu1 %v19142_v28  ;;  %v4060_v28 = vld [vmem:[#allocation4 + $0x18] sm:$0xfe] }
 0x2a2   : > { %4792 = vmatpush1.bf16.msra.mxu1 %v19140_v25  ;;  %v19212_v25 = vld [vmem:[%s24302_s3 + $0x540] ss:$12 sps:$4 sm:$0xff]  }
 0x2a3   : > { %3435 = vmatpush2.bf16.msra.mxu0 %v19059_v29  ;;  %v19145_v29 = vld [vmem:[%s24302_s3 + $0x34c] ss:$12 sps:$4 sm:$0xff]   ;;  %4793 = vmatprep.subr.bf16.mxu1 %v19148_v31 }
 0x2a4   : > { %3436 = vmatprep.subr.bf16.mxu0 %v19067_v30  ;;  %v19143_v30 = vld [vmem:[%s24302_s3 + $0x348] ss:$12 sps:$4 sm:$0xff]  }
 0x2a7   : > { %3437 = vmatpush2.bf16.msra.mxu0 %v19065_v32  ;;  %v19146_v32 = vld [vmem:[%s24302_s3 + $0x4c8] ss:$12 sps:$4 sm:$0xff]  }
 0x2a8   : > { %3438 = vmatprep.subr.bf16.mxu0 %v19073_v33  ;;  %v19151_v33 = vld [vmem:[%s24302_s3 + $0x334] ss:$12 sps:$4 sm:$0xff]   ;;  %4794 = vmatpush1.bf16.msra.mxu1 %v19146_v32 }
 0x2a9   : > { %4795 = vmatprep.subr.bf16.mxu1 %v19154_v34 }
 0x2ab   : > { %3439 = vmatpush2.bf16.msra.mxu0 %v19071_v35  ;;  %v19152_v35 = vld [vmem:[%s24302_s3 + $0x4b0] ss:$12 sps:$4 sm:$0xff]  }
 0x2ac   : > { %3840 = vmatprep.subr.bf16.mxu0 %v19079_v38  ;;  %v19160_v38 = vld [vmem:[%s24302_s3 + $0x49c] ss:$12 sps:$4 sm:$0xff]   ;;  %4796 = vmatpush1.bf16.msra.mxu1 %v19152_v35 }
 0x2ad   : > { %4797 = vmatprep.subr.bf16.mxu1 %v19160_v38  ;;  %v19217_v35 = vld [vmem:[%s24302_s3 + $0x5f0] ss:$12 sps:$4 sm:$0xff]  }
 0x2ae   : > { %3441 = vmatmul.mubr.bf16.vlgmr.msra.gmra.mxu0 %v3148_v40  ;;  %v19163_v40 = vld [vmem:[%s24302_s3 + $0x304] ss:$12 sps:$4 sm:$0xff]  }
 0x2af   : > { %3841 = vmatpush1.bf16.msra.mxu0 %v19077_v39  ;;  %3872 = vmatprep.mubr.bf16.mxu0 %v24315_v0  ;;  %v19158_v39 = vld [vmem:[%s24302_s3 + $0x498] ss:$12 sps:$4 sm:$0xff]  }
 0x2b0   : > { %3842 = vmatprep.subr.bf16.mxu0 %v19085_v41  ;;  %v19166_v41 = vld [vmem:[%s24302_s3 + $0x484] ss:$12 sps:$4 sm:$0xff]   ;;  %4798 = vmatpush1.bf16.msra.mxu1 %v19158_v39 }
 0x2b1   : > { %4799 = vmatprep.subr.bf16.mxu1 %v19166_v41 }
 0x2b3   : > { %3843 = vmatpush1.bf16.msra.mxu0 %v19083_v42  ;;  %v19161_v42 = vld [vmem:[%s24302_s3 + $0x300] ss:$12 sps:$4 sm:$0xff]  }
 0x2b4   : > { %3844 = vmatprep.subr.bf16.mxu0 %v19091_v43  ;;  %v19164_v43 = vld [vmem:[%s24302_s3 + $0x480] ss:$12 sps:$4 sm:$0xff]  }
 0x2b5   : > { %4800 = vmatpush1.bf16.msra.mxu1 %v19164_v43 }
 0x2b7   : > { %3845 = vmatpush1.bf16.msra.mxu0 %v19089_v45  ;;  %v19169_v45 = vld [vmem:[%s24302_s3 + $0x46c] ss:$12 sps:$4 sm:$0xff]  }
 0x2b8   : > { %3846 = vmatprep.subr.bf16.mxu0 %v19097_v46  ;;  %v19172_v46 = vld [vmem:[%s24302_s3 + $0x5ec] ss:$12 sps:$4 sm:$0xff]  }
 0x2b9   : > { %4801 = vmatprep.subr.bf16.mxu1 %v19172_v46 }
 0x2bb   : > { %3847 = vmatpush1.bf16.msra.mxu0 %v19095_v48  ;;  %v19170_v48 = vld [vmem:[%s24302_s3 + $0x5e8] ss:$12 sps:$4 sm:$0xff]  }
 0x2bc   : > { %3848 = vmatprep.subr.bf16.mxu0 %v19103_v50  ;;  %v19173_v50 = vld [vmem:[%s24302_s3 + $0x450] ss:$12 sps:$4 sm:$0xff]   ;;  %4802 = vmatpush2.bf16.msra.mxu1 %v19170_v48 }
 0x2bf   : > { %3849 = vmatpush1.bf16.msra.mxu0 %v19101_v51  ;;  %v19178_v51 = vld [vmem:[%s24302_s3 + $0x5d4] ss:$12 sps:$4 sm:$0xff]  }
 0x2c0   : > { %3850 = vmatprep.subr.bf16.mxu0 %v19109_v52  ;;  %4803 = vmatprep.subr.bf16.mxu1 %v19178_v51 }
 0x2c3   : > { %3851 = vmatpush1.bf16.msra.mxu0 %v19107_v53  ;;  %v19176_v53 = vld [vmem:[%s24302_s3 + $0x5d0] ss:$12 sps:$4 sm:$0xff]  }
 0x2c4   : > { %3852 = vmatprep.subr.bf16.mxu0 %v19115_v54  ;;  %4804 = vmatpush2.bf16.msra.mxu1 %v19176_v53 }
 0x2c7   : > { %3853 = vmatpush1.bf16.msra.mxu0 %v19113_v55 }
 0x2c8   : > { %3854 = vmatprep.subr.bf16.mxu0 %v19118_v58 }
 0x2c9   : > { %v21205_v1 = vpop.f32.mrf.mxu1 }
 0x2cb   : > { %3855 = vmatpush1.bf16.msra.mxu0 %v19116_v59  ;;  %v21210_v3 = vpop.f32.mrf.mxu1  ;;  %v19184_v59 = vld [vmem:[%s24302_s3 + $0x5bc] ss:$12 sps:$4 sm:$0xff]  }
 0x2cc   : > { %4742 = vmatprep.subr.bf16.mxu0 %v19121_v61  ;;  %4805 = vmatprep.subr.bf16.mxu1 %v19184_v59 }
 0x2cd   : > { %v3037_v7 = vpop.f32.mrf.mxu1 }
 0x2ce   : > { %3873 = vmatmul.mubr.bf16.vlgmr.msra.gmra.mxu0 %v3555_v63  ;;  %v21215_v5 = vpop.f32.mrf.mxu0  ;;  %v19193_v7 = vld [vmem:[%s24302_s3 + $0x40c] ss:$12 sps:$4 sm:$0xff]  }
 0x2cf   : > { %4743 = vmatpush1.bf16.msra.mxu0 %v19119_v62  ;;  %v3038_v11 = vpop.f32.mrf.mxu1  ;;  %v2364_v52 = vadd.f32 %v21182_v6, %v21215_v5  ;;  %v19179_v6 = vld [vmem:[%s24302_s3 + $0x438] ss:$12 sps:$4 sm:$0xff]   ;;  %v19188_v5 = vld [vmem:[%s24302_s3 + $0x5a0] ss:$12 sps:$4 sm:$0xff]  }
 0x2d0   : > { %v21217_v9 = vpop.f32.mrf.mxu0  ;;  %4744 = vmatprep.subr.bf16.mxu0 %v19127_v2  ;;  %v19187_v62 = vld [vmem:[%s24302_s3 + $0x424] ss:$12 sps:$4 sm:$0xff]   ;;  %v19185_v2 = vld [vmem:[%s24302_s3 + $0x420] ss:$12 sps:$4 sm:$0xff]  }
 0x2d1   : > { %v2366_v55 = vadd.f32 %v21184_v10, %v21217_v9  ;;  %v19182_v10 = vld [vmem:[%s24302_s3 + $0x5b8] ss:$12 sps:$4 sm:$0xff]   ;;  %v19191_v9 = vld [vmem:[%s24302_s3 + $0x408] ss:$12 sps:$4 sm:$0xff]  }
 0x2d2   : > { %v2326_v12 = vpop.f32.mrf.mxu0  ;;  %4806 = vmatpush2.bf16.msra.mxu1 %v19182_v10  ;;  %v19196_v11 = vld [vmem:[%s24302_s3 + $0x58c] ss:$12 sps:$4 sm:$0xff]  }
 0x2d3   : > { %4745 = vmatpush1.bf16.msra.mxu0 %v19125_v4  ;;  %v19190_v4 = vld [vmem:[%s24302_s3 + $0x5a4] ss:$12 sps:$4 sm:$0xff]   ;;  %v19194_v12 = vld [vmem:[%s24302_s3 + $0x588] ss:$12 sps:$4 sm:$0xff]  }
 0x2d4   : > { %v2327_v13 = vpop.f32.mrf.mxu0  ;;  %4746 = vmatprep.subr.bf16.mxu0 %v19133_v19  ;;  %4807 = vmatprep.subr.bf16.mxu1 %v19190_v4  ;;  %v19205_v19 = vld [vmem:[%s24302_s3 + $0x3dc] ss:$12 sps:$4 sm:$0xff]  }
 0x2d5   : > { %v19197_v13 = vld [vmem:[%s24302_s3 + $0x3f0] ss:$12 sps:$4 sm:$0xff]  }
 0x2d6   : > { %4808 = vmatpush2.bf16.msra.mxu1 %v19188_v5 }
 0x2d7   : > { %4747 = vmatpush1.bf16.msra.mxu0 %v19131_v21  ;;  %4809 = vmatprep.subr.bf16.mxu1 %v19196_v11  ;;  %v19208_v21 = vld [vmem:[%s24302_s3 + $0x55c] ss:$12 sps:$4 sm:$0xff]  }
 0x2d8   : > { %4748 = vmatprep.subr.bf16.mxu0 %v19139_v24  ;;  %v19214_v24 = vld [vmem:[%s24302_s3 + $0x544] ss:$12 sps:$4 sm:$0xff]  }
 0x2da   : > { %4810 = vmatpush2.bf16.msra.mxu1 %v19194_v12 }
 0x2db   : > { %4749 = vmatpush1.bf16.msra.mxu0 %v19137_v44  ;;  %v19209_v44 = vld [vmem:[%s24302_s3 + $0x3c0] ss:$12 sps:$4 sm:$0xff]  }
 0x2dc   : > { %4750 = vmatprep.subr.bf16.mxu0 %v19145_v29  ;;  %v4064_v29 = vld [vmem:[#allocation4 + $0x38] sm:$0x1f] }
 0x2df   : > { %4751 = vmatpush1.bf16.msra.mxu0 %v19143_v30  ;;  %v4068_v30 = vpack.c.bf16 %v4064_v29, %v4060_v28 }
 0x2e0   : > { %4752 = vmatprep.subr.bf16.mxu0 %v19151_v33  ;;  %v19215_v33 = vld [vmem:[%s24302_s3 + $0x470] ss:$12 sps:$4 sm:$0xff]  }
 0x2e1   : > { %v4222_v31 = vshll.u32 %v4068_v30, 16  ;;  %v4220_v32 = vshrl.u32 %v4068_v30, 16 }
 0x2e3   : > { %4753 = vmatpush1.bf16.msra.mxu0 %v19149_v8  ;;  %v4224_v34 = vrot.slane %v4222_v31, 1 }
 0x2e4   : > { %4754 = vmatprep.subr.bf16.mxu0 %v19157_v36 }
 0x2e5   : > { %v21408_v8 = vor.u32 %v4224_v34, %v4220_v32 }
 0x2e7   : > { %4755 = vmatpush1.bf16.msra.mxu0 %v19155_v37  ;;  %4817 = vmatprep.mubr.bf16.mxu1 %v21408_v8 }
 0x2e8   : > { %4756 = vmatprep.subr.bf16.mxu0 %v19163_v40 }
 0x2e9   : > { %v21219_v14 = vpop.f32.mrf.mxu1 }
 0x2eb   : > { %v21221_v15 = vpop.f32.mrf.mxu1  ;;  %4757 = vmatpush1.bf16.msra.mxu0 %v19161_v42 }
 0x2ec   : > { %4758 = vmatprep.subr.bf16.mxu0 %v19169_v45 }
 0x2ed   : > { %v3487_v18 = vpop.f32.mrf.mxu1 }
 0x2ee   : > { %v19202_v18 = vld [vmem:[%s24302_s3 + $0x574] ss:$12 sps:$4 sm:$0xff]  }
 0x2ef   : > { %v3488_v20 = vpop.f32.mrf.mxu1  ;;  %4759 = vmatpush2.bf16.msra.mxu0 %v19167_v47  ;;  %4811 = vmatprep.subr.bf16.mxu1 %v19202_v18 }
 0x2f0   : > { %4760 = vmatprep.subr.bf16.mxu0 %v19175_v49  ;;  %v19203_v20 = vld [vmem:[%s24302_s3 + $0x3d8] ss:$12 sps:$4 sm:$0xff]   ;;  %4812 = vmatpush2.bf16.msra.mxu1 %v19200_v17 }
 0x2f1   : > { %4813 = vmatprep.subr.bf16.mxu1 %v19208_v21 }
 0x2f3   : > { %4761 = vmatpush2.bf16.msra.mxu0 %v19173_v50 }
 0x2f4   : > { %4762 = vmatprep.subr.bf16.mxu0 %v19181_v57  ;;  %4814 = vmatpush2.bf16.msra.mxu1 %v19206_v27 }
 0x2f5   : > { %4815 = vmatprep.subr.bf16.mxu1 %v19214_v24 }
 0x2f7   : > { %4763 = vmatpush2.bf16.msra.mxu0 %v19179_v6 }
 0x2f8   : > { %4764 = vmatprep.subr.bf16.mxu0 %v19187_v62  ;;  %4816 = vmatpush2.bf16.msra.mxu1 %v19212_v25 }
 0x2f9   : > { %18251 = vmatprep.subr.bf16.mxu1 %v19217_v35  ;;  %v19216_v35 = vld [vmem:[%s24302_s3 + $0x3b0] ss:$12 sps:$4 sm:$0xff]  }
 0x2fb   : > { %4765 = vmatpush2.bf16.msra.mxu0 %v19185_v2 }
 0x2fc   : > { %4766 = vmatprep.subr.bf16.mxu0 %v19193_v7 }
 0x2ff   : > { %4767 = vmatpush2.bf16.msra.mxu0 %v19191_v9 }
 0x300   : > { %4768 = vmatprep.subr.bf16.mxu0 %v19199_v16  ;;  %v4061_v16 = vld [vmem:[#allocation4 + $0x28] sm:$0x1f] }
 0x303   : > { %4769 = vmatpush2.bf16.msra.mxu0 %v19197_v13  ;;  %v4057_v13 = vld [vmem:[#allocation4] sm:$0xfe] }
 0x304   : > { %4770 = vmatprep.subr.bf16.mxu0 %v19205_v19  ;;  %v4065_v18 = vpack.c.bf16 %v4061_v16, %v4057_v13  ;;  %v19258_v13 = vld [vmem:[%s24302_s3 + $0x214] ss:$12 sps:$4 sm:$0xff]  }
 0x306   : > { %v4201_v19 = vshll.u32 %v4065_v18, 16 }
 0x307   : > { %4771 = vmatpush2.bf16.msra.mxu0 %v19203_v20 }
 0x308   : > { %4772 = vmatprep.subr.bf16.mxu0 %v19211_v22  ;;  %v4199_v22 = vshrl.u32 %v4065_v18, 16  ;;  %v4203_v24 = vrot.slane %v4201_v19, 1  ;;  %v19253_v19 = vld [vmem:[%s24302_s3 + $0x90] ss:$12 sps:$4 sm:$0xff]  }
 0x30b   : > { %4773 = vmatpush2.bf16.msra.mxu0 %v19209_v44 }
 0x30c   : > { %18229 = vmatprep.subr.bf16.mxu0 %v19215_v33  ;;  %v21435_v33 = vor.u32 %v4203_v24, %v4199_v22  ;;  %v19259_v22 = vld [vmem:[%s24302_s3 + $0x78] ss:$12 sps:$4 sm:$0xff]  }
 0x30d   : > { %v19262_v24 = vld [vmem:[%s24302_s3 + $0x1f8] ss:$12 sps:$4 sm:$0xff]  }
 0x30e   : > { %v2644_v54 = vpop.f32.mrf.mxu0 }
 0x30f   : > { %v21329_v56 = vadd.f32 %v2644_v54, %v2364_v52 }
 0x310   : > { %v2646_v58 = vpop.f32.mrf.mxu0 }
 0x311   : > { %v21340_v60 = vadd.f32 %v2646_v58, %v2366_v55  ;;  %v2686_v39 = vadd.f32 %v21188_v23, %v21329_v56  ;;  %v3885_v55 = vlaneseq }
 0x312   : > { %v2648_v61 = vpop.f32.mrf.mxu0 }
 0x313   : > { %v2688_v43 = vadd.f32 %v21190_v26, %v21340_v60  ;;  %v21420_v23 = vshrl.u32 %v3885_v55, 7  ;;  %v3883_v26 = vld [vmem:[%s24308_s9] sm:$0x3]  ;;  %v19234_v55 = vld [vmem:[%s24302_s3 + $0x4d0] ss:$12 sps:$4 sm:$0xff]  }
 0x314   : > { %v2649_v63 = vpop.f32.mrf.mxu0 }
 0x315   : > { %v21424_v56 = vsub.s32 0, %v21420_v23  ;;  %v21431_v57 = vsub.s32 1, %v21420_v23 }
 0x317   : > { %24321 = vst [vmem:[#allocation16_spill] sm:$0xff] %v21431_v57  ;;  %v3888_v60 = vrot.slane %v3883_v26, %v21424_v56  ;;  %v3892_v63 = vrot.slane %v3883_v26, %v21431_v57  ;;  %v19237_v26 = vld [vmem:[%s24302_s3 + $0x578] ss:$12 sps:$4 sm:$0xff]  }
 0x329   : > { %v3833_v36 = vpop.f32.mrf.mxu1 }
 0x32b   : > { %v3835_v37 = vpop.f32.mrf.mxu1 }
 0x32d   : > { %v3837_v41 = vpop.f32.mrf.mxu1 }
 0x32e   : > { %v3074_v38 = vpop.f32.mrf.mxu0  ;;  %v19221_v41 = vld [vmem:[%s24302_s3 + $0x5d8] ss:$12 sps:$4 sm:$0xff]  }
 0x32f   : > { %v3075_v40 = vadd.f32 %v3074_v38, %v21205_v1  ;;  %v3838_v47 = vpop.f32.mrf.mxu1  ;;  %v19218_v38 = vld [vmem:[%s24302_s3 + $0x530] ss:$12 sps:$4 sm:$0xff]  }
 0x330   : > { %v3076_v42 = vpop.f32.mrf.mxu0  ;;  %v19224_v47 = vld [vmem:[%s24302_s3 + $0x380] ss:$12 sps:$4 sm:$0xff]  }
 0x331   : > { %v3081_v45 = vadd.f32 %v3075_v40, %v2686_v39  ;;  %v3077_v46 = vadd.f32 %v3076_v42, %v21210_v3  ;;  %v19219_v40 = vld [vmem:[%s24302_s3 + $0x458] ss:$12 sps:$4 sm:$0xff]  }
 0x332   : > { %v3078_v48 = vpop.f32.mrf.mxu0  ;;  %v19220_v42 = vld [vmem:[%s24302_s3 + $0x398] ss:$12 sps:$4 sm:$0xff]  }
 0x333   : > { %v3082_v49 = vadd.f32 %v3077_v46, %v2688_v43  ;;  %v19222_v43 = vld [vmem:[%s24302_s3 + $0x518] ss:$12 sps:$4 sm:$0xff]   ;;  %v19225_v46 = vld [vmem:[%s24302_s3 + $0x5c0] ss:$12 sps:$4 sm:$0xff]  }
 0x334   : > { %v3079_v50 = vpop.f32.mrf.mxu0  ;;  %v19226_v48 = vld [vmem:[%s24302_s3 + $0x500] ss:$12 sps:$4 sm:$0xff]  }
 0x335   : > { %v19228_v50 = vld [vmem:[%s24302_s3 + $0x368] ss:$12 sps:$4 sm:$0xff]  }
 0x36e   : > { %v3442_v51 = vpop.f32.mrf.mxu0 }
 0x36f   : > { %v3484_v1 = vadd.f32 %v21219_v14, %v3442_v51  ;;  %v19230_v51 = vld [vmem:[%s24302_s3 + $0x4e8] ss:$12 sps:$4 sm:$0xff]  }
 0x370   : > { %v3444_v52 = vpop.f32.mrf.mxu0 }
 0x371   : > { %v3486_v3 = vadd.f32 %v21221_v15, %v3444_v52  ;;  %v3490_v6 = vadd.f32 %v3484_v1, %v3081_v45  ;;  %v19223_v45 = vld [vmem:[%s24302_s3 + $0x440] ss:$12 sps:$4 sm:$0xff]   ;;  %v19231_v52 = vld [vmem:[%s24302_s3 + $0x410] ss:$12 sps:$4 sm:$0xff]   ;;  %v19235_v1 = vld [vmem:[%s24302_s3 + $0x3f8] ss:$12 sps:$4 sm:$0xff]  }
 0x372   : > { %v3446_v53 = vpop.f32.mrf.mxu0 }
 0x373   : > { %v3491_v61 = vadd.f32 %v3486_v3, %v3082_v49  ;;  %v19227_v49 = vld [vmem:[%s24302_s3 + $0x428] ss:$12 sps:$4 sm:$0xff]   ;;  %v19233_v53 = vld [vmem:[%s24302_s3 + $0x590] ss:$12 sps:$4 sm:$0xff]   ;;  %v19236_v3 = vld [vmem:[%s24302_s3 + $0x338] ss:$12 sps:$4 sm:$0xff]  }
 0x374   : > { %v3447_v54 = vpop.f32.mrf.mxu0 }
 0x375   : > { %v19232_v54 = vld [vmem:[%s24302_s3 + $0x350] ss:$12 sps:$4 sm:$0xff]  }
 0x38e   : > { %v3874_v58 = vpop.f32.mrf.mxu0 }
 0x38f   : > { %v3875_v59 = vadd.f32 %v3874_v58, %v3833_v36  ;;  %v19238_v58 = vld [vmem:[%s24302_s3 + $0x4b8] ss:$12 sps:$4 sm:$0xff]  }
 0x390   : > { %v3876_v10 = vpop.f32.mrf.mxu0 }
 0x391   : > { %v3881_v14 = vadd.f32 %v3875_v59, %v3490_v6  ;;  %v3877_v62 = vadd.f32 %v3876_v10, %v3835_v37  ;;  %v19239_v6 = vld [vmem:[%s24302_s3 + $0x3e0] ss:$12 sps:$4 sm:$0xff]  }
 0x392   : > { %v3878_v2 = vpop.f32.mrf.mxu0  ;;  %v19241_v59 = vld [vmem:[%s24302_s3 + $0x560] ss:$12 sps:$4 sm:$0xff]  }
 0x393   : > { %v3895_v4 = vadd.f32 %v3888_v60, %v3881_v14  ;;  %v3882_v5 = vadd.f32 %v3877_v62, %v3491_v61  ;;  %v19240_v60 = vld [vmem:[%s24302_s3 + $0x320] ss:$12 sps:$4 sm:$0xff]   ;;  %v19243_v61 = vld [vmem:[%s24302_s3 + $0x3c8] ss:$12 sps:$4 sm:$0xff]  }
 0x394   : > { %v3879_v7 = vpop.f32.mrf.mxu0  ;;  %v19242_v10 = vld [vmem:[%s24302_s3 + $0x4a0] ss:$12 sps:$4 sm:$0xff]   ;;  %v19245_v14 = vld [vmem:[%s24302_s3 + $0x548] ss:$12 sps:$4 sm:$0xff]  }
 0x395   : > { %v3897_v9 = vmax.f32 %v3895_v4, 0.0  ;;  %v3896_v15 = vadd.f32 %v3892_v63, %v3882_v5  ;;  %v19244_v62 = vld [vmem:[%s24302_s3 + $0x308] ss:$12 sps:$4 sm:$0xff]   ;;  %v19249_v2 = vld [vmem:[%s24302_s3 + $0xac] ss:$12 sps:$4 sm:$0xff]  }
 0x396   : > { %v19246_v63 = vld [vmem:[%s24302_s3 + $0x488] ss:$12 sps:$4 sm:$0xff]   ;;  %v19252_v4 = vld [vmem:[%s24302_s3 + $0x22c] ss:$12 sps:$4 sm:$0xff]  }
 0x397   : > { %v3909_v11 = vrot.slane %v3897_v9, 4  ;;  %v3898_v12 = vmax.f32 %v3896_v15, 0.0  ;;  %v19247_v5 = vld [vmem:[%s24302_s3 + $0xa8] ss:$12 sps:$4 sm:$0xff]  }
 0x398   : > { %v3924_v15 = vld [vmem:[#allocation4 + $0x38] sm:$0xf] }
 0x399   : > { %3913 = vst [vmem:[#allocation4 + $0x30] ss:$-36 sps:$4 sm:$0xff] %v3909_v11   ;;  %v3910_v17 = vrot.slane %v3898_v12, 4  ;;  %v19250_v11 = vld [vmem:[%s24302_s3 + $0x228] ss:$12 sps:$4 sm:$0xff]  }
 0x39a   : > { %v19255_v12 = vld [vmem:[%s24302_s3 + $0x94] ss:$12 sps:$4 sm:$0xff]  }
 0x39b   : > { %3914 = vst [vmem:[#allocation4 + $0x10] ss:$20 sps:$4 sm:$0xff] %v3910_v17   ;;  %v21553_v17 = vld [vmem:[#allocation3 + $0x28] sm:$0xff] }
 0x39c   : > { %v21556_v18 = vpack.c.bf16 %v3924_v15, %v21553_v17  ;;  %v19334_v15 = vld [vmem:[%s24302_s3 + $0x258] ss:$12 sps:$4 sm:$0xff]  }
 0x3a0   : > { %v4058_v20 = vld [vmem:[#allocation4 + $0x8] sm:$0xfe]  ;;  %v4062_v21 = vld [vmem:[#allocation4 + $0x30] sm:$0x1f] }
 0x3a1   : > { %v4066_v27 = vpack.c.bf16 %v4062_v21, %v4058_v20  ;;  %v3918_v7 = vld [vmem:[#allocation4 + $0x8] sm:$0xff]  ;;  %v3922_v9 = vld [vmem:[#allocation4 + $0x30] sm:$0xf] }
 0x3a2   : > { %v4059_v44 = vld [vmem:[#allocation4 + $0x20] sm:$0xfe]  ;;  %v4063_v25 = vld [vmem:[#allocation4 + $0x10] sm:$0x1f]  ;;  %v21551_v16 = vpack.c.bf16 %v3922_v9, %v3918_v7  ;;  %v19261_v21 = vld [vmem:[%s24302_s3 + $0x7c] ss:$12 sps:$4 sm:$0xff]  }
 0x3a3   : > { %v4208_v28 = vshll.u32 %v4066_v27, 16  ;;  %v4067_v29 = vpack.c.bf16 %v4063_v25, %v4059_v44  ;;  %v4206_v30 = vshrl.u32 %v4066_v27, 16  ;;  %v19256_v20 = vld [vmem:[%s24302_s3 + $0x210] ss:$12 sps:$4 sm:$0xff]   ;;  %v19331_v9 = vld [vmem:[%s24302_s3 + $0xd8] ss:$12 sps:$4 sm:$0xff]  }
 0x3a4   : > { %v19264_v27 = vld [vmem:[%s24302_s3 + $0x1fc] ss:$12 sps:$4 sm:$0xff]   ;;  %v19267_v44 = vld [vmem:[%s24302_s3 + $0x64] ss:$12 sps:$4 sm:$0xff]  }
 0x3a5   : > { %v4210_v31 = vrot.slane %v4208_v28, 1  ;;  %v4215_v32 = vshll.u32 %v4067_v29, 16  ;;  %v4213_v36 = vshrl.u32 %v4067_v29, 16  ;;  %v19270_v25 = vld [vmem:[%s24302_s3 + $0x1e4] ss:$12 sps:$4 sm:$0xff]  }
 0x3a6   : > { %v19265_v28 = vld [vmem:[%s24302_s3 + $0x60] ss:$12 sps:$4 sm:$0xff]   ;;  %v19336_v7 = vld [vmem:[%s24302_s3 + $0x25c] ss:$12 sps:$4 sm:$0xff]  }
 0x3a7   : > { %v4211_v34 = vor.u32 %v4210_v31, %v4206_v30  ;;  %v4217_v37 = vrot.slane %v4215_v32, 1  ;;  %v19268_v29 = vld [vmem:[%s24302_s3 + $0x1e0] ss:$12 sps:$4 sm:$0xff]   ;;  %v19271_v32 = vld [vmem:[%s24302_s3 + $0x48] ss:$12 sps:$4 sm:$0xff]  }
 0x3a8   : > { %v19273_v30 = vld [vmem:[%s24302_s3 + $0x4c] ss:$12 sps:$4 sm:$0xff]  }
 0x3a9   : > { %4774 = vmatprep.mubr.bf16.mxu0 %v4211_v34  ;;  %v21443_v39 = vor.u32 %v4217_v37, %v4213_v36  ;;  %v19276_v31 = vld [vmem:[%s24302_s3 + $0x1cc] ss:$12 sps:$4 sm:$0xff]   ;;  %v19277_v36 = vld [vmem:[%s24302_s3 + $0x30] ss:$12 sps:$4 sm:$0xff]  }
 0x3aa   : > { %4775 = vmatmul.mubr.bf16.vlgmr.msra.gmra.mxu0 %v21435_v33  ;;  %v19280_v37 = vld [vmem:[%s24302_s3 + $0x1b0] ss:$12 sps:$4 sm:$0xff]  }
 0x3ab   : > { %18230 = vmatpush3.bf16.msra.mxu0 %v19216_v35  ;;  %4818 = vmatmul.mubr.bf16.vlgmr.msra.gmra.mxu1 %v21443_v39  ;;  %v19282_v35 = vld [vmem:[%s24302_s3 + $0x1b4] ss:$12 sps:$4 sm:$0xff]  }
 0x3ac   : > { %4860 = vmatprep.mubr.bf16.mxu0 %v4211_v34  ;;  %18252 = vmatpush3.bf16.msra.mxu1 %v19218_v38  ;;  %v19279_v34 = vld [vmem:[%s24302_s3 + $0x34] ss:$12 sps:$4 sm:$0xff]   ;;  %v19285_v38 = vld [vmem:[%s24302_s3 + $0x1c] ss:$12 sps:$4 sm:$0xff]  }
 0x3ad   : > { %18231 = vmatprep.subr.bf16.mxu0 %v19219_v40  ;;  %18253 = vmatprep.subr.bf16.mxu1 %v19221_v41  ;;  %v19283_v40 = vld [vmem:[%s24302_s3 + $0x18] ss:$12 sps:$4 sm:$0xff]  }
 0x3ae   : > { %4901 = vmatprep.mubr.bf16.mxu1 %v21408_v8  ;;  %v19229_v8 = vld [vmem:[%s24302_s3 + $0x5a8] ss:$12 sps:$4 sm:$0xff]   ;;  %v19286_v41 = vld [vmem:[%s24302_s3 + $0x198] ss:$12 sps:$4 sm:$0xff]  }
 0x3af   : > { %18232 = vmatpush3.bf16.msra.mxu0 %v19220_v42  ;;  %v19291_v42 = vld [vmem:[%s24302_s3 + $0x4] ss:$12 sps:$4 sm:$0xff]  }
 0x3b0   : > { %18254 = vmatpush3.bf16.msra.mxu1 %v19222_v43  ;;  %18233 = vmatprep.subr.bf16.mxu0 %v19223_v45  ;;  %v19294_v43 = vld [vmem:[%s24302_s3 + $0x184] ss:$12 sps:$4 sm:$0xff]   ;;  %v19289_v45 = vld [vmem:[%s24302_s3] ss:$12 sps:$4 sm:$0xff]  }
 0x3b1   : > { %18255 = vmatprep.subr.bf16.mxu1 %v19225_v46  ;;  %v19292_v46 = vld [vmem:[%s24302_s3 + $0x180] ss:$12 sps:$4 sm:$0xff]  }
 0x3b3   : > { %18234 = vmatpush3.bf16.msra.mxu0 %v19224_v47  ;;  %v19297_v47 = vld [vmem:[%s24302_s3 + $0x16c] ss:$12 sps:$4 sm:$0xff]  }
 0x3b4   : > { %18256 = vmatpush3.bf16.msra.mxu1 %v19226_v48  ;;  %18235 = vmatprep.subr.bf16.mxu0 %v19227_v49  ;;  %v19300_v48 = vld [vmem:[%s24302_s3 + $0x2ec] ss:$12 sps:$4 sm:$0xff]   ;;  %v19295_v49 = vld [vmem:[%s24302_s3 + $0x168] ss:$12 sps:$4 sm:$0xff]  }
 0x3b5   : > { %18257 = vmatprep.subr.bf16.mxu1 %v19229_v8  ;;  %v19298_v8 = vld [vmem:[%s24302_s3 + $0x2e8] ss:$12 sps:$4 sm:$0xff]  }
 0x3b7   : > { %18236 = vmatpush3.bf16.msra.mxu0 %v19228_v50  ;;  %v19303_v50 = vld [vmem:[%s24302_s3 + $0x154] ss:$12 sps:$4 sm:$0xff]  }
 0x3b8   : > { %18258 = vmatpush3.bf16.msra.mxu1 %v19230_v51  ;;  %18237 = vmatprep.subr.bf16.mxu0 %v19231_v52  ;;  %v19306_v51 = vld [vmem:[%s24302_s3 + $0x2d4] ss:$12 sps:$4 sm:$0xff]   ;;  %v19301_v52 = vld [vmem:[%s24302_s3 + $0x150] ss:$12 sps:$4 sm:$0xff]  }
 0x3b9   : > { %18259 = vmatprep.subr.bf16.mxu1 %v19233_v53  ;;  %v19304_v53 = vld [vmem:[%s24302_s3 + $0x2d0] ss:$12 sps:$4 sm:$0xff]  }
 0x3bb   : > { %18238 = vmatpush3.bf16.msra.mxu0 %v19232_v54  ;;  %v19309_v54 = vld [vmem:[%s24302_s3 + $0x13c] ss:$12 sps:$4 sm:$0xff]  }
 0x3bc   : > { %18260 = vmatpush3.bf16.msra.mxu1 %v19234_v55  ;;  %18239 = vmatprep.subr.bf16.mxu0 %v19235_v1  ;;  %v19312_v55 = vld [vmem:[%s24302_s3 + $0x2bc] ss:$12 sps:$4 sm:$0xff]   ;;  %v19307_v1 = vld [vmem:[%s24302_s3 + $0x138] ss:$12 sps:$4 sm:$0xff]  }
 0x3bd   : > { %18261 = vmatprep.subr.bf16.mxu1 %v19237_v26  ;;  %v19310_v26 = vld [vmem:[%s24302_s3 + $0x2b8] ss:$12 sps:$4 sm:$0xff]  }
 0x3bf   : > { %18240 = vmatpush3.bf16.msra.mxu0 %v19236_v3  ;;  %v19315_v3 = vld [vmem:[%s24302_s3 + $0x124] ss:$12 sps:$4 sm:$0xff]  }
 0x3c0   : > { %18262 = vmatpush3.bf16.msra.mxu1 %v19238_v58  ;;  %18241 = vmatprep.subr.bf16.mxu0 %v19239_v6  ;;  %v19318_v58 = vld [vmem:[%s24302_s3 + $0x2a4] ss:$12 sps:$4 sm:$0xff]   ;;  %v19313_v6 = vld [vmem:[%s24302_s3 + $0x120] ss:$12 sps:$4 sm:$0xff]  }
 0x3c1   : > { %18263 = vmatprep.subr.bf16.mxu1 %v19241_v59  ;;  %v19316_v59 = vld [vmem:[%s24302_s3 + $0x2a0] ss:$12 sps:$4 sm:$0xff]  }
 0x3c3   : > { %18242 = vmatpush3.bf16.msra.mxu0 %v19240_v60  ;;  %v19321_v60 = vld [vmem:[%s24302_s3 + $0x10c] ss:$12 sps:$4 sm:$0xff]  }
 0x3c4   : > { %18264 = vmatpush3.bf16.msra.mxu1 %v19242_v10  ;;  %18243 = vmatprep.subr.bf16.mxu0 %v19243_v61  ;;  %v19324_v10 = vld [vmem:[%s24302_s3 + $0x28c] ss:$12 sps:$4 sm:$0xff]   ;;  %v19319_v61 = vld [vmem:[%s24302_s3 + $0x108] ss:$12 sps:$4 sm:$0xff]  }
 0x3c5   : > { %18265 = vmatprep.subr.bf16.mxu1 %v19245_v14  ;;  %v19322_v14 = vld [vmem:[%s24302_s3 + $0x288] ss:$12 sps:$4 sm:$0xff]  }
 0x3c7   : > { %18244 = vmatpush3.bf16.msra.mxu0 %v19244_v62  ;;  %v19327_v62 = vld [vmem:[%s24302_s3 + $0xf4] ss:$12 sps:$4 sm:$0xff]  }
 0x3c8   : > { %18266 = vmatpush3.bf16.msra.mxu1 %v19246_v63  ;;  %5422 = vmatprep.subr.bf16.mxu0 %v19249_v2  ;;  %v19330_v63 = vld [vmem:[%s24302_s3 + $0x274] ss:$12 sps:$4 sm:$0xff]   ;;  %v19325_v2 = vld [vmem:[%s24302_s3 + $0xf0] ss:$12 sps:$4 sm:$0xff]  }
 0x3c9   : > { %5465 = vmatprep.subr.bf16.mxu1 %v19252_v4  ;;  %v19328_v4 = vld [vmem:[%s24302_s3 + $0x270] ss:$12 sps:$4 sm:$0xff]  }
 0x3ca   : > { %4861 = vmatmul.mubr.bf16.vlgmr.msra.gmra.mxu0 %v21435_v33  ;;  %v19274_v33 = vld [vmem:[%s24302_s3 + $0x1c8] ss:$12 sps:$4 sm:$0xff]  }
 0x3cb   : > { %4902 = vmatmul.mubr.bf16.vlgmr.msra.gmra.mxu1 %v21443_v39  ;;  %5423 = vmatpush1.bf16.msra.mxu0 %v19247_v5  ;;  %v19288_v39 = vld [vmem:[%s24302_s3 + $0x19c] ss:$12 sps:$4 sm:$0xff]  }
 0x3cc   : > { %5454 = vmatprep.mubr.bf16.mxu0 %v21551_v16  ;;  %5466 = vmatpush1.bf16.msra.mxu1 %v19250_v11  ;;  %v19333_v5 = vld [vmem:[%s24302_s3 + $0xdc] ss:$12 sps:$4 sm:$0xff]   ;;  %v19339_v11 = vld [vmem:[%s24302_s3 + $0xc4] ss:$12 sps:$4 sm:$0xff]  }
 0x3cd   : > { %5424 = vmatprep.subr.bf16.mxu0 %v19255_v12  ;;  %5467 = vmatprep.subr.bf16.mxu1 %v19258_v13  ;;  %v19342_v12 = vld [vmem:[%s24302_s3 + $0x244] ss:$12 sps:$4 sm:$0xff]   ;;  %v19337_v13 = vld [vmem:[%s24302_s3 + $0xc0] ss:$12 sps:$4 sm:$0xff]  }
 0x3ce   : > { %5497 = vmatprep.mubr.bf16.mxu1 %v21556_v18 }
 0x3cf   : > { %5425 = vmatpush1.bf16.msra.mxu0 %v19253_v19  ;;  %v3921_v19 = vld [vmem:[#allocation4 + $0x28] sm:$0xf] }
 0x3d0   : > { %5468 = vmatpush1.bf16.msra.mxu1 %v19256_v20  ;;  %5426 = vmatprep.subr.bf16.mxu0 %v19261_v21  ;;  %v19340_v20 = vld [vmem:[%s24302_s3 + $0x240] ss:$12 sps:$4 sm:$0xff]   ;;  %v19343_v21 = vld [vmem:[%s24302_s3 + $0x170] ss:$12 sps:$4 sm:$0xff]  }
 0x3d1   : > { %5469 = vmatprep.subr.bf16.mxu1 %v19264_v27  ;;  %v19345_v27 = vld [vmem:[%s24302_s3 + $0x2f0] ss:$12 sps:$4 sm:$0xff]  }
 0x3d3   : > { %5427 = vmatpush1.bf16.msra.mxu0 %v19259_v22  ;;  %v21742_v22 = vpack.c.bf16 %v3921_v19, %v21553_v17  ;;  %v19347_v17 = vld [vmem:[%s24302_s3 + $0x158] ss:$12 sps:$4 sm:$0xff]   ;;  %v19393_v19 = vld [vmem:[%s24302_s3 + $0x660] ss:$12 sps:$4 sm:$0xff]  }
 0x3d4   : > { %5470 = vmatpush1.bf16.msra.mxu1 %v19262_v24  ;;  %5428 = vmatprep.subr.bf16.mxu0 %v19267_v44  ;;  %v3919_v24 = vld [vmem:[#allocation4 + $0x20] sm:$0xff]  ;;  %v3923_v44 = vld [vmem:[#allocation4 + $0x10] sm:$0xf] }
 0x3d5   : > { %5471 = vmatprep.subr.bf16.mxu1 %v19270_v25  ;;  %v19344_v25 = vld [vmem:[%s24302_s3 + $0xb0] ss:$12 sps:$4 sm:$0xff]  }
 0x3d7   : > { %5429 = vmatpush1.bf16.msra.mxu0 %v19265_v28  ;;  %v19346_v28 = vld [vmem:[%s24302_s3 + $0x230] ss:$12 sps:$4 sm:$0xff]  }
 0x3d8   : > { %5472 = vmatpush1.bf16.msra.mxu1 %v19268_v29  ;;  %5430 = vmatprep.subr.bf16.mxu0 %v19273_v30  ;;  %v21750_v29 = vpack.c.bf16 %v3923_v44, %v3919_v24  ;;  %v19349_v30 = vld [vmem:[%s24302_s3 + $0x2d8] ss:$12 sps:$4 sm:$0xff]   ;;  %v19402_v24 = vld [vmem:[%s24302_s3 + $0x7c8] ss:$12 sps:$4 sm:$0xff]  }
 0x3d9   : > { %5473 = vmatprep.subr.bf16.mxu1 %v19276_v31  ;;  %v19348_v31 = vld [vmem:[%s24302_s3 + $0x98] ss:$12 sps:$4 sm:$0xff]   ;;  %v19407_v44 = vld [vmem:[%s24302_s3 + $0x634] ss:$12 sps:$4 sm:$0xff]  }
 0x3db   : > { %5431 = vmatpush1.bf16.msra.mxu0 %v19271_v32  ;;  %v19350_v32 = vld [vmem:[%s24302_s3 + $0x218] ss:$12 sps:$4 sm:$0xff]  }
 0x3dc   : > { %5474 = vmatpush1.bf16.msra.mxu1 %v19274_v33  ;;  %5432 = vmatprep.subr.bf16.mxu0 %v19279_v34  ;;  %v19351_v33 = vld [vmem:[%s24302_s3 + $0x140] ss:$12 sps:$4 sm:$0xff]  }
 0x3dd   : > { %5475 = vmatprep.subr.bf16.mxu1 %v19282_v35  ;;  %v19353_v34 = vld [vmem:[%s24302_s3 + $0x2c0] ss:$12 sps:$4 sm:$0xff]  }
 0x3de   : > { %v19354_v35 = vld [vmem:[%s24302_s3 + $0x200] ss:$12 sps:$4 sm:$0xff]  }
 0x3df   : > { %5433 = vmatpush1.bf16.msra.mxu0 %v19277_v36  ;;  %v19355_v36 = vld [vmem:[%s24302_s3 + $0x128] ss:$12 sps:$4 sm:$0xff]  }
 0x3e0   : > { %5476 = vmatpush1.bf16.msra.mxu1 %v19280_v37  ;;  %5434 = vmatprep.subr.bf16.mxu0 %v19285_v38  ;;  %v19356_v37 = vld [vmem:[%s24302_s3 + $0x68] ss:$12 sps:$4 sm:$0xff]  }
 0x3e1   : > { %5477 = vmatprep.subr.bf16.mxu1 %v19288_v39  ;;  %v19358_v38 = vld [vmem:[%s24302_s3 + $0x1e8] ss:$12 sps:$4 sm:$0xff]   ;;  %v19359_v39 = vld [vmem:[%s24302_s3 + $0x110] ss:$12 sps:$4 sm:$0xff]  }
 0x3e3   : > { %5435 = vmatpush1.bf16.msra.mxu0 %v19283_v40  ;;  %v19361_v40 = vld [vmem:[%s24302_s3 + $0x290] ss:$12 sps:$4 sm:$0xff]  }
 0x3e4   : > { %5478 = vmatpush1.bf16.msra.mxu1 %v19286_v41  ;;  %5436 = vmatprep.subr.bf16.mxu0 %v19291_v42  ;;  %v19360_v41 = vld [vmem:[%s24302_s3 + $0x50] ss:$12 sps:$4 sm:$0xff]  }
 0x3e5   : > { %5479 = vmatprep.subr.bf16.mxu1 %v19294_v43  ;;  %v19362_v42 = vld [vmem:[%s24302_s3 + $0x1d0] ss:$12 sps:$4 sm:$0xff]   ;;  %v19363_v43 = vld [vmem:[%s24302_s3 + $0xf8] ss:$12 sps:$4 sm:$0xff]  }
 0x3e7   : > { %5437 = vmatpush1.bf16.msra.mxu0 %v19289_v45  ;;  %v19365_v45 = vld [vmem:[%s24302_s3 + $0x278] ss:$12 sps:$4 sm:$0xff]  }
 0x3e8   : > { %5480 = vmatpush1.bf16.msra.mxu1 %v19292_v46  ;;  %5438 = vmatprep.subr.bf16.mxu0 %v19297_v47  ;;  %v19364_v46 = vld [vmem:[%s24302_s3 + $0x38] ss:$12 sps:$4 sm:$0xff]  }
 0x3e9   : > { %5481 = vmatprep.subr.bf16.mxu1 %v19300_v48  ;;  %v19366_v47 = vld [vmem:[%s24302_s3 + $0x1b8] ss:$12 sps:$4 sm:$0xff]   ;;  %v19367_v48 = vld [vmem:[%s24302_s3 + $0xe0] ss:$12 sps:$4 sm:$0xff]  }
 0x3eb   : > { %5439 = vmatpush2.bf16.msra.mxu0 %v19295_v49  ;;  %v19369_v49 = vld [vmem:[%s24302_s3 + $0x260] ss:$12 sps:$4 sm:$0xff]  }
 0x3ec   : > { %5482 = vmatpush2.bf16.msra.mxu1 %v19298_v8  ;;  %5440 = vmatprep.subr.bf16.mxu0 %v19303_v50  ;;  %v19368_v8 = vld [vmem:[%s24302_s3 + $0x20] ss:$12 sps:$4 sm:$0xff]  }
 0x3ed   : > { %5483 = vmatprep.subr.bf16.mxu1 %v19306_v51  ;;  %v19370_v50 = vld [vmem:[%s24302_s3 + $0x1a0] ss:$12 sps:$4 sm:$0xff]   ;;  %v19371_v51 = vld [vmem:[%s24302_s3 + $0xc8] ss:$12 sps:$4 sm:$0xff]  }
 0x3ef   : > { %5441 = vmatpush2.bf16.msra.mxu0 %v19301_v52  ;;  %v19373_v52 = vld [vmem:[%s24302_s3 + $0x248] ss:$12 sps:$4 sm:$0xff]  }
 0x3f0   : > { %5484 = vmatpush2.bf16.msra.mxu1 %v19304_v53  ;;  %5442 = vmatprep.subr.bf16.mxu0 %v19309_v54  ;;  %v19372_v53 = vld [vmem:[%s24302_s3 + $0x8] ss:$12 sps:$4 sm:$0xff]   ;;  %v5591_v54 = vld [vmem:[#allocation4 + $0x8] sm:$0xfc] }
 0x3f1   : > { %5485 = vmatprep.subr.bf16.mxu1 %v19312_v55  ;;  %v5595_v55 = vld [vmem:[#allocation4 + $0x30] sm:$0x3f] }
 0x3f3   : > { %5443 = vmatpush2.bf16.msra.mxu0 %v19307_v1  ;;  %v5593_v1 = vld [vmem:[#allocation4 + $0x18] sm:$0xfc] }
 0x3f4   : > { %5486 = vmatpush2.bf16.msra.mxu1 %v19310_v26  ;;  %5444 = vmatprep.subr.bf16.mxu0 %v19315_v3  ;;  %v5597_v26 = vld [vmem:[#allocation4 + $0x38] sm:$0x3f] }
 0x3f5   : > { %5487 = vmatprep.subr.bf16.mxu1 %v19318_v58  ;;  %v19374_v3 = vld [vmem:[%s24302_s3 + $0x188] ss:$12 sps:$4 sm:$0xff]   ;;  %v19377_v58 = vld [vmem:[%s24302_s3 + $0x6ac] ss:$12 sps:$4 sm:$0xff]  }
 0x3f7   : > { %5445 = vmatpush2.bf16.msra.mxu0 %v19313_v6  ;;  %v19380_v6 = vld [vmem:[%s24302_s3 + $0x82c] ss:$12 sps:$4 sm:$0xff]  }
 0x3f8   : > { %5488 = vmatpush2.bf16.msra.mxu1 %v19316_v59  ;;  %5446 = vmatprep.subr.bf16.mxu0 %v19321_v60  ;;  %v5599_v59 = vpack.c.bf16 %v5595_v55, %v5591_v54  ;;  %v5601_v60 = vpack.c.bf16 %v5597_v26, %v5593_v1  ;;  %v19450_v54 = vld [vmem:[%s24302_s3 + $0x888] ss:$12 sps:$4 sm:$0xff]   ;;  %v19453_v26 = vld [vmem:[%s24302_s3 + $0x6f0] ss:$12 sps:$4 sm:$0xff]  }
 0x3f9   : > { %5489 = vmatprep.subr.bf16.mxu1 %v19324_v10  ;;  %v19375_v10 = vld [vmem:[%s24302_s3 + $0x6a8] ss:$12 sps:$4 sm:$0xff]  }
 0x3fa   : > { %v19455_v55 = vld [vmem:[%s24302_s3 + $0x6f4] ss:$12 sps:$4 sm:$0xff]  }
 0x3fb   : > { %5447 = vmatpush2.bf16.msra.mxu0 %v19319_v61  ;;  %v19378_v61 = vld [vmem:[%s24302_s3 + $0x828] ss:$12 sps:$4 sm:$0xff]  }
 0x3fc   : > { %5490 = vmatpush2.bf16.msra.mxu1 %v19322_v14  ;;  %5448 = vmatprep.subr.bf16.mxu0 %v19327_v62  ;;  %v19383_v14 = vld [vmem:[%s24302_s3 + $0x694] ss:$12 sps:$4 sm:$0xff]  }
 0x3fd   : > { %5491 = vmatprep.subr.bf16.mxu1 %v19330_v63  ;;  %v19386_v62 = vld [vmem:[%s24302_s3 + $0x814] ss:$12 sps:$4 sm:$0xff]   ;;  %v21859_v63 = vrot.slane %v5599_v59, 1  ;;  %v19459_v59 = vld [vmem:[%s24302_s3 + $0x6d8] ss:$12 sps:$4 sm:$0xff]  }
 0x3fe   : > { %v19458_v1 = vld [vmem:[%s24302_s3 + $0x874] ss:$12 sps:$4 sm:$0xff]  }
 0x3ff   : > { %5449 = vmatpush2.bf16.msra.mxu0 %v19325_v2  ;;  %v21861_v2 = vrot.slane %v5601_v60, 1  ;;  %v5590_v60 = vld [vmem:[#allocation4] sm:$0xfc] }
 0x400   : > { %5492 = vmatpush2.bf16.msra.mxu1 %v19328_v4  ;;  %5450 = vmatprep.subr.bf16.mxu0 %v19333_v5  ;;  %v19381_v4 = vld [vmem:[%s24302_s3 + $0x690] ss:$12 sps:$4 sm:$0xff]  }
 0x401   : > { %5493 = vmatprep.subr.bf16.mxu1 %v19336_v7  ;;  %v19384_v5 = vld [vmem:[%s24302_s3 + $0x810] ss:$12 sps:$4 sm:$0xff]  }
 0x402   : > { %v19389_v7 = vld [vmem:[%s24302_s3 + $0x67c] ss:$12 sps:$4 sm:$0xff]  }
 0x403   : > { %5451 = vmatpush2.bf16.msra.mxu0 %v19331_v9  ;;  %v19392_v9 = vld [vmem:[%s24302_s3 + $0x7fc] ss:$12 sps:$4 sm:$0xff]  }
 0x404   : > { %5494 = vmatpush2.bf16.msra.mxu1 %v19334_v15  ;;  %5452 = vmatprep.subr.bf16.mxu0 %v19339_v11  ;;  %v19387_v15 = vld [vmem:[%s24302_s3 + $0x678] ss:$12 sps:$4 sm:$0xff]  }
 0x405   : > { %5495 = vmatprep.subr.bf16.mxu1 %v19342_v12  ;;  %v19390_v11 = vld [vmem:[%s24302_s3 + $0x7f8] ss:$12 sps:$4 sm:$0xff]  }
 0x406   : > { %v19395_v12 = vld [vmem:[%s24302_s3 + $0x664] ss:$12 sps:$4 sm:$0xff]  }
 0x407   : > { %5453 = vmatpush2.bf16.msra.mxu0 %v19337_v13  ;;  %v19398_v13 = vld [vmem:[%s24302_s3 + $0x7e4] ss:$12 sps:$4 sm:$0xff]  }
 0x408   : > { %5496 = vmatpush2.bf16.msra.mxu1 %v19340_v20  ;;  %18273 = vmatprep.subr.bf16.mxu0 %v19343_v21  ;;  %v19396_v20 = vld [vmem:[%s24302_s3 + $0x7e0] ss:$12 sps:$4 sm:$0xff]  }
 0x409   : > { %18295 = vmatprep.subr.bf16.mxu1 %v19345_v27  ;;  %v19401_v21 = vld [vmem:[%s24302_s3 + $0x64c] ss:$12 sps:$4 sm:$0xff]  }
 0x40a   : > { %5455 = vmatmul.mubr.bf16.vlgmr.msra.gmra.mxu0 %v21742_v22  ;;  %v19404_v27 = vld [vmem:[%s24302_s3 + $0x7cc] ss:$12 sps:$4 sm:$0xff]  }
 0x40b   : > { %5498 = vmatmul.mubr.bf16.vlgmr.msra.gmra.mxu1 %v21750_v29  ;;  %18274 = vmatpush3.bf16.msra.mxu0 %v19344_v25  ;;  %v19410_v25 = vld [vmem:[%s24302_s3 + $0x7b4] ss:$12 sps:$4 sm:$0xff]  }
 0x40c   : > { %5540 = vmatprep.mubr.bf16.mxu0 %v21551_v16  ;;  %18296 = vmatpush3.bf16.msra.mxu1 %v19346_v28  ;;  %v19352_v16 = vld [vmem:[%s24302_s3 + $0x80] ss:$12 sps:$4 sm:$0xff]   ;;  %v19405_v28 = vld [vmem:[%s24302_s3 + $0x630] ss:$12 sps:$4 sm:$0xff]  }
 0x40d   : > { %18275 = vmatprep.subr.bf16.mxu0 %v19347_v17  ;;  %18297 = vmatprep.subr.bf16.mxu1 %v19349_v30  ;;  %v19413_v17 = vld [vmem:[%s24302_s3 + $0x61c] ss:$12 sps:$4 sm:$0xff]  }
 0x40e   : > { %5581 = vmatprep.mubr.bf16.mxu1 %v21556_v18  ;;  %v19357_v18 = vld [vmem:[%s24302_s3 + $0x2a8] ss:$12 sps:$4 sm:$0xff]  }
 0x40f   : > { %18276 = vmatpush3.bf16.msra.mxu0 %v19348_v31  ;;  %v19416_v30 = vld [vmem:[%s24302_s3 + $0x79c] ss:$12 sps:$4 sm:$0xff]   ;;  %v19411_v31 = vld [vmem:[%s24302_s3 + $0x618] ss:$12 sps:$4 sm:$0xff]  }
 0x410   : > { %18298 = vmatpush3.bf16.msra.mxu1 %v19350_v32  ;;  %18277 = vmatprep.subr.bf16.mxu0 %v19351_v33  ;;  %v19414_v32 = vld [vmem:[%s24302_s3 + $0x798] ss:$12 sps:$4 sm:$0xff]  }
 0x411   : > { %18299 = vmatprep.subr.bf16.mxu1 %v19353_v34  ;;  %v19419_v33 = vld [vmem:[%s24302_s3 + $0x604] ss:$12 sps:$4 sm:$0xff]  }
 0x412   : > { %v19422_v34 = vld [vmem:[%s24302_s3 + $0x784] ss:$12 sps:$4 sm:$0xff]  }
 0x413   : > { %18278 = vmatpush3.bf16.msra.mxu0 %v19352_v16  ;;  %v19417_v16 = vld [vmem:[%s24302_s3 + $0x600] ss:$12 sps:$4 sm:$0xff]  }
 0x414   : > { %18300 = vmatpush3.bf16.msra.mxu1 %v19354_v35  ;;  %18279 = vmatprep.subr.bf16.mxu0 %v19355_v36  ;;  %v19420_v35 = vld [vmem:[%s24302_s3 + $0x780] ss:$12 sps:$4 sm:$0xff]  }
 0x415   : > { %18301 = vmatprep.subr.bf16.mxu1 %v19357_v18  ;;  %v19425_v36 = vld [vmem:[%s24302_s3 + $0x76c] ss:$12 sps:$4 sm:$0xff]  }
 0x416   : > { %v19428_v18 = vld [vmem:[%s24302_s3 + $0x8ec] ss:$12 sps:$4 sm:$0xff]  }
 0x417   : > { %18280 = vmatpush3.bf16.msra.mxu0 %v19356_v37  ;;  %v19423_v37 = vld [vmem:[%s24302_s3 + $0x768] ss:$12 sps:$4 sm:$0xff]  }
 0x418   : > { %18302 = vmatpush3.bf16.msra.mxu1 %v19358_v38  ;;  %18281 = vmatprep.subr.bf16.mxu0 %v19359_v39  ;;  %v19426_v38 = vld [vmem:[%s24302_s3 + $0x8e8] ss:$12 sps:$4 sm:$0xff]  }
 0x419   : > { %18303 = vmatprep.subr.bf16.mxu1 %v19361_v40  ;;  %v19431_v39 = vld [vmem:[%s24302_s3 + $0x754] ss:$12 sps:$4 sm:$0xff]  }
 0x41a   : > { %v19434_v40 = vld [vmem:[%s24302_s3 + $0x8d4] ss:$12 sps:$4 sm:$0xff]  }
 0x41b   : > { %18282 = vmatpush3.bf16.msra.mxu0 %v19360_v41  ;;  %v19429_v41 = vld [vmem:[%s24302_s3 + $0x750] ss:$12 sps:$4 sm:$0xff]  }
 0x41c   : > { %18304 = vmatpush3.bf16.msra.mxu1 %v19362_v42  ;;  %18283 = vmatprep.subr.bf16.mxu0 %v19363_v43  ;;  %v19432_v42 = vld [vmem:[%s24302_s3 + $0x8d0] ss:$12 sps:$4 sm:$0xff]  }
 0x41d   : > { %18305 = vmatprep.subr.bf16.mxu1 %v19365_v45  ;;  %v19437_v43 = vld [vmem:[%s24302_s3 + $0x73c] ss:$12 sps:$4 sm:$0xff]  }
 0x41e   : > { %v19440_v45 = vld [vmem:[%s24302_s3 + $0x8bc] ss:$12 sps:$4 sm:$0xff]  }
 0x41f   : > { %18284 = vmatpush3.bf16.msra.mxu0 %v19364_v46  ;;  %v19435_v46 = vld [vmem:[%s24302_s3 + $0x738] ss:$12 sps:$4 sm:$0xff]  }
 0x420   : > { %18306 = vmatpush3.bf16.msra.mxu1 %v19366_v47  ;;  %18285 = vmatprep.subr.bf16.mxu0 %v19367_v48  ;;  %v19438_v47 = vld [vmem:[%s24302_s3 + $0x8b8] ss:$12 sps:$4 sm:$0xff]  }
 0x421   : > { %18307 = vmatprep.subr.bf16.mxu1 %v19369_v49  ;;  %v19443_v48 = vld [vmem:[%s24302_s3 + $0x724] ss:$12 sps:$4 sm:$0xff]  }
 0x422   : > { %v19446_v49 = vld [vmem:[%s24302_s3 + $0x8a4] ss:$12 sps:$4 sm:$0xff]  }
 0x423   : > { %18286 = vmatpush3.bf16.msra.mxu0 %v19368_v8  ;;  %v19441_v8 = vld [vmem:[%s24302_s3 + $0x720] ss:$12 sps:$4 sm:$0xff]  }
 0x424   : > { %18308 = vmatpush3.bf16.msra.mxu1 %v19370_v50  ;;  %18287 = vmatprep.subr.bf16.mxu0 %v19371_v51  ;;  %v19444_v50 = vld [vmem:[%s24302_s3 + $0x8a0] ss:$12 sps:$4 sm:$0xff]  }
 0x425   : > { %18309 = vmatprep.subr.bf16.mxu1 %v19373_v52  ;;  %v19449_v51 = vld [vmem:[%s24302_s3 + $0x70c] ss:$12 sps:$4 sm:$0xff]  }
 0x426   : > { %v19452_v52 = vld [vmem:[%s24302_s3 + $0x88c] ss:$12 sps:$4 sm:$0xff]  }
 0x427   : > { %18288 = vmatpush3.bf16.msra.mxu0 %v19372_v53  ;;  %v19447_v53 = vld [vmem:[%s24302_s3 + $0x708] ss:$12 sps:$4 sm:$0xff]  }
 0x428   : > { %18310 = vmatpush3.bf16.msra.mxu1 %v19374_v3  ;;  %6255 = vmatprep.subr.bf16.mxu0 %v19377_v58  ;;  %v19456_v3 = vld [vmem:[%s24302_s3 + $0x870] ss:$12 sps:$4 sm:$0xff]  }
 0x429   : > { %6298 = vmatprep.subr.bf16.mxu1 %v19380_v6  ;;  %v19461_v58 = vld [vmem:[%s24302_s3 + $0x6dc] ss:$12 sps:$4 sm:$0xff]  }
 0x42a   : > { %5541 = vmatmul.mubr.bf16.vlgmr.msra.gmra.mxu0 %v21742_v22  ;;  %v19399_v22 = vld [vmem:[%s24302_s3 + $0x648] ss:$12 sps:$4 sm:$0xff]  }
 0x42b   : > { %5582 = vmatmul.mubr.bf16.vlgmr.msra.gmra.mxu1 %v21750_v29  ;;  %6256 = vmatpush1.bf16.msra.mxu0 %v19375_v10  ;;  %v19408_v29 = vld [vmem:[%s24302_s3 + $0x7b0] ss:$12 sps:$4 sm:$0xff]  }
 0x42c   : > { %6287 = vmatprep.mubr.bf16.mxu0 %v21859_v63  ;;  %6299 = vmatpush1.bf16.msra.mxu1 %v19378_v61  ;;  %v19464_v6 = vld [vmem:[%s24302_s3 + $0x85c] ss:$12 sps:$4 sm:$0xff]   ;;  %v19462_v61 = vld [vmem:[%s24302_s3 + $0x858] ss:$12 sps:$4 sm:$0xff]  }
 0x42d   : > { %6257 = vmatprep.subr.bf16.mxu0 %v19383_v14  ;;  %6300 = vmatprep.subr.bf16.mxu1 %v19386_v62  ;;  %v5594_v10 = vld [vmem:[#allocation4 + $0x28] sm:$0x3f]  ;;  %v19467_v14 = vld [vmem:[%s24302_s3 + $0x6c4] ss:$12 sps:$4 sm:$0xff]  }
 0x42e   : > { %6330 = vmatprep.mubr.bf16.mxu1 %v21861_v2  ;;  %v19470_v62 = vld [vmem:[%s24302_s3 + $0x844] ss:$12 sps:$4 sm:$0xff]  }
 0x42f   : > { %6258 = vmatpush1.bf16.msra.mxu0 %v19381_v4  ;;  %v5598_v4 = vpack.c.bf16 %v5594_v10, %v5590_v60  ;;  %v19505_v60 = vld [vmem:[%s24302_s3 + $0x9ac] ss:$12 sps:$4 sm:$0xff]  }
 0x430   : > { %6301 = vmatpush1.bf16.msra.mxu1 %v19384_v5  ;;  %6259 = vmatprep.subr.bf16.mxu0 %v19389_v7  ;;  %v5592_v5 = vld [vmem:[#allocation4 + $0x20] sm:$0xfc]  ;;  %v5596_v7 = vld [vmem:[#allocation4 + $0x10] sm:$0x3f] }
 0x431   : > { %6302 = vmatprep.subr.bf16.mxu1 %v19392_v9  ;;  %v19465_v9 = vld [vmem:[%s24302_s3 + $0x6c0] ss:$12 sps:$4 sm:$0xff]  }
 0x433   : > { %6260 = vmatpush1.bf16.msra.mxu0 %v19387_v15  ;;  %v19468_v15 = vld [vmem:[%s24302_s3 + $0x840] ss:$12 sps:$4 sm:$0xff]  }
 0x434   : > { %6303 = vmatpush1.bf16.msra.mxu1 %v19390_v11  ;;  %6261 = vmatprep.subr.bf16.mxu0 %v19395_v12  ;;  %v19471_v11 = vld [vmem:[%s24302_s3 + $0x770] ss:$12 sps:$4 sm:$0xff]   ;;  %v5600_v12 = vpack.c.bf16 %v5596_v7, %v5592_v5  ;;  %v19503_v7 = vld [vmem:[%s24302_s3 + $0x9a8] ss:$12 sps:$4 sm:$0xff]  }
 0x435   : > { %6304 = vmatprep.subr.bf16.mxu1 %v19398_v13  ;;  %v19473_v13 = vld [vmem:[%s24302_s3 + $0x8f0] ss:$12 sps:$4 sm:$0xff]  }
 0x437   : > { %6262 = vmatpush1.bf16.msra.mxu0 %v19393_v19  ;;  %v22046_v19 = vrot.slane %v5598_v4, 1 }
 0x438   : > { %6305 = vmatpush1.bf16.msra.mxu1 %v19396_v20  ;;  %6263 = vmatprep.subr.bf16.mxu0 %v19401_v21  ;;  %v19472_v20 = vld [vmem:[%s24302_s3 + $0x6b0] ss:$12 sps:$4 sm:$0xff]  }
 0x439   : > { %6306 = vmatprep.subr.bf16.mxu1 %v19404_v27  ;;  %v19474_v21 = vld [vmem:[%s24302_s3 + $0x830] ss:$12 sps:$4 sm:$0xff]   ;;  %v22054_v27 = vrot.slane %v5600_v12, 1  ;;  %v19511_v12 = vld [vmem:[%s24302_s3 + $0x994] ss:$12 sps:$4 sm:$0xff]  }
 0x43b   : > { %6264 = vmatpush1.bf16.msra.mxu0 %v19399_v22  ;;  %v19475_v22 = vld [vmem:[%s24302_s3 + $0x758] ss:$12 sps:$4 sm:$0xff]  }
 0x43c   : > { %6307 = vmatpush1.bf16.msra.mxu1 %v19402_v24  ;;  %6265 = vmatprep.subr.bf16.mxu0 %v19407_v44  ;;  %v19477_v24 = vld [vmem:[%s24302_s3 + $0x8d8] ss:$12 sps:$4 sm:$0xff]  }
 0x43d   : > { %6308 = vmatprep.subr.bf16.mxu1 %v19410_v25  ;;  %v19476_v44 = vld [vmem:[%s24302_s3 + $0x698] ss:$12 sps:$4 sm:$0xff]  }
 0x43e   : > { %v19478_v25 = vld [vmem:[%s24302_s3 + $0x818] ss:$12 sps:$4 sm:$0xff]  }
 0x43f   : > { %6266 = vmatpush1.bf16.msra.mxu0 %v19405_v28  ;;  %v19479_v28 = vld [vmem:[%s24302_s3 + $0x740] ss:$12 sps:$4 sm:$0xff]  }
 0x440   : > { %6309 = vmatpush1.bf16.msra.mxu1 %v19408_v29  ;;  %6267 = vmatprep.subr.bf16.mxu0 %v19413_v17  ;;  %v19481_v29 = vld [vmem:[%s24302_s3 + $0x8c0] ss:$12 sps:$4 sm:$0xff]  }
 0x441   : > { %6310 = vmatprep.subr.bf16.mxu1 %v19416_v30  ;;  %v19482_v17 = vld [vmem:[%s24302_s3 + $0x800] ss:$12 sps:$4 sm:$0xff]   ;;  %v19483_v30 = vld [vmem:[%s24302_s3 + $0x728] ss:$12 sps:$4 sm:$0xff]  }
 0x443   : > { %6268 = vmatpush1.bf16.msra.mxu0 %v19411_v31  ;;  %v19484_v31 = vld [vmem:[%s24302_s3 + $0x668] ss:$12 sps:$4 sm:$0xff]  }
 0x444   : > { %6311 = vmatpush1.bf16.msra.mxu1 %v19414_v32  ;;  %6269 = vmatprep.subr.bf16.mxu0 %v19419_v33  ;;  %v19486_v32 = vld [vmem:[%s24302_s3 + $0x7e8] ss:$12 sps:$4 sm:$0xff]   ;;  %v19487_v33 = vld [vmem:[%s24302_s3 + $0x710] ss:$12 sps:$4 sm:$0xff]  }
 0x445   : > { %6312 = vmatprep.subr.bf16.mxu1 %v19422_v34  ;;  %v19489_v34 = vld [vmem:[%s24302_s3 + $0x890] ss:$12 sps:$4 sm:$0xff]  }
 0x447   : > { %6270 = vmatpush1.bf16.msra.mxu0 %v19417_v16  ;;  %v19488_v16 = vld [vmem:[%s24302_s3 + $0x650] ss:$12 sps:$4 sm:$0xff]  }
 0x448   : > { %6313 = vmatpush1.bf16.msra.mxu1 %v19420_v35  ;;  %6271 = vmatprep.subr.bf16.mxu0 %v19425_v36  ;;  %v19490_v35 = vld [vmem:[%s24302_s3 + $0x7d0] ss:$12 sps:$4 sm:$0xff]   ;;  %v19491_v36 = vld [vmem:[%s24302_s3 + $0x6f8] ss:$12 sps:$4 sm:$0xff]  }
 0x449   : > { %6314 = vmatprep.subr.bf16.mxu1 %v19428_v18  ;;  %v19493_v18 = vld [vmem:[%s24302_s3 + $0x878] ss:$12 sps:$4 sm:$0xff]  }
 0x44b   : > { %6272 = vmatpush2.bf16.msra.mxu0 %v19423_v37  ;;  %v6430_v37 = vld [vmem:[#allocation4 + $0x8] sm:$0xf8] }
 0x44c   : > { %6315 = vmatpush2.bf16.msra.mxu1 %v19426_v38  ;;  %6273 = vmatprep.subr.bf16.mxu0 %v19431_v39  ;;  %v6434_v38 = vld [vmem:[#allocation4 + $0x30] sm:$0x7f] }
 0x44d   : > { %6316 = vmatprep.subr.bf16.mxu1 %v19434_v40  ;;  %v19492_v39 = vld [vmem:[%s24302_s3 + $0x638] ss:$12 sps:$4 sm:$0xff]   ;;  %v6432_v40 = vld [vmem:[#allocation4 + $0x18] sm:$0xf8] }
 0x44f   : > { %6274 = vmatpush2.bf16.msra.mxu0 %v19429_v41  ;;  %v6436_v41 = vld [vmem:[#allocation4 + $0x38] sm:$0x7f] }
 0x450   : > { %6317 = vmatpush2.bf16.msra.mxu1 %v19432_v42  ;;  %6275 = vmatprep.subr.bf16.mxu0 %v19437_v43  ;;  %v19494_v43 = vld [vmem:[%s24302_s3 + $0x7b8] ss:$12 sps:$4 sm:$0xff]  }
 0x451   : > { %6318 = vmatprep.subr.bf16.mxu1 %v19440_v45  ;;  %v19495_v45 = vld [vmem:[%s24302_s3 + $0x6e0] ss:$12 sps:$4 sm:$0xff]  }
 0x453   : > { %6276 = vmatpush2.bf16.msra.mxu0 %v19435_v46 }
 0x454   : > { %6319 = vmatpush2.bf16.msra.mxu1 %v19438_v47  ;;  %6277 = vmatprep.subr.bf16.mxu0 %v19443_v48  ;;  %v19497_v47 = vld [vmem:[%s24302_s3 + $0x860] ss:$12 sps:$4 sm:$0xff]   ;;  %v6438_v48 = vpack.c.bf16 %v6434_v38, %v6430_v37 }
 0x455   : > { %6320 = vmatprep.subr.bf16.mxu1 %v19446_v49  ;;  %v6440_v49 = vpack.c.bf16 %v6436_v41, %v6432_v40  ;;  %v19521_v38 = vld [vmem:[%s24302_s3 + $0x960] ss:$12 sps:$4 sm:$0xff]  }
 0x456   : > { %v19524_v40 = vld [vmem:[%s24302_s3 + $0xae0] ss:$12 sps:$4 sm:$0xff]  }
 0x457   : > { %6278 = vmatpush2.bf16.msra.mxu0 %v19441_v8  ;;  %v19496_v8 = vld [vmem:[%s24302_s3 + $0x620] ss:$12 sps:$4 sm:$0xff]  }
 0x458   : > { %6321 = vmatpush2.bf16.msra.mxu1 %v19444_v50  ;;  %6279 = vmatprep.subr.bf16.mxu0 %v19449_v51  ;;  %v19498_v51 = vld [vmem:[%s24302_s3 + $0x7a0] ss:$12 sps:$4 sm:$0xff]  }
 0x459   : > { %6322 = vmatprep.subr.bf16.mxu1 %v19452_v52  ;;  %v19499_v52 = vld [vmem:[%s24302_s3 + $0x6c8] ss:$12 sps:$4 sm:$0xff]   ;;  %v19529_v41 = vld [vmem:[%s24302_s3 + $0x94c] ss:$12 sps:$4 sm:$0xff]  }
 0x45b   : > { %6280 = vmatpush2.bf16.msra.mxu0 %v19447_v53 }
 0x45c   : > { %6323 = vmatpush2.bf16.msra.mxu1 %v19450_v54  ;;  %6281 = vmatprep.subr.bf16.mxu0 %v19455_v55  ;;  %v19501_v54 = vld [vmem:[%s24302_s3 + $0x848] ss:$12 sps:$4 sm:$0xff]   ;;  %v6579_v55 = vshrl.u32 %v6438_v48, 16 }
 0x45d   : > { %6324 = vmatprep.subr.bf16.mxu1 %v19458_v1  ;;  %v6582_v1 = vshll.u32 %v6438_v48, 16  ;;  %v19535_v48 = vld [vmem:[%s24302_s3 + $0x934] ss:$12 sps:$4 sm:$0xff]  }
 0x45f   : > { %6282 = vmatpush2.bf16.msra.mxu0 %v19453_v26  ;;  %v6595_v26 = vshrl.u32 %v6440_v49, 16 }
 0x460   : > { %6325 = vmatpush2.bf16.msra.mxu1 %v19456_v3  ;;  %6283 = vmatprep.subr.bf16.mxu0 %v19461_v58  ;;  %v6598_v3 = vshll.u32 %v6440_v49, 16  ;;  %v19500_v58 = vld [vmem:[%s24302_s3 + $0x608] ss:$12 sps:$4 sm:$0xff]  }
 0x461   : > { %6326 = vmatprep.subr.bf16.mxu1 %v19464_v6  ;;  %v6597_v4 = vrot.slane %v6595_v26, 1  ;;  %v19538_v49 = vld [vmem:[%s24302_s3 + $0xab4] ss:$12 sps:$4 sm:$0xff]   ;;  %v19547_v26 = vld [vmem:[%s24302_s3 + $0x904] ss:$12 sps:$4 sm:$0xff]  }
 0x462   : > { %v6600_v5 = vrot.slane %v6598_v3, 2  ;;  %v19550_v3 = vld [vmem:[%s24302_s3 + $0xa84] ss:$12 sps:$4 sm:$0xff]  }
 0x463   : > { %6284 = vmatpush2.bf16.msra.mxu0 %v19459_v59  ;;  %v19502_v59 = vld [vmem:[%s24302_s3 + $0x788] ss:$12 sps:$4 sm:$0xff]  }
 0x464   : > { %6327 = vmatpush2.bf16.msra.mxu1 %v19462_v61  ;;  %6285 = vmatprep.subr.bf16.mxu0 %v19467_v14  ;;  %v19508_v61 = vld [vmem:[%s24302_s3 + $0xb2c] ss:$12 sps:$4 sm:$0xff]   ;;  %v6581_v14 = vrot.slane %v6579_v55, 1 }
 0x465   : > { %6328 = vmatprep.subr.bf16.mxu1 %v19470_v62  ;;  %v6584_v62 = vrot.slane %v6582_v1, 2  ;;  %v19539_v55 = vld [vmem:[%s24302_s3 + $0x918] ss:$12 sps:$4 sm:$0xff]  }
 0x466   : > { %v19542_v1 = vld [vmem:[%s24302_s3 + $0xa98] ss:$12 sps:$4 sm:$0xff]  }
 0x467   : > { %6286 = vmatpush2.bf16.msra.mxu0 %v19465_v9 }
 0x468   : > { %6329 = vmatpush2.bf16.msra.mxu1 %v19468_v15  ;;  %18317 = vmatprep.subr.bf16.mxu0 %v19471_v11  ;;  %v19506_v15 = vld [vmem:[%s24302_s3 + $0xb28] ss:$12 sps:$4 sm:$0xff]  }
 0x469   : > { %18339 = vmatprep.subr.bf16.mxu1 %v19473_v13  ;;  %v19514_v13 = vld [vmem:[%s24302_s3 + $0xb14] ss:$12 sps:$4 sm:$0xff]  }
 0x46a   : > { %6288 = vmatmul.mubr.bf16.vlgmr.msra.gmra.mxu0 %v22046_v19  ;;  %v22117_v42 = vpop.f32.mrf.mxu0 }
 0x46b   : > { %6331 = vmatmul.mubr.bf16.vlgmr.msra.gmra.mxu1 %v22054_v27  ;;  %18318 = vmatpush3.bf16.msra.mxu0 %v19472_v20  ;;  %v22125_v46 = vpop.f32.mrf.mxu1 }
 0x46c   : > { %6373 = vmatprep.mubr.bf16.mxu0 %v21859_v63  ;;  %18340 = vmatpush3.bf16.msra.mxu1 %v19474_v21  ;;  %v19480_v63 = vld [vmem:[%s24302_s3 + $0x680] ss:$12 sps:$4 sm:$0xff]   ;;  %v22133_v50 = vpop.f32.mrf.mxu0  ;;  %v22179_v21 = vor.u32 %v6584_v62, %v6581_v14  ;;  %v19551_v14 = vld [vmem:[%s24302_s3 + $0xa68] ss:$12 sps:$4 sm:$0xff]  }
 0x46d   : > { %18319 = vmatprep.subr.bf16.mxu0 %v19475_v22  ;;  %18341 = vmatprep.subr.bf16.mxu1 %v19477_v24  ;;  %v22141_v53 = vpop.f32.mrf.mxu1  ;;  %v22181_v22 = vor.u32 %v6600_v5, %v6597_v4  ;;  %v19554_v62 = vld [vmem:[%s24302_s3 + $0xbe8] ss:$12 sps:$4 sm:$0xff]  }
 0x46e   : > { %6414 = vmatprep.mubr.bf16.mxu1 %v21861_v2  ;;  %v19485_v2 = vld [vmem:[%s24302_s3 + $0x8a8] ss:$12 sps:$4 sm:$0xff]   ;;  %v22149_v6 = vpop.f32.mrf.mxu0 }
 0x46f   : > { %18320 = vmatpush3.bf16.msra.mxu0 %v19476_v44  ;;  %v22157_v10 = vpop.f32.mrf.mxu1  ;;  %v19509_v44 = vld [vmem:[%s24302_s3 + $0x990] ss:$12 sps:$4 sm:$0xff]   ;;  %v19559_v4 = vld [vmem:[%s24302_s3 + $0xa54] ss:$12 sps:$4 sm:$0xff]  }
 0x470   : > { %18342 = vmatpush3.bf16.msra.mxu1 %v19478_v25  ;;  %18321 = vmatprep.subr.bf16.mxu0 %v19479_v28  ;;  %v22165_v9 = vpop.f32.mrf.mxu0  ;;  %v19517_v28 = vld [vmem:[%s24302_s3 + $0x97c] ss:$12 sps:$4 sm:$0xff]   ;;  %v19562_v5 = vld [vmem:[%s24302_s3 + $0xbd4] ss:$12 sps:$4 sm:$0xff]  }
 0x471   : > { %18343 = vmatprep.subr.bf16.mxu1 %v19481_v29  ;;  %v22170_v11 = vpop.f32.mrf.mxu1 }
 0x473   : > { %18322 = vmatpush3.bf16.msra.mxu0 %v19480_v63 }
 0x474   : > { %18344 = vmatpush3.bf16.msra.mxu1 %v19482_v17  ;;  %18323 = vmatprep.subr.bf16.mxu0 %v19483_v30 }
 0x475   : > { %18345 = vmatprep.subr.bf16.mxu1 %v19485_v2 }
 0x477   : > { %18324 = vmatpush3.bf16.msra.mxu0 %v19484_v31  ;;  %v19515_v31 = vld [vmem:[%s24302_s3 + $0x978] ss:$12 sps:$4 sm:$0xff]  }
 0x478   : > { %18346 = vmatpush3.bf16.msra.mxu1 %v19486_v32  ;;  %18325 = vmatprep.subr.bf16.mxu0 %v19487_v33 }
 0x479   : > { %18347 = vmatprep.subr.bf16.mxu1 %v19489_v34  ;;  %v19518_v34 = vld [vmem:[%s24302_s3 + $0xaf8] ss:$12 sps:$4 sm:$0xff]  }
 0x47b   : > { %18326 = vmatpush3.bf16.msra.mxu0 %v19488_v16  ;;  %v19523_v16 = vld [vmem:[%s24302_s3 + $0x964] ss:$12 sps:$4 sm:$0xff]  }
 0x47c   : > { %18348 = vmatpush3.bf16.msra.mxu1 %v19490_v35  ;;  %18327 = vmatprep.subr.bf16.mxu0 %v19491_v36 }
 0x47d   : > { %18349 = vmatprep.subr.bf16.mxu1 %v19493_v18  ;;  %v19526_v18 = vld [vmem:[%s24302_s3 + $0xae4] ss:$12 sps:$4 sm:$0xff]  }
 0x47f   : > { %18328 = vmatpush3.bf16.msra.mxu0 %v19492_v39 }
 0x480   : > { %18350 = vmatpush3.bf16.msra.mxu1 %v19494_v43  ;;  %18329 = vmatprep.subr.bf16.mxu0 %v19495_v45  ;;  %v19532_v43 = vld [vmem:[%s24302_s3 + $0xacc] ss:$12 sps:$4 sm:$0xff]   ;;  %v19527_v45 = vld [vmem:[%s24302_s3 + $0x948] ss:$12 sps:$4 sm:$0xff]  }
 0x481   : > { %18351 = vmatprep.subr.bf16.mxu1 %v19497_v47  ;;  %v19530_v47 = vld [vmem:[%s24302_s3 + $0xac8] ss:$12 sps:$4 sm:$0xff]  }
 0x483   : > { %18330 = vmatpush3.bf16.msra.mxu0 %v19496_v8  ;;  %v19533_v8 = vld [vmem:[%s24302_s3 + $0x930] ss:$12 sps:$4 sm:$0xff]  }
 0x484   : > { %18352 = vmatpush3.bf16.msra.mxu1 %v19498_v51  ;;  %18331 = vmatprep.subr.bf16.mxu0 %v19499_v52  ;;  %v19536_v51 = vld [vmem:[%s24302_s3 + $0xab0] ss:$12 sps:$4 sm:$0xff]  }
 0x485   : > { %18353 = vmatprep.subr.bf16.mxu1 %v19501_v54  ;;  %v19541_v52 = vld [vmem:[%s24302_s3 + $0x91c] ss:$12 sps:$4 sm:$0xff]  }
 0x486   : > { %v19544_v54 = vld [vmem:[%s24302_s3 + $0xa9c] ss:$12 sps:$4 sm:$0xff]  }
 0x487   : > { %18332 = vmatpush3.bf16.msra.mxu0 %v19500_v58  ;;  %v19545_v58 = vld [vmem:[%s24302_s3 + $0x900] ss:$12 sps:$4 sm:$0xff]  }
 0x488   : > { %18354 = vmatpush3.bf16.msra.mxu1 %v19502_v59  ;;  %7118 = vmatprep.subr.bf16.mxu0 %v19505_v60  ;;  %v19548_v59 = vld [vmem:[%s24302_s3 + $0xa80] ss:$12 sps:$4 sm:$0xff]  }
 0x489   : > { %7161 = vmatprep.subr.bf16.mxu1 %v19508_v61  ;;  %v19553_v60 = vld [vmem:[%s24302_s3 + $0xa6c] ss:$12 sps:$4 sm:$0xff]  }
 0x48a   : > { %v18245_v20 = vpop.f32.mrf.mxu0  ;;  %6374 = vmatmul.mubr.bf16.vlgmr.msra.gmra.mxu0 %v22046_v19  ;;  %v19512_v19 = vld [vmem:[%s24302_s3 + $0xb10] ss:$12 sps:$4 sm:$0xff]   ;;  %v19556_v61 = vld [vmem:[%s24302_s3 + $0xbec] ss:$12 sps:$4 sm:$0xff]  }
 0x48b   : > { %v18267_v24 = vpop.f32.mrf.mxu1  ;;  %6415 = vmatmul.mubr.bf16.vlgmr.msra.gmra.mxu1 %v22054_v27  ;;  %7119 = vmatpush1.bf16.msra.mxu0 %v19503_v7  ;;  %v19520_v27 = vld [vmem:[%s24302_s3 + $0xafc] ss:$12 sps:$4 sm:$0xff]  }
 0x48c   : > { %7150 = vmatprep.mubr.bf16.mxu0 %v22179_v21  ;;  %v18246_v25 = vpop.f32.mrf.mxu0  ;;  %7162 = vmatpush1.bf16.msra.mxu1 %v19506_v15  ;;  %v19557_v7 = vld [vmem:[%s24302_s3 + $0xa50] ss:$12 sps:$4 sm:$0xff]  }
 0x48d   : > { %v18247_v29 = vadd.f32 %v18246_v25, %v18245_v20  ;;  %v18268_v63 = vpop.f32.mrf.mxu1  ;;  %7120 = vmatprep.subr.bf16.mxu0 %v19511_v12  ;;  %7163 = vmatprep.subr.bf16.mxu1 %v19514_v13  ;;  %v19560_v15 = vld [vmem:[%s24302_s3 + $0xbd0] ss:$12 sps:$4 sm:$0xff]   ;;  %v19563_v20 = vld [vmem:[%s24302_s3 + $0xa38] ss:$12 sps:$4 sm:$0xff]  }
 0x48e   : > { %v18269_v17 = vadd.f32 %v18268_v63, %v18267_v24  ;;  %v18248_v30 = vpop.f32.mrf.mxu0  ;;  %7193 = vmatprep.mubr.bf16.mxu1 %v22181_v22  ;;  %v19565_v12 = vld [vmem:[%s24302_s3 + $0xa3c] ss:$12 sps:$4 sm:$0xff]   ;;  %v19566_v24 = vld [vmem:[%s24302_s3 + $0xbb8] ss:$12 sps:$4 sm:$0xff]  }
 0x48f   : > { %v18270_v2 = vpop.f32.mrf.mxu1  ;;  %7121 = vmatpush1.bf16.msra.mxu0 %v19509_v44  ;;  %v19568_v13 = vld [vmem:[%s24302_s3 + $0xbbc] ss:$12 sps:$4 sm:$0xff]   ;;  %v19571_v44 = vld [vmem:[%s24302_s3 + $0xa24] ss:$12 sps:$4 sm:$0xff]   ;;  %v19580_v63 = vld [vmem:[%s24302_s3 + $0xb8c] ss:$12 sps:$4 sm:$0xff]  }
 0x490   : > { %v22201_v32 = vadd.f32 %v18269_v17, %v18247_v29  ;;  %v18249_v33 = vpop.f32.mrf.mxu0  ;;  %7164 = vmatpush1.bf16.msra.mxu1 %v19512_v19  ;;  %7122 = vmatprep.subr.bf16.mxu0 %v19517_v28  ;;  %v19574_v25 = vld [vmem:[%s24302_s3 + $0xba4] ss:$12 sps:$4 sm:$0xff]   ;;  %v19569_v19 = vld [vmem:[%s24302_s3 + $0xa20] ss:$12 sps:$4 sm:$0xff]  }
 0x491   : > { %v18250_v35 = vadd.f32 %v18249_v33, %v18248_v30  ;;  %v18271_v36 = vpop.f32.mrf.mxu1  ;;  %7165 = vmatprep.subr.bf16.mxu1 %v19520_v27  ;;  %v19572_v28 = vld [vmem:[%s24302_s3 + $0xba0] ss:$12 sps:$4 sm:$0xff]   ;;  %v19575_v27 = vld [vmem:[%s24302_s3 + $0xa08] ss:$12 sps:$4 sm:$0xff]   ;;  %v6433_v30 = vld [vmem:[#allocation4 + $0x28] sm:$0x7f] }
 0x492   : > { %v18272_v37 = vadd.f32 %v18271_v36, %v18270_v2  ;;  %v19577_v29 = vld [vmem:[%s24302_s3 + $0xa0c] ss:$12 sps:$4 sm:$0xff]   ;;  %v6429_v17 = vld [vmem:[#allocation4] sm:$0xf8] }
 0x493   : > { %7123 = vmatpush1.bf16.msra.mxu0 %v19515_v31  ;;  %v19578_v2 = vld [vmem:[%s24302_s3 + $0xb88] ss:$12 sps:$4 sm:$0xff]   ;;  %v19581_v36 = vld [vmem:[%s24302_s3 + $0x9f0] ss:$12 sps:$4 sm:$0xff]  }
 0x494   : > { %v22215_v39 = vadd.f32 %v18272_v37, %v18250_v35  ;;  %7166 = vmatpush1.bf16.msra.mxu1 %v19518_v34  ;;  %7124 = vmatprep.subr.bf16.mxu0 %v19523_v16  ;;  %v19583_v31 = vld [vmem:[%s24302_s3 + $0x9f4] ss:$12 sps:$4 sm:$0xff]   ;;  %v6437_v34 = vpack.c.bf16 %v6433_v30, %v6429_v17  ;;  %v19589_v37 = vld [vmem:[%s24302_s3 + $0x9dc] ss:$12 sps:$4 sm:$0xff]   ;;  %v19621_v17 = vld [vmem:[%s24302_s3 + $0xb78] ss:$12 sps:$4 sm:$0xff]  }
 0x495   : > { %7167 = vmatprep.subr.bf16.mxu1 %v19526_v18  ;;  %v19586_v33 = vld [vmem:[%s24302_s3 + $0xb74] ss:$12 sps:$4 sm:$0xff]   ;;  %v19584_v18 = vld [vmem:[%s24302_s3 + $0xb70] ss:$12 sps:$4 sm:$0xff]   ;;  %v19620_v30 = vld [vmem:[%s24302_s3 + $0x938] ss:$12 sps:$4 sm:$0xff]  }
 0x496   : > { %v6431_v16 = vld [vmem:[#allocation4 + $0x20] sm:$0xf8]  ;;  %v6435_v35 = vld [vmem:[#allocation4 + $0x10] sm:$0x7f] }
 0x497   : > { %7125 = vmatpush1.bf16.msra.mxu0 %v19521_v38  ;;  %v19592_v38 = vld [vmem:[%s24302_s3 + $0xb5c] ss:$12 sps:$4 sm:$0xff]  }
 0x498   : > { %7168 = vmatpush1.bf16.msra.mxu1 %v19524_v40  ;;  %7126 = vmatprep.subr.bf16.mxu0 %v19529_v41  ;;  %v6439_v40 = vpack.c.bf16 %v6435_v35, %v6431_v16  ;;  %v6571_v41 = vshrl.u32 %v6437_v34, 16  ;;  %v19625_v16 = vld [vmem:[%s24302_s3 + $0xb60] ss:$12 sps:$4 sm:$0xff]  }
 0x499   : > { %7169 = vmatprep.subr.bf16.mxu1 %v19532_v43  ;;  %v6574_v43 = vshll.u32 %v6437_v34, 16  ;;  %v19624_v35 = vld [vmem:[%s24302_s3 + $0x920] ss:$12 sps:$4 sm:$0xff]  }
 0x49b   : > { %7127 = vmatpush1.bf16.msra.mxu0 %v19527_v45  ;;  %v19587_v45 = vld [vmem:[%s24302_s3 + $0x9d8] ss:$12 sps:$4 sm:$0xff]  }
 0x49c   : > { %7170 = vmatpush1.bf16.msra.mxu1 %v19530_v47  ;;  %7128 = vmatprep.subr.bf16.mxu0 %v19535_v48  ;;  %v19590_v47 = vld [vmem:[%s24302_s3 + $0xb58] ss:$12 sps:$4 sm:$0xff]  }
 0x49d   : > { %7171 = vmatprep.subr.bf16.mxu1 %v19538_v49  ;;  %v19595_v48 = vld [vmem:[%s24302_s3 + $0x9c4] ss:$12 sps:$4 sm:$0xff]  }
 0x49e   : > { %v19598_v49 = vld [vmem:[%s24302_s3 + $0xb44] ss:$12 sps:$4 sm:$0xff]  }
 0x49f   : > { %7129 = vmatpush1.bf16.msra.mxu0 %v19533_v8  ;;  %v6587_v8 = vshrl.u32 %v6439_v40, 16 }
 0x4a0   : > { %7172 = vmatpush1.bf16.msra.mxu1 %v19536_v51  ;;  %7130 = vmatprep.subr.bf16.mxu0 %v19541_v52  ;;  %v6590_v51 = vshll.u32 %v6439_v40, 16  ;;  %v6573_v52 = vrot.slane %v6571_v41, 1  ;;  %v19629_v40 = vld [vmem:[%s24302_s3 + $0xb48] ss:$12 sps:$4 sm:$0xff]   ;;  %v7297_v41 = vld [vmem:[#allocation4 + $0x30] sm:$0xff] }
 0x4a1   : > { %7173 = vmatprep.subr.bf16.mxu1 %v19544_v54  ;;  %v6576_v54 = vrot.slane %v6574_v43, 2  ;;  %v19628_v43 = vld [vmem:[%s24302_s3 + $0x908] ss:$12 sps:$4 sm:$0xff]  }
 0x4a3   : > { %7131 = vmatpush1.bf16.msra.mxu0 %v19539_v55  ;;  %v19593_v55 = vld [vmem:[%s24302_s3 + $0x9c0] ss:$12 sps:$4 sm:$0xff]  }
 0x4a4   : > { %7174 = vmatpush1.bf16.msra.mxu1 %v19542_v1  ;;  %7132 = vmatprep.subr.bf16.mxu0 %v19547_v26  ;;  %v19596_v1 = vld [vmem:[%s24302_s3 + $0xb40] ss:$12 sps:$4 sm:$0xff]   ;;  %v19599_v26 = vld [vmem:[%s24302_s3 + $0xa70] ss:$12 sps:$4 sm:$0xff]  }
 0x4a5   : > { %7175 = vmatprep.subr.bf16.mxu1 %v19550_v3  ;;  %v6589_v3 = vrot.slane %v6587_v8, 1  ;;  %v19633_v8 = vld [vmem:[%s24302_s3 + $0xcac] ss:$12 sps:$4 sm:$0xff]  }
 0x4a7   : > { %7133 = vmatpush1.bf16.msra.mxu0 %v19545_v58  ;;  %v6592_v58 = vrot.slane %v6590_v51, 2 }
 0x4a8   : > { %7176 = vmatpush1.bf16.msra.mxu1 %v19548_v59  ;;  %7134 = vmatprep.subr.bf16.mxu0 %v19553_v60  ;;  %v19601_v59 = vld [vmem:[%s24302_s3 + $0xbf0] ss:$12 sps:$4 sm:$0xff]   ;;  %v22370_v60 = vor.u32 %v6576_v54, %v6573_v52  ;;  %v19636_v52 = vld [vmem:[%s24302_s3 + $0xe2c] ss:$12 sps:$4 sm:$0xff]  }
 0x4a9   : > { %7177 = vmatprep.subr.bf16.mxu1 %v19556_v61  ;;  %v19600_v61 = vld [vmem:[%s24302_s3 + $0x9b0] ss:$12 sps:$4 sm:$0xff]  }
 0x4ab   : > { %7135 = vmatpush2.bf16.msra.mxu0 %v19551_v14  ;;  %v19602_v14 = vld [vmem:[%s24302_s3 + $0xb30] ss:$12 sps:$4 sm:$0xff]  }
 0x4ac   : > { %7178 = vmatpush2.bf16.msra.mxu1 %v19554_v62  ;;  %7136 = vmatprep.subr.bf16.mxu0 %v19559_v4  ;;  %v22378_v62 = vor.u32 %v6592_v58, %v6589_v3  ;;  %v19603_v4 = vld [vmem:[%s24302_s3 + $0xa58] ss:$12 sps:$4 sm:$0xff]   ;;  %v19634_v58 = vld [vmem:[%s24302_s3 + $0xe28] ss:$12 sps:$4 sm:$0xff]  }
 0x4ad   : > { %7179 = vmatprep.subr.bf16.mxu1 %v19562_v5  ;;  %v19605_v5 = vld [vmem:[%s24302_s3 + $0xbd8] ss:$12 sps:$4 sm:$0xff]  }
 0x4af   : > { %7137 = vmatpush2.bf16.msra.mxu0 %v19557_v7  ;;  %v19604_v7 = vld [vmem:[%s24302_s3 + $0x998] ss:$12 sps:$4 sm:$0xff]  }
 0x4b0   : > { %7180 = vmatpush2.bf16.msra.mxu1 %v19560_v15  ;;  %7138 = vmatprep.subr.bf16.mxu0 %v19565_v12  ;;  %v19606_v15 = vld [vmem:[%s24302_s3 + $0xb18] ss:$12 sps:$4 sm:$0xff]   ;;  %v19607_v12 = vld [vmem:[%s24302_s3 + $0xa40] ss:$12 sps:$4 sm:$0xff]  }
 0x4b1   : > { %7181 = vmatprep.subr.bf16.mxu1 %v19568_v13  ;;  %v19609_v13 = vld [vmem:[%s24302_s3 + $0xbc0] ss:$12 sps:$4 sm:$0xff]  }
 0x4b3   : > { %7139 = vmatpush2.bf16.msra.mxu0 %v19563_v20  ;;  %v19610_v20 = vld [vmem:[%s24302_s3 + $0xb00] ss:$12 sps:$4 sm:$0xff]  }
 0x4b4   : > { %7182 = vmatpush2.bf16.msra.mxu1 %v19566_v24  ;;  %7140 = vmatprep.subr.bf16.mxu0 %v19571_v44  ;;  %v19611_v24 = vld [vmem:[%s24302_s3 + $0xa28] ss:$12 sps:$4 sm:$0xff]  }
 0x4b5   : > { %7183 = vmatprep.subr.bf16.mxu1 %v19574_v25  ;;  %v19612_v44 = vld [vmem:[%s24302_s3 + $0x968] ss:$12 sps:$4 sm:$0xff]  }
 0x4b6   : > { %v19614_v25 = vld [vmem:[%s24302_s3 + $0xae8] ss:$12 sps:$4 sm:$0xff]  }
 0x4b7   : > { %7141 = vmatpush2.bf16.msra.mxu0 %v19569_v19  ;;  %v19615_v19 = vld [vmem:[%s24302_s3 + $0xa10] ss:$12 sps:$4 sm:$0xff]  }
 0x4b8   : > { %7184 = vmatpush2.bf16.msra.mxu1 %v19572_v28  ;;  %7142 = vmatprep.subr.bf16.mxu0 %v19577_v29  ;;  %v19617_v28 = vld [vmem:[%s24302_s3 + $0xb90] ss:$12 sps:$4 sm:$0xff]  }
 0x4b9   : > { %7185 = vmatprep.subr.bf16.mxu1 %v19580_v63  ;;  %v19616_v29 = vld [vmem:[%s24302_s3 + $0x950] ss:$12 sps:$4 sm:$0xff]  }
 0x4ba   : > { %v19618_v63 = vld [vmem:[%s24302_s3 + $0xad0] ss:$12 sps:$4 sm:$0xff]  }
 0x4bb   : > { %7143 = vmatpush2.bf16.msra.mxu0 %v19575_v27  ;;  %v19619_v27 = vld [vmem:[%s24302_s3 + $0x9f8] ss:$12 sps:$4 sm:$0xff]  }
 0x4bc   : > { %7186 = vmatpush2.bf16.msra.mxu1 %v19578_v2  ;;  %7144 = vmatprep.subr.bf16.mxu0 %v19583_v31  ;;  %v19622_v31 = vld [vmem:[%s24302_s3 + $0xab8] ss:$12 sps:$4 sm:$0xff]  }
 0x4bd   : > { %7187 = vmatprep.subr.bf16.mxu1 %v19586_v33  ;;  %v19623_v33 = vld [vmem:[%s24302_s3 + $0x9e0] ss:$12 sps:$4 sm:$0xff]  }
 0x4bf   : > { %7145 = vmatpush2.bf16.msra.mxu0 %v19581_v36 }
 0x4c0   : > { %7188 = vmatpush2.bf16.msra.mxu1 %v19584_v18  ;;  %7146 = vmatprep.subr.bf16.mxu0 %v19589_v37  ;;  %v19626_v18 = vld [vmem:[%s24302_s3 + $0xaa0] ss:$12 sps:$4 sm:$0xff]   ;;  %v19627_v37 = vld [vmem:[%s24302_s3 + $0x9c8] ss:$12 sps:$4 sm:$0xff]  }
 0x4c1   : > { %7189 = vmatprep.subr.bf16.mxu1 %v19592_v38 }
 0x4c3   : > { %7147 = vmatpush2.bf16.msra.mxu0 %v19587_v45  ;;  %v7293_v45 = vld [vmem:[#allocation4 + $0x8] sm:$0xf0] }
 0x4c4   : > { %7190 = vmatpush2.bf16.msra.mxu1 %v19590_v47  ;;  %7148 = vmatprep.subr.bf16.mxu0 %v19595_v48  ;;  %v7295_v47 = vld [vmem:[#allocation4 + $0x18] sm:$0xf0]  ;;  %v7301_v54 = vpack.c.bf16 %v7297_v41, %v7293_v45  ;;  %v19655_v41 = vld [vmem:[%s24302_s3 + $0xc48] ss:$12 sps:$4 sm:$0xff]  }
 0x4c5   : > { %7191 = vmatprep.subr.bf16.mxu1 %v19598_v49  ;;  %v19630_v49 = vld [vmem:[%s24302_s3 + $0xa88] ss:$12 sps:$4 sm:$0xff]  }
 0x4c6   : > { %v19663_v45 = vld [vmem:[%s24302_s3 + $0xc34] ss:$12 sps:$4 sm:$0xff]  }
 0x4c7   : > { %7149 = vmatpush2.bf16.msra.mxu0 %v19593_v55  ;;  %v22486_v55 = vld [vmem:[#allocation3 + $0x28] sm:$0xff] }
 0x4c8   : > { %7192 = vmatpush2.bf16.msra.mxu1 %v19596_v1  ;;  %18361 = vmatprep.subr.bf16.mxu0 %v19599_v26  ;;  %v7303_v1 = vpack.c.bf16 %v22486_v55, %v7295_v47  ;;  %v19631_v26 = vld [vmem:[%s24302_s3 + $0xca8] ss:$12 sps:$4 sm:$0xff]  }
 0x4c9   : > { %18383 = vmatprep.subr.bf16.mxu1 %v19601_v59  ;;  %v19666_v47 = vld [vmem:[%s24302_s3 + $0xdb4] ss:$12 sps:$4 sm:$0xff]  }
 0x4ca   : > { %7151 = vmatmul.mubr.bf16.vlgmr.msra.gmra.mxu0 %v22370_v60  ;;  %v22441_v2 = vpop.f32.mrf.mxu0 }
 0x4cb   : > { %7194 = vmatmul.mubr.bf16.vlgmr.msra.gmra.mxu1 %v22378_v62  ;;  %18362 = vmatpush3.bf16.msra.mxu0 %v19600_v61  ;;  %v22449_v34 = vpop.f32.mrf.mxu1  ;;  %v19639_v61 = vld [vmem:[%s24302_s3 + $0xc94] ss:$12 sps:$4 sm:$0xff]  }
 0x4cc   : > { %7236 = vmatprep.mubr.bf16.mxu0 %v22179_v21  ;;  %18384 = vmatpush3.bf16.msra.mxu1 %v19602_v14  ;;  %v19608_v21 = vld [vmem:[%s24302_s3 + $0x980] ss:$12 sps:$4 sm:$0xff]   ;;  %v22457_v36 = vpop.f32.mrf.mxu0 }
 0x4cd   : > { %18363 = vmatprep.subr.bf16.mxu0 %v19603_v4  ;;  %18385 = vmatprep.subr.bf16.mxu1 %v19605_v5  ;;  %v22465_v38 = vpop.f32.mrf.mxu1  ;;  %v19642_v14 = vld [vmem:[%s24302_s3 + $0xe14] ss:$12 sps:$4 sm:$0xff]   ;;  %v22506_v5 = vrot.slane %v7301_v54, 2  ;;  %v19672_v54 = vld [vmem:[%s24302_s3 + $0xd9c] ss:$12 sps:$4 sm:$0xff]  }
 0x4ce   : > { %7277 = vmatprep.mubr.bf16.mxu1 %v22181_v22  ;;  %v19613_v22 = vld [vmem:[%s24302_s3 + $0xba8] ss:$12 sps:$4 sm:$0xff]   ;;  %v22473_v48 = vpop.f32.mrf.mxu0 }
 0x4cf   : > { %18364 = vmatpush3.bf16.msra.mxu0 %v19604_v7  ;;  %v22481_v51 = vpop.f32.mrf.mxu1  ;;  %v22508_v7 = vrot.slane %v7303_v1, 2  ;;  %v19667_v1 = vld [vmem:[%s24302_s3 + $0xc18] ss:$12 sps:$4 sm:$0xff]  }
 0x4d0   : > { %18386 = vmatpush3.bf16.msra.mxu1 %v19606_v15  ;;  %18365 = vmatprep.subr.bf16.mxu0 %v19607_v12  ;;  %v22492_v3 = vpop.f32.mrf.mxu0  ;;  %v19637_v12 = vld [vmem:[%s24302_s3 + $0xc90] ss:$12 sps:$4 sm:$0xff]  }
 0x4d1   : > { %18387 = vmatprep.subr.bf16.mxu1 %v19609_v13  ;;  %v22497_v59 = vpop.f32.mrf.mxu1 }
 0x4d3   : > { %18366 = vmatpush3.bf16.msra.mxu0 %v19608_v21  ;;  %v19645_v21 = vld [vmem:[%s24302_s3 + $0xc7c] ss:$12 sps:$4 sm:$0xff]  }
 0x4d4   : > { %18388 = vmatpush3.bf16.msra.mxu1 %v19610_v20  ;;  %18367 = vmatprep.subr.bf16.mxu0 %v19611_v24 }
 0x4d5   : > { %18389 = vmatprep.subr.bf16.mxu1 %v19613_v22 }
 0x4d7   : > { %18368 = vmatpush3.bf16.msra.mxu0 %v19612_v44 }
 0x4d8   : > { %18390 = vmatpush3.bf16.msra.mxu1 %v19614_v25  ;;  %18369 = vmatprep.subr.bf16.mxu0 %v19615_v19 }
 0x4d9   : > { %18391 = vmatprep.subr.bf16.mxu1 %v19617_v28  ;;  %v19643_v28 = vld [vmem:[%s24302_s3 + $0xc78] ss:$12 sps:$4 sm:$0xff]  }
 0x4db   : > { %18370 = vmatpush3.bf16.msra.mxu0 %v19616_v29 }
 0x4dc   : > { %18392 = vmatpush3.bf16.msra.mxu1 %v19618_v63  ;;  %18371 = vmatprep.subr.bf16.mxu0 %v19619_v27  ;;  %v19646_v63 = vld [vmem:[%s24302_s3 + $0xdf8] ss:$12 sps:$4 sm:$0xff]  }
 0x4dd   : > { %18393 = vmatprep.subr.bf16.mxu1 %v19621_v17  ;;  %v19651_v27 = vld [vmem:[%s24302_s3 + $0xc64] ss:$12 sps:$4 sm:$0xff]  }
 0x4df   : > { %18372 = vmatpush3.bf16.msra.mxu0 %v19620_v30 }
 0x4e0   : > { %18394 = vmatpush3.bf16.msra.mxu1 %v19622_v31  ;;  %18373 = vmatprep.subr.bf16.mxu0 %v19623_v33  ;;  %v19654_v31 = vld [vmem:[%s24302_s3 + $0xde4] ss:$12 sps:$4 sm:$0xff]  }
 0x4e1   : > { %18395 = vmatprep.subr.bf16.mxu1 %v19625_v16 }
 0x4e3   : > { %18374 = vmatpush3.bf16.msra.mxu0 %v19624_v35  ;;  %v19649_v35 = vld [vmem:[%s24302_s3 + $0xc60] ss:$12 sps:$4 sm:$0xff]  }
 0x4e4   : > { %18396 = vmatpush3.bf16.msra.mxu1 %v19626_v18  ;;  %18375 = vmatprep.subr.bf16.mxu0 %v19627_v37  ;;  %v19652_v18 = vld [vmem:[%s24302_s3 + $0xde0] ss:$12 sps:$4 sm:$0xff]  }
 0x4e5   : > { %18397 = vmatprep.subr.bf16.mxu1 %v19629_v40  ;;  %v19657_v37 = vld [vmem:[%s24302_s3 + $0xc4c] ss:$12 sps:$4 sm:$0xff]  }
 0x4e7   : > { %18376 = vmatpush3.bf16.msra.mxu0 %v19628_v43  ;;  %v19658_v43 = vld [vmem:[%s24302_s3 + $0xdc8] ss:$12 sps:$4 sm:$0xff]  }
 0x4e8   : > { %18398 = vmatpush3.bf16.msra.mxu1 %v19630_v49  ;;  %7957 = vmatprep.subr.bf16.mxu0 %v19633_v8  ;;  %v19661_v49 = vld [vmem:[%s24302_s3 + $0xc30] ss:$12 sps:$4 sm:$0xff]  }
 0x4e9   : > { %8000 = vmatprep.subr.bf16.mxu1 %v19636_v52  ;;  %v19664_v8 = vld [vmem:[%s24302_s3 + $0xdb0] ss:$12 sps:$4 sm:$0xff]  }
 0x4ea   : > { %v18289_v4 = vpop.f32.mrf.mxu0  ;;  %7237 = vmatmul.mubr.bf16.vlgmr.msra.gmra.mxu0 %v22370_v60  ;;  %v19640_v60 = vld [vmem:[%s24302_s3 + $0xe10] ss:$12 sps:$4 sm:$0xff]  }
 0x4eb   : > { %v18311_v15 = vpop.f32.mrf.mxu1  ;;  %7278 = vmatmul.mubr.bf16.vlgmr.msra.gmra.mxu1 %v22378_v62  ;;  %7958 = vmatpush1.bf16.msra.mxu0 %v19631_v26  ;;  %v19648_v62 = vld [vmem:[%s24302_s3 + $0xdfc] ss:$12 sps:$4 sm:$0xff]   ;;  %v19670_v26 = vld [vmem:[%s24302_s3 + $0xd98] ss:$12 sps:$4 sm:$0xff]  }
 0x4ec   : > { %7989 = vmatprep.mubr.bf16.mxu0 %v22506_v5  ;;  %v18290_v13 = vpop.f32.mrf.mxu0  ;;  %8001 = vmatpush1.bf16.msra.mxu1 %v19634_v58  ;;  %v19669_v52 = vld [vmem:[%s24302_s3 + $0xc1c] ss:$12 sps:$4 sm:$0xff]   ;;  %v19675_v58 = vld [vmem:[%s24302_s3 + $0xc04] ss:$12 sps:$4 sm:$0xff]  }
 0x4ed   : > { %v18291_v20 = vadd.f32 %v18290_v13, %v18289_v4  ;;  %v18312_v24 = vpop.f32.mrf.mxu1  ;;  %7959 = vmatprep.subr.bf16.mxu0 %v19639_v61  ;;  %8002 = vmatprep.subr.bf16.mxu1 %v19642_v14  ;;  %v19678_v61 = vld [vmem:[%s24302_s3 + $0xd84] ss:$12 sps:$4 sm:$0xff]   ;;  %v19673_v14 = vld [vmem:[%s24302_s3 + $0xc00] ss:$12 sps:$4 sm:$0xff]   ;;  %v19679_v13 = vld [vmem:[%s24302_s3 + $0xd68] ss:$12 sps:$4 sm:$0xff]  }
 0x4ee   : > { %v18313_v22 = vadd.f32 %v18312_v24, %v18311_v15  ;;  %v18292_v44 = vpop.f32.mrf.mxu0  ;;  %8032 = vmatprep.mubr.bf16.mxu1 %v22508_v7  ;;  %v19676_v4 = vld [vmem:[%s24302_s3 + $0xd80] ss:$12 sps:$4 sm:$0xff]   ;;  %v19685_v24 = vld [vmem:[%s24302_s3 + $0xd50] ss:$12 sps:$4 sm:$0xff]  }
 0x4ef   : > { %v5543_v25 = vadd.f32 %v18291_v20, %v22201_v32  ;;  %v18314_v19 = vpop.f32.mrf.mxu1  ;;  %7960 = vmatpush1.bf16.msra.mxu0 %v19637_v12  ;;  %v19681_v15 = vld [vmem:[%s24302_s3 + $0xd6c] ss:$12 sps:$4 sm:$0xff]   ;;  %v19690_v20 = vld [vmem:[%s24302_s3 + $0xed4] ss:$12 sps:$4 sm:$0xff]  }
 0x4f0   : > { %v18293_v29 = vpop.f32.mrf.mxu0  ;;  %8003 = vmatpush1.bf16.msra.mxu1 %v19640_v60  ;;  %7961 = vmatprep.subr.bf16.mxu0 %v19645_v21  ;;  %v19684_v12 = vld [vmem:[%s24302_s3 + $0xeec] ss:$12 sps:$4 sm:$0xff]   ;;  %v19682_v60 = vld [vmem:[%s24302_s3 + $0xee8] ss:$12 sps:$4 sm:$0xff]  }
 0x4f1   : > { %v22535_v17 = vadd.f32 %v18313_v22, %v5543_v25  ;;  %v18294_v32 = vadd.f32 %v18293_v29, %v18292_v44  ;;  %v18315_v30 = vpop.f32.mrf.mxu1  ;;  %8004 = vmatprep.subr.bf16.mxu1 %v19648_v62  ;;  %v19687_v21 = vld [vmem:[%s24302_s3 + $0xd54] ss:$12 sps:$4 sm:$0xff]   ;;  %v19688_v62 = vld [vmem:[%s24302_s3 + $0xed0] ss:$12 sps:$4 sm:$0xff]   ;;  %v19691_v25 = vld [vmem:[%s24302_s3 + $0xd38] ss:$12 sps:$4 sm:$0xff]  }
 0x4f2   : > { %v18316_v33 = vadd.f32 %v18315_v30, %v18314_v19  ;;  %v19693_v22 = vld [vmem:[%s24302_s3 + $0xd3c] ss:$12 sps:$4 sm:$0xff]   ;;  %v19694_v19 = vld [vmem:[%s24302_s3 + $0xeb8] ss:$12 sps:$4 sm:$0xff]  }
 0x4f3   : > { %v5546_v16 = vadd.f32 %v18294_v32, %v22215_v39  ;;  %7962 = vmatpush1.bf16.msra.mxu0 %v19643_v28  ;;  %v19660_v39 = vld [vmem:[%s24302_s3 + $0xdcc] ss:$12 sps:$4 sm:$0xff]   ;;  %v19696_v44 = vld [vmem:[%s24302_s3 + $0xebc] ss:$12 sps:$4 sm:$0xff]   ;;  %v19699_v28 = vld [vmem:[%s24302_s3 + $0xd24] ss:$12 sps:$4 sm:$0xff]  }
 0x4f4   : > { %8005 = vmatpush1.bf16.msra.mxu1 %v19646_v63  ;;  %7963 = vmatprep.subr.bf16.mxu0 %v19651_v27  ;;  %v19702_v29 = vld [vmem:[%s24302_s3 + $0xea4] ss:$12 sps:$4 sm:$0xff]   ;;  %v19697_v63 = vld [vmem:[%s24302_s3 + $0xd20] ss:$12 sps:$4 sm:$0xff]  }
 0x4f5   : > { %v22550_v40 = vadd.f32 %v18316_v33, %v5546_v16  ;;  %8006 = vmatprep.subr.bf16.mxu1 %v19654_v31  ;;  %v19700_v27 = vld [vmem:[%s24302_s3 + $0xea0] ss:$12 sps:$4 sm:$0xff]   ;;  %v19703_v31 = vld [vmem:[%s24302_s3 + $0xd08] ss:$12 sps:$4 sm:$0xff]  }
 0x4f6   : > { %v19705_v32 = vld [vmem:[%s24302_s3 + $0xd0c] ss:$12 sps:$4 sm:$0xff]   ;;  %v19706_v33 = vld [vmem:[%s24302_s3 + $0xe88] ss:$12 sps:$4 sm:$0xff]  }
 0x4f7   : > { %7964 = vmatpush1.bf16.msra.mxu0 %v19649_v35  ;;  %v19708_v30 = vld [vmem:[%s24302_s3 + $0xe8c] ss:$12 sps:$4 sm:$0xff]   ;;  %v19711_v16 = vld [vmem:[%s24302_s3 + $0xcf4] ss:$12 sps:$4 sm:$0xff]  }
 0x4f8   : > { %8007 = vmatpush1.bf16.msra.mxu1 %v19652_v18  ;;  %7965 = vmatprep.subr.bf16.mxu0 %v19657_v37  ;;  %v19714_v35 = vld [vmem:[%s24302_s3 + $0xe74] ss:$12 sps:$4 sm:$0xff]   ;;  %v19709_v18 = vld [vmem:[%s24302_s3 + $0xcf0] ss:$12 sps:$4 sm:$0xff]  }
 0x4f9   : > { %8008 = vmatprep.subr.bf16.mxu1 %v19660_v39  ;;  %v19712_v37 = vld [vmem:[%s24302_s3 + $0xe70] ss:$12 sps:$4 sm:$0xff]  }
 0x4fa   : > { %v19717_v39 = vld [vmem:[%s24302_s3 + $0xcdc] ss:$12 sps:$4 sm:$0xff]  }
 0x4fb   : > { %7966 = vmatpush1.bf16.msra.mxu0 %v19655_v41  ;;  %v19720_v41 = vld [vmem:[%s24302_s3 + $0xe5c] ss:$12 sps:$4 sm:$0xff]  }
 0x4fc   : > { %8009 = vmatpush1.bf16.msra.mxu1 %v19658_v43  ;;  %7967 = vmatprep.subr.bf16.mxu0 %v19663_v45  ;;  %v19715_v43 = vld [vmem:[%s24302_s3 + $0xcd8] ss:$12 sps:$4 sm:$0xff]   ;;  %v7292_v45 = vld [vmem:[#allocation4] sm:$0xf0] }
 0x4fd   : > { %8010 = vmatprep.subr.bf16.mxu1 %v19666_v47  ;;  %v19718_v47 = vld [vmem:[%s24302_s3 + $0xe58] ss:$12 sps:$4 sm:$0xff]  }
 0x4ff   : > { %7968 = vmatpush1.bf16.msra.mxu0 %v19661_v49  ;;  %v19723_v49 = vld [vmem:[%s24302_s3 + $0xcc4] ss:$12 sps:$4 sm:$0xff]  }
 0x500   : > { %8011 = vmatpush1.bf16.msra.mxu1 %v19664_v8  ;;  %7969 = vmatprep.subr.bf16.mxu0 %v19669_v52  ;;  %v19726_v8 = vld [vmem:[%s24302_s3 + $0xe44] ss:$12 sps:$4 sm:$0xff]   ;;  %v7300_v52 = vpack.c.bf16 %v22486_v55, %v7292_v45  ;;  %v19757_v45 = vld [vmem:[%s24302_s3 + $0xe48] ss:$12 sps:$4 sm:$0xff]  }
 0x501   : > { %8012 = vmatprep.subr.bf16.mxu1 %v19672_v54  ;;  %v7294_v54 = vld [vmem:[#allocation4 + $0x20] sm:$0xf0] }
 0x503   : > { %7970 = vmatpush1.bf16.msra.mxu0 %v19667_v1  ;;  %v7298_v1 = vld [vmem:[#allocation4 + $0x10] sm:$0xff] }
 0x504   : > { %8013 = vmatpush1.bf16.msra.mxu1 %v19670_v26  ;;  %7971 = vmatprep.subr.bf16.mxu0 %v19675_v58  ;;  %v19721_v26 = vld [vmem:[%s24302_s3 + $0xcc0] ss:$12 sps:$4 sm:$0xff]  }
 0x505   : > { %8014 = vmatprep.subr.bf16.mxu1 %v19678_v61  ;;  %v19724_v58 = vld [vmem:[%s24302_s3 + $0xe40] ss:$12 sps:$4 sm:$0xff]   ;;  %v19727_v61 = vld [vmem:[%s24302_s3 + $0xd70] ss:$12 sps:$4 sm:$0xff]  }
 0x507   : > { %7972 = vmatpush1.bf16.msra.mxu0 %v19673_v14  ;;  %v7302_v14 = vpack.c.bf16 %v7298_v1, %v7294_v54  ;;  %v19764_v54 = vld [vmem:[#allocation13 + $0x2e4] ss:$8 sps:$4 sm:$0xff]   ;;  %v19762_v1 = vld [vmem:[#allocation13 + $0x2e0] ss:$8 sps:$4 sm:$0xff]  }
 0x508   : > { %8015 = vmatpush1.bf16.msra.mxu1 %v19676_v4  ;;  %7973 = vmatprep.subr.bf16.mxu0 %v19681_v15  ;;  %v19729_v4 = vld [vmem:[%s24302_s3 + $0xef0] ss:$12 sps:$4 sm:$0xff]   ;;  %v22700_v15 = vrot.slane %v7300_v52, 2  ;;  %v19759_v52 = vld [vmem:[#allocation13 + $0x2f0] ss:$8 sps:$4 sm:$0xff]  }
 0x509   : > { %8016 = vmatprep.subr.bf16.mxu1 %v19684_v12  ;;  %v19728_v12 = vld [vmem:[%s24302_s3 + $0xcb0] ss:$12 sps:$4 sm:$0xff]  }
 0x50b   : > { %7974 = vmatpush2.bf16.msra.mxu0 %v19679_v13  ;;  %v19730_v13 = vld [vmem:[%s24302_s3 + $0xe30] ss:$12 sps:$4 sm:$0xff]  }
 0x50c   : > { %8017 = vmatpush2.bf16.msra.mxu1 %v19682_v60  ;;  %7975 = vmatprep.subr.bf16.mxu0 %v19687_v21  ;;  %v22708_v60 = vrot.slane %v7302_v14, 2  ;;  %v19731_v21 = vld [vmem:[%s24302_s3 + $0xd58] ss:$12 sps:$4 sm:$0xff]  }
 0x50d   : > { %8018 = vmatprep.subr.bf16.mxu1 %v19690_v20  ;;  %v19733_v20 = vld [vmem:[%s24302_s3 + $0xed8] ss:$12 sps:$4 sm:$0xff]  }
 0x50e   : > { %v19768_v14 = vld [vmem:[#allocation13 + $0x2c0] ss:$8 sps:$4 sm:$0xff]  }
 0x50f   : > { %7976 = vmatpush2.bf16.msra.mxu0 %v19685_v24  ;;  %v19732_v24 = vld [vmem:[%s24302_s3 + $0xc98] ss:$12 sps:$4 sm:$0xff]  }
 0x510   : > { %8019 = vmatpush2.bf16.msra.mxu1 %v19688_v62  ;;  %7977 = vmatprep.subr.bf16.mxu0 %v19693_v22  ;;  %v19734_v62 = vld [vmem:[%s24302_s3 + $0xe18] ss:$12 sps:$4 sm:$0xff]   ;;  %v19735_v22 = vld [vmem:[%s24302_s3 + $0xd40] ss:$12 sps:$4 sm:$0xff]  }
 0x511   : > { %8020 = vmatprep.subr.bf16.mxu1 %v19696_v44  ;;  %v19737_v44 = vld [vmem:[%s24302_s3 + $0xec0] ss:$12 sps:$4 sm:$0xff]  }
 0x513   : > { %7978 = vmatpush2.bf16.msra.mxu0 %v19691_v25  ;;  %v19738_v25 = vld [vmem:[%s24302_s3 + $0xe00] ss:$12 sps:$4 sm:$0xff]  }
 0x514   : > { %8021 = vmatpush2.bf16.msra.mxu1 %v19694_v19  ;;  %7979 = vmatprep.subr.bf16.mxu0 %v19699_v28  ;;  %v19739_v19 = vld [vmem:[%s24302_s3 + $0xd28] ss:$12 sps:$4 sm:$0xff]  }
 0x515   : > { %8022 = vmatprep.subr.bf16.mxu1 %v19702_v29  ;;  %v19740_v28 = vld [vmem:[%s24302_s3 + $0xc68] ss:$12 sps:$4 sm:$0xff]  }
 0x516   : > { %v19742_v29 = vld [vmem:[%s24302_s3 + $0xde8] ss:$12 sps:$4 sm:$0xff]  }
 0x517   : > { %7980 = vmatpush2.bf16.msra.mxu0 %v19697_v63  ;;  %v19743_v63 = vld [vmem:[%s24302_s3 + $0xd10] ss:$12 sps:$4 sm:$0xff]  }
 0x518   : > { %8023 = vmatpush2.bf16.msra.mxu1 %v19700_v27  ;;  %7981 = vmatprep.subr.bf16.mxu0 %v19705_v32  ;;  %v19745_v27 = vld [vmem:[%s24302_s3 + $0xe90] ss:$12 sps:$4 sm:$0xff]  }
 0x519   : > { %8024 = vmatprep.subr.bf16.mxu1 %v19708_v30  ;;  %v19744_v32 = vld [vmem:[%s24302_s3 + $0xc50] ss:$12 sps:$4 sm:$0xff]  }
 0x51a   : > { %v19746_v30 = vld [vmem:[%s24302_s3 + $0xdd0] ss:$12 sps:$4 sm:$0xff]  }
 0x51b   : > { %7982 = vmatpush2.bf16.msra.mxu0 %v19703_v31  ;;  %v19747_v31 = vld [vmem:[%s24302_s3 + $0xcf8] ss:$12 sps:$4 sm:$0xff]  }
 0x51c   : > { %8025 = vmatpush2.bf16.msra.mxu1 %v19706_v33  ;;  %7983 = vmatprep.subr.bf16.mxu0 %v19711_v16  ;;  %v19749_v33 = vld [vmem:[%s24302_s3 + $0xe78] ss:$12 sps:$4 sm:$0xff]  }
 0x51d   : > { %8026 = vmatprep.subr.bf16.mxu1 %v19714_v35  ;;  %v19748_v16 = vld [vmem:[%s24302_s3 + $0xc38] ss:$12 sps:$4 sm:$0xff]  }
 0x51e   : > { %v19750_v35 = vld [vmem:[%s24302_s3 + $0xdb8] ss:$12 sps:$4 sm:$0xff]  }
 0x51f   : > { %7984 = vmatpush2.bf16.msra.mxu0 %v19709_v18  ;;  %v19751_v18 = vld [vmem:[%s24302_s3 + $0xce0] ss:$12 sps:$4 sm:$0xff]  }
 0x520   : > { %8027 = vmatpush2.bf16.msra.mxu1 %v19712_v37  ;;  %7985 = vmatprep.subr.bf16.mxu0 %v19717_v39  ;;  %v19753_v37 = vld [vmem:[%s24302_s3 + $0xe60] ss:$12 sps:$4 sm:$0xff]  }
 0x521   : > { %8028 = vmatprep.subr.bf16.mxu1 %v19720_v41  ;;  %v19752_v39 = vld [vmem:[%s24302_s3 + $0xc20] ss:$12 sps:$4 sm:$0xff]  }
 0x522   : > { %v19754_v41 = vld [vmem:[%s24302_s3 + $0xda0] ss:$12 sps:$4 sm:$0xff]  }
 0x523   : > { %7986 = vmatpush2.bf16.msra.mxu0 %v19715_v43  ;;  %v19755_v43 = vld [vmem:[%s24302_s3 + $0xcc8] ss:$12 sps:$4 sm:$0xff]  }
 0x524   : > { %8029 = vmatpush2.bf16.msra.mxu1 %v19718_v47  ;;  %7987 = vmatprep.subr.bf16.mxu0 %v19723_v49  ;;  %v19756_v47 = vld [vmem:[%s24302_s3 + $0xc08] ss:$12 sps:$4 sm:$0xff]  }
 0x525   : > { %8030 = vmatprep.subr.bf16.mxu1 %v19726_v8  ;;  %v19758_v49 = vld [vmem:[%s24302_s3 + $0xd88] ss:$12 sps:$4 sm:$0xff]   ;;  %v19761_v8 = vld [vmem:[#allocation13 + $0x2f4] ss:$8 sps:$4 sm:$0xff]  }
 0x527   : > { %7988 = vmatpush2.bf16.msra.mxu0 %v19721_v26  ;;  %v19767_v26 = vld [vmem:[#allocation13 + $0x2d4] ss:$8 sps:$4 sm:$0xff]  }
 0x528   : > { %8031 = vmatpush2.bf16.msra.mxu1 %v19724_v58  ;;  %18405 = vmatprep.subr.bf16.mxu0 %v19727_v61  ;;  %v19765_v58 = vld [vmem:[#allocation13 + $0x2d0] ss:$8 sps:$4 sm:$0xff]   ;;  %v19770_v61 = vld [vmem:[#allocation13 + $0x2c4] ss:$8 sps:$4 sm:$0xff]  }
 0x529   : > { %18427 = vmatprep.subr.bf16.mxu1 %v19729_v4  ;;  %v19773_v4 = vld [vmem:[#allocation13 + $0x2b4] ss:$8 sps:$4 sm:$0xff]  }
 0x52a   : > { %7990 = vmatmul.mubr.bf16.vlgmr.msra.gmra.mxu0 %v22700_v15 }
 0x52b   : > { %8033 = vmatmul.mubr.bf16.vlgmr.msra.gmra.mxu1 %v22708_v60  ;;  %18406 = vmatpush3.bf16.msra.mxu0 %v19728_v12  ;;  %v19771_v12 = vld [vmem:[#allocation13 + $0x2b0] ss:$8 sps:$4 sm:$0xff]  }
 0x52c   : > { %8075 = vmatprep.mubr.bf16.mxu0 %v22506_v5  ;;  %18428 = vmatpush3.bf16.msra.mxu1 %v19730_v13  ;;  %v19736_v5 = vld [vmem:[%s24302_s3 + $0xc80] ss:$12 sps:$4 sm:$0xff]   ;;  %v19776_v13 = vld [vmem:[#allocation13 + $0x2a4] ss:$8 sps:$4 sm:$0xff]  }
 0x52d   : > { %18407 = vmatprep.subr.bf16.mxu0 %v19731_v21  ;;  %18429 = vmatprep.subr.bf16.mxu1 %v19733_v20  ;;  %v19777_v21 = vld [vmem:[#allocation13 + $0x290] ss:$8 sps:$4 sm:$0xff]   ;;  %v19782_v20 = vld [vmem:[#allocation13 + $0x284] ss:$8 sps:$4 sm:$0xff]  }
 0x52e   : > { %8116 = vmatprep.mubr.bf16.mxu1 %v22508_v7  ;;  %v19741_v7 = vld [vmem:[%s24302_s3 + $0xea8] ss:$12 sps:$4 sm:$0xff]  }
 0x52f   : > { %18408 = vmatpush3.bf16.msra.mxu0 %v19732_v24  ;;  %v19780_v24 = vld [vmem:[#allocation13 + $0x280] ss:$8 sps:$4 sm:$0xff]  }
 0x530   : > { %18430 = vmatpush3.bf16.msra.mxu1 %v19734_v62  ;;  %18409 = vmatprep.subr.bf16.mxu0 %v19735_v22  ;;  %v19785_v62 = vld [vmem:[#allocation13 + $0x374] ss:$8 sps:$4 sm:$0xff]   ;;  %v19783_v22 = vld [vmem:[#allocation13 + $0x370] ss:$8 sps:$4 sm:$0xff]  }
 0x531   : > { %18431 = vmatprep.subr.bf16.mxu1 %v19737_v44  ;;  %v19788_v44 = vld [vmem:[#allocation13 + $0x364] ss:$8 sps:$4 sm:$0xff]  }
 0x533   : > { %18410 = vmatpush3.bf16.msra.mxu0 %v19736_v5  ;;  %v19791_v5 = vld [vmem:[#allocation13 + $0x3f4] ss:$8 sps:$4 sm:$0xff]  }
 0x534   : > { %18432 = vmatpush3.bf16.msra.mxu1 %v19738_v25  ;;  %18411 = vmatprep.subr.bf16.mxu0 %v19739_v19  ;;  %v19786_v25 = vld [vmem:[#allocation13 + $0x360] ss:$8 sps:$4 sm:$0xff]   ;;  %v19789_v19 = vld [vmem:[#allocation13 + $0x3f0] ss:$8 sps:$4 sm:$0xff]  }
 0x535   : > { %18433 = vmatprep.subr.bf16.mxu1 %v19741_v7  ;;  %v19794_v7 = vld [vmem:[#allocation13 + $0x354] ss:$8 sps:$4 sm:$0xff]  }
 0x537   : > { %18412 = vmatpush3.bf16.msra.mxu0 %v19740_v28  ;;  %v19797_v28 = vld [vmem:[#allocation13 + $0x3e4] ss:$8 sps:$4 sm:$0xff]  }
 0x538   : > { %18434 = vmatpush3.bf16.msra.mxu1 %v19742_v29  ;;  %18413 = vmatprep.subr.bf16.mxu0 %v19743_v63  ;;  %v19792_v29 = vld [vmem:[#allocation13 + $0x350] ss:$8 sps:$4 sm:$0xff]   ;;  %v19795_v63 = vld [vmem:[#allocation13 + $0x3e0] ss:$8 sps:$4 sm:$0xff]  }
 0x539   : > { %18435 = vmatprep.subr.bf16.mxu1 %v19745_v27  ;;  %v19800_v27 = vld [vmem:[#allocation13 + $0x344] ss:$8 sps:$4 sm:$0xff]  }
 0x53b   : > { %18414 = vmatpush3.bf16.msra.mxu0 %v19744_v32  ;;  %v19803_v32 = vld [vmem:[#allocation13 + $0x3d4] ss:$8 sps:$4 sm:$0xff]  }
 0x53c   : > { %18436 = vmatpush3.bf16.msra.mxu1 %v19746_v30  ;;  %18415 = vmatprep.subr.bf16.mxu0 %v19747_v31  ;;  %v19798_v30 = vld [vmem:[#allocation13 + $0x340] ss:$8 sps:$4 sm:$0xff]   ;;  %v19801_v31 = vld [vmem:[#allocation13 + $0x3d0] ss:$8 sps:$4 sm:$0xff]  }
 0x53d   : > { %18437 = vmatprep.subr.bf16.mxu1 %v19749_v33  ;;  %v19806_v33 = vld [vmem:[#allocation13 + $0x334] ss:$8 sps:$4 sm:$0xff]  }
 0x53f   : > { %18416 = vmatpush3.bf16.msra.mxu0 %v19748_v16  ;;  %v19804_v16 = vld [vmem:[#allocation13 + $0x330] ss:$8 sps:$4 sm:$0xff]  }
 0x540   : > { %18438 = vmatpush3.bf16.msra.mxu1 %v19750_v35  ;;  %18417 = vmatprep.subr.bf16.mxu0 %v19751_v18  ;;  %v19807_v35 = vld [vmem:[#allocation13 + $0x3c0] ss:$8 sps:$4 sm:$0xff]   ;;  %v19809_v18 = vld [vmem:[#allocation13 + $0x3c4] ss:$8 sps:$4 sm:$0xff]  }
 0x541   : > { %18439 = vmatprep.subr.bf16.mxu1 %v19753_v37  ;;  %v19812_v37 = vld [vmem:[#allocation13 + $0x324] ss:$8 sps:$4 sm:$0xff]  }
 0x543   : > { %18418 = vmatpush3.bf16.msra.mxu0 %v19752_v39  ;;  %v19815_v39 = vld [vmem:[#allocation13 + $0x3b4] ss:$8 sps:$4 sm:$0xff]  }
 0x544   : > { %18440 = vmatpush3.bf16.msra.mxu1 %v19754_v41  ;;  %18419 = vmatprep.subr.bf16.mxu0 %v19755_v43  ;;  %v19810_v41 = vld [vmem:[#allocation13 + $0x320] ss:$8 sps:$4 sm:$0xff]   ;;  %v19813_v43 = vld [vmem:[#allocation13 + $0x3b0] ss:$8 sps:$4 sm:$0xff]  }
 0x545   : > { %18441 = vmatprep.subr.bf16.mxu1 %v19757_v45  ;;  %v19818_v45 = vld [vmem:[#allocation13 + $0x314] ss:$8 sps:$4 sm:$0xff]  }
 0x547   : > { %18420 = vmatpush3.bf16.msra.mxu0 %v19756_v47  ;;  %v19821_v47 = vld [vmem:[#allocation13 + $0x3a4] ss:$8 sps:$4 sm:$0xff]  }
 0x548   : > { %18442 = vmatpush3.bf16.msra.mxu1 %v19758_v49  ;;  %8865 = vmatprep.subr.bf16.mxu0 %v19761_v8  ;;  %v19816_v49 = vld [vmem:[#allocation13 + $0x310] ss:$8 sps:$4 sm:$0xff]   ;;  %v19819_v8 = vld [vmem:[#allocation13 + $0x3a0] ss:$8 sps:$4 sm:$0xff]  }
 0x549   : > { %8908 = vmatprep.subr.bf16.mxu1 %v19791_v5  ;;  %v19864_v5 = vld [vmem:[#allocation13 + $0x420] ss:$8 sps:$4 sm:$0xff]  }
 0x54a   : > { %8076 = vmatmul.mubr.bf16.vlgmr.msra.gmra.mxu0 %v22700_v15  ;;  %v19774_v15 = vld [vmem:[#allocation13 + $0x2a0] ss:$8 sps:$4 sm:$0xff]  }
 0x54b   : > { %8117 = vmatmul.mubr.bf16.vlgmr.msra.gmra.mxu1 %v22708_v60  ;;  %8866 = vmatpush1.bf16.msra.mxu0 %v19759_v52  ;;  %v19779_v60 = vld [vmem:[#allocation13 + $0x294] ss:$8 sps:$4 sm:$0xff]   ;;  %v19824_v52 = vld [vmem:[#allocation13 + $0x304] ss:$8 sps:$4 sm:$0xff]  }
 0x54c   : > { %8867 = vmatprep.subr.bf16.mxu0 %v19764_v54  ;;  %8909 = vmatpush1.bf16.msra.mxu1 %v19789_v19  ;;  %v19827_v54 = vld [vmem:[#allocation13 + $0x394] ss:$8 sps:$4 sm:$0xff]   ;;  %v19870_v19 = vld [vmem:[#allocation13 + $0x410] ss:$8 sps:$4 sm:$0xff]  }
 0x54d   : > { %8910 = vmatprep.subr.bf16.mxu1 %v19797_v28  ;;  %v19876_v28 = vld [vmem:[#allocation13 + $0x400] ss:$8 sps:$4 sm:$0xff]  }
 0x54f   : > { %8868 = vmatpush1.bf16.msra.mxu0 %v19762_v1  ;;  %v19822_v1 = vld [vmem:[#allocation13 + $0x300] ss:$8 sps:$4 sm:$0xff]  }
 0x550   : > { %8869 = vmatprep.subr.bf16.mxu0 %v19767_v26  ;;  %8911 = vmatpush1.bf16.msra.mxu1 %v19795_v63  ;;  %v19825_v26 = vld [vmem:[#allocation13 + $0x390] ss:$8 sps:$4 sm:$0xff]   ;;  %v6289_v63 = vpop.f32.mrf.mxu0 }
 0x551   : > { %8912 = vmatprep.subr.bf16.mxu1 %v19803_v32 }
 0x552   : > { %v6291_v32 = vpop.f32.mrf.mxu0 }
 0x553   : > { %8870 = vmatpush1.bf16.msra.mxu0 %v19765_v58  ;;  %v19830_v58 = vld [vmem:[#allocation13 + $0x384] ss:$8 sps:$4 sm:$0xff]  }
 0x554   : > { %8871 = vmatprep.subr.bf16.mxu0 %v19770_v61  ;;  %8913 = vmatpush1.bf16.msra.mxu1 %v19801_v31  ;;  %v19828_v61 = vld [vmem:[#allocation13 + $0x380] ss:$8 sps:$4 sm:$0xff]   ;;  %v6293_v31 = vpop.f32.mrf.mxu0 }
 0x555   : > { %8914 = vmatprep.subr.bf16.mxu1 %v19809_v18 }
 0x557   : > { %8872 = vmatpush1.bf16.msra.mxu0 %v19768_v14  ;;  %v19833_v14 = vld [vmem:[#allocation13 + $0x4f4] ss:$8 sps:$4 sm:$0xff]  }
 0x558   : > { %8873 = vmatprep.subr.bf16.mxu0 %v19773_v4  ;;  %8915 = vmatpush1.bf16.msra.mxu1 %v19807_v35  ;;  %v19836_v4 = vld [vmem:[#allocation13 + $0x474] ss:$8 sps:$4 sm:$0xff]  }
 0x559   : > { %8916 = vmatprep.subr.bf16.mxu1 %v19815_v39 }
 0x55b   : > { %8874 = vmatpush1.bf16.msra.mxu0 %v19771_v12  ;;  %v19834_v12 = vld [vmem:[#allocation13 + $0x470] ss:$8 sps:$4 sm:$0xff]  }
 0x55c   : > { %8875 = vmatprep.subr.bf16.mxu0 %v19776_v13  ;;  %8917 = vmatpush1.bf16.msra.mxu1 %v19813_v43  ;;  %v19842_v13 = vld [vmem:[#allocation13 + $0x464] ss:$8 sps:$4 sm:$0xff]  }
 0x55d   : > { %8918 = vmatprep.subr.bf16.mxu1 %v19821_v47 }
 0x55f   : > { %8876 = vmatpush1.bf16.msra.mxu0 %v19774_v15  ;;  %v19840_v15 = vld [vmem:[#allocation13 + $0x460] ss:$8 sps:$4 sm:$0xff]  }
 0x560   : > { %8877 = vmatprep.subr.bf16.mxu0 %v19779_v60  ;;  %8919 = vmatpush1.bf16.msra.mxu1 %v19819_v8  ;;  %v19848_v60 = vld [vmem:[#allocation13 + $0x454] ss:$8 sps:$4 sm:$0xff]  }
 0x561   : > { %8920 = vmatprep.subr.bf16.mxu1 %v19827_v54 }
 0x563   : > { %8878 = vmatpush1.bf16.msra.mxu0 %v19777_v21  ;;  %v19846_v21 = vld [vmem:[#allocation13 + $0x450] ss:$8 sps:$4 sm:$0xff]  }
 0x564   : > { %8879 = vmatprep.subr.bf16.mxu0 %v19782_v20  ;;  %8921 = vmatpush1.bf16.msra.mxu1 %v19825_v26  ;;  %v19852_v20 = vld [vmem:[#allocation13 + $0x440] ss:$8 sps:$4 sm:$0xff]  }
 0x565   : > { %8922 = vmatprep.subr.bf16.mxu1 %v19830_v58 }
 0x567   : > { %8880 = vmatpush1.bf16.msra.mxu0 %v19780_v24  ;;  %v19854_v24 = vld [vmem:[#allocation13 + $0x444] ss:$8 sps:$4 sm:$0xff]  }
 0x568   : > { %8881 = vmatprep.subr.bf16.mxu0 %v19785_v62  ;;  %8923 = vmatpush1.bf16.msra.mxu1 %v19828_v61  ;;  %v19860_v62 = vld [vmem:[#allocation13 + $0x434] ss:$8 sps:$4 sm:$0xff]  }
 0x569   : > { %8924 = vmatprep.subr.bf16.mxu1 %v19836_v4 }
 0x56b   : > { %8882 = vmatpush2.bf16.msra.mxu0 %v19783_v22  ;;  %v19858_v22 = vld [vmem:[#allocation13 + $0x430] ss:$8 sps:$4 sm:$0xff]  }
 0x56c   : > { %8883 = vmatprep.subr.bf16.mxu0 %v19788_v44  ;;  %8925 = vmatpush2.bf16.msra.mxu1 %v19834_v12  ;;  %v19866_v44 = vld [vmem:[#allocation13 + $0x424] ss:$8 sps:$4 sm:$0xff]  }
 0x56d   : > { %8926 = vmatprep.subr.bf16.mxu1 %v19842_v13 }
 0x56f   : > { %8884 = vmatpush2.bf16.msra.mxu0 %v19786_v25  ;;  %v19872_v25 = vld [vmem:[#allocation13 + $0x414] ss:$8 sps:$4 sm:$0xff]  }
 0x570   : > { %8885 = vmatprep.subr.bf16.mxu0 %v19794_v7  ;;  %8927 = vmatpush2.bf16.msra.mxu1 %v19840_v15  ;;  %v19878_v7 = vld [vmem:[#allocation13 + $0x404] ss:$8 sps:$4 sm:$0xff]  }
 0x571   : > { %8928 = vmatprep.subr.bf16.mxu1 %v19848_v60  ;;  %v4820_v60 = vadd.f32 %v22125_v46, %v22117_v42 }
 0x573   : > { %8886 = vmatpush2.bf16.msra.mxu0 %v19792_v29  ;;  %v19884_v29 = vld [vmem:[#allocation13 + $0x74] ss:$8 sps:$4 sm:$0xff]  }
 0x574   : > { %8887 = vmatprep.subr.bf16.mxu0 %v19800_v27  ;;  %8929 = vmatpush2.bf16.msra.mxu1 %v19846_v21  ;;  %v6332_v27 = vpop.f32.mrf.mxu1  ;;  %v4822_v21 = vadd.f32 %v22141_v53, %v22133_v50 }
 0x575   : > { %8930 = vmatprep.subr.bf16.mxu1 %v19854_v24 }
 0x577   : > { %8888 = vmatpush2.bf16.msra.mxu0 %v19798_v30  ;;  %v6334_v30 = vpop.f32.mrf.mxu1 }
 0x578   : > { %8889 = vmatprep.subr.bf16.mxu0 %v19806_v33  ;;  %8931 = vmatpush2.bf16.msra.mxu1 %v19852_v20  ;;  %v5457_v20 = vadd.f32 %v22441_v2, %v4820_v60  ;;  %v6335_v46 = vadd.f32 %v6334_v30, %v6291_v32 }
 0x579   : > { %8932 = vmatprep.subr.bf16.mxu1 %v19860_v62  ;;  %v6336_v33 = vpop.f32.mrf.mxu1  ;;  %v4824_v62 = vadd.f32 %v22157_v10, %v22149_v6 }
 0x57a   : > { %v5500_v50 = vadd.f32 %v22449_v34, %v5457_v20  ;;  %v6337_v10 = vadd.f32 %v6336_v33, %v6293_v31 }
 0x57b   : > { %8890 = vmatpush2.bf16.msra.mxu0 %v19804_v16  ;;  %v6295_v16 = vpop.f32.mrf.mxu0  ;;  %v6338_v35 = vpop.f32.mrf.mxu1  ;;  %v5461_v42 = vadd.f32 %v22473_v48, %v4824_v62 }
 0x57c   : > { %8891 = vmatprep.subr.bf16.mxu0 %v19812_v37  ;;  %8933 = vmatpush2.bf16.msra.mxu1 %v19858_v22  ;;  %v5459_v22 = vadd.f32 %v22457_v36, %v4822_v21 }
 0x57d   : > { %8934 = vmatprep.subr.bf16.mxu1 %v19866_v44  ;;  %v22800_v18 = vpop.f32.mrf.mxu0  ;;  %v22802_v37 = vpop.f32.mrf.mxu1  ;;  %v5504_v34 = vadd.f32 %v22481_v51, %v5461_v42 }
 0x57f   : > { %8892 = vmatpush2.bf16.msra.mxu0 %v19810_v41  ;;  %v22804_v39 = vpop.f32.mrf.mxu0  ;;  %v22806_v41 = vpop.f32.mrf.mxu1  ;;  %v6426_v33 = vadd.f32 %v6337_v10, %v5504_v34  ;;  %v8303_v34 = vld [vmem:[#allocation5 + $0x30] sm:$0x1] }
 0x580   : > { %8893 = vmatprep.subr.bf16.mxu0 %v19818_v45  ;;  %8935 = vmatpush2.bf16.msra.mxu1 %v19864_v5  ;;  %v6333_v5 = vadd.f32 %v6332_v27, %v6289_v63 }
 0x581   : > { %8936 = vmatprep.subr.bf16.mxu1 %v19872_v25  ;;  %v22808_v43 = vpop.f32.mrf.mxu0  ;;  %v22810_v45 = vpop.f32.mrf.mxu1  ;;  %v4826_v25 = vadd.f32 %v22170_v11, %v22165_v9 }
 0x582   : > { %v6423_v9 = vadd.f32 %v6333_v5, %v5500_v50 }
 0x583   : > { %8894 = vmatpush2.bf16.msra.mxu0 %v19816_v49  ;;  %v22812_v47 = vpop.f32.mrf.mxu0  ;;  %v22814_v49 = vpop.f32.mrf.mxu1  ;;  %v5463_v6 = vadd.f32 %v22492_v3, %v4826_v25 }
 0x584   : > { %8895 = vmatprep.subr.bf16.mxu0 %v19824_v52  ;;  %8937 = vmatpush2.bf16.msra.mxu1 %v19870_v19  ;;  %v5502_v19 = vadd.f32 %v22465_v38, %v5459_v22 }
 0x585   : > { %8938 = vmatprep.subr.bf16.mxu1 %v19878_v7  ;;  %v22849_v7 = vld [vmem:[%s24309_s10] sm:$0x7]  ;;  %v5506_v31 = vadd.f32 %v22497_v59, %v5463_v6 }
 0x586   : > { %v8136_v3 = vrot.slane %v22849_v7, %v21424_v56  ;;  %v8140_v51 = vrot.slane %v22849_v7, %v21431_v57 }
 0x587   : > { %8896 = vmatpush2.bf16.msra.mxu0 %v19822_v1 }
 0x588   : > { %8951 = vmatprep.subr.bf16.mxu0 %v19833_v14  ;;  %8939 = vmatpush2.bf16.msra.mxu1 %v19876_v28  ;;  %v6424_v28 = vadd.f32 %v6335_v46, %v5502_v19  ;;  %v8298_v46 = vld [vmem:[#allocation5 + $0x40] sm:$0xfe] }
 0x589   : > { %9394 = vmatprep.subr.bf16.mxu1 %v19884_v29  ;;  %v6339_v29 = vadd.f32 %v6338_v35, %v6295_v16  ;;  %v8308_v10 = vpack.c.bf16 %v22486_v55, %v8298_v46 }
 0x58a   : > { %v7152_v8 = vpop.f32.mrf.mxu0 }
 0x58b   : > { %v7195_v52 = vpop.f32.mrf.mxu1  ;;  %v6427_v35 = vadd.f32 %v6339_v29, %v5506_v31 }
 0x58c   : > { %v7154_v54 = vpop.f32.mrf.mxu0  ;;  %v7196_v53 = vadd.f32 %v7195_v52, %v7152_v8 }
 0x58d   : > { %v7197_v1 = vpop.f32.mrf.mxu1 }
 0x58e   : > { %v7156_v26 = vpop.f32.mrf.mxu0  ;;  %v7198_v11 = vadd.f32 %v7197_v1, %v7154_v54  ;;  %v7286_v27 = vadd.f32 %v7196_v53, %v6423_v9 }
 0x58f   : > { %v7199_v58 = vpop.f32.mrf.mxu1 }
 0x590   : > { %v7158_v61 = vpop.f32.mrf.mxu0  ;;  %v7200_v38 = vadd.f32 %v7199_v58, %v7156_v26  ;;  %v7287_v60 = vadd.f32 %v7198_v11, %v6424_v28  ;;  %v8304_v28 = vld [vmem:[#allocation5 + $0x68] sm:$0x1] }
 0x591   : > { %v7201_v14 = vpop.f32.mrf.mxu1 }
 0x592   : > { %v7202_v8 = vadd.f32 %v7201_v14, %v7158_v61  ;;  %v7289_v26 = vadd.f32 %v7200_v38, %v6426_v33  ;;  %v8403_v38 = vshll.u32 %v8308_v10, 16  ;;  %v8401_v33 = vshrl.u32 %v8308_v10, 16 }
 0x594   : > { %v7290_v5 = vadd.f32 %v7202_v8, %v6427_v35  ;;  %v8405_v8 = vrot.slane %v8403_v38, 1  ;;  %v8302_v38 = vld [vmem:[#allocation5 + $0x20] sm:$0xfe] }
 0x5aa   : > { %v22816_v4 = vpop.f32.mrf.mxu0 }
 0x5ab   : > { %v22818_v12 = vpop.f32.mrf.mxu1 }
 0x5ac   : > { %v22820_v13 = vpop.f32.mrf.mxu0 }
 0x5ad   : > { %v22822_v15 = vpop.f32.mrf.mxu1 }
 0x5ae   : > { %v22829_v24 = vpop.f32.mrf.mxu0 }
 0x5af   : > { %v22834_v44 = vpop.f32.mrf.mxu1 }
 0x5b0   : > { %v22840_v2 = vpop.f32.mrf.mxu0 }
 0x5b1   : > { %v22844_v36 = vpop.f32.mrf.mxu1 }
 0x5ea   : > { %v7991_v48 = vpop.f32.mrf.mxu0 }
 0x5eb   : > { %v8034_v63 = vpop.f32.mrf.mxu1 }
 0x5ec   : > { %v8035_v32 = vadd.f32 %v8034_v63, %v7991_v48  ;;  %v7993_v30 = vpop.f32.mrf.mxu0 }
 0x5ed   : > { %v8036_v52 = vpop.f32.mrf.mxu1 }
 0x5ee   : > { %v8125_v54 = vadd.f32 %v8035_v32, %v7286_v27  ;;  %v8037_v1 = vadd.f32 %v8036_v52, %v7993_v30  ;;  %v7995_v16 = vpop.f32.mrf.mxu0  ;;  %v8313_v27 = vpack.c.bf16 %v8303_v34, %v8303_v34 }
 0x5ef   : > { %v8038_v21 = vpop.f32.mrf.mxu1 }
 0x5f0   : > { %v8148_v58 = vadd.f32 %v8136_v3, %v8125_v54  ;;  %v8126_v20 = vadd.f32 %v8037_v1, %v7287_v60  ;;  %v8039_v62 = vadd.f32 %v8038_v21, %v7995_v16  ;;  %v7997_v22 = vpop.f32.mrf.mxu0  ;;  %v8408_v52 = vshll.u32 %v8313_v27, 16  ;;  %v19857_v27 = vld [vmem:[#allocation13 + $0x4b4] ss:$8 sps:$4 sm:$0xff]  }
 0x5f1   : > { %v8040_v25 = vpop.f32.mrf.mxu1 }
 0x5f2   : > { %v8154_v59 = vmax.f32 %v8148_v58, 0.0  ;;  %v8149_v42 = vadd.f32 %v8140_v51, %v8126_v20  ;;  %v8128_v61 = vadd.f32 %v8039_v62, %v7289_v26  ;;  %v8041_v14 = vadd.f32 %v8040_v25, %v7997_v22  ;;  %v19831_v20 = vld [vmem:[#allocation13 + $0x4f0] ss:$8 sps:$4 sm:$0xff]  }
 0x5f3   : > { %v8410_v16 = vrot.slane %v8408_v52, 1  ;;  %v18335_v22 = vadd.f32 %v22804_v39, %v22800_v18  ;;  %v18338_v18 = vadd.f32 %v22812_v47, %v22808_v43  ;;  %v19843_v43 = vld [vmem:[#allocation13 + $0x4d0] ss:$8 sps:$4 sm:$0xff]  }
 0x5f4   : > { %v8182_v50 = vrot.slane %v8154_v59, 4  ;;  %v8155_v53 = vmax.f32 %v8149_v42, 0.0  ;;  %v8151_v19 = vadd.f32 %v8136_v3, %v8128_v61  ;;  %v8129_v6 = vadd.f32 %v8041_v14, %v7290_v5  ;;  %v19839_v59 = vld [vmem:[#allocation13 + $0x4e4] ss:$8 sps:$4 sm:$0xff]   ;;  %v19837_v14 = vld [vmem:[#allocation13 + $0x4e0] ss:$8 sps:$4 sm:$0xff]  }
 0x5f5   : > { %v8314_v3 = vpack.c.bf16 %v8304_v28, %v8304_v28  ;;  %v18357_v5 = vadd.f32 %v22806_v41, %v22802_v37  ;;  %v18379_v42 = vadd.f32 %v22820_v13, %v22816_v4  ;;  %v18401_v61 = vadd.f32 %v22822_v15, %v22818_v12  ;;  %v19845_v41 = vld [vmem:[#allocation13 + $0x4d4] ss:$8 sps:$4 sm:$0xff]   ;;  %v19849_v28 = vld [vmem:[#allocation13 + $0x4c0] ss:$8 sps:$4 sm:$0xff]  }
 0x5f6   : > { %8197 = vst [vmem:[#allocation5 + $0x70] sm:$0xf0] %v8182_v50  ;;  %v8183_v9 = vrot.slane %v8155_v53, 4  ;;  %v8157_v11 = vmax.f32 %v8151_v19, 0.0  ;;  %v8152_v48 = vadd.f32 %v8140_v51, %v8129_v6  ;;  %v8406_v51 = vor.u32 %v8405_v8, %v8401_v33  ;;  %v19855_v33 = vld [vmem:[#allocation13 + $0x4b0] ss:$8 sps:$4 sm:$0xff]  }
 0x5f7   : > { %v8420_v54 = vshll.u32 %v8314_v3, 16  ;;  %v6417_v46 = vadd.f32 %v18357_v5, %v18335_v22  ;;  %v18360_v37 = vadd.f32 %v22814_v49, %v22810_v45  ;;  %v7280_v4 = vadd.f32 %v18401_v61, %v18379_v42  ;;  %v22890_v8 = vld [vmem:[#allocation3 + $0x28] sm:$0xff] }
 0x5f8   : > { %8198 = vst [vmem:[#allocation5 + $0x28] sm:$0xf0] %v8183_v9  ;;  %v8185_v29 = vrot.slane %v8157_v11, 4  ;;  %v8158_v63 = vmax.f32 %v8152_v48, 0.0  ;;  %v8411_v62 = vsel %vm8399_vm4, %v8406_v51, %v8410_v16  ;;  %v18382_v12 = vadd.f32 %v22840_v2, %v22829_v24 }
 0x5f9   : > { %v8422_v26 = vrot.slane %v8420_v54, 1  ;;  %v18404_v13 = vadd.f32 %v22844_v36, %v22834_v44  ;;  %v8143_v53 = vsub.s32 2, %v21420_v23  ;;  %v6425_v45 = vadd.f32 %v6417_v46, %v22535_v17  ;;  %v19863_v54 = vld [vmem:[#allocation13 + $0x4a4] ss:$8 sps:$4 sm:$0xff]  }
 0x5fa   : > { %v22859_v32 = vsel %vm8181_vm3, %v8182_v50, %v8185_v29  ;;  %v8187_v30 = vrot.slane %v8158_v63, 4  ;;  %v6420_v47 = vadd.f32 %v18360_v37, %v18338_v18  ;;  %v19875_v18 = vld [vmem:[#allocation13 + $0x484] ss:$8 sps:$4 sm:$0xff]  }
 0x5fb   : > { %8200 = vst [vmem:[#allocation5 + $0x58] sm:$0xff] %v22859_v32  ;;  %v7288_v48 = vadd.f32 %v7280_v4, %v6425_v45  ;;  %v7283_v24 = vadd.f32 %v18404_v13, %v18382_v12  ;;  %v8144_v44 = vrot.slane %v22849_v7, %v8143_v53  ;;  %v8312_v7 = vpack.c.bf16 %v22890_v8, %v8302_v38 }
 0x5fc   : > { %v22863_v55 = vsel %vm8181_vm3, %v8183_v9, %v8187_v30  ;;  %v19851_v9 = vld [vmem:[#allocation13 + $0x4c4] ss:$8 sps:$4 sm:$0xff]   ;;  %v6428_v29 = vadd.f32 %v6420_v47, %v22550_v40 }
 0x5fd   : > { %8201 = vst [vmem:[#allocation5 + $0x18] sm:$0xff] %v22863_v55  ;;  %v8299_v31 = vld [vmem:[#allocation5 + $0x70] sm:$0xfe]  ;;  %v8449_v42 = vshrl.u32 %v8312_v7, 16 }
 0x5fe   : > { %v8309_v60 = vpack.c.bf16 %v22859_v32, %v8299_v31  ;;  %v7291_v30 = vadd.f32 %v7283_v24, %v6428_v29  ;;  %v19885_v29 = vld [vmem:[#allocation13 + $0x160] ss:$8 sps:$4 sm:$0xff]  }
 0x5ff   : > { %v8300_v16 = vld [vmem:[#allocation5 + $0x28] sm:$0xfe] }
 0x600   : > { %v8415_v1 = vshll.u32 %v8309_v60, 16  ;;  %v8413_v35 = vshrl.u32 %v8309_v60, 16  ;;  %v8310_v22 = vpack.c.bf16 %v22863_v55, %v8300_v16  ;;  %v19903_v16 = vld [vmem:[#allocation13 + $0x130] ss:$8 sps:$4 sm:$0xff]  }
 0x602   : > { %v8417_v21 = vrot.slane %v8415_v1, 1  ;;  %v8307_v1 = vld [vmem:[#allocation5 + $0x8] sm:$0x1] }
 0x604   : > { %v8418_v58 = vor.u32 %v8417_v21, %v8413_v35  ;;  %v19861_v35 = vld [vmem:[#allocation13 + $0x4a0] ss:$8 sps:$4 sm:$0xff]   ;;  %v8317_v21 = vpack.c.bf16 %v8307_v1, %v8307_v1  ;;  %v19902_v1 = vld [vmem:[#allocation13 + $0x44] ss:$8 sps:$4 sm:$0xff]  }
 0x606   : > { %v8423_v25 = vsel %vm8399_vm4, %v8418_v58, %v8422_v26  ;;  %v8451_v26 = vshll.u32 %v8312_v7, 16  ;;  %v19896_v7 = vld [vmem:[#allocation13 + $0x54] ss:$8 sps:$4 sm:$0xff]  }
 0x607   : > { %8897 = vmatprep.mubr.bf16.mxu0 %v8423_v25  ;;  %v8305_v25 = vld [vmem:[#allocation5 + $0x10] sm:$0x1] }
 0x608   : > { %8898 = vmatmul.mubr.bf16.vlgmr.msra.gmra.mxu0 %v8411_v62  ;;  %v8306_v62 = vld [vmem:[#allocation5 + $0x60] sm:$0x1]  ;;  %v8453_v61 = vrot.slane %v8451_v26, 1  ;;  %v19906_v26 = vld [vmem:[#allocation13 + $0x30] ss:$8 sps:$4 sm:$0xff]  }
 0x609   : > { %8952 = vmatpush1.bf16.msra.mxu0 %v19831_v20  ;;  %8983 = vmatprep.mubr.bf16.mxu0 %v24315_v0  ;;  %v19869_v20 = vld [vmem:[#allocation13 + $0x494] ss:$8 sps:$4 sm:$0xff]   ;;  %v8316_v37 = vpack.c.bf16 %v8306_v62, %v8306_v62 }
 0x60a   : > { %v18421_v39 = vpop.f32.mrf.mxu0  ;;  %8953 = vmatprep.subr.bf16.mxu0 %v19839_v59  ;;  %v19867_v59 = vld [vmem:[#allocation13 + $0x490] ss:$8 sps:$4 sm:$0xff]   ;;  %v8454_v4 = vor.u32 %v8453_v61, %v8449_v42  ;;  %v19917_v62 = vld [vmem:[#allocation13 + $0x114] ss:$8 sps:$4 sm:$0xff]   ;;  %v19921_v61 = vld [vmem:[#allocation13 + $0x100] ss:$8 sps:$4 sm:$0xff]  }
 0x60b   : > { %v18443_v50 = vpop.f32.mrf.mxu1  ;;  %v19918_v42 = vld [vmem:[#allocation13 + $0x10] ss:$8 sps:$4 sm:$0xff]  }
 0x60c   : > { %v18422_v15 = vpop.f32.mrf.mxu0 }
 0x60d   : > { %v18423_v19 = vadd.f32 %v18422_v15, %v18421_v39  ;;  %v18444_v6 = vpop.f32.mrf.mxu1  ;;  %8954 = vmatpush1.bf16.msra.mxu0 %v19837_v14  ;;  %v8456_v14 = vshll.u32 %v8317_v21, 16  ;;  %v8315_v39 = vpack.c.bf16 %v8305_v25, %v8305_v25  ;;  %v19881_v15 = vld [vmem:[#allocation13 + $0x174] ss:$8 sps:$4 sm:$0xff]   ;;  %v19911_v21 = vld [vmem:[#allocation13 + $0x124] ss:$8 sps:$4 sm:$0xff]  }
 0x60e   : > { %v18445_v49 = vadd.f32 %v18444_v6, %v18443_v50  ;;  %v18424_v10 = vpop.f32.mrf.mxu0  ;;  %8955 = vmatprep.subr.bf16.mxu0 %v19845_v41  ;;  %v8427_v41 = vshll.u32 %v8310_v22, 16  ;;  %v19873_v50 = vld [vmem:[#allocation13 + $0x480] ss:$8 sps:$4 sm:$0xff]   ;;  %v19920_v25 = vld [vmem:[#allocation13 + $0x14] ss:$8 sps:$4 sm:$0xff]  }
 0x60f   : > { %v18446_v11 = vpop.f32.mrf.mxu1  ;;  %v8458_v12 = vrot.slane %v8456_v14, 1  ;;  %v19926_v14 = vld [vmem:[#allocation13 + $0x4] ss:$8 sps:$4 sm:$0xff]  }
 0x610   : > { %v8119_v2 = vadd.f32 %v18445_v49, %v18423_v19  ;;  %v18425_v36 = vpop.f32.mrf.mxu0  ;;  %v8444_v19 = vshll.u32 %v8316_v37, 16  ;;  %v8429_v6 = vrot.slane %v8427_v41, 1  ;;  %v19924_v37 = vld [vmem:[#allocation13] ss:$8 sps:$4 sm:$0xff]   ;;  %v19932_v41 = vld [vmem:[#allocation13 + $0xf4] ss:$8 sps:$4 sm:$0xff]  }
 0x611   : > { %v18426_v34 = vadd.f32 %v18425_v36, %v18424_v10  ;;  %v18447_v23 = vpop.f32.mrf.mxu1  ;;  %8956 = vmatpush1.bf16.msra.mxu0 %v19843_v43  ;;  %v8432_v43 = vshll.u32 %v8315_v39, 16  ;;  %v8459_v49 = vsel %vm8399_vm4, %v8454_v4, %v8458_v12  ;;  %v19879_v10 = vld [vmem:[#allocation13 + $0x170] ss:$8 sps:$4 sm:$0xff]   ;;  %v19933_v12 = vld [vmem:[#allocation13 + $0x1e0] ss:$8 sps:$4 sm:$0xff]  }
 0x612   : > { %v8127_v63 = vadd.f32 %v8119_v2, %v7288_v48  ;;  %v18448_v17 = vadd.f32 %v18447_v23, %v18446_v11  ;;  %8957 = vmatprep.subr.bf16.mxu0 %v19851_v9  ;;  %v8425_v9 = vshrl.u32 %v8310_v22, 16  ;;  %v8446_v24 = vrot.slane %v8444_v19, 1  ;;  %v19887_v2 = vld [vmem:[#allocation13 + $0x164] ss:$8 sps:$4 sm:$0xff]   ;;  %v19912_v22 = vld [vmem:[#allocation13 + $0x20] ss:$8 sps:$4 sm:$0xff]  }
 0x613   : > { %v19927_v39 = vld [vmem:[#allocation13 + $0x1f0] ss:$8 sps:$4 sm:$0xff]  }
 0x614   : > { %v8150_v3 = vadd.f32 %v8144_v44, %v8127_v63  ;;  %v8122_v31 = vadd.f32 %v18448_v17, %v18426_v34  ;;  %v8430_v36 = vor.u32 %v8429_v6, %v8425_v9  ;;  %v8434_v34 = vrot.slane %v8432_v43, 1  ;;  %v8204_v63 = vld [vmem:[#allocation5 + $0x70] sm:$0xff]  ;;  %v19947_v43 = vld [vmem:[#allocation13 + $0x1c4] ss:$8 sps:$4 sm:$0xff]   ;;  %v19948_v9 = vld [vmem:[#allocation13 + $0xc0] ss:$8 sps:$4 sm:$0xff]  }
 0x615   : > { %8958 = vmatpush1.bf16.msra.mxu0 %v19849_v28  ;;  %v19882_v28 = vld [vmem:[#allocation13 + $0x70] ss:$8 sps:$4 sm:$0xff]   ;;  %v19944_v6 = vld [vmem:[#allocation13 + $0xd4] ss:$8 sps:$4 sm:$0xff]  }
 0x616   : > { %v8156_v52 = vmax.f32 %v8150_v3, 0.0  ;;  %v8130_v60 = vadd.f32 %v8122_v31, %v7291_v30  ;;  %8959 = vmatprep.subr.bf16.mxu0 %v19857_v27  ;;  %v19890_v27 = vld [vmem:[#allocation13 + $0x64] ss:$8 sps:$4 sm:$0xff]   ;;  %v8435_v38 = vsel %vm8399_vm4, %v8430_v36, %v8434_v34  ;;  %v19893_v30 = vld [vmem:[#allocation13 + $0x154] ss:$8 sps:$4 sm:$0xff]   ;;  %v8214_v3 = vpack.c.bf16 %v22859_v32, %v8204_v63 }
 0x617   : > { %v19888_v31 = vld [vmem:[#allocation13 + $0x60] ss:$8 sps:$4 sm:$0xff]   ;;  %v19930_v4 = vld [vmem:[#allocation13 + $0xf0] ss:$8 sps:$4 sm:$0xff]   ;;  %v19962_v36 = vld [vmem:[#allocation13 + $0xa4] ss:$8 sps:$4 sm:$0xff]  }
 0x618   : > { %v8184_v40 = vrot.slane %v8156_v52, 4  ;;  %v8153_v51 = vadd.f32 %v8144_v44, %v8130_v60  ;;  %v19899_v52 = vld [vmem:[#allocation13 + $0x144] ss:$8 sps:$4 sm:$0xff]   ;;  %v19894_v60 = vld [vmem:[#allocation13 + $0x50] ss:$8 sps:$4 sm:$0xff]  }
 0x619   : > { %8960 = vmatpush1.bf16.msra.mxu0 %v19855_v33  ;;  %v19891_v33 = vld [vmem:[#allocation13 + $0x150] ss:$8 sps:$4 sm:$0xff]   ;;  %v19965_v34 = vld [vmem:[#allocation13 + $0x194] ss:$8 sps:$4 sm:$0xff]  }
 0x61a   : > { %8199 = vst [vmem:[#allocation5] sm:$0xf0] %v8184_v40  ;;  %v8159_v58 = vmax.f32 %v8153_v51, 0.0  ;;  %8961 = vmatprep.subr.bf16.mxu0 %v19863_v54  ;;  %v19897_v54 = vld [vmem:[#allocation13 + $0x140] ss:$8 sps:$4 sm:$0xff]  }
 0x61b   : > { %v19900_v51 = vld [vmem:[#allocation13 + $0x40] ss:$8 sps:$4 sm:$0xff]   ;;  %v19939_v19 = vld [vmem:[#allocation13 + $0x1d0] ss:$8 sps:$4 sm:$0xff]   ;;  %v19968_v63 = vld [vmem:[#allocation13 + $0x94] ss:$8 sps:$4 sm:$0xff]  }
 0x61c   : > { %v8189_v5 = vrot.slane %v8159_v58, 4  ;;  %v19909_v58 = vld [vmem:[#allocation13 + $0x120] ss:$8 sps:$4 sm:$0xff]  }
 0x61d   : > { %8962 = vmatpush1.bf16.msra.mxu0 %v19861_v35  ;;  %v19908_v35 = vld [vmem:[#allocation13 + $0x34] ss:$8 sps:$4 sm:$0xff]  }
 0x61e   : > { %v22895_v46 = vsel %vm8181_vm3, %v8184_v40, %v8189_v5  ;;  %8963 = vmatprep.subr.bf16.mxu0 %v19869_v20  ;;  %v19905_v40 = vld [vmem:[#allocation13 + $0x134] ss:$8 sps:$4 sm:$0xff]   ;;  %v19914_v20 = vld [vmem:[#allocation13 + $0x24] ss:$8 sps:$4 sm:$0xff]   ;;  %v19915_v5 = vld [vmem:[#allocation13 + $0x110] ss:$8 sps:$4 sm:$0xff]  }
 0x61f   : > { %8202 = vst [vmem:[#allocation5 + $0x38] sm:$0xff] %v22895_v46 }
 0x621   : > { %8964 = vmatpush1.bf16.msra.mxu0 %v19867_v59  ;;  %v8301_v13 = vld [vmem:[#allocation5] sm:$0xfe] }
 0x622   : > { %8965 = vmatprep.subr.bf16.mxu0 %v19875_v18  ;;  %v8311_v53 = vpack.c.bf16 %v22895_v46, %v8301_v13  ;;  %v8206_v45 = vld [vmem:[#allocation5] sm:$0xff]  ;;  %v19929_v18 = vld [vmem:[#allocation13 + $0x1f4] ss:$8 sps:$4 sm:$0xff]  }
 0x623   : > { %v8216_v44 = vpack.c.bf16 %v22895_v46, %v8206_v45  ;;  %v19923_v59 = vld [vmem:[#allocation13 + $0x104] ss:$8 sps:$4 sm:$0xff]   ;;  %v19942_v45 = vld [vmem:[#allocation13 + $0xd0] ss:$8 sps:$4 sm:$0xff]  }
 0x624   : > { %v8439_v47 = vshll.u32 %v8311_v53, 16  ;;  %v8437_v11 = vshrl.u32 %v8311_v53, 16  ;;  %v19938_v13 = vld [vmem:[#allocation13 + $0xe4] ss:$8 sps:$4 sm:$0xff]   ;;  %v19936_v53 = vld [vmem:[#allocation13 + $0xe0] ss:$8 sps:$4 sm:$0xff]  }
 0x625   : > { %8966 = vmatpush1.bf16.msra.mxu0 %v19873_v50  ;;  %v19935_v50 = vld [vmem:[#allocation13 + $0x1e4] ss:$8 sps:$4 sm:$0xff]  }
 0x626   : > { %9437 = vmatprep.subr.bf16.mxu0 %v19881_v15  ;;  %v8441_v48 = vrot.slane %v8439_v47, 1  ;;  %v19941_v15 = vld [vmem:[#allocation13 + $0x1d4] ss:$8 sps:$4 sm:$0xff]   ;;  %v19945_v47 = vld [vmem:[#allocation13 + $0x1c0] ss:$8 sps:$4 sm:$0xff]  }
 0x628   : > { %8984 = vmatmul.mubr.bf16.vlgmr.msra.gmra.mxu0 %v8459_v49  ;;  %v8442_v23 = vor.u32 %v8441_v48, %v8437_v11  ;;  %v19950_v49 = vld [vmem:[#allocation13 + $0xc4] ss:$8 sps:$4 sm:$0xff]   ;;  %v19951_v11 = vld [vmem:[#allocation13 + $0x1b0] ss:$8 sps:$4 sm:$0xff]   ;;  %v19956_v48 = vld [vmem:[#allocation13 + $0xb4] ss:$8 sps:$4 sm:$0xff]  }
 0x629   : > { %9438 = vmatpush1.bf16.msra.mxu0 %v19879_v10  ;;  %9469 = vmatprep.mubr.bf16.mxu0 %v8216_v44  ;;  %v19953_v10 = vld [vmem:[#allocation13 + $0x1b4] ss:$8 sps:$4 sm:$0xff]   ;;  %v19957_v44 = vld [vmem:[#allocation13 + $0x1a0] ss:$8 sps:$4 sm:$0xff]  }
 0x62a   : > { %v8447_v17 = vsel %vm8399_vm4, %v8442_v23, %v8446_v24  ;;  %9439 = vmatprep.subr.bf16.mxu0 %v19887_v2  ;;  %v19959_v24 = vld [vmem:[#allocation13 + $0x1a4] ss:$8 sps:$4 sm:$0xff]   ;;  %v19954_v2 = vld [vmem:[#allocation13 + $0xb0] ss:$8 sps:$4 sm:$0xff]   ;;  %v19960_v23 = vld [vmem:[#allocation13 + $0xa0] ss:$8 sps:$4 sm:$0xff]  }
 0x62b   : > { %8940 = vmatprep.mubr.bf16.mxu1 %v8447_v17  ;;  %v19971_v17 = vld [vmem:[#allocation13 + $0x184] ss:$8 sps:$4 sm:$0xff]  }
 0x62c   : > { %8941 = vmatmul.mubr.bf16.vlgmr.msra.gmra.mxu1 %v8435_v38  ;;  %v19966_v38 = vld [vmem:[#allocation13 + $0x90] ss:$8 sps:$4 sm:$0xff]  }
 0x62d   : > { %9395 = vmatpush1.bf16.msra.mxu1 %v19882_v28  ;;  %9440 = vmatpush1.bf16.msra.mxu0 %v19885_v29  ;;  %v19963_v28 = vld [vmem:[#allocation13 + $0x190] ss:$8 sps:$4 sm:$0xff]   ;;  %v9529_v29 = vld [vmem:[#allocation5 + $0x68] sm:$0x3] }
 0x62e   : > { %9426 = vmatprep.mubr.bf16.mxu1 %v8214_v3  ;;  %9396 = vmatprep.subr.bf16.mxu1 %v19890_v27  ;;  %v9524_v27 = vld [vmem:[#allocation5 + $0x70] sm:$0xfc] }
 0x62f   : > { %9441 = vmatprep.subr.bf16.mxu0 %v19893_v30  ;;  %v19969_v30 = vld [vmem:[#allocation13 + $0x180] ss:$8 sps:$4 sm:$0xff]   ;;  %v9534_v3 = vpack.c.bf16 %v22859_v32, %v9524_v27  ;;  %v20034_v27 = vld [vmem:[#allocation13 + $0x5d4] ss:$8 sps:$4 sm:$0xff]  }
 0x631   : > { %9397 = vmatpush1.bf16.msra.mxu1 %v19888_v31  ;;  %9442 = vmatpush1.bf16.msra.mxu0 %v19891_v33  ;;  %v9539_v31 = vpack.c.bf16 %v9529_v29, %v9529_v29  ;;  %v19974_v33 = vld [vmem:[#allocation13 + $0x84] ss:$8 sps:$4 sm:$0xff]   ;;  %v20029_v29 = vld [vmem:[#allocation13 + $0x670] ss:$8 sps:$4 sm:$0xff]  }
 0x632   : > { %9398 = vmatprep.subr.bf16.mxu1 %v19896_v7  ;;  %9443 = vmatprep.subr.bf16.mxu0 %v19899_v52  ;;  %v19977_v7 = vld [vmem:[#allocation13 + $0x574] ss:$8 sps:$4 sm:$0xff]   ;;  %v8205_v52 = vld [vmem:[#allocation5 + $0x28] sm:$0xff] }
 0x635   : > { %9399 = vmatpush1.bf16.msra.mxu1 %v19894_v60  ;;  %9444 = vmatpush1.bf16.msra.mxu0 %v19897_v54  ;;  %v19972_v60 = vld [vmem:[#allocation13 + $0x80] ss:$8 sps:$4 sm:$0xff]   ;;  %v19975_v54 = vld [vmem:[#allocation13 + $0x570] ss:$8 sps:$4 sm:$0xff]  }
 0x636   : > { %9400 = vmatprep.subr.bf16.mxu1 %v19902_v1  ;;  %9445 = vmatprep.subr.bf16.mxu0 %v19905_v40  ;;  %v9638_v1 = vrot.slane %v9534_v3, 1  ;;  %v9639_v40 = vrot.slane %v9539_v31, 1  ;;  %v20032_v3 = vld [vmem:[#allocation13 + $0x5d0] ss:$8 sps:$4 sm:$0xff]   ;;  %v20035_v31 = vld [vmem:[#allocation13 + $0x660] ss:$8 sps:$4 sm:$0xff]  }
 0x639   : > { %9401 = vmatpush1.bf16.msra.mxu1 %v19900_v51  ;;  %9446 = vmatpush1.bf16.msra.mxu0 %v19903_v16  ;;  %v8215_v51 = vpack.c.bf16 %v22863_v55, %v8205_v52  ;;  %v19980_v16 = vld [vmem:[#allocation13 + $0x274] ss:$8 sps:$4 sm:$0xff]   ;;  %v20038_v52 = vld [vmem:[#allocation13 + $0x5c0] ss:$8 sps:$4 sm:$0xff]  }
 0x63a   : > { %9402 = vmatprep.subr.bf16.mxu1 %v19908_v35  ;;  %9447 = vmatprep.subr.bf16.mxu0 %v19911_v21  ;;  %v19983_v35 = vld [vmem:[#allocation13 + $0x564] ss:$8 sps:$4 sm:$0xff]   ;;  %v22908_v21 = vpack.c.bf16 %v22890_v8, %v22890_v8 }
 0x63d   : > { %9403 = vmatpush1.bf16.msra.mxu1 %v19906_v26  ;;  %9448 = vmatpush1.bf16.msra.mxu0 %v19909_v58  ;;  %v9640_v26 = vsel %vm9634_vm5, %v9638_v1, %v9639_v40  ;;  %v19978_v58 = vld [vmem:[#allocation13 + $0x270] ss:$8 sps:$4 sm:$0xff]   ;;  %v20049_v1 = vld [vmem:[#allocation13 + $0x644] ss:$8 sps:$4 sm:$0xff]  }
 0x63e   : > { %9404 = vmatprep.subr.bf16.mxu1 %v19914_v20  ;;  %9449 = vmatprep.subr.bf16.mxu0 %v19917_v62  ;;  %v19981_v20 = vld [vmem:[#allocation13 + $0x560] ss:$8 sps:$4 sm:$0xff]   ;;  %v19986_v62 = vld [vmem:[#allocation13 + $0x264] ss:$8 sps:$4 sm:$0xff]   ;;  %v20044_v40 = vld [vmem:[#allocation13 + $0x5b0] ss:$8 sps:$4 sm:$0xff]  }
 0x641   : > { %9405 = vmatpush1.bf16.msra.mxu1 %v19912_v22  ;;  %9450 = vmatpush1.bf16.msra.mxu0 %v19915_v5  ;;  %v19989_v22 = vld [vmem:[#allocation13 + $0x554] ss:$8 sps:$4 sm:$0xff]   ;;  %v19984_v5 = vld [vmem:[#allocation13 + $0x260] ss:$8 sps:$4 sm:$0xff]  }
 0x642   : > { %9406 = vmatprep.subr.bf16.mxu1 %v19920_v25  ;;  %9451 = vmatprep.subr.bf16.mxu0 %v19923_v59  ;;  %v19987_v25 = vld [vmem:[#allocation13 + $0x550] ss:$8 sps:$4 sm:$0xff]   ;;  %v19992_v59 = vld [vmem:[#allocation13 + $0x254] ss:$8 sps:$4 sm:$0xff]  }
 0x645   : > { %9407 = vmatpush1.bf16.msra.mxu1 %v19918_v42  ;;  %9452 = vmatpush1.bf16.msra.mxu0 %v19921_v61  ;;  %v19995_v42 = vld [vmem:[#allocation13 + $0x544] ss:$8 sps:$4 sm:$0xff]   ;;  %v19990_v61 = vld [vmem:[#allocation13 + $0x250] ss:$8 sps:$4 sm:$0xff]  }
 0x646   : > { %9408 = vmatprep.subr.bf16.mxu1 %v19926_v14  ;;  %9453 = vmatprep.subr.bf16.mxu0 %v19929_v18  ;;  %v19993_v14 = vld [vmem:[#allocation13 + $0x540] ss:$8 sps:$4 sm:$0xff]   ;;  %v19998_v18 = vld [vmem:[#allocation13 + $0x244] ss:$8 sps:$4 sm:$0xff]  }
 0x649   : > { %9409 = vmatpush1.bf16.msra.mxu1 %v19924_v37  ;;  %9454 = vmatpush2.bf16.msra.mxu0 %v19927_v39  ;;  %v20001_v37 = vld [vmem:[#allocation13 + $0x534] ss:$8 sps:$4 sm:$0xff]   ;;  %v19996_v39 = vld [vmem:[#allocation13 + $0x240] ss:$8 sps:$4 sm:$0xff]  }
 0x64a   : > { %9410 = vmatprep.subr.bf16.mxu1 %v19932_v41  ;;  %9455 = vmatprep.subr.bf16.mxu0 %v19935_v50  ;;  %v19999_v41 = vld [vmem:[#allocation13 + $0x530] ss:$8 sps:$4 sm:$0xff]   ;;  %v20004_v50 = vld [vmem:[#allocation13 + $0x234] ss:$8 sps:$4 sm:$0xff]  }
 0x64d   : > { %9411 = vmatpush2.bf16.msra.mxu1 %v19930_v4  ;;  %9456 = vmatpush2.bf16.msra.mxu0 %v19933_v12  ;;  %v20007_v4 = vld [vmem:[#allocation13 + $0x524] ss:$8 sps:$4 sm:$0xff]   ;;  %v20002_v12 = vld [vmem:[#allocation13 + $0x230] ss:$8 sps:$4 sm:$0xff]  }
 0x64e   : > { %9412 = vmatprep.subr.bf16.mxu1 %v19938_v13  ;;  %9457 = vmatprep.subr.bf16.mxu0 %v19941_v15  ;;  %v20005_v13 = vld [vmem:[#allocation13 + $0x520] ss:$8 sps:$4 sm:$0xff]   ;;  %v20010_v15 = vld [vmem:[#allocation13 + $0x224] ss:$8 sps:$4 sm:$0xff]  }
 0x651   : > { %9413 = vmatpush2.bf16.msra.mxu1 %v19936_v53  ;;  %9458 = vmatpush2.bf16.msra.mxu0 %v19939_v19  ;;  %v20013_v53 = vld [vmem:[#allocation13 + $0x514] ss:$8 sps:$4 sm:$0xff]   ;;  %v20008_v19 = vld [vmem:[#allocation13 + $0x220] ss:$8 sps:$4 sm:$0xff]  }
 0x652   : > { %9414 = vmatprep.subr.bf16.mxu1 %v19944_v6  ;;  %9459 = vmatprep.subr.bf16.mxu0 %v19947_v43  ;;  %v20011_v6 = vld [vmem:[#allocation13 + $0x510] ss:$8 sps:$4 sm:$0xff]   ;;  %v20016_v43 = vld [vmem:[#allocation13 + $0x214] ss:$8 sps:$4 sm:$0xff]  }
 0x655   : > { %9415 = vmatpush2.bf16.msra.mxu1 %v19942_v45  ;;  %9460 = vmatpush2.bf16.msra.mxu0 %v19945_v47  ;;  %v20019_v45 = vld [vmem:[#allocation13 + $0x504] ss:$8 sps:$4 sm:$0xff]   ;;  %v20014_v47 = vld [vmem:[#allocation13 + $0x210] ss:$8 sps:$4 sm:$0xff]  }
 0x656   : > { %9416 = vmatprep.subr.bf16.mxu1 %v19950_v49  ;;  %9461 = vmatprep.subr.bf16.mxu0 %v19953_v10  ;;  %v20017_v49 = vld [vmem:[#allocation13 + $0x500] ss:$8 sps:$4 sm:$0xff]  }
 0x657   : > { %v9531_v10 = vld [vmem:[#allocation5 + $0x60] sm:$0x3] }
 0x659   : > { %9417 = vmatpush2.bf16.msra.mxu1 %v19948_v9  ;;  %9462 = vmatpush2.bf16.msra.mxu0 %v19951_v11  ;;  %v20022_v9 = vld [vmem:[#allocation13 + $0x204] ss:$8 sps:$4 sm:$0xff]   ;;  %v20025_v11 = vld [vmem:[#allocation13 + $0x5f4] ss:$8 sps:$4 sm:$0xff]  }
 0x65a   : > { %9418 = vmatprep.subr.bf16.mxu1 %v19956_v48  ;;  %9463 = vmatprep.subr.bf16.mxu0 %v19959_v24  ;;  %v9526_v48 = vld [vmem:[#allocation5] sm:$0xfc] }
 0x65b   : > { %v20020_v24 = vld [vmem:[#allocation13 + $0x200] ss:$8 sps:$4 sm:$0xff]  }
 0x65d   : > { %9419 = vmatpush2.bf16.msra.mxu1 %v19954_v2  ;;  %9464 = vmatpush2.bf16.msra.mxu0 %v19957_v44  ;;  %v20023_v2 = vld [vmem:[#allocation13 + $0x5f0] ss:$8 sps:$4 sm:$0xff]   ;;  %v9536_v44 = vpack.c.bf16 %v22895_v46, %v9526_v48 }
 0x65e   : > { %9420 = vmatprep.subr.bf16.mxu1 %v19962_v36  ;;  %9465 = vmatprep.subr.bf16.mxu0 %v19965_v34  ;;  %v9541_v36 = vpack.c.bf16 %v9531_v10, %v9531_v10  ;;  %v20028_v34 = vld [vmem:[#allocation13 + $0x5e4] ss:$8 sps:$4 sm:$0xff]   ;;  %v20083_v10 = vld [vmem:[#allocation13 + $0x750] ss:$8 sps:$4 sm:$0xff]  }
 0x65f   : > { %v20086_v48 = vld [vmem:[#allocation13 + $0x6d0] ss:$8 sps:$4 sm:$0xff]  }
 0x661   : > { %9421 = vmatpush2.bf16.msra.mxu1 %v19960_v23  ;;  %9466 = vmatpush2.bf16.msra.mxu0 %v19963_v28  ;;  %v20031_v23 = vld [vmem:[#allocation13 + $0x674] ss:$8 sps:$4 sm:$0xff]   ;;  %v20026_v28 = vld [vmem:[#allocation13 + $0x5e0] ss:$8 sps:$4 sm:$0xff]  }
 0x662   : > { %9422 = vmatprep.subr.bf16.mxu1 %v19968_v63  ;;  %9467 = vmatprep.subr.bf16.mxu0 %v19971_v17  ;;  %v9644_v63 = vrot.slane %v9536_v44, 1  ;;  %v9645_v17 = vrot.slane %v9541_v36, 1  ;;  %v20097_v44 = vld [vmem:[#allocation13 + $0x734] ss:$8 sps:$4 sm:$0xff]   ;;  %v10196_v36 = vld [vmem:[#allocation5 + $0x60] sm:$0x7] }
 0x665   : > { %9423 = vmatpush2.bf16.msra.mxu1 %v19966_v38  ;;  %9468 = vmatpush2.bf16.msra.mxu0 %v19969_v30  ;;  %v20037_v38 = vld [vmem:[#allocation13 + $0x664] ss:$8 sps:$4 sm:$0xff]   ;;  %v9646_v30 = vsel %vm9634_vm5, %v9644_v63, %v9645_v17  ;;  %v10206_v17 = vpack.c.bf16 %v10196_v36, %v10196_v36 }
 0x666   : > { %9424 = vmatprep.subr.bf16.mxu1 %v19974_v33  ;;  %10055 = vmatprep.subr.bf16.mxu0 %v19977_v7  ;;  %v20040_v33 = vld [vmem:[#allocation13 + $0x5c4] ss:$8 sps:$4 sm:$0xff]   ;;  %v20043_v7 = vld [vmem:[#allocation13 + $0x654] ss:$8 sps:$4 sm:$0xff]  }
 0x667   : > { %v20103_v63 = vld [vmem:[#allocation13 + $0x724] ss:$8 sps:$4 sm:$0xff]  }
 0x668   : > { %9470 = vmatmul.mubr.bf16.vlgmr.msra.gmra.mxu0 %v8215_v51  ;;  %v20047_v51 = vld [vmem:[#allocation13 + $0x640] ss:$8 sps:$4 sm:$0xff]  }
 0x669   : > { %9425 = vmatpush2.bf16.msra.mxu1 %v19972_v60  ;;  %10056 = vmatpush1.bf16.msra.mxu0 %v19975_v54  ;;  %v20041_v60 = vld [vmem:[#allocation13 + $0x650] ss:$8 sps:$4 sm:$0xff]   ;;  %v20046_v54 = vld [vmem:[#allocation13 + $0x5b4] ss:$8 sps:$4 sm:$0xff]  }
 0x66a   : > { %10087 = vmatprep.mubr.bf16.mxu0 %v9640_v26  ;;  %9480 = vmatprep.subr.bf16.mxu1 %v19980_v16  ;;  %v20052_v16 = vld [vmem:[#allocation13 + $0x5a4] ss:$8 sps:$4 sm:$0xff]   ;;  %v20053_v26 = vld [vmem:[#allocation13 + $0x630] ss:$8 sps:$4 sm:$0xff]  }
 0x66b   : > { %10057 = vmatprep.subr.bf16.mxu0 %v19983_v35  ;;  %v20055_v35 = vld [vmem:[#allocation13 + $0x634] ss:$8 sps:$4 sm:$0xff]  }
 0x66c   : > { %9427 = vmatmul.mubr.bf16.vlgmr.msra.gmra.mxu1 %v22908_v21 }
 0x66d   : > { %9481 = vmatpush1.bf16.msra.mxu1 %v19978_v58  ;;  %10058 = vmatpush1.bf16.msra.mxu0 %v19981_v20  ;;  %v20058_v58 = vld [vmem:[#allocation13 + $0x594] ss:$8 sps:$4 sm:$0xff]   ;;  %v20061_v20 = vld [vmem:[#allocation13 + $0x624] ss:$8 sps:$4 sm:$0xff]  }
 0x66e   : > { %9482 = vmatprep.subr.bf16.mxu1 %v19986_v62  ;;  %10059 = vmatprep.subr.bf16.mxu0 %v19989_v22  ;;  %v9523_v62 = vld [vmem:[#allocation5 + $0x40] sm:$0xfc]  ;;  %v9528_v22 = vld [vmem:[#allocation5 + $0x30] sm:$0x3] }
 0x66f   : > { %9512 = vmatprep.mubr.bf16.mxu1 %v24315_v0 }
 0x671   : > { %9483 = vmatpush1.bf16.msra.mxu1 %v19984_v5  ;;  %10060 = vmatpush1.bf16.msra.mxu0 %v19987_v25  ;;  %v20056_v5 = vld [vmem:[#allocation13 + $0x590] ss:$8 sps:$4 sm:$0xff]   ;;  %v20059_v25 = vld [vmem:[#allocation13 + $0x620] ss:$8 sps:$4 sm:$0xff]  }
 0x672   : > { %9484 = vmatprep.subr.bf16.mxu1 %v19992_v59  ;;  %10061 = vmatprep.subr.bf16.mxu0 %v19995_v42  ;;  %v9533_v59 = vpack.c.bf16 %v22890_v8, %v9523_v62  ;;  %v9538_v42 = vpack.c.bf16 %v9528_v22, %v9528_v22  ;;  %v20115_v62 = vld [vmem:[#allocation13 + $0x704] ss:$8 sps:$4 sm:$0xff]  }
 0x675   : > { %9485 = vmatpush1.bf16.msra.mxu1 %v19990_v61  ;;  %10062 = vmatpush1.bf16.msra.mxu0 %v19993_v14  ;;  %v20064_v61 = vld [vmem:[#allocation13 + $0x584] ss:$8 sps:$4 sm:$0xff]   ;;  %v20067_v14 = vld [vmem:[#allocation13 + $0x614] ss:$8 sps:$4 sm:$0xff]  }
 0x676   : > { %9486 = vmatprep.subr.bf16.mxu1 %v19998_v18  ;;  %10063 = vmatprep.subr.bf16.mxu0 %v20001_v37  ;;  %v20062_v18 = vld [vmem:[#allocation13 + $0x580] ss:$8 sps:$4 sm:$0xff]   ;;  %v20065_v37 = vld [vmem:[#allocation13 + $0x610] ss:$8 sps:$4 sm:$0xff]  }
 0x679   : > { %9487 = vmatpush1.bf16.msra.mxu1 %v19996_v39  ;;  %10064 = vmatpush1.bf16.msra.mxu0 %v19999_v41  ;;  %v9635_v39 = vrot.slane %v9533_v59, 1  ;;  %v9636_v41 = vrot.slane %v9538_v42, 1 }
 0x67a   : > { %9488 = vmatprep.subr.bf16.mxu1 %v20004_v50  ;;  %10065 = vmatprep.subr.bf16.mxu0 %v20007_v4  ;;  %v20070_v50 = vld [vmem:[#allocation13 + $0x604] ss:$8 sps:$4 sm:$0xff]   ;;  %v20073_v4 = vld [vmem:[#allocation13 + $0x774] ss:$8 sps:$4 sm:$0xff]  }
 0x67d   : > { %9489 = vmatpush1.bf16.msra.mxu1 %v20002_v12  ;;  %10066 = vmatpush1.bf16.msra.mxu0 %v20005_v13  ;;  %v20068_v12 = vld [vmem:[#allocation13 + $0x600] ss:$8 sps:$4 sm:$0xff]   ;;  %v20071_v13 = vld [vmem:[#allocation13 + $0x770] ss:$8 sps:$4 sm:$0xff]  }
 0x67e   : > { %9490 = vmatprep.subr.bf16.mxu1 %v20010_v15  ;;  %10067 = vmatprep.subr.bf16.mxu0 %v20013_v53  ;;  %v9637_v15 = vsel %vm9634_vm5, %v9635_v39, %v9636_v41  ;;  %v20076_v53 = vld [vmem:[#allocation13 + $0x6f4] ss:$8 sps:$4 sm:$0xff]   ;;  %v20110_v39 = vld [vmem:[#allocation13 + $0x690] ss:$8 sps:$4 sm:$0xff]   ;;  %v20113_v41 = vld [vmem:[#allocation13 + $0x700] ss:$8 sps:$4 sm:$0xff]  }
 0x681   : > { %9491 = vmatpush1.bf16.msra.mxu1 %v20008_v19  ;;  %10068 = vmatpush1.bf16.msra.mxu0 %v20011_v6  ;;  %v20079_v19 = vld [vmem:[#allocation13 + $0x764] ss:$8 sps:$4 sm:$0xff]   ;;  %v20074_v6 = vld [vmem:[#allocation13 + $0x6f0] ss:$8 sps:$4 sm:$0xff]  }
 0x682   : > { %9492 = vmatprep.subr.bf16.mxu1 %v20016_v43  ;;  %10069 = vmatprep.subr.bf16.mxu0 %v20019_v45  ;;  %v20077_v43 = vld [vmem:[#allocation13 + $0x760] ss:$8 sps:$4 sm:$0xff]   ;;  %v20082_v45 = vld [vmem:[#allocation13 + $0x6e4] ss:$8 sps:$4 sm:$0xff]  }
 0x685   : > { %9493 = vmatpush1.bf16.msra.mxu1 %v20014_v47  ;;  %10070 = vmatpush1.bf16.msra.mxu0 %v20017_v49  ;;  %v20085_v47 = vld [vmem:[#allocation13 + $0x754] ss:$8 sps:$4 sm:$0xff]   ;;  %v20080_v49 = vld [vmem:[#allocation13 + $0x6e0] ss:$8 sps:$4 sm:$0xff]  }
 0x686   : > { %9494 = vmatprep.subr.bf16.mxu1 %v20022_v9  ;;  %10071 = vmatprep.subr.bf16.mxu0 %v20025_v11  ;;  %v20088_v9 = vld [vmem:[#allocation13 + $0x6d4] ss:$8 sps:$4 sm:$0xff]   ;;  %v20091_v11 = vld [vmem:[#allocation13 + $0x744] ss:$8 sps:$4 sm:$0xff]  }
 0x689   : > { %9495 = vmatpush1.bf16.msra.mxu1 %v20020_v24  ;;  %10072 = vmatpush2.bf16.msra.mxu0 %v20023_v2  ;;  %v20089_v24 = vld [vmem:[#allocation13 + $0x740] ss:$8 sps:$4 sm:$0xff]   ;;  %v20094_v2 = vld [vmem:[#allocation13 + $0x6c4] ss:$8 sps:$4 sm:$0xff]  }
 0x68a   : > { %10073 = vmatprep.subr.bf16.mxu0 %v20028_v34  ;;  %10098 = vmatprep.subr.bf16.mxu1 %v20031_v23  ;;  %v20092_v34 = vld [vmem:[#allocation13 + $0x6c0] ss:$8 sps:$4 sm:$0xff]   ;;  %v20095_v23 = vld [vmem:[#allocation13 + $0x730] ss:$8 sps:$4 sm:$0xff]  }
 0x68c   : > { %9513 = vmatmul.mubr.bf16.vlgmr.msra.gmra.mxu1 %v22908_v21  ;;  %v20050_v21 = vld [vmem:[#allocation13 + $0x5a0] ss:$8 sps:$4 sm:$0xff]  }
 0x68d   : > { %10074 = vmatpush2.bf16.msra.mxu0 %v20026_v28  ;;  %10099 = vmatpush1.bf16.msra.mxu1 %v20029_v29  ;;  %v10191_v28 = vld [vmem:[#allocation5] sm:$0xf8]  ;;  %v20100_v29 = vld [vmem:[#allocation13 + $0x6b4] ss:$8 sps:$4 sm:$0xff]  }
 0x68e   : > { %10130 = vmatprep.mubr.bf16.mxu1 %v9646_v30  ;;  %10075 = vmatprep.subr.bf16.mxu0 %v20034_v27  ;;  %v10201_v27 = vpack.c.bf16 %v22895_v46, %v10191_v28  ;;  %v10194_v30 = vld [vmem:[#allocation5 + $0x68] sm:$0x7]  ;;  %v20130_v28 = vld [vmem:[#allocation13 + $0x7e4] ss:$8 sps:$4 sm:$0xff]  }
 0x68f   : > { %10100 = vmatprep.subr.bf16.mxu1 %v20037_v38  ;;  %v10189_v38 = vld [vmem:[#allocation5 + $0x70] sm:$0xf8]  ;;  %v20104_v46 = vld [vmem:[#allocation13 + $0x6a0] ss:$8 sps:$4 sm:$0xff]  }
 0x691   : > { %10076 = vmatpush2.bf16.msra.mxu0 %v20032_v3  ;;  %10101 = vmatpush1.bf16.msra.mxu1 %v20035_v31  ;;  %v20098_v3 = vld [vmem:[#allocation13 + $0x6b0] ss:$8 sps:$4 sm:$0xff]   ;;  %v20101_v31 = vld [vmem:[#allocation13 + $0x720] ss:$8 sps:$4 sm:$0xff]  }
 0x692   : > { %10077 = vmatprep.subr.bf16.mxu0 %v20040_v33  ;;  %10102 = vmatprep.subr.bf16.mxu1 %v20043_v7  ;;  %v20106_v33 = vld [vmem:[#allocation13 + $0x6a4] ss:$8 sps:$4 sm:$0xff]   ;;  %v20109_v7 = vld [vmem:[#allocation13 + $0x714] ss:$8 sps:$4 sm:$0xff]  }
 0x695   : > { %10078 = vmatpush2.bf16.msra.mxu0 %v20038_v52  ;;  %10103 = vmatpush1.bf16.msra.mxu1 %v20041_v60  ;;  %v9527_v52 = vld [vmem:[#allocation5 + $0x20] sm:$0xfc]  ;;  %v9532_v60 = vld [vmem:[#allocation5 + $0x8] sm:$0x3] }
 0x696   : > { %10079 = vmatprep.subr.bf16.mxu0 %v20046_v54  ;;  %10104 = vmatprep.subr.bf16.mxu1 %v20049_v1  ;;  %v10350_v54 = vshrl.u32 %v10206_v17, 16  ;;  %v10353_v1 = vshll.u32 %v10206_v17, 16 }
 0x698   : > { %v10352_v22 = vrot.slane %v10350_v54, 1  ;;  %v20143_v54 = vld [vmem:[#allocation13 + $0x8b0] ss:$8 sps:$4 sm:$0xff]  }
 0x699   : > { %10080 = vmatpush2.bf16.msra.mxu0 %v20044_v40  ;;  %10105 = vmatpush1.bf16.msra.mxu1 %v20047_v51  ;;  %v10204_v40 = vpack.c.bf16 %v10194_v30, %v10194_v30  ;;  %v10342_v51 = vshrl.u32 %v10201_v27, 16  ;;  %v20136_v30 = vld [vmem:[#allocation13 + $0x7d4] ss:$8 sps:$4 sm:$0xff]  }
 0x69a   : > { %10081 = vmatprep.subr.bf16.mxu0 %v20052_v16  ;;  %10106 = vmatprep.subr.bf16.mxu1 %v20055_v35  ;;  %v10345_v16 = vshll.u32 %v10201_v27, 16  ;;  %v10199_v35 = vpack.c.bf16 %v22859_v32, %v10189_v38  ;;  %v20128_v27 = vld [vmem:[#allocation13 + $0x7e0] ss:$8 sps:$4 sm:$0xff]   ;;  %v20131_v38 = vld [vmem:[#allocation13 + $0x8d0] ss:$8 sps:$4 sm:$0xff]  }
 0x69b   : > { %v10316_v59 = vshrl.u32 %v10204_v40, 16  ;;  %v10319_v42 = vshll.u32 %v10204_v40, 16  ;;  %v20151_v40 = vld [vmem:[#allocation13 + $0x8a4] ss:$8 sps:$4 sm:$0xff]  }
 0x69c   : > { %v10308_v32 = vshrl.u32 %v10199_v35, 16 }
 0x69d   : > { %10082 = vmatpush2.bf16.msra.mxu0 %v20050_v21  ;;  %10107 = vmatpush1.bf16.msra.mxu1 %v20053_v26  ;;  %v20107_v21 = vld [vmem:[#allocation13 + $0x710] ss:$8 sps:$4 sm:$0xff]   ;;  %v9537_v26 = vpack.c.bf16 %v22890_v8, %v9527_v52  ;;  %v20145_v52 = vld [vmem:[#allocation13 + $0x8b4] ss:$8 sps:$4 sm:$0xff]  }
 0x69e   : > { %10083 = vmatprep.subr.bf16.mxu0 %v20058_v58  ;;  %10108 = vmatprep.subr.bf16.mxu1 %v20061_v20  ;;  %v9542_v58 = vpack.c.bf16 %v9532_v60, %v9532_v60  ;;  %v20112_v20 = vld [vmem:[#allocation13 + $0x694] ss:$8 sps:$4 sm:$0xff]   ;;  %v20140_v60 = vld [vmem:[#allocation13 + $0x7c0] ss:$8 sps:$4 sm:$0xff]  }
 0x69f   : > { %v9647_v8 = vrot.slane %v9537_v26, 1  ;;  %v20155_v26 = vld [vmem:[#allocation13 + $0x890] ss:$8 sps:$4 sm:$0xff]  }
 0x6a1   : > { %10084 = vmatpush2.bf16.msra.mxu0 %v20056_v5  ;;  %10109 = vmatpush1.bf16.msra.mxu1 %v20059_v25  ;;  %v10355_v5 = vrot.slane %v10353_v1, 2  ;;  %v9530_v25 = vld [vmem:[#allocation5 + $0x10] sm:$0x3]  ;;  %v20148_v1 = vld [vmem:[#allocation13 + $0x7b4] ss:$8 sps:$4 sm:$0xff]  }
 0x6a2   : > { %10085 = vmatprep.subr.bf16.mxu0 %v20064_v61  ;;  %10110 = vmatprep.subr.bf16.mxu1 %v20067_v14  ;;  %v10344_v61 = vrot.slane %v10342_v51, 1  ;;  %v10347_v14 = vrot.slane %v10345_v16, 2  ;;  %v20146_v51 = vld [vmem:[#allocation13 + $0x7b0] ss:$8 sps:$4 sm:$0xff]   ;;  %v20149_v16 = vld [vmem:[#allocation13 + $0x8a0] ss:$8 sps:$4 sm:$0xff]  }
 0x6a5   : > { %10086 = vmatpush2.bf16.msra.mxu0 %v20062_v18  ;;  %10111 = vmatpush1.bf16.msra.mxu1 %v20065_v37  ;;  %v9525_v18 = vld [vmem:[#allocation5 + $0x28] sm:$0xfc]  ;;  %v10311_v37 = vshll.u32 %v10199_v35, 16 }
 0x6a6   : > { %10112 = vmatprep.subr.bf16.mxu1 %v20070_v50  ;;  %10141 = vmatprep.subr.bf16.mxu0 %v20073_v4  ;;  %v9648_v50 = vrot.slane %v9542_v58, 1  ;;  %v20118_v4 = vld [vmem:[#allocation13 + $0x684] ss:$8 sps:$4 sm:$0xff]   ;;  %v20160_v58 = vld [vmem:[#allocation13 + $0x794] ss:$8 sps:$4 sm:$0xff]  }
 0x6a7   : > { %v20154_v35 = vld [vmem:[#allocation13 + $0x7a4] ss:$8 sps:$4 sm:$0xff]  }
 0x6a8   : > { %10088 = vmatmul.mubr.bf16.vlgmr.msra.gmra.mxu0 %v9637_v15  ;;  %v9540_v15 = vpack.c.bf16 %v9530_v25, %v9530_v25  ;;  %v20169_v25 = vld [vmem:[#allocation13 + $0x974] ss:$8 sps:$4 sm:$0xff]  }
 0x6a9   : > { %10113 = vmatpush1.bf16.msra.mxu1 %v20068_v12  ;;  %10142 = vmatpush1.bf16.msra.mxu0 %v20071_v13  ;;  %v20121_v12 = vld [vmem:[#allocation13 + $0x8f4] ss:$8 sps:$4 sm:$0xff]   ;;  %v9535_v13 = vpack.c.bf16 %v22863_v55, %v9525_v18  ;;  %v20170_v18 = vld [vmem:[#allocation13 + $0x870] ss:$8 sps:$4 sm:$0xff]  }
 0x6aa   : > { %10114 = vmatprep.subr.bf16.mxu1 %v20076_v53  ;;  %10143 = vmatprep.subr.bf16.mxu0 %v20079_v19  ;;  %v10310_v53 = vrot.slane %v10308_v32, 1  ;;  %v10313_v19 = vrot.slane %v10311_v37, 2  ;;  %v20173_v32 = vld [vmem:[#allocation13 + $0x960] ss:$8 sps:$4 sm:$0xff]   ;;  %v20178_v37 = vld [vmem:[#allocation13 + $0x864] ss:$8 sps:$4 sm:$0xff]  }
 0x6ab   : > { %10173 = vmatprep.mubr.bf16.mxu0 %v24315_v0 }
 0x6ac   : > { %v10314_v55 = vor.u32 %v10313_v19, %v10310_v53  ;;  %v20193_v53 = vld [vmem:[#allocation13 + $0x934] ss:$8 sps:$4 sm:$0xff]   ;;  %v10195_v19 = vld [vmem:[#allocation5 + $0x10] sm:$0x7] }
 0x6ad   : > { %10115 = vmatpush2.bf16.msra.mxu1 %v20074_v6  ;;  %10144 = vmatpush1.bf16.msra.mxu0 %v20077_v43  ;;  %v10318_v6 = vrot.slane %v10316_v59, 1  ;;  %v10321_v43 = vrot.slane %v10319_v42, 2  ;;  %v20164_v59 = vld [vmem:[#allocation13 + $0x780] ss:$8 sps:$4 sm:$0xff]   ;;  %v20167_v42 = vld [vmem:[#allocation13 + $0x970] ss:$8 sps:$4 sm:$0xff]  }
 0x6ae   : > { %10116 = vmatprep.subr.bf16.mxu1 %v20082_v45  ;;  %10145 = vmatprep.subr.bf16.mxu0 %v20085_v47  ;;  %v20116_v45 = vld [vmem:[#allocation13 + $0x680] ss:$8 sps:$4 sm:$0xff]   ;;  %v9649_v47 = vsel %vm9634_vm5, %v9647_v8, %v9648_v50  ;;  %v20179_v8 = vld [vmem:[#allocation13 + $0x950] ss:$8 sps:$4 sm:$0xff]   ;;  %v20184_v50 = vld [vmem:[#allocation13 + $0x854] ss:$8 sps:$4 sm:$0xff]  }
 0x6b1   : > { %10117 = vmatpush2.bf16.msra.mxu1 %v20080_v49  ;;  %10146 = vmatpush1.bf16.msra.mxu0 %v20083_v10  ;;  %v20119_v49 = vld [vmem:[#allocation13 + $0x8f0] ss:$8 sps:$4 sm:$0xff]   ;;  %v10348_v10 = vor.u32 %v10347_v14, %v10344_v61  ;;  %v20172_v61 = vld [vmem:[#allocation13 + $0x874] ss:$8 sps:$4 sm:$0xff]   ;;  %v20175_v14 = vld [vmem:[#allocation13 + $0x964] ss:$8 sps:$4 sm:$0xff]  }
 0x6b2   : > { %10118 = vmatprep.subr.bf16.mxu1 %v20088_v9  ;;  %10147 = vmatprep.subr.bf16.mxu0 %v20091_v11  ;;  %v10356_v9 = vor.u32 %v10355_v5, %v10352_v22  ;;  %v20124_v11 = vld [vmem:[#allocation13 + $0x7f4] ss:$8 sps:$4 sm:$0xff]   ;;  %v20161_v22 = vld [vmem:[#allocation13 + $0x880] ss:$8 sps:$4 sm:$0xff]   ;;  %v20166_v5 = vld [vmem:[#allocation13 + $0x784] ss:$8 sps:$4 sm:$0xff]  }
 0x6b4   : > { %v10357_v36 = vsel %vm10289_vm6, %v10348_v10, %v10356_v9  ;;  %v10193_v10 = vld [vmem:[#allocation5 + $0x30] sm:$0x7]  ;;  %v20199_v9 = vld [vmem:[#allocation13 + $0x924] ss:$8 sps:$4 sm:$0xff]  }
 0x6b5   : > { %10119 = vmatpush2.bf16.msra.mxu1 %v20086_v48  ;;  %10148 = vmatpush1.bf16.msra.mxu0 %v20089_v24  ;;  %v9641_v48 = vrot.slane %v9535_v13, 1  ;;  %v9642_v24 = vrot.slane %v9540_v15, 1  ;;  %v20185_v13 = vld [vmem:[#allocation13 + $0x940] ss:$8 sps:$4 sm:$0xff]   ;;  %v20190_v15 = vld [vmem:[#allocation13 + $0x844] ss:$8 sps:$4 sm:$0xff]  }
 0x6b6   : > { %10120 = vmatprep.subr.bf16.mxu1 %v20094_v2  ;;  %10149 = vmatprep.subr.bf16.mxu0 %v20097_v44  ;;  %v20127_v2 = vld [vmem:[#allocation13 + $0x8e4] ss:$8 sps:$4 sm:$0xff]   ;;  %v10322_v44 = vor.u32 %v10321_v43, %v10318_v6  ;;  %v20188_v6 = vld [vmem:[#allocation13 + $0x840] ss:$8 sps:$4 sm:$0xff]   ;;  %v20191_v43 = vld [vmem:[#allocation13 + $0x930] ss:$8 sps:$4 sm:$0xff]  }
 0x6b8   : > { %v10323_v17 = vsel %vm10289_vm6, %v10314_v55, %v10322_v44  ;;  %v22930_v55 = vld [vmem:[#allocation3 + $0x28] sm:$0xff] }
 0x6b9   : > { %10121 = vmatpush2.bf16.msra.mxu1 %v20092_v34  ;;  %10150 = vmatpush1.bf16.msra.mxu0 %v20095_v23  ;;  %v20122_v34 = vld [vmem:[#allocation13 + $0x7f0] ss:$8 sps:$4 sm:$0xff]   ;;  %v20125_v23 = vld [vmem:[#allocation13 + $0x8e0] ss:$8 sps:$4 sm:$0xff]  }
 0x6ba   : > { %10122 = vmatprep.subr.bf16.mxu1 %v20100_v29  ;;  %10151 = vmatprep.subr.bf16.mxu0 %v20103_v63  ;;  %v9643_v29 = vsel %vm9634_vm5, %v9641_v48, %v9642_v24  ;;  %v20133_v63 = vld [vmem:[#allocation13 + $0x8d4] ss:$8 sps:$4 sm:$0xff]  }
 0x6bb   : > { %v22927_v48 = vld [vmem:[#allocation5 + $0x18] sm:$0xff] }
 0x6bd   : > { %10123 = vmatpush2.bf16.msra.mxu1 %v20098_v3  ;;  %10152 = vmatpush1.bf16.msra.mxu0 %v20101_v31  ;;  %v20139_v3 = vld [vmem:[#allocation13 + $0x8c4] ss:$8 sps:$4 sm:$0xff]   ;;  %v20134_v31 = vld [vmem:[#allocation13 + $0x7d0] ss:$8 sps:$4 sm:$0xff]  }
 0x6be   : > { %10124 = vmatprep.subr.bf16.mxu1 %v20106_v33  ;;  %10153 = vmatprep.subr.bf16.mxu0 %v20109_v7  ;;  %v20137_v33 = vld [vmem:[#allocation13 + $0x8c0] ss:$8 sps:$4 sm:$0xff]   ;;  %v20142_v7 = vld [vmem:[#allocation13 + $0x7c4] ss:$8 sps:$4 sm:$0xff]  }
 0x6c1   : > { %10125 = vmatpush2.bf16.msra.mxu1 %v20104_v46  ;;  %10154 = vmatpush1.bf16.msra.mxu0 %v20107_v21  ;;  %v20157_v46 = vld [vmem:[#allocation13 + $0x894] ss:$8 sps:$4 sm:$0xff]   ;;  %v20152_v21 = vld [vmem:[#allocation13 + $0x7a0] ss:$8 sps:$4 sm:$0xff]  }
 0x6c2   : > { %10126 = vmatprep.subr.bf16.mxu1 %v20112_v20  ;;  %10155 = vmatprep.subr.bf16.mxu0 %v20115_v62  ;;  %v20163_v20 = vld [vmem:[#allocation13 + $0x884] ss:$8 sps:$4 sm:$0xff]   ;;  %v20158_v62 = vld [vmem:[#allocation13 + $0x790] ss:$8 sps:$4 sm:$0xff]  }
 0x6c5   : > { %10127 = vmatpush2.bf16.msra.mxu1 %v20110_v39  ;;  %10156 = vmatpush1.bf16.msra.mxu0 %v20113_v41  ;;  %v20181_v39 = vld [vmem:[#allocation13 + $0x954] ss:$8 sps:$4 sm:$0xff]   ;;  %v20176_v41 = vld [vmem:[#allocation13 + $0x860] ss:$8 sps:$4 sm:$0xff]  }
 0x6c6   : > { %10128 = vmatprep.subr.bf16.mxu1 %v20118_v4  ;;  %10823 = vmatprep.subr.bf16.mxu0 %v20121_v12  ;;  %v20187_v4 = vld [vmem:[#allocation13 + $0x944] ss:$8 sps:$4 sm:$0xff]   ;;  %v20182_v12 = vld [vmem:[#allocation13 + $0x850] ss:$8 sps:$4 sm:$0xff]  }
 0x6c8   : > { %10174 = vmatmul.mubr.bf16.vlgmr.msra.gmra.mxu0 %v9649_v47  ;;  %v20196_v47 = vld [vmem:[#allocation13 + $0x834] ss:$8 sps:$4 sm:$0xff]  }
 0x6c9   : > { %10129 = vmatpush2.bf16.msra.mxu1 %v20116_v45  ;;  %10824 = vmatpush1.bf16.msra.mxu0 %v20119_v49  ;;  %v10190_v45 = vld [vmem:[#allocation5 + $0x28] sm:$0xf8]  ;;  %v10188_v49 = vld [vmem:[#allocation5 + $0x40] sm:$0xf8] }
 0x6ca   : > { %10855 = vmatprep.mubr.bf16.mxu0 %v10357_v36  ;;  %10780 = vmatprep.subr.bf16.mxu1 %v20124_v11  ;;  %v10205_v11 = vpack.c.bf16 %v10195_v19, %v10195_v19  ;;  %v10200_v24 = vpack.c.bf16 %v22927_v48, %v10190_v45  ;;  %v10198_v44 = vpack.c.bf16 %v22930_v55, %v10188_v49  ;;  %v20221_v19 = vld [vmem:[#allocation13 + $0xa60] ss:$8 sps:$4 sm:$0xff]   ;;  %v20232_v49 = vld [vmem:[#allocation13 + $0x9d4] ss:$8 sps:$4 sm:$0xff]  }
 0x6cb   : > { %10825 = vmatprep.subr.bf16.mxu0 %v20127_v2  ;;  %v20194_v2 = vld [vmem:[#allocation13 + $0x830] ss:$8 sps:$4 sm:$0xff]   ;;  %v10203_v36 = vpack.c.bf16 %v10193_v10, %v10193_v10  ;;  %v20224_v45 = vld [vmem:[#allocation13 + $0x9e0] ss:$8 sps:$4 sm:$0xff]   ;;  %v20235_v10 = vld [vmem:[#allocation13 + $0xa44] ss:$8 sps:$4 sm:$0xff]  }
 0x6cc   : > { %10131 = vmatmul.mubr.bf16.vlgmr.msra.gmra.mxu1 %v9643_v29  ;;  %v10333_v29 = vshrl.u32 %v10205_v11, 16 }
 0x6cd   : > { %10781 = vmatpush1.bf16.msra.mxu1 %v20122_v34  ;;  %10812 = vmatprep.mubr.bf16.mxu1 %v10323_v17  ;;  %v20197_v34 = vld [vmem:[#allocation13 + $0x920] ss:$8 sps:$4 sm:$0xff]   ;;  %v10325_v17 = vshrl.u32 %v10200_v24, 16 }
 0x6ce   : > { %10826 = vmatpush1.bf16.msra.mxu0 %v20125_v23  ;;  %10782 = vmatprep.subr.bf16.mxu1 %v20130_v28  ;;  %v20202_v23 = vld [vmem:[#allocation13 + $0x824] ss:$8 sps:$4 sm:$0xff]   ;;  %v20205_v28 = vld [vmem:[#allocation13 + $0x914] ss:$8 sps:$4 sm:$0xff]  }
 0x6cf   : > { %10827 = vmatprep.subr.bf16.mxu0 %v20133_v63  ;;  %v10919_v63 = vld [vmem:[#allocation5 + $0x68] sm:$0xf] }
 0x6d1   : > { %10783 = vmatpush1.bf16.msra.mxu1 %v20128_v27  ;;  %v10328_v27 = vshll.u32 %v10200_v24, 16  ;;  %v20238_v24 = vld [vmem:[#allocation13 + $0x9c4] ss:$8 sps:$4 sm:$0xff]  }
 0x6d2   : > { %10828 = vmatpush1.bf16.msra.mxu0 %v20131_v38  ;;  %10784 = vmatprep.subr.bf16.mxu1 %v20136_v30  ;;  %v10336_v38 = vshll.u32 %v10205_v11, 16  ;;  %v10914_v30 = vld [vmem:[#allocation5 + $0x70] sm:$0xf0]  ;;  %v20233_v11 = vld [vmem:[#allocation13 + $0xa40] ss:$8 sps:$4 sm:$0xff]  }
 0x6d3   : > { %10829 = vmatprep.subr.bf16.mxu0 %v20139_v3  ;;  %v20200_v3 = vld [vmem:[#allocation13 + $0x820] ss:$8 sps:$4 sm:$0xff]  }
 0x6d5   : > { %10785 = vmatpush1.bf16.msra.mxu1 %v20134_v31  ;;  %v10291_v31 = vshrl.u32 %v10198_v44, 16 }
 0x6d6   : > { %10830 = vmatpush1.bf16.msra.mxu0 %v20137_v33  ;;  %10786 = vmatprep.subr.bf16.mxu1 %v20142_v7  ;;  %v10294_v33 = vshll.u32 %v10198_v44, 16  ;;  %v10299_v7 = vshrl.u32 %v10203_v36, 16  ;;  %v20236_v44 = vld [vmem:[#allocation13 + $0x9c0] ss:$8 sps:$4 sm:$0xff]  }
 0x6d7   : > { %10831 = vmatprep.subr.bf16.mxu0 %v20145_v52  ;;  %v10302_v52 = vshll.u32 %v10203_v36, 16  ;;  %v20239_v36 = vld [vmem:[#allocation13 + $0xa30] ss:$8 sps:$4 sm:$0xff]  }
 0x6d9   : > { %10787 = vmatpush1.bf16.msra.mxu1 %v20140_v60  ;;  %v20203_v60 = vld [vmem:[#allocation13 + $0x910] ss:$8 sps:$4 sm:$0xff]  }
 0x6da   : > { %10832 = vmatpush1.bf16.msra.mxu0 %v20143_v54  ;;  %10788 = vmatprep.subr.bf16.mxu1 %v20148_v1  ;;  %v20208_v54 = vld [vmem:[#allocation13 + $0x814] ss:$8 sps:$4 sm:$0xff]   ;;  %v20211_v1 = vld [vmem:[#allocation13 + $0x904] ss:$8 sps:$4 sm:$0xff]  }
 0x6db   : > { %10833 = vmatprep.subr.bf16.mxu0 %v20151_v40  ;;  %v10335_v40 = vrot.slane %v10333_v29, 1  ;;  %v20247_v29 = vld [vmem:[#allocation13 + $0xa24] ss:$8 sps:$4 sm:$0xff]  }
 0x6dd   : > { %10789 = vmatpush1.bf16.msra.mxu1 %v20146_v51  ;;  %v10929_v51 = vpack.c.bf16 %v10919_v63, %v10919_v63  ;;  %v20242_v63 = vld [vmem:[#allocation13 + $0x9b0] ss:$8 sps:$4 sm:$0xff]  }
 0x6de   : > { %10834 = vmatpush1.bf16.msra.mxu0 %v20149_v16  ;;  %10790 = vmatprep.subr.bf16.mxu1 %v20154_v35  ;;  %v10327_v16 = vrot.slane %v10325_v17, 1  ;;  %v10330_v35 = vrot.slane %v10328_v27, 2 }
 0x6df   : > { %10835 = vmatprep.subr.bf16.mxu0 %v20157_v46  ;;  %v10338_v46 = vrot.slane %v10336_v38, 2  ;;  %v20245_v38 = vld [vmem:[#allocation13 + $0xa20] ss:$8 sps:$4 sm:$0xff]  }
 0x6e1   : > { %10791 = vmatpush1.bf16.msra.mxu1 %v20152_v21  ;;  %v20843_v21 = vld [vmem:[#allocation5 + $0x58] sm:$0xff] }
 0x6e2   : > { %10836 = vmatpush1.bf16.msra.mxu0 %v20155_v26  ;;  %10792 = vmatprep.subr.bf16.mxu1 %v20160_v58  ;;  %v10924_v26 = vpack.c.bf16 %v20843_v21, %v10914_v30  ;;  %v20206_v58 = vld [vmem:[#allocation13 + $0x810] ss:$8 sps:$4 sm:$0xff]   ;;  %v20250_v30 = vld [vmem:[#allocation13 + $0x9a4] ss:$8 sps:$4 sm:$0xff]  }
 0x6e3   : > { %10837 = vmatprep.subr.bf16.mxu0 %v20163_v20  ;;  %v10293_v20 = vrot.slane %v10291_v31, 1  ;;  %v20248_v31 = vld [vmem:[#allocation13 + $0x9a0] ss:$8 sps:$4 sm:$0xff]  }
 0x6e5   : > { %10793 = vmatpush1.bf16.msra.mxu1 %v20158_v62  ;;  %v10296_v62 = vrot.slane %v10294_v33, 2 }
 0x6e6   : > { %10838 = vmatpush1.bf16.msra.mxu0 %v20161_v22  ;;  %10794 = vmatprep.subr.bf16.mxu1 %v20166_v5  ;;  %v10301_v22 = vrot.slane %v10299_v7, 1  ;;  %v10304_v5 = vrot.slane %v10302_v52, 2 }
 0x6e7   : > { %10839 = vmatprep.subr.bf16.mxu0 %v20169_v25  ;;  %v20209_v25 = vld [vmem:[#allocation13 + $0x900] ss:$8 sps:$4 sm:$0xff]  }
 0x6e9   : > { %10795 = vmatpush1.bf16.msra.mxu1 %v20164_v59  ;;  %v20214_v59 = vld [vmem:[#allocation13 + $0x804] ss:$8 sps:$4 sm:$0xff]  }
 0x6ea   : > { %10840 = vmatpush2.bf16.msra.mxu0 %v20167_v42  ;;  %10796 = vmatprep.subr.bf16.mxu1 %v20172_v61  ;;  %v20217_v42 = vld [vmem:[#allocation13 + $0xa74] ss:$8 sps:$4 sm:$0xff]   ;;  %v10331_v61 = vor.u32 %v10330_v35, %v10327_v16  ;;  %v10921_v16 = vld [vmem:[#allocation5 + $0x60] sm:$0xf]  ;;  %v20254_v35 = vld [vmem:[#allocation13 + $0x990] ss:$8 sps:$4 sm:$0xff]  }
 0x6eb   : > { %10841 = vmatprep.subr.bf16.mxu0 %v20175_v14  ;;  %v10339_v14 = vor.u32 %v10338_v46, %v10335_v40  ;;  %v20259_v40 = vld [vmem:[#allocation13 + $0xa04] ss:$8 sps:$4 sm:$0xff]  }
 0x6ed   : > { %10797 = vmatpush2.bf16.msra.mxu1 %v20170_v18  ;;  %v20212_v18 = vld [vmem:[#allocation13 + $0x800] ss:$8 sps:$4 sm:$0xff]  }
 0x6ee   : > { %10842 = vmatpush2.bf16.msra.mxu0 %v20173_v32  ;;  %10798 = vmatprep.subr.bf16.mxu1 %v20178_v37  ;;  %v11028_v32 = vrot.slane %v10924_v26, 2  ;;  %v11029_v37 = vrot.slane %v10929_v51, 2  ;;  %v10916_v51 = vld [vmem:[#allocation5] sm:$0xf0] }
 0x6ef   : > { %10843 = vmatprep.subr.bf16.mxu0 %v20181_v39  ;;  %v10297_v39 = vor.u32 %v10296_v62, %v10293_v20  ;;  %v20257_v20 = vld [vmem:[#allocation13 + $0xa00] ss:$8 sps:$4 sm:$0xff]   ;;  %v20262_v62 = vld [vmem:[#allocation13 + $0x984] ss:$8 sps:$4 sm:$0xff]  }
 0x6f1   : > { %10799 = vmatpush2.bf16.msra.mxu1 %v20176_v41  ;;  %v10305_v41 = vor.u32 %v10304_v5, %v10301_v22  ;;  %v20265_v22 = vld [vmem:[#allocation13 + $0xaf4] ss:$8 sps:$4 sm:$0xff]  }
 0x6f2   : > { %10844 = vmatpush2.bf16.msra.mxu0 %v20179_v8  ;;  %10800 = vmatprep.subr.bf16.mxu1 %v20184_v50  ;;  %v20215_v8 = vld [vmem:[#allocation13 + $0xa70] ss:$8 sps:$4 sm:$0xff]   ;;  %v20220_v50 = vld [vmem:[#allocation13 + $0x9f4] ss:$8 sps:$4 sm:$0xff]  }
 0x6f3   : > { %10845 = vmatprep.subr.bf16.mxu0 %v20187_v4  ;;  %v20223_v4 = vld [vmem:[#allocation13 + $0xa64] ss:$8 sps:$4 sm:$0xff]   ;;  %v20844_v5 = vld [vmem:[#allocation5 + $0x38] sm:$0xff] }
 0x6f5   : > { %10801 = vmatpush2.bf16.msra.mxu1 %v20182_v12  ;;  %v10340_v12 = vsel %vm10289_vm6, %v10331_v61, %v10339_v14 }
 0x6f6   : > { %10846 = vmatpush2.bf16.msra.mxu0 %v20185_v13  ;;  %10802 = vmatprep.subr.bf16.mxu1 %v20190_v15  ;;  %v11030_v13 = vsel %vm11024_vm7, %v11028_v32, %v11029_v37  ;;  %v10306_v15 = vsel %vm10289_vm6, %v10297_v39, %v10305_v41  ;;  %v20271_v32 = vld [vmem:[#allocation13 + $0xb74] ss:$8 sps:$4 sm:$0xff]   ;;  %v20268_v37 = vld [vmem:[#allocation13 + $0xae4] ss:$8 sps:$4 sm:$0xff]  }
 0x6f7   : > { %10847 = vmatprep.subr.bf16.mxu0 %v20193_v53  ;;  %v20218_v53 = vld [vmem:[#allocation13 + $0x9f0] ss:$8 sps:$4 sm:$0xff]  }
 0x6f9   : > { %10803 = vmatpush2.bf16.msra.mxu1 %v20188_v6  ;;  %v20226_v6 = vld [vmem:[#allocation13 + $0x9e4] ss:$8 sps:$4 sm:$0xff]  }
 0x6fa   : > { %10848 = vmatpush2.bf16.msra.mxu0 %v20191_v43  ;;  %10804 = vmatprep.subr.bf16.mxu1 %v20196_v47  ;;  %v20229_v43 = vld [vmem:[#allocation13 + $0xa54] ss:$8 sps:$4 sm:$0xff]   ;;  %v20227_v47 = vld [vmem:[#allocation13 + $0xa50] ss:$8 sps:$4 sm:$0xff]  }
 0x6fb   : > { %10849 = vmatprep.subr.bf16.mxu0 %v20199_v9  ;;  %v20230_v9 = vld [vmem:[#allocation13 + $0x9d0] ss:$8 sps:$4 sm:$0xff]  }
 0x6fd   : > { %10805 = vmatpush2.bf16.msra.mxu1 %v20194_v2  ;;  %v20241_v2 = vld [vmem:[#allocation13 + $0xa34] ss:$8 sps:$4 sm:$0xff]  }
 0x6fe   : > { %10850 = vmatpush2.bf16.msra.mxu0 %v20197_v34  ;;  %10806 = vmatprep.subr.bf16.mxu1 %v20202_v23  ;;  %v20244_v34 = vld [vmem:[#allocation13 + $0x9b4] ss:$8 sps:$4 sm:$0xff]   ;;  %v10192_v23 = vld [vmem:[#allocation5 + $0x20] sm:$0xf8] }
 0x6ff   : > { %10851 = vmatprep.subr.bf16.mxu0 %v20205_v28  ;;  %v10197_v28 = vld [vmem:[#allocation5 + $0x8] sm:$0x7]  ;;  %v10202_v17 = vpack.c.bf16 %v22930_v55, %v10192_v23  ;;  %v20298_v23 = vld [vmem:[#allocation13 + $0xa94] ss:$8 sps:$4 sm:$0xff]  }
 0x700   : > { %v10207_v27 = vpack.c.bf16 %v10197_v28, %v10197_v28  ;;  %v10913_v28 = vld [vmem:[#allocation5 + $0x40] sm:$0xf0] }
 0x701   : > { %10807 = vmatpush2.bf16.msra.mxu1 %v20200_v3  ;;  %v20253_v3 = vld [vmem:[#allocation13 + $0xa14] ss:$8 sps:$4 sm:$0xff]   ;;  %v10359_v33 = vshrl.u32 %v10202_v17, 16  ;;  %v10362_v7 = vshll.u32 %v10202_v17, 16  ;;  %v20296_v17 = vld [vmem:[#allocation13 + $0xa90] ss:$8 sps:$4 sm:$0xff]  }
 0x702   : > { %10852 = vmatpush2.bf16.msra.mxu0 %v20203_v60  ;;  %10808 = vmatprep.subr.bf16.mxu1 %v20208_v54  ;;  %v10367_v52 = vshrl.u32 %v10207_v27, 16  ;;  %v10370_v60 = vshll.u32 %v10207_v27, 16  ;;  %v20251_v54 = vld [vmem:[#allocation13 + $0xa10] ss:$8 sps:$4 sm:$0xff]   ;;  %v20307_v27 = vld [vmem:[#allocation13 + $0xb14] ss:$8 sps:$4 sm:$0xff]  }
 0x703   : > { %10853 = vmatprep.subr.bf16.mxu0 %v20211_v1  ;;  %v20256_v1 = vld [vmem:[#allocation13 + $0x994] ss:$8 sps:$4 sm:$0xff]   ;;  %v10361_v46 = vrot.slane %v10359_v33, 1  ;;  %v10364_v21 = vrot.slane %v10362_v7, 2  ;;  %v20302_v33 = vld [vmem:[#allocation13 + $0xa80] ss:$8 sps:$4 sm:$0xff]  }
 0x704   : > { %v10369_v26 = vrot.slane %v10367_v52, 1  ;;  %v20310_v7 = vld [vmem:[#allocation13 + $0xb04] ss:$8 sps:$4 sm:$0xff]  }
 0x705   : > { %10809 = vmatpush2.bf16.msra.mxu1 %v20206_v58  ;;  %v10372_v58 = vrot.slane %v10370_v60, 2  ;;  %v10365_v61 = vor.u32 %v10364_v21, %v10361_v46  ;;  %v20314_v46 = vld [vmem:[#allocation13 + $0xbf0] ss:$8 sps:$4 sm:$0xff]   ;;  %v20317_v21 = vld [vmem:[#allocation13 + $0xc60] ss:$8 sps:$4 sm:$0xff]  }
 0x706   : > { %10854 = vmatpush2.bf16.msra.mxu0 %v20209_v25  ;;  %10810 = vmatprep.subr.bf16.mxu1 %v20214_v59  ;;  %v10926_v25 = vpack.c.bf16 %v20844_v5, %v10916_v51  ;;  %v10931_v59 = vpack.c.bf16 %v10921_v16, %v10921_v16  ;;  %v20316_v16 = vld [vmem:[#allocation13 + $0xbf4] ss:$8 sps:$4 sm:$0xff]   ;;  %v20331_v5 = vld [vmem:[#allocation13 + $0xc44] ss:$8 sps:$4 sm:$0xff]  }
 0x707   : > { %11445 = vmatprep.subr.bf16.mxu0 %v20217_v42  ;;  %v20260_v42 = vld [vmem:[#allocation13 + $0x980] ss:$8 sps:$4 sm:$0xff]   ;;  %v10373_v14 = vor.u32 %v10372_v58, %v10369_v26  ;;  %v20322_v26 = vld [vmem:[#allocation13 + $0xbe4] ss:$8 sps:$4 sm:$0xff]   ;;  %v20325_v58 = vld [vmem:[#allocation13 + $0xc54] ss:$8 sps:$4 sm:$0xff]  }
 0x708   : > { %v11034_v39 = vrot.slane %v10926_v25, 2  ;;  %v11035_v41 = vrot.slane %v10931_v59, 2  ;;  %v20326_v25 = vld [vmem:[#allocation13 + $0xbd0] ss:$8 sps:$4 sm:$0xff]   ;;  %v20329_v59 = vld [vmem:[#allocation13 + $0xc40] ss:$8 sps:$4 sm:$0xff]  }
 0x709   : > { %10856 = vmatmul.mubr.bf16.vlgmr.msra.gmra.mxu0 %v10340_v12  ;;  %10811 = vmatpush2.bf16.msra.mxu1 %v20212_v18  ;;  %v20263_v18 = vld [vmem:[#allocation13 + $0xaf0] ss:$8 sps:$4 sm:$0xff]   ;;  %v20277_v12 = vld [vmem:[#allocation13 + $0xb64] ss:$8 sps:$4 sm:$0xff]  }
 0x70a   : > { %11446 = vmatpush1.bf16.msra.mxu0 %v20215_v8  ;;  %11477 = vmatprep.mubr.bf16.mxu0 %v11030_v13  ;;  %v10374_v8 = vsel %vm10289_vm6, %v10365_v61, %v10373_v14  ;;  %v20274_v13 = vld [vmem:[#allocation13 + $0xad4] ss:$8 sps:$4 sm:$0xff]   ;;  %v20332_v14 = vld [vmem:[#allocation13 + $0xbc0] ss:$8 sps:$4 sm:$0xff]  }
 0x70b   : > { %10866 = vmatprep.subr.bf16.mxu1 %v20220_v50  ;;  %11447 = vmatprep.subr.bf16.mxu0 %v20223_v4  ;;  %v20269_v50 = vld [vmem:[#allocation13 + $0xb70] ss:$8 sps:$4 sm:$0xff]   ;;  %v20266_v4 = vld [vmem:[#allocation13 + $0xae0] ss:$8 sps:$4 sm:$0xff]   ;;  %v20337_v61 = vld [vmem:[#allocation13 + $0xc34] ss:$8 sps:$4 sm:$0xff]  }
 0x70c   : > { %10813 = vmatmul.mubr.bf16.vlgmr.msra.gmra.mxu1 %v10306_v15  ;;  %v11036_v15 = vsel %vm11024_vm7, %v11034_v39, %v11035_v41  ;;  %v20338_v39 = vld [vmem:[#allocation13 + $0xbb0] ss:$8 sps:$4 sm:$0xff]   ;;  %v20341_v41 = vld [vmem:[#allocation13 + $0xc20] ss:$8 sps:$4 sm:$0xff]  }
 0x70d   : > { %10867 = vmatpush1.bf16.msra.mxu1 %v20218_v53  ;;  %10898 = vmatprep.mubr.bf16.mxu1 %v24315_v0  ;;  %v20275_v53 = vld [vmem:[#allocation13 + $0xb60] ss:$8 sps:$4 sm:$0xff]  }
 0x70e   : > { %11448 = vmatpush1.bf16.msra.mxu0 %v20221_v19  ;;  %10868 = vmatprep.subr.bf16.mxu1 %v20226_v6  ;;  %v20272_v19 = vld [vmem:[#allocation13 + $0xad0] ss:$8 sps:$4 sm:$0xff]   ;;  %v20283_v6 = vld [vmem:[#allocation13 + $0xb54] ss:$8 sps:$4 sm:$0xff]  }
 0x70f   : > { %11449 = vmatprep.subr.bf16.mxu0 %v20229_v43  ;;  %v20280_v43 = vld [vmem:[#allocation13 + $0xac4] ss:$8 sps:$4 sm:$0xff]  }
 0x711   : > { %10869 = vmatpush1.bf16.msra.mxu1 %v20224_v45  ;;  %v20281_v45 = vld [vmem:[#allocation13 + $0xb50] ss:$8 sps:$4 sm:$0xff]  }
 0x712   : > { %11450 = vmatpush1.bf16.msra.mxu0 %v20227_v47  ;;  %10870 = vmatprep.subr.bf16.mxu1 %v20232_v49  ;;  %v20278_v47 = vld [vmem:[#allocation13 + $0xac0] ss:$8 sps:$4 sm:$0xff]   ;;  %v20289_v49 = vld [vmem:[#allocation13 + $0xb44] ss:$8 sps:$4 sm:$0xff]  }
 0x713   : > { %11451 = vmatprep.subr.bf16.mxu0 %v20235_v10  ;;  %v20286_v10 = vld [vmem:[#allocation13 + $0xab4] ss:$8 sps:$4 sm:$0xff]  }
 0x715   : > { %10871 = vmatpush1.bf16.msra.mxu1 %v20230_v9  ;;  %v20287_v9 = vld [vmem:[#allocation13 + $0xb40] ss:$8 sps:$4 sm:$0xff]  }
 0x716   : > { %11452 = vmatpush1.bf16.msra.mxu0 %v20233_v11  ;;  %10872 = vmatprep.subr.bf16.mxu1 %v20238_v24  ;;  %v20284_v11 = vld [vmem:[#allocation13 + $0xab0] ss:$8 sps:$4 sm:$0xff]   ;;  %v20295_v24 = vld [vmem:[#allocation13 + $0xb34] ss:$8 sps:$4 sm:$0xff]  }
 0x717   : > { %11453 = vmatprep.subr.bf16.mxu0 %v20241_v2  ;;  %v20292_v2 = vld [vmem:[#allocation13 + $0xaa4] ss:$8 sps:$4 sm:$0xff]  }
 0x719   : > { %10873 = vmatpush1.bf16.msra.mxu1 %v20236_v44  ;;  %v20293_v44 = vld [vmem:[#allocation13 + $0xb30] ss:$8 sps:$4 sm:$0xff]  }
 0x71a   : > { %11454 = vmatpush1.bf16.msra.mxu0 %v20239_v36  ;;  %10874 = vmatprep.subr.bf16.mxu1 %v20244_v34  ;;  %v20290_v36 = vld [vmem:[#allocation13 + $0xaa0] ss:$8 sps:$4 sm:$0xff]   ;;  %v20301_v34 = vld [vmem:[#allocation13 + $0xb24] ss:$8 sps:$4 sm:$0xff]  }
 0x71b   : > { %11455 = vmatprep.subr.bf16.mxu0 %v20247_v29  ;;  %v10918_v29 = vld [vmem:[#allocation5 + $0x30] sm:$0xf] }
 0x71d   : > { %10875 = vmatpush1.bf16.msra.mxu1 %v20242_v63  ;;  %v20299_v63 = vld [vmem:[#allocation13 + $0xb20] ss:$8 sps:$4 sm:$0xff]  }
 0x71e   : > { %11456 = vmatpush1.bf16.msra.mxu0 %v20245_v38  ;;  %10876 = vmatprep.subr.bf16.mxu1 %v20250_v30  ;;  %v10923_v38 = vpack.c.bf16 %v22930_v55, %v10913_v28  ;;  %v10928_v30 = vpack.c.bf16 %v10918_v29, %v10918_v29  ;;  %v20361_v29 = vld [vmem:[%s24304_s5 + $0x1f4] ss:$8 sps:$4 sm:$0xff]  }
 0x71f   : > { %11457 = vmatprep.subr.bf16.mxu0 %v20253_v3  ;;  %v20304_v3 = vld [vmem:[#allocation13 + $0xa84] ss:$8 sps:$4 sm:$0xff]  }
 0x720   : > { %v11025_v52 = vrot.slane %v10923_v38, 2  ;;  %v11026_v60 = vrot.slane %v10928_v30, 2  ;;  %v20367_v38 = vld [vmem:[%s24304_s5 + $0x1d4] ss:$8 sps:$4 sm:$0xff]   ;;  %v20383_v30 = vld [vmem:[%s24304_s5 + $0x2f0] ss:$8 sps:$4 sm:$0xff]  }
 0x721   : > { %10877 = vmatpush1.bf16.msra.mxu1 %v20248_v31  ;;  %v20305_v31 = vld [vmem:[#allocation13 + $0xb10] ss:$8 sps:$4 sm:$0xff]  }
 0x722   : > { %11458 = vmatpush1.bf16.msra.mxu0 %v20251_v54  ;;  %10878 = vmatprep.subr.bf16.mxu1 %v20256_v1  ;;  %v20313_v54 = vld [vmem:[#allocation13 + $0xc74] ss:$8 sps:$4 sm:$0xff]   ;;  %v20308_v1 = vld [vmem:[#allocation13 + $0xb00] ss:$8 sps:$4 sm:$0xff]   ;;  %v11027_v51 = vsel %vm11024_vm7, %v11025_v52, %v11026_v60  ;;  %v20389_v60 = vld [vmem:[%s24304_s5 + $0x2e0] ss:$8 sps:$4 sm:$0xff]  }
 0x723   : > { %11459 = vmatprep.subr.bf16.mxu0 %v20259_v40  ;;  %v20311_v40 = vld [vmem:[#allocation13 + $0xc70] ss:$8 sps:$4 sm:$0xff]   ;;  %v20370_v52 = vld [vmem:[%s24304_s5 + $0x1c4] ss:$8 sps:$4 sm:$0xff]  }
 0x725   : > { %10879 = vmatpush1.bf16.msra.mxu1 %v20254_v35  ;;  %v20319_v35 = vld [vmem:[#allocation13 + $0xc64] ss:$8 sps:$4 sm:$0xff]  }
 0x726   : > { %11460 = vmatpush1.bf16.msra.mxu0 %v20257_v20  ;;  %10880 = vmatprep.subr.bf16.mxu1 %v20262_v62  ;;  %v20320_v20 = vld [vmem:[#allocation13 + $0xbe0] ss:$8 sps:$4 sm:$0xff]   ;;  %v20323_v62 = vld [vmem:[#allocation13 + $0xc50] ss:$8 sps:$4 sm:$0xff]  }
 0x727   : > { %11461 = vmatprep.subr.bf16.mxu0 %v20265_v22  ;;  %v20328_v22 = vld [vmem:[#allocation13 + $0xbd4] ss:$8 sps:$4 sm:$0xff]  }
 0x729   : > { %10881 = vmatpush1.bf16.msra.mxu1 %v20260_v42  ;;  %v20334_v42 = vld [vmem:[#allocation13 + $0xbc4] ss:$8 sps:$4 sm:$0xff]  }
 0x72a   : > { %11462 = vmatpush2.bf16.msra.mxu0 %v20263_v18  ;;  %11488 = vmatprep.subr.bf16.mxu1 %v20271_v32  ;;  %v20335_v18 = vld [vmem:[#allocation13 + $0xc30] ss:$8 sps:$4 sm:$0xff]   ;;  %v20340_v32 = vld [vmem:[#allocation13 + $0xbb4] ss:$8 sps:$4 sm:$0xff]  }
 0x72b   : > { %11463 = vmatprep.subr.bf16.mxu0 %v20268_v37  ;;  %v20343_v37 = vld [vmem:[#allocation13 + $0xc24] ss:$8 sps:$4 sm:$0xff]  }
 0x72c   : > { %10899 = vmatmul.mubr.bf16.vlgmr.msra.gmra.mxu1 %v10374_v8  ;;  %v20346_v8 = vld [vmem:[#allocation13 + $0xba4] ss:$8 sps:$4 sm:$0xff]  }
 0x72d   : > { %11489 = vmatpush1.bf16.msra.mxu1 %v20269_v50  ;;  %11520 = vmatprep.mubr.bf16.mxu1 %v11036_v15  ;;  %v20349_v50 = vld [vmem:[#allocation13 + $0xc14] ss:$8 sps:$4 sm:$0xff]   ;;  %v20347_v15 = vld [vmem:[#allocation13 + $0xc10] ss:$8 sps:$4 sm:$0xff]  }
 0x72e   : > { %11464 = vmatpush2.bf16.msra.mxu0 %v20266_v4  ;;  %11490 = vmatprep.subr.bf16.mxu1 %v20277_v12  ;;  %v10917_v4 = vld [vmem:[#allocation5 + $0x20] sm:$0xf0]  ;;  %v10922_v12 = vld [vmem:[#allocation5 + $0x8] sm:$0xf] }
 0x72f   : > { %11465 = vmatprep.subr.bf16.mxu0 %v20274_v13  ;;  %v20344_v13 = vld [vmem:[#allocation13 + $0xba0] ss:$8 sps:$4 sm:$0xff]  }
 0x731   : > { %11491 = vmatpush1.bf16.msra.mxu1 %v20275_v53  ;;  %v20352_v53 = vld [vmem:[#allocation13 + $0xb94] ss:$8 sps:$4 sm:$0xff]  }
 0x732   : > { %11466 = vmatpush2.bf16.msra.mxu0 %v20272_v19  ;;  %11492 = vmatprep.subr.bf16.mxu1 %v20283_v6  ;;  %v10927_v19 = vpack.c.bf16 %v22930_v55, %v10917_v4  ;;  %v10932_v6 = vpack.c.bf16 %v10922_v12, %v10922_v12 }
 0x733   : > { %11467 = vmatprep.subr.bf16.mxu0 %v20280_v43  ;;  %v20355_v43 = vld [vmem:[#allocation13 + $0xc04] ss:$8 sps:$4 sm:$0xff]  }
 0x735   : > { %11493 = vmatpush1.bf16.msra.mxu1 %v20281_v45  ;;  %v10915_v45 = vld [vmem:[#allocation5 + $0x28] sm:$0xf0] }
 0x736   : > { %11468 = vmatpush2.bf16.msra.mxu0 %v20278_v47  ;;  %11494 = vmatprep.subr.bf16.mxu1 %v20289_v49  ;;  %v10920_v47 = vld [vmem:[#allocation5 + $0x10] sm:$0xf] }
 0x737   : > { %11469 = vmatprep.subr.bf16.mxu0 %v20286_v10  ;;  %v20350_v49 = vld [vmem:[#allocation13 + $0xb90] ss:$8 sps:$4 sm:$0xff]   ;;  %v20353_v10 = vld [vmem:[#allocation13 + $0xc00] ss:$8 sps:$4 sm:$0xff]  }
 0x739   : > { %11495 = vmatpush1.bf16.msra.mxu1 %v20287_v9  ;;  %v20358_v9 = vld [vmem:[#allocation13 + $0xb84] ss:$8 sps:$4 sm:$0xff]  }
 0x73a   : > { %11470 = vmatpush2.bf16.msra.mxu0 %v20284_v11  ;;  %11496 = vmatprep.subr.bf16.mxu1 %v20295_v24  ;;  %v11037_v11 = vrot.slane %v10927_v19, 2  ;;  %v11038_v24 = vrot.slane %v10932_v6, 2 }
 0x73b   : > { %11471 = vmatprep.subr.bf16.mxu0 %v20292_v2  ;;  %v10925_v2 = vpack.c.bf16 %v22927_v48, %v10915_v45  ;;  %v20359_v48 = vld [vmem:[%s24304_s5 + $0x1f0] ss:$8 sps:$4 sm:$0xff]  }
 0x73c   : > { %v11039_v55 = vsel %vm11024_vm7, %v11037_v11, %v11038_v24 }
 0x73d   : > { %11497 = vmatpush1.bf16.msra.mxu1 %v20293_v44  ;;  %v10930_v44 = vpack.c.bf16 %v10920_v47, %v10920_v47 }
 0x73e   : > { %11472 = vmatpush2.bf16.msra.mxu0 %v20290_v36  ;;  %11498 = vmatprep.subr.bf16.mxu1 %v20301_v34  ;;  %v20356_v36 = vld [vmem:[#allocation13 + $0xb80] ss:$8 sps:$4 sm:$0xff]   ;;  %v11031_v34 = vrot.slane %v10925_v2, 2 }
 0x73f   : > { %11473 = vmatprep.subr.bf16.mxu0 %v20298_v23  ;;  %v11032_v23 = vrot.slane %v10930_v44, 2 }
 0x741   : > { %11499 = vmatpush1.bf16.msra.mxu1 %v20299_v63  ;;  %v11033_v28 = vsel %vm11024_vm7, %v11031_v34, %v11032_v23  ;;  %v20364_v63 = vld [vmem:[%s24304_s5 + $0x1e4] ss:$8 sps:$4 sm:$0xff]  }
 0x742   : > { %11474 = vmatpush2.bf16.msra.mxu0 %v20296_v17  ;;  %11500 = vmatprep.subr.bf16.mxu1 %v20307_v27  ;;  %v22957_v17 = vpop.f32.mrf.mxu0  ;;  %v20362_v27 = vld [vmem:[%s24304_s5 + $0x1e0] ss:$8 sps:$4 sm:$0xff]  }
 0x743   : > { %11475 = vmatprep.subr.bf16.mxu0 %v20304_v3  ;;  %v20385_v3 = vld [vmem:[%s24304_s5 + $0x2f4] ss:$8 sps:$4 sm:$0xff]  }
 0x745   : > { %11501 = vmatpush1.bf16.msra.mxu1 %v20305_v31  ;;  %v22971_v31 = vpop.f32.mrf.mxu0 }
 0x746   : > { %11476 = vmatpush2.bf16.msra.mxu0 %v20302_v33  ;;  %11502 = vmatprep.subr.bf16.mxu1 %v20310_v7  ;;  %v20365_v33 = vld [vmem:[%s24304_s5 + $0x1d0] ss:$8 sps:$4 sm:$0xff]   ;;  %v20391_v7 = vld [vmem:[%s24304_s5 + $0x2e4] ss:$8 sps:$4 sm:$0xff]  }
 0x747   : > { %11531 = vmatprep.subr.bf16.mxu0 %v20313_v54  ;;  %v22985_v54 = vpop.f32.mrf.mxu0 }
 0x749   : > { %11478 = vmatmul.mubr.bf16.vlgmr.msra.gmra.mxu0 %v11027_v51  ;;  %11503 = vmatpush1.bf16.msra.mxu1 %v20308_v1  ;;  %v20368_v1 = vld [vmem:[%s24304_s5 + $0x1c0] ss:$8 sps:$4 sm:$0xff]   ;;  %v22993_v51 = vpop.f32.mrf.mxu0 }
 0x74a   : > { %11532 = vmatpush1.bf16.msra.mxu0 %v20311_v40  ;;  %11504 = vmatprep.subr.bf16.mxu1 %v20316_v16  ;;  %v20373_v40 = vld [vmem:[%s24304_s5 + $0x1b4] ss:$8 sps:$4 sm:$0xff]   ;;  %v20371_v16 = vld [vmem:[%s24304_s5 + $0x1b0] ss:$8 sps:$4 sm:$0xff]  }
 0x74b   : > { %11533 = vmatprep.subr.bf16.mxu0 %v20319_v35  ;;  %11563 = vmatprep.mubr.bf16.mxu0 %v24315_v0  ;;  %v20376_v35 = vld [vmem:[%s24304_s5 + $0x1a4] ss:$8 sps:$4 sm:$0xff]  }
 0x74d   : > { %11505 = vmatpush2.bf16.msra.mxu1 %v20314_v46  ;;  %v23001_v46 = vpop.f32.mrf.mxu0 }
 0x74e   : > { %11534 = vmatpush1.bf16.msra.mxu0 %v20317_v21  ;;  %11506 = vmatprep.subr.bf16.mxu1 %v20322_v26  ;;  %v20374_v21 = vld [vmem:[%s24304_s5 + $0x1a0] ss:$8 sps:$4 sm:$0xff]   ;;  %v8942_v26 = vpop.f32.mrf.mxu1 }
 0x74f   : > { %11535 = vmatprep.subr.bf16.mxu0 %v20325_v58  ;;  %v20379_v58 = vld [vmem:[%s24304_s5 + $0x194] ss:$8 sps:$4 sm:$0xff]  }
 0x751   : > { %11507 = vmatpush2.bf16.msra.mxu1 %v20320_v20  ;;  %v23009_v20 = vpop.f32.mrf.mxu0 }
 0x752   : > { %11536 = vmatpush1.bf16.msra.mxu0 %v20323_v62  ;;  %11508 = vmatprep.subr.bf16.mxu1 %v20328_v22  ;;  %v20377_v62 = vld [vmem:[%s24304_s5 + $0x190] ss:$8 sps:$4 sm:$0xff]   ;;  %v8944_v22 = vpop.f32.mrf.mxu1 }
 0x753   : > { %11537 = vmatprep.subr.bf16.mxu0 %v20331_v5  ;;  %v20382_v5 = vld [vmem:[%s24304_s5 + $0x184] ss:$8 sps:$4 sm:$0xff]  }
 0x755   : > { %11509 = vmatpush2.bf16.msra.mxu1 %v20326_v25  ;;  %v8989_v25 = vpop.f32.mrf.mxu0 }
 0x756   : > { %11538 = vmatpush1.bf16.msra.mxu0 %v20329_v59  ;;  %11510 = vmatprep.subr.bf16.mxu1 %v20334_v42  ;;  %v20380_v59 = vld [vmem:[%s24304_s5 + $0x180] ss:$8 sps:$4 sm:$0xff]   ;;  %v8946_v42 = vpop.f32.mrf.mxu1 }
 0x757   : > { %11539 = vmatprep.subr.bf16.mxu0 %v20337_v61  ;;  %v20388_v61 = vld [vmem:[%s24304_s5 + $0x274] ss:$8 sps:$4 sm:$0xff]  }
 0x759   : > { %11511 = vmatpush2.bf16.msra.mxu1 %v20332_v14  ;;  %v8991_v14 = vpop.f32.mrf.mxu0 }
 0x75a   : > { %11540 = vmatpush1.bf16.msra.mxu0 %v20335_v18  ;;  %11512 = vmatprep.subr.bf16.mxu1 %v20340_v32  ;;  %v20386_v32 = vld [vmem:[%s24304_s5 + $0x270] ss:$8 sps:$4 sm:$0xff]  }
 0x75b   : > { %11541 = vmatprep.subr.bf16.mxu0 %v20343_v37  ;;  %v23023_v18 = vpop.f32.mrf.mxu0  ;;  %v8948_v37 = vpop.f32.mrf.mxu1 }
 0x75d   : > { %11513 = vmatpush2.bf16.msra.mxu1 %v20338_v39  ;;  %v20394_v39 = vld [vmem:[%s24304_s5 + $0x264] ss:$8 sps:$4 sm:$0xff]  }
 0x75e   : > { %11542 = vmatpush1.bf16.msra.mxu0 %v20341_v41  ;;  %11514 = vmatprep.subr.bf16.mxu1 %v20346_v8  ;;  %v9428_v41 = vpop.f32.mrf.mxu1  ;;  %v9473_v8 = vpop.f32.mrf.mxu0 }
 0x75f   : > { %11543 = vmatprep.subr.bf16.mxu0 %v20349_v50  ;;  %v20392_v50 = vld [vmem:[%s24304_s5 + $0x260] ss:$8 sps:$4 sm:$0xff]  }
 0x760   : > { %v9430_v4 = vpop.f32.mrf.mxu1  ;;  %v9475_v12 = vpop.f32.mrf.mxu0 }
 0x761   : > { %11515 = vmatpush2.bf16.msra.mxu1 %v20344_v13 }
 0x762   : > { %11544 = vmatpush1.bf16.msra.mxu0 %v20347_v15  ;;  %11516 = vmatprep.subr.bf16.mxu1 %v20352_v53  ;;  %v9432_v13 = vpop.f32.mrf.mxu1  ;;  %v9477_v15 = vpop.f32.mrf.mxu0 }
 0x763   : > { %11545 = vmatprep.subr.bf16.mxu0 %v20355_v43 }
 0x764   : > { %v9434_v19 = vpop.f32.mrf.mxu1 }
 0x765   : > { %11517 = vmatpush2.bf16.msra.mxu1 %v20350_v49 }
 0x766   : > { %11546 = vmatpush1.bf16.msra.mxu0 %v20353_v10  ;;  %11518 = vmatprep.subr.bf16.mxu1 %v20358_v9  ;;  %v9514_v6 = vpop.f32.mrf.mxu1 }
 0x767   : > { %12121 = vmatprep.subr.bf16.mxu0 %v20385_v3 }
 0x768   : > { %v10089_v53 = vpop.f32.mrf.mxu0  ;;  %v9516_v45 = vpop.f32.mrf.mxu1 }
 0x769   : > { %11564 = vmatmul.mubr.bf16.vlgmr.msra.gmra.mxu0 %v11039_v55  ;;  %11519 = vmatpush2.bf16.msra.mxu1 %v20356_v36 }
 0x76a   : > { %12153 = vmatprep.mubr.bf16.mxu0 %v24315_v0  ;;  %12070 = vmatprep.subr.bf16.mxu1 %v20361_v29  ;;  %v10091_v43 = vpop.f32.mrf.mxu0  ;;  %v9518_v49 = vpop.f32.mrf.mxu1 }
 0x76b   : > { %12122 = vmatpush1.bf16.msra.mxu0 %v20383_v30 }
 0x76c   : > { %11521 = vmatmul.mubr.bf16.vlgmr.msra.gmra.mxu1 %v11033_v28  ;;  %12123 = vmatprep.subr.bf16.mxu0 %v20391_v7  ;;  %v10093_v47 = vpop.f32.mrf.mxu0  ;;  %v23034_v11 = vpop.f32.mrf.mxu1 }
 0x76d   : > { %12071 = vmatpush1.bf16.msra.mxu1 %v20359_v48 }
 0x76e   : > { %12072 = vmatprep.subr.bf16.mxu1 %v20364_v63  ;;  %v10095_v10 = vpop.f32.mrf.mxu0 }
 0x76f   : > { %12124 = vmatpush1.bf16.msra.mxu0 %v20389_v60 }
 0x771   : > { %12073 = vmatpush1.bf16.msra.mxu1 %v20362_v27 }
 0x772   : > { %12074 = vmatprep.subr.bf16.mxu1 %v20367_v38 }
 0x775   : > { %12075 = vmatpush1.bf16.msra.mxu1 %v20365_v33 }
 0x776   : > { %12076 = vmatprep.subr.bf16.mxu1 %v20370_v52  ;;  %v8943_v52 = vadd.f32 %v8942_v26, %v22957_v17 }
 0x779   : > { %12077 = vmatpush1.bf16.msra.mxu1 %v20368_v1  ;;  %v8945_v1 = vadd.f32 %v8944_v22, %v22971_v31 }
 0x77a   : > { %12078 = vmatprep.subr.bf16.mxu1 %v20373_v40  ;;  %v8947_v40 = vadd.f32 %v8946_v42, %v22985_v54 }
 0x77d   : > { %12079 = vmatpush1.bf16.msra.mxu1 %v20371_v16  ;;  %v8949_v16 = vadd.f32 %v8948_v37, %v22993_v51 }
 0x77e   : > { %12080 = vmatprep.subr.bf16.mxu1 %v20376_v35 }
 0x781   : > { %12081 = vmatpush1.bf16.msra.mxu1 %v20374_v21  ;;  %v8986_v21 = vadd.f32 %v23001_v46, %v8943_v52 }
 0x782   : > { %12082 = vmatprep.subr.bf16.mxu1 %v20379_v58 }
 0x785   : > { %12083 = vmatpush1.bf16.msra.mxu1 %v20377_v62  ;;  %v8988_v62 = vadd.f32 %v23009_v20, %v8945_v1 }
 0x786   : > { %12084 = vmatprep.subr.bf16.mxu1 %v20382_v5  ;;  %v9429_v5 = vadd.f32 %v9428_v41, %v8986_v21 }
 0x788   : > { %v10175_v9 = vpop.f32.mrf.mxu0  ;;  %v9472_v54 = vadd.f32 %v23023_v18, %v9429_v5  ;;  %v11578_v18 = vld [vmem:[%s24310_s11] sm:$0x3] }
 0x789   : > { %12085 = vmatpush1.bf16.msra.mxu1 %v20380_v59  ;;  %v8990_v59 = vadd.f32 %v8989_v25, %v8947_v40 }
 0x78a   : > { %12086 = vmatprep.subr.bf16.mxu1 %v20388_v61  ;;  %v10177_v2 = vpop.f32.mrf.mxu0  ;;  %v9515_v41 = vadd.f32 %v9514_v6, %v9472_v54 }
 0x78b   : > { %v9433_v26 = vadd.f32 %v9432_v13, %v8990_v59 }
 0x78c   : > { %v10132_v24 = vpop.f32.mrf.mxu1  ;;  %v10179_v36 = vpop.f32.mrf.mxu0 }
 0x78d   : > { %12087 = vmatpush2.bf16.msra.mxu1 %v20386_v32  ;;  %v10133_v61 = vadd.f32 %v10132_v24, %v10089_v53  ;;  %v9431_v32 = vadd.f32 %v9430_v4, %v8988_v62  ;;  %v9476_v25 = vadd.f32 %v9475_v12, %v9433_v26  ;;  %v20397_v12 = vld [vmem:[%s24304_s5 + $0x2d4] ss:$8 sps:$4 sm:$0xff]   ;;  %v20407_v26 = vld [vmem:[%s24304_s5 + $0x2b0] ss:$8 sps:$4 sm:$0xff]  }
 0x78e   : > { %12088 = vmatprep.subr.bf16.mxu1 %v20394_v39  ;;  %v10134_v44 = vpop.f32.mrf.mxu1  ;;  %v10181_v34 = vpop.f32.mrf.mxu0  ;;  %v8992_v39 = vadd.f32 %v8991_v14, %v8949_v16  ;;  %12125 = vmatprep.subr.bf16.mxu0 %v20397_v12 }
 0x78f   : > { %v10176_v51 = vadd.f32 %v10175_v9, %v10133_v61  ;;  %v9474_v46 = vadd.f32 %v9473_v8, %v9431_v32  ;;  %v20395_v8 = vld [vmem:[%s24304_s5 + $0x2d0] ss:$8 sps:$4 sm:$0xff]   ;;  %v9519_v6 = vadd.f32 %v9518_v49, %v9476_v25  ;;  %v20400_v49 = vld [vmem:[%s24304_s5 + $0x254] ss:$8 sps:$4 sm:$0xff]  }
 0x790   : > { %v10136_v55 = vpop.f32.mrf.mxu1  ;;  %v9435_v31 = vadd.f32 %v9434_v19, %v8992_v39  ;;  %12126 = vmatpush1.bf16.msra.mxu0 %v20395_v8  ;;  %v20424_v8 = vld [vmem:[%s24304_s5 + $0x214] ss:$8 sps:$4 sm:$0xff]  }
 0x791   : > { %12089 = vmatpush2.bf16.msra.mxu1 %v20392_v50  ;;  %v10135_v50 = vadd.f32 %v10134_v44, %v10091_v43  ;;  %v10137_v22 = vadd.f32 %v10136_v55, %v10093_v47  ;;  %v9517_v14 = vadd.f32 %v9516_v45, %v9474_v46  ;;  %v10184_v47 = vadd.f32 %v10176_v51, %v9515_v41  ;;  %v20409_v51 = vld [vmem:[%s24304_s5 + $0x2b4] ss:$8 sps:$4 sm:$0xff]  }
 0x792   : > { %v10138_v28 = vpop.f32.mrf.mxu1  ;;  %v9478_v43 = vadd.f32 %v9477_v15, %v9435_v31  ;;  %12090 = vmatprep.subr.bf16.mxu1 %v20400_v49  ;;  %v20412_v41 = vld [vmem:[%s24304_s5 + $0x234] ss:$8 sps:$4 sm:$0xff]  }
 0x793   : > { %v10178_v52 = vadd.f32 %v10177_v2, %v10135_v50  ;;  %v10139_v57 = vadd.f32 %v10138_v28, %v10095_v10  ;;  %v10180_v24 = vadd.f32 %v10179_v36, %v10137_v22 }
 0x795   : > { %v10182_v10 = vadd.f32 %v10181_v34, %v10139_v57  ;;  %v10185_v2 = vadd.f32 %v10178_v52, %v9517_v14  ;;  %v20401_v57 = vld [vmem:[%s24304_s5 + $0x2c0] ss:$8 sps:$4 sm:$0xff]   ;;  %v9521_v34 = vadd.f32 %v23034_v11, %v9478_v43  ;;  %v20415_v43 = vld [vmem:[%s24304_s5 + $0x2a4] ss:$8 sps:$4 sm:$0xff]  }
 0x796   : > { %v20413_v14 = vld [vmem:[%s24304_s5 + $0x2a0] ss:$8 sps:$4 sm:$0xff]  }
 0x797   : > { %v10187_v62 = vadd.f32 %v10182_v10, %v9521_v34  ;;  %v20422_v10 = vld [vmem:[%s24304_s5 + $0x210] ss:$8 sps:$4 sm:$0xff]  }
 0x7c9   : > { %v10857_v23 = vpop.f32.mrf.mxu0 }
 0x7cb   : > { %v10859_v29 = vpop.f32.mrf.mxu0 }
 0x7cc   : > { %v10814_v48 = vpop.f32.mrf.mxu1 }
 0x7cd   : > { %v10861_v27 = vpop.f32.mrf.mxu0  ;;  %v10858_v42 = vadd.f32 %v10857_v23, %v10814_v48 }
 0x7ce   : > { %v10816_v63 = vpop.f32.mrf.mxu1 }
 0x7cf   : > { %v10863_v30 = vpop.f32.mrf.mxu0  ;;  %v10860_v53 = vadd.f32 %v10859_v29, %v10816_v63  ;;  %v11583_v29 = vrot.slane %v11578_v18, %v21424_v56  ;;  %v20398_v63 = vld [vmem:[%s24304_s5 + $0x250] ss:$8 sps:$4 sm:$0xff]  }
 0x7d0   : > { %v10818_v38 = vpop.f32.mrf.mxu1  ;;  %12091 = vmatpush2.bf16.msra.mxu1 %v20398_v63 }
 0x7d1   : > { %v10862_v13 = vadd.f32 %v10861_v27, %v10818_v38  ;;  %v10186_v27 = vadd.f32 %v10180_v24, %v9519_v6  ;;  %v20418_v24 = vld [vmem:[%s24304_s5 + $0x224] ss:$8 sps:$4 sm:$0xff]  }
 0x7d2   : > { %v10820_v33 = vpop.f32.mrf.mxu1 }
 0x7d3   : > { %v10864_v9 = vadd.f32 %v10863_v30, %v10820_v33  ;;  %v24322_v33 = vld [vmem:[#allocation16_spill] sm:$0xff] }
 0x7ec   : > { %v10900_v7 = vpop.f32.mrf.mxu1 }
 0x7ed   : > { %v10901_v4 = vadd.f32 %v10900_v7, %v10858_v42  ;;  %v11587_v7 = vrot.slane %v11578_v18, %v24322_v33  ;;  %v20416_v18 = vld [vmem:[%s24304_s5 + $0x220] ss:$8 sps:$4 sm:$0xff]  }
 0x7ee   : > { %v10902_v35 = vpop.f32.mrf.mxu1 }
 0x7ef   : > { %v10903_v45 = vadd.f32 %v10902_v35, %v10860_v53  ;;  %v10909_v23 = vadd.f32 %v10901_v4, %v10184_v47  ;;  %v20419_v47 = vld [vmem:[%s24304_s5 + $0x290] ss:$8 sps:$4 sm:$0xff]  }
 0x7f0   : > { %v10904_v17 = vpop.f32.mrf.mxu1 }
 0x7f1   : > { %v10905_v36 = vadd.f32 %v10904_v17, %v10862_v13  ;;  %v10910_v1 = vadd.f32 %v10903_v45, %v10185_v2  ;;  %v20404_v17 = vld [vmem:[%s24304_s5 + $0x240] ss:$8 sps:$4 sm:$0xff]   ;;  %v20421_v13 = vld [vmem:[%s24304_s5 + $0x294] ss:$8 sps:$4 sm:$0xff]   ;;  %v20427_v45 = vld [vmem:[%s24304_s5 + $0x284] ss:$8 sps:$4 sm:$0xff]  }
 0x7f2   : > { %v10906_v20 = vpop.f32.mrf.mxu1  ;;  %v20425_v2 = vld [vmem:[%s24304_s5 + $0x280] ss:$8 sps:$4 sm:$0xff]  }
 0x7f3   : > { %v10907_v38 = vadd.f32 %v10906_v20, %v10864_v9  ;;  %v10911_v21 = vadd.f32 %v10905_v36, %v10186_v27  ;;  %v20410_v20 = vld [vmem:[%s24304_s5 + $0x230] ss:$8 sps:$4 sm:$0xff]   ;;  %v20430_v9 = vld [vmem:[%s24304_s5 + $0x204] ss:$8 sps:$4 sm:$0xff]   ;;  %v20433_v36 = vld [vmem:[%s24304_s5 + $0x74] ss:$8 sps:$4 sm:$0xff]  }
 0x7f5   : > { %v10912_v39 = vadd.f32 %v10907_v38, %v10187_v62 }
 0x809   : > { %v11479_v3 = vpop.f32.mrf.mxu0 }
 0x80b   : > { %v11481_v60 = vpop.f32.mrf.mxu0 }
 0x80d   : > { %v11483_v58 = vpop.f32.mrf.mxu0 }
 0x80f   : > { %v11485_v0 = vpop.f32.mrf.mxu0 }
 0x829   : > { %v11565_v37 = vpop.f32.mrf.mxu0 }
 0x82b   : > { %v11567_v44 = vpop.f32.mrf.mxu0 }
 0x82c   : > { %v11522_v19 = vpop.f32.mrf.mxu1 }
 0x82d   : > { %v11523_v15 = vadd.f32 %v11522_v19, %v11479_v3  ;;  %v11569_v30 = vpop.f32.mrf.mxu0 }
 0x82e   : > { %v11524_v55 = vpop.f32.mrf.mxu1 }
 0x82f   : > { %v11566_v28 = vadd.f32 %v11565_v37, %v11523_v15  ;;  %v11525_v48 = vadd.f32 %v11524_v55, %v11481_v60  ;;  %v20403_v60 = vld [vmem:[%s24304_s5 + $0x2c4] ss:$8 sps:$4 sm:$0xff]   ;;  %v11571_v50 = vpop.f32.mrf.mxu0  ;;  %v20428_v55 = vld [vmem:[%s24304_s5 + $0x200] ss:$8 sps:$4 sm:$0xff]  }
 0x830   : > { %v11526_v3 = vpop.f32.mrf.mxu1  ;;  %12127 = vmatprep.subr.bf16.mxu0 %v20403_v60 }
 0x831   : > { %v11574_v40 = vadd.f32 %v11566_v28, %v10909_v23  ;;  %v11568_v16 = vadd.f32 %v11567_v44, %v11525_v48  ;;  %v11527_v35 = vadd.f32 %v11526_v3, %v11483_v58  ;;  %12128 = vmatpush1.bf16.msra.mxu0 %v20401_v57  ;;  %v20406_v58 = vld [vmem:[%s24304_s5 + $0x244] ss:$8 sps:$4 sm:$0xff]   ;;  %v20436_v23 = vld [vmem:[%s24304_s5 + $0x174] ss:$8 sps:$4 sm:$0xff]  }
 0x832   : > { %v11528_v5 = vpop.f32.mrf.mxu1  ;;  %12092 = vmatprep.subr.bf16.mxu1 %v20406_v58  ;;  %12129 = vmatprep.subr.bf16.mxu0 %v20409_v51 }
 0x833   : > { %v11570_v11 = vadd.f32 %v11569_v30, %v11527_v35  ;;  %v11529_v59 = vadd.f32 %v11528_v5, %v11485_v0  ;;  %v11590_v61 = vadd.f32 %v11583_v29, %v11574_v40  ;;  %v11575_v32 = vadd.f32 %v11568_v16, %v10910_v1  ;;  %12093 = vmatpush2.bf16.msra.mxu1 %v20404_v17 }
 0x834   : > { %12094 = vmatprep.subr.bf16.mxu1 %v20412_v41 }
 0x835   : > { %v11576_v31 = vadd.f32 %v11570_v11, %v10911_v21  ;;  %v11572_v22 = vadd.f32 %v11571_v50, %v11529_v59  ;;  %v11594_v0 = vmax.f32 %v11590_v61, 0.0  ;;  %v11591_v54 = vadd.f32 %v11587_v7, %v11575_v32  ;;  %12130 = vmatpush1.bf16.msra.mxu0 %v20407_v26 }
 0x836   : > { %12131 = vmatprep.subr.bf16.mxu0 %v20415_v43  ;;  %v20434_v43 = vld [vmem:[%s24304_s5 + $0x170] ss:$8 sps:$4 sm:$0xff]  }
 0x837   : > { %v11592_v42 = vadd.f32 %v11583_v29, %v11576_v31  ;;  %v11577_v37 = vadd.f32 %v11572_v22, %v10912_v39  ;;  %v11611_v46 = vrot.slane %v11594_v0, 4  ;;  %v11595_v52 = vmax.f32 %v11591_v54, 0.0  ;;  %12095 = vmatpush2.bf16.msra.mxu1 %v20410_v20 }
 0x838   : > { %12096 = vmatprep.subr.bf16.mxu1 %v20418_v24 }
 0x839   : > { %11617 = vrot.lane.b32.xlu0 %v11611_v46, %s20951_s27  ;;  %v11593_v25 = vadd.f32 %v11587_v7, %v11577_v37  ;;  %v11612_v53 = vrot.slane %v11595_v52, 4  ;;  %v11596_v4 = vmax.f32 %v11592_v42, 0.0  ;;  %12132 = vmatpush1.bf16.msra.mxu0 %v20413_v14  ;;  %v20431_v42 = vld [vmem:[%s24304_s5 + $0x70] ss:$8 sps:$4 sm:$0xff]  }
 0x83a   : > { %12133 = vmatprep.subr.bf16.mxu0 %v20421_v13 }
 0x83b   : > { %11619 = vrot.lane.b32.xlu1 %v11612_v53, %s20951_s27  ;;  %v11613_v44 = vrot.slane %v11596_v4, 4  ;;  %v11597_v19 = vmax.f32 %v11593_v25, 0.0  ;;  %12097 = vmatpush2.bf16.msra.mxu1 %v20416_v18  ;;  %v20439_v4 = vld [vmem:[%s24304_s5 + $0x64] ss:$8 sps:$4 sm:$0xff]  }
 0x83c   : > { %12098 = vmatprep.subr.bf16.mxu1 %v20424_v8  ;;  %v20437_v8 = vld [vmem:[%s24304_s5 + $0x60] ss:$8 sps:$4 sm:$0xff]  }
 0x83d   : > { %v11614_v12 = vsel %vm8181_vm3, %v11611_v46, %v11613_v44  ;;  %v11615_v6 = vrot.slane %v11597_v19, 4  ;;  %12134 = vmatpush1.bf16.msra.mxu0 %v20419_v47  ;;  %v20442_v19 = vld [vmem:[%s24304_s5 + $0x164] ss:$8 sps:$4 sm:$0xff]   ;;  %v24323_v47 = vmov 0  }
 0x83e   : > { %12135 = vmatprep.subr.bf16.mxu0 %v20427_v45 }
 0x83f   : > { %11621 = vrot.lane.b32.xlu1 %v11614_v12, %s20951_s27  ;;  %v11616_v15 = vsel %vm8181_vm3, %v11612_v53, %v11615_v6  ;;  %12099 = vmatpush2.bf16.msra.mxu1 %v20422_v10  ;;  %v20445_v12 = vld [vmem:[%s24304_s5 + $0x54] ss:$8 sps:$4 sm:$0xff]  }
 0x840   : > { %11623 = vrot.lane.b32.xlu0 %v11616_v15, %s20951_s27  ;;  %12100 = vmatprep.subr.bf16.mxu1 %v20430_v9  ;;  %v20448_v10 = vld [vmem:[%s24304_s5 + $0x154] ss:$8 sps:$4 sm:$0xff]   ;;  %v20443_v9 = vld [vmem:[%s24304_s5 + $0x50] ss:$8 sps:$4 sm:$0xff]  }
 0x841   : > { %12136 = vmatpush1.bf16.msra.mxu0 %v20425_v2 }
 0x842   : > { %12412 = vmatprep.subr.bf16.mxu0 %v20433_v36 }
 0x843   : > { %11625 = vrot.lane.b32.xlu1 %v11613_v44, %s20951_s27  ;;  %12101 = vmatpush2.bf16.msra.mxu1 %v20428_v55  ;;  %v20451_v55 = vld [vmem:[%s24304_s5 + $0x44] ss:$8 sps:$4 sm:$0xff]  }
 0x844   : > { %11627 = vrot.lane.b32.xlu0 %v11615_v6, %s20951_s27  ;;  %12463 = vmatprep.subr.bf16.mxu1 %v20436_v23  ;;  %v20440_v6 = vld [vmem:[%s24304_s5 + $0x160] ss:$8 sps:$4 sm:$0xff]   ;;  %s532_s27 = scalar_lea.vmem %s24314_s15, %s18140_s22 }
 0x8ab   : > { %v11618_v28 = vpop.permute.xlu0 %11617 }
 0x8ac   : > { %11642 = vst.msk [vmem:[#allocation6] sm:$0xf0] %vm11641_vm8, %v11618_v28 }
 0x8ad   : > { %v11620_v48 = vpop.permute.xlu1 %11619 }
 0x8ae   : > { %v11629_v29 = vsel %vm878_vm1, %v11618_v28, %v11620_v48  ;;  %11645 = vst.msk [vmem:[#allocation6 + $0x10] sm:$0xf0] %vm11644_vm9, %v11620_v48  ;;  %v20446_v28 = vld [vmem:[%s24304_s5 + $0x150] ss:$8 sps:$4 sm:$0xff]  }
 0x8af   : > { %11643 = vst [vmem:[#allocation6 + $0x8] sm:$0xf0] %v11629_v29  ;;  %v20454_v29 = vld [vmem:[%s24304_s5 + $0x144] ss:$8 sps:$4 sm:$0xff]  }
 0x8b1   : > { %v11622_v63 = vpop.permute.xlu1 %11621 }
 0x8b2   : > { %11647 = vst.msk [vmem:[#allocation6 + $0x18] sm:$0xff] %vm11646_vm10, %v11622_v63  ;;  %v11624_v49 = vpop.permute.xlu0 %11623 }
 0x8b3   : > { %v23138_v57 = vsel %vm878_vm1, %v11622_v63, %v11624_v49  ;;  %11649 = vst.msk [vmem:[#allocation6 + $0x28] sm:$0xff] %vm878_vm1, %v11624_v49  ;;  %v11718_v60 = vld [vmem:[#allocation6] sm:$0xfe]  ;;  %v20457_v49 = vld [vmem:[%s24304_s5 + $0x34] ss:$8 sps:$4 sm:$0xff]  }
 0x8b4   : > { %v20449_v63 = vld [vmem:[%s24304_s5 + $0x40] ss:$8 sps:$4 sm:$0xff]  }
 0x8b5   : > { %v11626_v34 = vpop.permute.xlu1 %11625  ;;  %v11720_v40 = vld [vmem:[#allocation6 + $0x10] sm:$0xfe] }
 0x8b6   : > { %11651 = vst.msk [vmem:[#allocation6 + $0x30] sm:$0xf] %vm11650_vm11, %v11626_v34  ;;  %v11628_v27 = vpop.permute.xlu0 %11627  ;;  %v11719_v38 = vld [vmem:[#allocation6 + $0x8] sm:$0xfe] }
 0x8b7   : > { %v11631_v30 = vsel %vm878_vm1, %v11626_v34, %v11628_v27  ;;  %11654 = vst.msk [vmem:[#allocation6 + $0x40] sm:$0xf] %vm11653_vm12, %v11628_v27  ;;  %v11725_v3 = vpack.c.bf16 %v23138_v57, %v11719_v38  ;;  %v11656_v15 = vld [vmem:[#allocation6 + $0x8] sm:$0xff]  ;;  %v20452_v34 = vld [vmem:[%s24304_s5 + $0x140] ss:$8 sps:$4 sm:$0xff]  }
 0x8b8   : > { %11652 = vst [vmem:[#allocation6 + $0x38] sm:$0xf] %v11631_v30  ;;  %v11665_v23 = vpack.c.bf16 %v23138_v57, %v11656_v15  ;;  %v20460_v27 = vld [vmem:[%s24304_s5 + $0x134] ss:$8 sps:$4 sm:$0xff]   ;;  %v20455_v38 = vld [vmem:[%s24304_s5 + $0x30] ss:$8 sps:$4 sm:$0xff]  }
 0x8b9   : > { %v23143_v7 = vld [vmem:[#allocation6 + $0x18] sm:$0xff]  ;;  %v11794_v21 = vshll.u32 %v11725_v3, 16  ;;  %v11792_v54 = vshrl.u32 %v11725_v3, 16  ;;  %v20458_v3 = vld [vmem:[%s24304_s5 + $0x130] ss:$8 sps:$4 sm:$0xff]  }
 0x8ba   : > { %v23145_v1 = vld [vmem:[#allocation6 + $0x28] sm:$0xff]  ;;  %v11724_v16 = vpack.c.bf16 %v23143_v7, %v11718_v60  ;;  %v20463_v30 = vld [vmem:[%s24304_s5 + $0x24] ss:$8 sps:$4 sm:$0xff]  }
 0x8bb   : > { %v11726_v35 = vpack.c.bf16 %v23145_v1, %v11720_v40  ;;  %v11796_v58 = vrot.slane %v11794_v21, 1  ;;  %v20466_v60 = vld [vmem:[%s24304_s5 + $0x124] ss:$8 sps:$4 sm:$0xff]   ;;  %v20461_v40 = vld [vmem:[%s24304_s5 + $0x20] ss:$8 sps:$4 sm:$0xff]  }
 0x8bc   : > { %v11782_v11 = vshll.u32 %v11724_v16, 16  ;;  %v11780_v52 = vshrl.u32 %v11724_v16, 16  ;;  %v20469_v16 = vld [vmem:[%s24304_s5 + $0x14] ss:$8 sps:$4 sm:$0xff]   ;;  %v20511_v15 = vld [vmem:[%s24304_s5 + $0xa4] ss:$8 sps:$4 sm:$0xff]  }
 0x8bd   : > { %v11806_v62 = vshll.u32 %v11726_v35, 16  ;;  %v11721_v5 = vld [vmem:[#allocation6 + $0x30] sm:$0x1f]  ;;  %v11804_v31 = vshrl.u32 %v11726_v35, 16  ;;  %v11797_v41 = vor.u32 %v11796_v58, %v11792_v54  ;;  %v20464_v35 = vld [vmem:[%s24304_s5 + $0x120] ss:$8 sps:$4 sm:$0xff]  }
 0x8be   : > { %v11723_v59 = vld [vmem:[#allocation6 + $0x40] sm:$0x1f]  ;;  %v11727_v61 = vpack.c.bf16 %v11721_v5, %v11721_v5  ;;  %v11784_v0 = vrot.slane %v11782_v11, 1  ;;  %v20472_v21 = vld [vmem:[%s24304_s5 + $0x114] ss:$8 sps:$4 sm:$0xff]  }
 0x8bf   : > { %v11729_v32 = vpack.c.bf16 %v11723_v59, %v11723_v59  ;;  %v11808_v39 = vrot.slane %v11806_v62, 1  ;;  %v11722_v50 = vld [vmem:[#allocation6 + $0x38] sm:$0x1f]  ;;  %v20467_v62 = vld [vmem:[%s24304_s5 + $0x10] ss:$8 sps:$4 sm:$0xff]  }
 0x8c0   : > { %v11728_v17 = vpack.c.bf16 %v11722_v50, %v11722_v50  ;;  %v11787_v26 = vshll.u32 %v11727_v61, 16  ;;  %v11785_v24 = vor.u32 %v11784_v0, %v11780_v52  ;;  %v11815_v36 = vshrl.u32 %v11727_v61, 16  ;;  %v20475_v5 = vld [vmem:[%s24304_s5 + $0x4] ss:$8 sps:$4 sm:$0xff]   ;;  %v20470_v11 = vld [vmem:[%s24304_s5 + $0x110] ss:$8 sps:$4 sm:$0xff]  }
 0x8c1   : > { %v11811_v22 = vshll.u32 %v11729_v32, 16  ;;  %v11809_v37 = vor.u32 %v11808_v39, %v11804_v31  ;;  %v11821_v45 = vshrl.u32 %v11729_v32, 16  ;;  %v20478_v59 = vld [vmem:[%s24304_s5 + $0x104] ss:$8 sps:$4 sm:$0xff]   ;;  %v20473_v61 = vld [vmem:[%s24304_s5] ss:$8 sps:$4 sm:$0xff]  }
 0x8c2   : > { %v11799_v51 = vshll.u32 %v11728_v17, 16  ;;  %v11789_v20 = vrot.slane %v11787_v26, 1  ;;  %v11818_v53 = vshrl.u32 %v11728_v17, 16  ;;  %v20481_v32 = vld [vmem:[%s24304_s5 + $0xf4] ss:$8 sps:$4 sm:$0xff]  }
 0x8c3   : > { %v11813_v46 = vrot.slane %v11811_v22, 1  ;;  %v20476_v39 = vld [vmem:[%s24304_s5 + $0x100] ss:$8 sps:$4 sm:$0xff]   ;;  %v20484_v50 = vld [vmem:[%s24304_s5 + $0x374] ss:$8 sps:$4 sm:$0xff]  }
 0x8c4   : > { %v11801_v25 = vrot.slane %v11799_v51, 1  ;;  %v11790_v18 = vsel %vm8399_vm4, %v11785_v24, %v11789_v20  ;;  %v11817_v48 = vor.u32 %v11815_v36, %v11789_v20  ;;  %v20479_v17 = vld [vmem:[%s24304_s5 + $0xf0] ss:$8 sps:$4 sm:$0xff]   ;;  %v20487_v58 = vld [vmem:[%s24304_s5 + $0xe4] ss:$8 sps:$4 sm:$0xff]  }
 0x8c5   : > { %v11814_v14 = vsel %vm8399_vm4, %v11809_v37, %v11813_v46  ;;  %v11823_v2 = vor.u32 %v11821_v45, %v11813_v46  ;;  %v11657_v26 = vld [vmem:[#allocation6 + $0x10] sm:$0xff]  ;;  %v12518_v22 = vld [vmem:[#allocation6 + $0x38] sm:$0x3f] }
 0x8c6   : > { %12154 = vmatmul.mubr.bf16.vlgmr.msra.gmra.mxu0 %v11814_v14  ;;  %v11802_v13 = vsel %vm8399_vm4, %v11797_v41, %v11801_v25  ;;  %v11820_v44 = vor.u32 %v11818_v53, %v11801_v25  ;;  %v20482_v31 = vld [vmem:[%s24304_s5 + $0x370] ss:$8 sps:$4 sm:$0xff]   ;;  %v11666_v0 = vpack.c.bf16 %v23145_v1, %v11657_v26  ;;  %v20490_v54 = vld [vmem:[%s24304_s5 + $0x364] ss:$8 sps:$4 sm:$0xff]   ;;  %v20485_v51 = vld [vmem:[%s24304_s5 + $0xe0] ss:$8 sps:$4 sm:$0xff]   ;;  %v12524_v46 = vpack.c.bf16 %v12518_v22, %v12518_v22 }
 0x8c7   : > { %12413 = vmatpush1.bf16.msra.mxu0 %v20431_v42  ;;  %12102 = vmatprep.mubr.bf16.mxu1 %v11802_v13  ;;  %v12515_v42 = vld [vmem:[#allocation6 + $0x8] sm:$0xfc]  ;;  %v20488_v52 = vld [vmem:[%s24304_s5 + $0x360] ss:$8 sps:$4 sm:$0xff]   ;;  %v20499_v14 = vld [vmem:[%s24304_s5 + $0xc4] ss:$8 sps:$4 sm:$0xff]  }
 0x8c8   : > { %12103 = vmatmul.mubr.bf16.vlgmr.msra.gmra.mxu1 %v11790_v18  ;;  %12414 = vmatprep.subr.bf16.mxu0 %v20439_v4  ;;  %v20493_v37 = vld [vmem:[%s24304_s5 + $0xd4] ss:$8 sps:$4 sm:$0xff]   ;;  %v12521_v41 = vpack.c.bf16 %v23138_v57, %v12515_v42  ;;  %v20491_v25 = vld [vmem:[%s24304_s5 + $0xd0] ss:$8 sps:$4 sm:$0xff]   ;;  %v11663_v53 = vld [vmem:[#allocation6 + $0x40] sm:$0xf] }
 0x8c9   : > { %12464 = vmatpush1.bf16.msra.mxu1 %v20434_v43  ;;  %12112 = vmatprep.mubr.bf16.mxu1 %v11820_v44  ;;  %v20496_v20 = vld [vmem:[%s24304_s5 + $0x354] ss:$8 sps:$4 sm:$0xff]   ;;  %v23281_v4 = vrot.slane %v12524_v46, 1  ;;  %v20494_v43 = vld [vmem:[%s24304_s5 + $0x350] ss:$8 sps:$4 sm:$0xff]   ;;  %v11669_v24 = vpack.c.bf16 %v11663_v53, %v11663_v53 }
 0x8ca   : > { %12465 = vmatprep.subr.bf16.mxu1 %v20442_v19  ;;  %12163 = vmatprep.mubr.bf16.mxu0 %v24323_v47  ;;  %v12584_v13 = vrot.slane %v12521_v41, 1  ;;  %v20502_v44 = vld [vmem:[%s24304_s5 + $0x344] ss:$8 sps:$4 sm:$0xff]   ;;  %v20497_v19 = vld [vmem:[%s24304_s5 + $0xc0] ss:$8 sps:$4 sm:$0xff]  }
 0x8cb   : > { %12415 = vmatpush1.bf16.msra.mxu0 %v20437_v8  ;;  %v20505_v8 = vld [vmem:[%s24304_s5 + $0xb4] ss:$8 sps:$4 sm:$0xff]   ;;  %v20503_v45 = vld [vmem:[%s24304_s5 + $0xb0] ss:$8 sps:$4 sm:$0xff]   ;;  %v20550_v26 = vld [vmem:[%s24304_s5 + $0x3c4] ss:$8 sps:$4 sm:$0xff]  }
 0x8cc   : > { %12416 = vmatprep.subr.bf16.mxu0 %v20445_v12  ;;  %v12586_v18 = vsel %vm9634_vm5, %v12584_v13, %v23281_v4  ;;  %v20500_v12 = vld [vmem:[%s24304_s5 + $0x340] ss:$8 sps:$4 sm:$0xff]   ;;  %v20517_v36 = vld [vmem:[%s24304_s5 + $0x94] ss:$8 sps:$4 sm:$0xff]   ;;  %v20559_v42 = vld [vmem:[%s24304_s5 + $0x424] ss:$8 sps:$4 sm:$0xff]  }
 0x8cd   : > { %12466 = vmatpush1.bf16.msra.mxu1 %v20440_v6  ;;  %v20508_v6 = vld [vmem:[%s24304_s5 + $0x334] ss:$8 sps:$4 sm:$0xff]   ;;  %v20562_v46 = vld [vmem:[%s24304_s5 + $0x3a4] ss:$8 sps:$4 sm:$0xff]   ;;  %v20560_v41 = vld [vmem:[%s24304_s5 + $0x3a0] ss:$8 sps:$4 sm:$0xff]  }
 0x8ce   : > { %12164 = vmatmul.mubr.bf16.gmra.mxu0 %v11823_v2  ;;  %12467 = vmatprep.subr.bf16.mxu1 %v20448_v10  ;;  %v20506_v10 = vld [vmem:[%s24304_s5 + $0x330] ss:$8 sps:$4 sm:$0xff]   ;;  %v20509_v2 = vld [vmem:[%s24304_s5 + $0xa0] ss:$8 sps:$4 sm:$0xff]   ;;  %v20553_v22 = vld [vmem:[%s24304_s5 + $0x434] ss:$8 sps:$4 sm:$0xff]  }
 0x8cf   : > { %12417 = vmatpush1.bf16.msra.mxu0 %v20443_v9  ;;  %12444 = vmatprep.mubr.bf16.mxu0 %v11665_v23  ;;  %v20514_v9 = vld [vmem:[%s24304_s5 + $0x324] ss:$8 sps:$4 sm:$0xff]   ;;  %v20520_v23 = vld [vmem:[%s24304_s5 + $0x314] ss:$8 sps:$4 sm:$0xff]  }
 0x8d0   : > { %12113 = vmatmul.mubr.bf16.gmra.mxu1 %v11817_v48  ;;  %12418 = vmatprep.subr.bf16.mxu0 %v20451_v55  ;;  %v20512_v55 = vld [vmem:[%s24304_s5 + $0x320] ss:$8 sps:$4 sm:$0xff]   ;;  %v20523_v48 = vld [vmem:[%s24304_s5 + $0x84] ss:$8 sps:$4 sm:$0xff]   ;;  %v12517_v13 = vld [vmem:[#allocation6 + $0x30] sm:$0x3f] }
 0x8d1   : > { %12468 = vmatpush1.bf16.msra.mxu1 %v20446_v28  ;;  %12495 = vmatprep.mubr.bf16.mxu1 %v24323_v47  ;;  %v20515_v28 = vld [vmem:[%s24304_s5 + $0x90] ss:$8 sps:$4 sm:$0xff]   ;;  %v12519_v53 = vld [vmem:[#allocation6 + $0x40] sm:$0x3f] }
 0x8d2   : > { %12469 = vmatprep.subr.bf16.mxu1 %v20454_v29  ;;  %v20518_v29 = vld [vmem:[%s24304_s5 + $0x310] ss:$8 sps:$4 sm:$0xff]  }
 0x8d3   : > { %12419 = vmatpush1.bf16.msra.mxu0 %v20449_v63  ;;  %v20526_v63 = vld [vmem:[%s24304_s5 + $0x304] ss:$8 sps:$4 sm:$0xff]  }
 0x8d4   : > { %12420 = vmatprep.subr.bf16.mxu0 %v20457_v49  ;;  %v20521_v49 = vld [vmem:[%s24304_s5 + $0x80] ss:$8 sps:$4 sm:$0xff]  }
 0x8d5   : > { %12470 = vmatpush1.bf16.msra.mxu1 %v20452_v34  ;;  %v20529_v34 = vld [vmem:[%s24304_s5 + $0x474] ss:$8 sps:$4 sm:$0xff]  }
 0x8d6   : > { %12471 = vmatprep.subr.bf16.mxu1 %v20460_v27  ;;  %v20524_v27 = vld [vmem:[%s24304_s5 + $0x300] ss:$8 sps:$4 sm:$0xff]  }
 0x8d7   : > { %12421 = vmatpush1.bf16.msra.mxu0 %v20455_v38  ;;  %v11662_v38 = vld [vmem:[#allocation6 + $0x38] sm:$0xf] }
 0x8d8   : > { %12422 = vmatprep.subr.bf16.mxu0 %v20463_v30  ;;  %v20532_v30 = vld [vmem:[%s24304_s5 + $0x3f4] ss:$8 sps:$4 sm:$0xff]  }
 0x8d9   : > { %12472 = vmatpush1.bf16.msra.mxu1 %v20458_v3  ;;  %v11655_v3 = vld [vmem:[#allocation6] sm:$0xff] }
 0x8da   : > { %12473 = vmatprep.subr.bf16.mxu1 %v20466_v60  ;;  %v20527_v60 = vld [vmem:[%s24304_s5 + $0x470] ss:$8 sps:$4 sm:$0xff]  }
 0x8db   : > { %12423 = vmatpush1.bf16.msra.mxu0 %v20461_v40  ;;  %v11664_v40 = vpack.c.bf16 %v23143_v7, %v11655_v3 }
 0x8dc   : > { %12424 = vmatprep.subr.bf16.mxu0 %v20469_v16  ;;  %v20535_v16 = vld [vmem:[%s24304_s5 + $0x464] ss:$8 sps:$4 sm:$0xff]  }
 0x8dd   : > { %12474 = vmatpush1.bf16.msra.mxu1 %v20464_v35  ;;  %v11668_v35 = vpack.c.bf16 %v11662_v38, %v11662_v38  ;;  %v20583_v38 = vld [vmem:[%s24304_s5 + $0x4e4] ss:$8 sps:$4 sm:$0xff]  }
 0x8de   : > { %12475 = vmatprep.subr.bf16.mxu1 %v20472_v21  ;;  %v20530_v21 = vld [vmem:[%s24304_s5 + $0x3f0] ss:$8 sps:$4 sm:$0xff]  }
 0x8df   : > { %12425 = vmatpush1.bf16.msra.mxu0 %v20467_v62  ;;  %v20538_v62 = vld [vmem:[%s24304_s5 + $0x3e4] ss:$8 sps:$4 sm:$0xff]  }
 0x8e0   : > { %12426 = vmatprep.subr.bf16.mxu0 %v20475_v5  ;;  %v20533_v5 = vld [vmem:[%s24304_s5 + $0x460] ss:$8 sps:$4 sm:$0xff]  }
 0x8e1   : > { %12476 = vmatpush1.bf16.msra.mxu1 %v20470_v11  ;;  %v20541_v11 = vld [vmem:[%s24304_s5 + $0x454] ss:$8 sps:$4 sm:$0xff]  }
 0x8e2   : > { %12477 = vmatprep.subr.bf16.mxu1 %v20478_v59  ;;  %v20536_v59 = vld [vmem:[%s24304_s5 + $0x3e0] ss:$8 sps:$4 sm:$0xff]  }
 0x8e3   : > { %12427 = vmatpush1.bf16.msra.mxu0 %v20473_v61  ;;  %v11661_v61 = vld [vmem:[#allocation6 + $0x30] sm:$0xf] }
 0x8e4   : > { %12428 = vmatprep.subr.bf16.mxu0 %v20481_v32  ;;  %v20544_v32 = vld [vmem:[%s24304_s5 + $0x3d4] ss:$8 sps:$4 sm:$0xff]  }
 0x8e5   : > { %12478 = vmatpush1.bf16.msra.mxu1 %v20476_v39  ;;  %v20539_v39 = vld [vmem:[%s24304_s5 + $0x450] ss:$8 sps:$4 sm:$0xff]  }
 0x8e6   : > { %12836 = vmatprep.subr.bf16.mxu1 %v20484_v50  ;;  %v11667_v50 = vpack.c.bf16 %v11661_v61, %v11661_v61 }
 0x8e7   : > { %12429 = vmatpush2.bf16.msra.mxu0 %v20479_v17  ;;  %v20547_v17 = vld [vmem:[%s24304_s5 + $0x444] ss:$8 sps:$4 sm:$0xff]  }
 0x8e8   : > { %12496 = vmatmul.mubr.bf16.vlgmr.msra.gmra.mxu1 %v11666_v0  ;;  %12430 = vmatprep.subr.bf16.mxu0 %v20487_v58  ;;  %v20542_v58 = vld [vmem:[%s24304_s5 + $0x3d0] ss:$8 sps:$4 sm:$0xff]   ;;  %v20548_v0 = vld [vmem:[%s24304_s5 + $0x3c0] ss:$8 sps:$4 sm:$0xff]  }
 0x8e9   : > { %12837 = vmatpush1.bf16.msra.mxu1 %v20482_v31  ;;  %12505 = vmatprep.mubr.bf16.mxu1 %v24323_v47  ;;  %v20545_v31 = vld [vmem:[%s24304_s5 + $0x440] ss:$8 sps:$4 sm:$0xff]  }
 0x8ea   : > { %12838 = vmatprep.subr.bf16.mxu1 %v20490_v54  ;;  %v20556_v54 = vld [vmem:[%s24304_s5 + $0x3b4] ss:$8 sps:$4 sm:$0xff]  }
 0x8eb   : > { %12431 = vmatpush2.bf16.msra.mxu0 %v20485_v51  ;;  %v20551_v51 = vld [vmem:[%s24304_s5 + $0x430] ss:$8 sps:$4 sm:$0xff]  }
 0x8ec   : > { %12432 = vmatprep.subr.bf16.mxu0 %v20493_v37  ;;  %v20554_v37 = vld [vmem:[%s24304_s5 + $0x3b0] ss:$8 sps:$4 sm:$0xff]  }
 0x8ed   : > { %12839 = vmatpush1.bf16.msra.mxu1 %v20488_v52  ;;  %v20557_v52 = vld [vmem:[%s24304_s5 + $0x420] ss:$8 sps:$4 sm:$0xff]  }
 0x8ee   : > { %12840 = vmatprep.subr.bf16.mxu1 %v20496_v20  ;;  %v20565_v20 = vld [vmem:[%s24304_s5 + $0x414] ss:$8 sps:$4 sm:$0xff]  }
 0x8ef   : > { %12433 = vmatpush2.bf16.msra.mxu0 %v20491_v25  ;;  %v20568_v25 = vld [vmem:[%s24304_s5 + $0x394] ss:$8 sps:$4 sm:$0xff]  }
 0x8f0   : > { %12506 = vmatmul.mubr.bf16.gmra.mxu1 %v11669_v24  ;;  %12434 = vmatprep.subr.bf16.mxu0 %v20499_v14  ;;  %v20563_v14 = vld [vmem:[%s24304_s5 + $0x410] ss:$8 sps:$4 sm:$0xff]   ;;  %v20571_v24 = vld [vmem:[%s24304_s5 + $0x404] ss:$8 sps:$4 sm:$0xff]  }
 0x8f1   : > { %12841 = vmatpush1.bf16.msra.mxu1 %v20494_v43  ;;  %12868 = vmatprep.mubr.bf16.mxu1 %v12586_v18  ;;  %v12948_v43 = vld [vmem:[#allocation6 + $0x38] sm:$0x7f]  ;;  %v12945_v18 = vld [vmem:[#allocation6 + $0x8] sm:$0xf8] }
 0x8f2   : > { %12842 = vmatprep.subr.bf16.mxu1 %v20502_v44  ;;  %v20566_v44 = vld [vmem:[%s24304_s5 + $0x390] ss:$8 sps:$4 sm:$0xff]  }
 0x8f3   : > { %12435 = vmatpush2.bf16.msra.mxu0 %v20497_v19  ;;  %v12525_v19 = vpack.c.bf16 %v12519_v53, %v12519_v53  ;;  %v20605_v53 = vld [vmem:[%s24304_s5 + $0x4a0] ss:$8 sps:$4 sm:$0xff]  }
 0x8f4   : > { %12436 = vmatprep.subr.bf16.mxu0 %v20505_v8  ;;  %v20574_v8 = vld [vmem:[%s24304_s5 + $0x384] ss:$8 sps:$4 sm:$0xff]  }
 0x8f5   : > { %12843 = vmatpush1.bf16.msra.mxu1 %v20500_v12  ;;  %v12516_v12 = vld [vmem:[#allocation6 + $0x10] sm:$0xfc] }
 0x8f6   : > { %12844 = vmatprep.subr.bf16.mxu1 %v20508_v6  ;;  %v12954_v6 = vpack.c.bf16 %v12948_v43, %v12948_v43  ;;  %v20613_v43 = vld [vmem:[%s24304_s5 + $0x494] ss:$8 sps:$4 sm:$0xff]  }
 0x8f7   : > { %12437 = vmatpush2.bf16.msra.mxu0 %v20503_v45  ;;  %v20569_v45 = vld [vmem:[%s24304_s5 + $0x400] ss:$8 sps:$4 sm:$0xff]  }
 0x8f8   : > { %12438 = vmatprep.subr.bf16.mxu0 %v20511_v15  ;;  %v12522_v15 = vpack.c.bf16 %v23145_v1, %v12516_v12 }
 0x8f9   : > { %12845 = vmatpush1.bf16.msra.mxu1 %v20506_v10  ;;  %v12523_v10 = vpack.c.bf16 %v12517_v13, %v12517_v13  ;;  %v20608_v13 = vld [vmem:[%s24304_s5 + $0x5a0] ss:$8 sps:$4 sm:$0xff]  }
 0x8fa   : > { %12846 = vmatprep.subr.bf16.mxu1 %v20514_v9  ;;  %v20577_v9 = vld [vmem:[%s24304_s5 + $0x4f4] ss:$8 sps:$4 sm:$0xff]  }
 0x8fb   : > { %12439 = vmatpush2.bf16.msra.mxu0 %v20509_v2  ;;  %v12514_v2 = vld [vmem:[#allocation6] sm:$0xfc] }
 0x8fc   : > { %12440 = vmatprep.subr.bf16.mxu0 %v20517_v36  ;;  %v12951_v36 = vpack.c.bf16 %v23138_v57, %v12945_v18  ;;  %v20611_v18 = vld [vmem:[%s24304_s5 + $0x490] ss:$8 sps:$4 sm:$0xff]  }
 0x8fd   : > { %12847 = vmatpush1.bf16.msra.mxu1 %v20512_v55  ;;  %v20572_v55 = vld [vmem:[%s24304_s5 + $0x380] ss:$8 sps:$4 sm:$0xff]  }
 0x8fe   : > { %12848 = vmatprep.subr.bf16.mxu1 %v20520_v23  ;;  %v12588_v23 = vrot.slane %v12525_v19, 1  ;;  %v13026_v3 = vshll.u32 %v12951_v36, 16  ;;  %v20616_v19 = vld [vmem:[%s24304_s5 + $0x594] ss:$8 sps:$4 sm:$0xff]  }
 0x8ff   : > { %12441 = vmatpush2.bf16.msra.mxu0 %v20515_v28  ;;  %v12520_v28 = vpack.c.bf16 %v23143_v7, %v12514_v2 }
 0x900   : > { %12442 = vmatprep.subr.bf16.mxu0 %v20523_v48  ;;  %v20580_v48 = vld [vmem:[%s24304_s5 + $0x5f4] ss:$8 sps:$4 sm:$0xff]  }
 0x901   : > { %12849 = vmatpush1.bf16.msra.mxu1 %v20518_v29  ;;  %v13031_v29 = vshrl.u32 %v12954_v6, 16 }
 0x902   : > { %12850 = vmatprep.subr.bf16.mxu1 %v20526_v63  ;;  %v13034_v63 = vshll.u32 %v12954_v6, 16  ;;  %v20619_v6 = vld [vmem:[%s24304_s5 + $0x484] ss:$8 sps:$4 sm:$0xff]  }
 0x903   : > { %12443 = vmatpush2.bf16.msra.mxu0 %v20521_v49  ;;  %v12587_v49 = vrot.slane %v12522_v15, 1 }
 0x904   : > { %12887 = vmatprep.subr.bf16.mxu0 %v20529_v34  ;;  %v20575_v34 = vld [vmem:[%s24304_s5 + $0x4f0] ss:$8 sps:$4 sm:$0xff]  }
 0x905   : > { %12851 = vmatpush1.bf16.msra.mxu1 %v20524_v27  ;;  %v12582_v27 = vrot.slane %v12523_v10, 1  ;;  %v20622_v10 = vld [vmem:[%s24304_s5 + $0x584] ss:$8 sps:$4 sm:$0xff]  }
 0x906   : > { %12445 = vmatmul.mubr.bf16.vlgmr.msra.gmra.mxu0 %v11664_v40  ;;  %12852 = vmatprep.subr.bf16.mxu1 %v20532_v30  ;;  %v13023_v30 = vshrl.u32 %v12951_v36, 16  ;;  %v12581_v40 = vrot.slane %v12520_v28, 1 }
 0x907   : > { %12454 = vmatprep.mubr.bf16.mxu0 %v11668_v35  ;;  %12888 = vmatpush1.bf16.msra.mxu0 %v20527_v60  ;;  %v12589_v60 = vsel %vm9634_vm5, %v12587_v49, %v12588_v23  ;;  %v20586_v35 = vld [vmem:[%s24304_s5 + $0x5e4] ss:$8 sps:$4 sm:$0xff]  }
 0x908   : > { %12889 = vmatprep.subr.bf16.mxu0 %v20535_v16  ;;  %v20578_v16 = vld [vmem:[%s24304_s5 + $0x5f0] ss:$8 sps:$4 sm:$0xff]   ;;  %v13025_v61 = vrot.slane %v13023_v30, 1  ;;  %v13414_v30 = vld [vmem:[#allocation6 + $0x38] sm:$0xff] }
 0x909   : > { %12853 = vmatpush2.bf16.msra.mxu1 %v20530_v21  ;;  %v13033_v21 = vrot.slane %v13031_v29, 1  ;;  %v20628_v29 = vld [vmem:[%s24304_s5 + $0x674] ss:$8 sps:$4 sm:$0xff]  }
 0x90a   : > { %12854 = vmatprep.subr.bf16.mxu1 %v20538_v62  ;;  %v13036_v62 = vrot.slane %v13034_v63, 2  ;;  %v20623_v63 = vld [vmem:[%s24304_s5 + $0x570] ss:$8 sps:$4 sm:$0xff]  }
 0x90b   : > { %12890 = vmatpush1.bf16.msra.mxu0 %v20533_v5  ;;  %v12583_v5 = vsel %vm9634_vm5, %v12581_v40, %v12582_v27  ;;  %v20629_v40 = vld [vmem:[%s24304_s5 + $0x560] ss:$8 sps:$4 sm:$0xff]  }
 0x90c   : > { %12891 = vmatprep.subr.bf16.mxu0 %v20541_v11  ;;  %v20581_v11 = vld [vmem:[%s24304_s5 + $0x4e0] ss:$8 sps:$4 sm:$0xff]  }
 0x90d   : > { %12855 = vmatpush2.bf16.msra.mxu1 %v20536_v59  ;;  %v20589_v59 = vld [vmem:[%s24304_s5 + $0x4d4] ss:$8 sps:$4 sm:$0xff]  }
 0x90e   : > { %12455 = vmatmul.mubr.bf16.gmra.mxu0 %v11667_v50  ;;  %12856 = vmatprep.subr.bf16.mxu1 %v20544_v32  ;;  %v13028_v32 = vrot.slane %v13026_v3, 2  ;;  %v23480_v50 = vor.u32 %v13036_v62, %v13033_v21  ;;  %v20634_v3 = vld [vmem:[%s24304_s5 + $0x664] ss:$8 sps:$4 sm:$0xff]   ;;  %v13420_v21 = vpack.c.bf16 %v13414_v30, %v13414_v30  ;;  %v20632_v62 = vld [vmem:[%s24304_s5 + $0x660] ss:$8 sps:$4 sm:$0xff]  }
 0x90f   : > { %12892 = vmatpush1.bf16.msra.mxu0 %v20539_v39  ;;  %12919 = vmatprep.mubr.bf16.mxu0 %v24323_v47  ;;  %v20584_v39 = vld [vmem:[%s24304_s5 + $0x5e0] ss:$8 sps:$4 sm:$0xff]   ;;  %v20691_v30 = vld [vmem:[%s24304_s5 + $0x744] ss:$8 sps:$4 sm:$0xff]  }
 0x910   : > { %12893 = vmatprep.subr.bf16.mxu0 %v20547_v17  ;;  %v20592_v17 = vld [vmem:[%s24304_s5 + $0x5d4] ss:$8 sps:$4 sm:$0xff]  }
 0x911   : > { %12857 = vmatpush2.bf16.msra.mxu1 %v20542_v58  ;;  %v20587_v58 = vld [vmem:[%s24304_s5 + $0x4d0] ss:$8 sps:$4 sm:$0xff]  }
 0x912   : > { %12858 = vmatprep.subr.bf16.mxu1 %v20550_v26  ;;  %v13029_v26 = vor.u32 %v13028_v32, %v13025_v61  ;;  %v23591_v61 = vrot.slane %v13420_v21, 2  ;;  %v20643_v32 = vld [vmem:[%s24304_s5 + $0x544] ss:$8 sps:$4 sm:$0xff]   ;;  %v20700_v21 = vld [vmem:[%s24304_s5 + $0x6b4] ss:$8 sps:$4 sm:$0xff]  }
 0x913   : > { %12894 = vmatpush1.bf16.msra.mxu0 %v20545_v31  ;;  %v20590_v31 = vld [vmem:[%s24304_s5 + $0x5d0] ss:$8 sps:$4 sm:$0xff]  }
 0x914   : > { %12895 = vmatprep.subr.bf16.mxu0 %v20553_v22  ;;  %v13038_v22 = vsel %vm10289_vm6, %v13029_v26, %v23480_v50 }
 0x915   : > { %12859 = vmatpush2.bf16.msra.mxu1 %v20548_v0  ;;  %v20598_v0 = vld [vmem:[%s24304_s5 + $0x5c4] ss:$8 sps:$4 sm:$0xff]  }
 0x916   : > { %12860 = vmatprep.subr.bf16.mxu1 %v20556_v54  ;;  %v20593_v54 = vld [vmem:[%s24304_s5 + $0x4c0] ss:$8 sps:$4 sm:$0xff]  }
 0x917   : > { %12896 = vmatpush1.bf16.msra.mxu0 %v20551_v51  ;;  %v20601_v51 = vld [vmem:[%s24304_s5 + $0x4b4] ss:$8 sps:$4 sm:$0xff]  }
 0x918   : > { %12897 = vmatprep.subr.bf16.mxu0 %v20559_v42  ;;  %v20596_v42 = vld [vmem:[%s24304_s5 + $0x5c0] ss:$8 sps:$4 sm:$0xff]  }
 0x919   : > { %12861 = vmatpush2.bf16.msra.mxu1 %v20554_v37  ;;  %v20604_v37 = vld [vmem:[%s24304_s5 + $0x5b4] ss:$8 sps:$4 sm:$0xff]  }
 0x91a   : > { %12862 = vmatprep.subr.bf16.mxu1 %v20562_v46  ;;  %v20599_v46 = vld [vmem:[%s24304_s5 + $0x4b0] ss:$8 sps:$4 sm:$0xff]  }
 0x91b   : > { %12898 = vmatpush1.bf16.msra.mxu0 %v20557_v52  ;;  %v20607_v52 = vld [vmem:[%s24304_s5 + $0x4a4] ss:$8 sps:$4 sm:$0xff]  }
 0x91c   : > { %12899 = vmatprep.subr.bf16.mxu0 %v20565_v20  ;;  %v12949_v20 = vld [vmem:[#allocation6 + $0x40] sm:$0x7f] }
 0x91d   : > { %12863 = vmatpush2.bf16.msra.mxu1 %v20560_v41  ;;  %v20602_v41 = vld [vmem:[%s24304_s5 + $0x5b0] ss:$8 sps:$4 sm:$0xff]  }
 0x91e   : > { %12864 = vmatprep.subr.bf16.mxu1 %v20568_v25  ;;  %v20610_v25 = vld [vmem:[%s24304_s5 + $0x5a4] ss:$8 sps:$4 sm:$0xff]  }
 0x91f   : > { %12900 = vmatpush1.bf16.msra.mxu0 %v20563_v14  ;;  %v12955_v14 = vpack.c.bf16 %v12949_v20, %v12949_v20  ;;  %v20653_v20 = vld [vmem:[%s24304_s5 + $0x520] ss:$8 sps:$4 sm:$0xff]  }
 0x920   : > { %12901 = vmatprep.subr.bf16.mxu0 %v20571_v24  ;;  %v12946_v24 = vld [vmem:[#allocation6 + $0x10] sm:$0xf8] }
 0x921   : > { %12865 = vmatpush2.bf16.msra.mxu1 %v20566_v44  ;;  %v12952_v44 = vpack.c.bf16 %v23145_v1, %v12946_v24  ;;  %v13051_v12 = vshll.u32 %v12955_v14, 16  ;;  %v20614_v1 = vld [vmem:[%s24304_s5 + $0x590] ss:$8 sps:$4 sm:$0xff]   ;;  %v20664_v24 = vld [vmem:[%s24304_s5 + $0x614] ss:$8 sps:$4 sm:$0xff]  }
 0x922   : > { %12866 = vmatprep.subr.bf16.mxu1 %v20574_v8  ;;  %v13048_v8 = vshrl.u32 %v12955_v14, 16 }
 0x923   : > { %12902 = vmatpush1.bf16.msra.mxu0 %v20569_v45  ;;  %v13040_v45 = vshrl.u32 %v12952_v44, 16  ;;  %v13043_v15 = vshll.u32 %v12952_v44, 16  ;;  %v13053_v36 = vrot.slane %v13051_v12, 2 }
 0x924   : > { %13302 = vmatprep.subr.bf16.mxu0 %v20577_v9  ;;  %v20617_v9 = vld [vmem:[%s24304_s5 + $0x480] ss:$8 sps:$4 sm:$0xff]   ;;  %v13050_v2 = vrot.slane %v13048_v8, 1 }
 0x925   : > { %12867 = vmatpush2.bf16.msra.mxu1 %v20572_v55  ;;  %v20625_v55 = vld [vmem:[%s24304_s5 + $0x574] ss:$8 sps:$4 sm:$0xff]   ;;  %v13042_v28 = vrot.slane %v13040_v45, 1 }
 0x926   : > { %12920 = vmatmul.mubr.bf16.vlgmr.msra.gmra.mxu0 %v12589_v60  ;;  %13353 = vmatprep.subr.bf16.mxu1 %v20580_v48  ;;  %v13045_v48 = vrot.slane %v13043_v15, 2  ;;  %v13054_v49 = vor.u32 %v13053_v36, %v13050_v2  ;;  %v20676_v36 = vld [vmem:[%s24304_s5 + $0x6f4] ss:$8 sps:$4 sm:$0xff]  }
 0x927   : > { %13303 = vmatpush1.bf16.msra.mxu0 %v20575_v34  ;;  %12929 = vmatprep.mubr.bf16.mxu0 %v24323_v47  ;;  %v20631_v34 = vld [vmem:[%s24304_s5 + $0x564] ss:$8 sps:$4 sm:$0xff]  }
 0x928   : > { %12869 = vmatmul.mubr.bf16.vlgmr.msra.gmra.mxu1 %v12583_v5  ;;  %13304 = vmatprep.subr.bf16.mxu0 %v20583_v38  ;;  %v20626_v38 = vld [vmem:[%s24304_s5 + $0x670] ss:$8 sps:$4 sm:$0xff]   ;;  %v20640_v5 = vld [vmem:[%s24304_s5 + $0x654] ss:$8 sps:$4 sm:$0xff]  }
 0x929   : > { %12878 = vmatprep.mubr.bf16.mxu1 %v23281_v4  ;;  %13354 = vmatpush1.bf16.msra.mxu1 %v20578_v16  ;;  %v20595_v4 = vld [vmem:[%s24304_s5 + $0x4c4] ss:$8 sps:$4 sm:$0xff]   ;;  %v13411_v16 = vld [vmem:[#allocation6 + $0x8] sm:$0xf0] }
 0x92a   : > { %13355 = vmatprep.subr.bf16.mxu1 %v20586_v35  ;;  %v20637_v35 = vld [vmem:[%s24304_s5 + $0x554] ss:$8 sps:$4 sm:$0xff]  }
 0x92b   : > { %13305 = vmatpush1.bf16.msra.mxu0 %v20581_v11  ;;  %v13417_v11 = vpack.c.bf16 %v23138_v57, %v13411_v16  ;;  %v20646_v57 = vld [vmem:[%s24304_s5 + $0x644] ss:$8 sps:$4 sm:$0xff]   ;;  %v20697_v16 = vld [vmem:[%s24304_s5 + $0x734] ss:$8 sps:$4 sm:$0xff]  }
 0x92c   : > { %13306 = vmatprep.subr.bf16.mxu0 %v20589_v59  ;;  %v20635_v59 = vld [vmem:[%s24304_s5 + $0x550] ss:$8 sps:$4 sm:$0xff]  }
 0x92d   : > { %13356 = vmatpush1.bf16.msra.mxu1 %v20584_v39  ;;  %v20638_v39 = vld [vmem:[%s24304_s5 + $0x650] ss:$8 sps:$4 sm:$0xff]  }
 0x92e   : > { %12930 = vmatmul.mubr.bf16.gmra.mxu0 %v12588_v23  ;;  %13357 = vmatprep.subr.bf16.mxu1 %v20592_v17  ;;  %v20620_v23 = vld [vmem:[%s24304_s5 + $0x580] ss:$8 sps:$4 sm:$0xff]   ;;  %v13480_v17 = vrot.slane %v13417_v11, 2  ;;  %v20698_v11 = vld [vmem:[%s24304_s5 + $0x6b0] ss:$8 sps:$4 sm:$0xff]  }
 0x92f   : > { %13307 = vmatpush1.bf16.msra.mxu0 %v20587_v58  ;;  %13334 = vmatprep.mubr.bf16.mxu0 %v13038_v22  ;;  %v20641_v58 = vld [vmem:[%s24304_s5 + $0x540] ss:$8 sps:$4 sm:$0xff]   ;;  %v20652_v22 = vld [vmem:[%s24304_s5 + $0x634] ss:$8 sps:$4 sm:$0xff]  }
 0x930   : > { %12879 = vmatmul.mubr.bf16.gmra.mxu1 %v12582_v27  ;;  %13308 = vmatprep.subr.bf16.mxu0 %v20595_v4  ;;  %v13046_v27 = vor.u32 %v13045_v48, %v13042_v28  ;;  %v13482_v26 = vsel %vm11024_vm7, %v13480_v17, %v23591_v61  ;;  %v20649_v4 = vld [vmem:[%s24304_s5 + $0x534] ss:$8 sps:$4 sm:$0xff]   ;;  %v20679_v28 = vld [vmem:[%s24304_s5 + $0x764] ss:$8 sps:$4 sm:$0xff]   ;;  %v20704_v17 = vld [vmem:[%s24304_s5 + $0x6a0] ss:$8 sps:$4 sm:$0xff]  }
 0x931   : > { %13358 = vmatpush1.bf16.msra.mxu1 %v20590_v31  ;;  %13385 = vmatprep.mubr.bf16.mxu1 %v24323_v47  ;;  %v20644_v31 = vld [vmem:[%s24304_s5 + $0x640] ss:$8 sps:$4 sm:$0xff]  }
 0x932   : > { %13359 = vmatprep.subr.bf16.mxu1 %v20598_v0  ;;  %v13055_v60 = vsel %vm10289_vm6, %v13046_v27, %v13054_v49  ;;  %v12947_v0 = vld [vmem:[#allocation6 + $0x30] sm:$0x7f]  ;;  %v20680_v27 = vld [vmem:[%s24304_s5 + $0x6e0] ss:$8 sps:$4 sm:$0xff]  }
 0x933   : > { %13309 = vmatpush1.bf16.msra.mxu0 %v20593_v54  ;;  %v20647_v54 = vld [vmem:[%s24304_s5 + $0x530] ss:$8 sps:$4 sm:$0xff]  }
 0x934   : > { %13310 = vmatprep.subr.bf16.mxu0 %v20601_v51  ;;  %v20655_v51 = vld [vmem:[%s24304_s5 + $0x524] ss:$8 sps:$4 sm:$0xff]  }
 0x935   : > { %13360 = vmatpush1.bf16.msra.mxu1 %v20596_v42  ;;  %v20650_v42 = vld [vmem:[%s24304_s5 + $0x630] ss:$8 sps:$4 sm:$0xff]  }
 0x936   : > { %13361 = vmatprep.subr.bf16.mxu1 %v20604_v37  ;;  %v12953_v37 = vpack.c.bf16 %v12947_v0, %v12947_v0 }
 0x937   : > { %13311 = vmatpush1.bf16.msra.mxu0 %v20599_v46  ;;  %v20658_v46 = vld [vmem:[%s24304_s5 + $0x624] ss:$8 sps:$4 sm:$0xff]  }
 0x938   : > { %13312 = vmatprep.subr.bf16.mxu0 %v20607_v52  ;;  %v12944_v52 = vld [vmem:[#allocation6] sm:$0xf8]  ;;  %v13014_v14 = vshrl.u32 %v12953_v37, 16 }
 0x939   : > { %13362 = vmatpush1.bf16.msra.mxu1 %v20602_v41  ;;  %v12950_v41 = vpack.c.bf16 %v23143_v7, %v12944_v52  ;;  %v20659_v7 = vld [vmem:[%s24304_s5 + $0x510] ss:$8 sps:$4 sm:$0xff]  }
 0x93a   : > { %13363 = vmatprep.subr.bf16.mxu1 %v20610_v25  ;;  %v20661_v25 = vld [vmem:[%s24304_s5 + $0x514] ss:$8 sps:$4 sm:$0xff]   ;;  %v13016_v8 = vrot.slane %v13014_v14, 1 }
 0x93b   : > { %13313 = vmatpush1.bf16.msra.mxu0 %v20605_v53  ;;  %v20656_v53 = vld [vmem:[%s24304_s5 + $0x620] ss:$8 sps:$4 sm:$0xff]   ;;  %v13009_v44 = vshll.u32 %v12950_v41, 16 }
 0x93c   : > { %13314 = vmatprep.subr.bf16.mxu0 %v20613_v43  ;;  %v13017_v43 = vshll.u32 %v12953_v37, 16  ;;  %v20845_v37 = vld [vmem:[#allocation6 + $0x28] sm:$0xff] }
 0x93d   : > { %13364 = vmatpush1.bf16.msra.mxu1 %v20608_v13  ;;  %v13006_v13 = vshrl.u32 %v12950_v41, 16  ;;  %v13011_v15 = vrot.slane %v13009_v44, 2  ;;  %v20716_v41 = vld [vmem:[%s24304_s5 + $0x680] ss:$8 sps:$4 sm:$0xff]  }
 0x93e   : > { %13365 = vmatprep.subr.bf16.mxu1 %v20616_v19  ;;  %v20667_v19 = vld [vmem:[%s24304_s5 + $0x504] ss:$8 sps:$4 sm:$0xff]   ;;  %v13019_v12 = vrot.slane %v13017_v43, 2 }
 0x93f   : > { %13315 = vmatpush1.bf16.msra.mxu0 %v20611_v18  ;;  %v20662_v18 = vld [vmem:[%s24304_s5 + $0x610] ss:$8 sps:$4 sm:$0xff]   ;;  %v13008_v45 = vrot.slane %v13006_v13, 1 }
 0x940   : > { %13316 = vmatprep.subr.bf16.mxu0 %v20619_v6  ;;  %v20670_v6 = vld [vmem:[%s24304_s5 + $0x604] ss:$8 sps:$4 sm:$0xff]   ;;  %v13020_v2 = vor.u32 %v13019_v12, %v13016_v8 }
 0x941   : > { %13366 = vmatpush1.bf16.msra.mxu1 %v20614_v1  ;;  %v20665_v1 = vld [vmem:[%s24304_s5 + $0x500] ss:$8 sps:$4 sm:$0xff]  }
 0x942   : > { %13367 = vmatprep.subr.bf16.mxu1 %v20622_v10  ;;  %v20673_v10 = vld [vmem:[%s24304_s5 + $0x774] ss:$8 sps:$4 sm:$0xff]  }
 0x943   : > { %13317 = vmatpush1.bf16.msra.mxu0 %v20617_v9  ;;  %v20668_v9 = vld [vmem:[%s24304_s5 + $0x600] ss:$8 sps:$4 sm:$0xff]  }
 0x944   : > { %13318 = vmatprep.subr.bf16.mxu0 %v20625_v55  ;;  %v13012_v55 = vor.u32 %v13011_v15, %v13008_v45 }
 0x945   : > { %13368 = vmatpush1.bf16.msra.mxu1 %v20620_v23  ;;  %v20671_v23 = vld [vmem:[%s24304_s5 + $0x770] ss:$8 sps:$4 sm:$0xff]  }
 0x946   : > { %13732 = vmatprep.subr.bf16.mxu1 %v20628_v29  ;;  %v13021_v48 = vsel %vm10289_vm6, %v13012_v55, %v13020_v2  ;;  %v20674_v29 = vld [vmem:[%s24304_s5 + $0x6f0] ss:$8 sps:$4 sm:$0xff]  }
 0x947   : > { %13319 = vmatpush2.bf16.msra.mxu0 %v20623_v63  ;;  %v20682_v63 = vld [vmem:[%s24304_s5 + $0x6e4] ss:$8 sps:$4 sm:$0xff]  }
 0x948   : > { %13386 = vmatmul.mubr.bf16.vlgmr.msra.gmra.mxu1 %v13055_v60  ;;  %13320 = vmatprep.subr.bf16.mxu0 %v20631_v34  ;;  %v20685_v34 = vld [vmem:[%s24304_s5 + $0x754] ss:$8 sps:$4 sm:$0xff]   ;;  %v20694_v60 = vld [vmem:[%s24304_s5 + $0x6c4] ss:$8 sps:$4 sm:$0xff]  }
 0x949   : > { %13733 = vmatpush1.bf16.msra.mxu1 %v20626_v38  ;;  %13395 = vmatprep.mubr.bf16.mxu1 %v24323_v47  ;;  %v20683_v38 = vld [vmem:[%s24304_s5 + $0x750] ss:$8 sps:$4 sm:$0xff]  }
 0x94a   : > { %13734 = vmatprep.subr.bf16.mxu1 %v20634_v3  ;;  %v20686_v3 = vld [vmem:[%s24304_s5 + $0x6d0] ss:$8 sps:$4 sm:$0xff]  }
 0x94b   : > { %13321 = vmatpush2.bf16.msra.mxu0 %v20629_v40  ;;  %v20689_v40 = vld [vmem:[%s24304_s5 + $0x740] ss:$8 sps:$4 sm:$0xff]  }
 0x94c   : > { %13322 = vmatprep.subr.bf16.mxu0 %v20637_v35  ;;  %v20692_v35 = vld [vmem:[%s24304_s5 + $0x6c0] ss:$8 sps:$4 sm:$0xff]  }
 0x94d   : > { %13735 = vmatpush1.bf16.msra.mxu1 %v20632_v62  ;;  %v20695_v62 = vld [vmem:[%s24304_s5 + $0x730] ss:$8 sps:$4 sm:$0xff]  }
 0x94e   : > { %13736 = vmatprep.subr.bf16.mxu1 %v20640_v5  ;;  %v20703_v5 = vld [vmem:[%s24304_s5 + $0x724] ss:$8 sps:$4 sm:$0xff]  }
 0x94f   : > { %13323 = vmatpush2.bf16.msra.mxu0 %v20635_v59  ;;  %v20706_v59 = vld [vmem:[%s24304_s5 + $0x6a4] ss:$8 sps:$4 sm:$0xff]  }
 0x950   : > { %13396 = vmatmul.mubr.bf16.gmra.mxu1 %v13054_v49  ;;  %13324 = vmatprep.subr.bf16.mxu0 %v20643_v32  ;;  %v20677_v49 = vld [vmem:[%s24304_s5 + $0x760] ss:$8 sps:$4 sm:$0xff]  }
 0x951   : > { %13737 = vmatpush1.bf16.msra.mxu1 %v20638_v39  ;;  %13764 = vmatprep.mubr.bf16.mxu1 %v13482_v26  ;;  %v20701_v32 = vld [vmem:[%s24304_s5 + $0x720] ss:$8 sps:$4 sm:$0xff]   ;;  %v20709_v39 = vld [vmem:[%s24304_s5 + $0x714] ss:$8 sps:$4 sm:$0xff]   ;;  %v20707_v26 = vld [vmem:[%s24304_s5 + $0x710] ss:$8 sps:$4 sm:$0xff]  }
 0x952   : > { %13738 = vmatprep.subr.bf16.mxu1 %v20646_v57  ;;  %v20712_v57 = vld [vmem:[%s24304_s5 + $0x694] ss:$8 sps:$4 sm:$0xff]  }
 0x953   : > { %13325 = vmatpush2.bf16.msra.mxu0 %v20641_v58  ;;  %v13415_v58 = vld [vmem:[#allocation6 + $0x40] sm:$0xff] }
 0x954   : > { %13326 = vmatprep.subr.bf16.mxu0 %v20649_v4  ;;  %v20715_v4 = vld [vmem:[%s24304_s5 + $0x704] ss:$8 sps:$4 sm:$0xff]   ;;  %v13421_v0 = vpack.c.bf16 %v13415_v58, %v13415_v58 }
 0x955   : > { %13739 = vmatpush1.bf16.msra.mxu1 %v20644_v31  ;;  %v13413_v31 = vld [vmem:[#allocation6 + $0x30] sm:$0xff] }
 0x956   : > { %13740 = vmatprep.subr.bf16.mxu1 %v20652_v22  ;;  %v20710_v22 = vld [vmem:[%s24304_s5 + $0x690] ss:$8 sps:$4 sm:$0xff]   ;;  %v13419_v52 = vpack.c.bf16 %v13413_v31, %v13413_v31 }
 0x957   : > { %13327 = vmatpush2.bf16.msra.mxu0 %v20647_v54  ;;  %v20718_v54 = vld [vmem:[%s24304_s5 + $0x684] ss:$8 sps:$4 sm:$0xff]  }
 0x958   : > { %13328 = vmatprep.subr.bf16.mxu0 %v20655_v51  ;;  %v13412_v51 = vld [vmem:[#allocation6 + $0x10] sm:$0xf0] }
 0x959   : > { %13741 = vmatpush1.bf16.msra.mxu1 %v20650_v42  ;;  %v20713_v42 = vld [vmem:[%s24304_s5 + $0x700] ss:$8 sps:$4 sm:$0xff]  }
 0x95a   : > { %13742 = vmatprep.subr.bf16.mxu1 %v20658_v46  ;;  %v13418_v46 = vpack.c.bf16 %v20845_v37, %v13412_v51 }
 0x95b   : > { %13329 = vmatpush2.bf16.msra.mxu0 %v20653_v20  ;;  %v13410_v20 = vld [vmem:[#allocation6] sm:$0xf0] }
 0x95c   : > { %13330 = vmatprep.subr.bf16.mxu0 %v20661_v25  ;;  %v13484_v25 = vrot.slane %v13421_v0, 2  ;;  %v13483_v43 = vrot.slane %v13418_v46, 2 }
 0x95d   : > { %13743 = vmatpush1.bf16.msra.mxu1 %v20656_v53  ;;  %v20846_v53 = vld [vmem:[#allocation6 + $0x18] sm:$0xff] }
 0x95e   : > { %13744 = vmatprep.subr.bf16.mxu1 %v20664_v24  ;;  %v13416_v14 = vpack.c.bf16 %v20846_v53, %v13410_v20  ;;  %v13478_v24 = vrot.slane %v13419_v52, 2  ;;  %v20719_v52 = vld [vmem:[%s24305_s6 + $0x38] sm:$0xff]   ;;  %v20722_v20 = vld [vmem:[%s24305_s6 + $0xa8] sm:$0xff]  }
 0x95f   : > { %13331 = vmatpush2.bf16.msra.mxu0 %v20659_v7  ;;  %v13485_v7 = vsel %vm11024_vm7, %v13483_v43, %v13484_v25  ;;  %v20721_v53 = vld [vmem:[%s24305_s6 + $0x28] sm:$0xff]  }
 0x960   : > { %13332 = vmatprep.subr.bf16.mxu0 %v20667_v19  ;;  %v13477_v13 = vrot.slane %v13416_v14, 2  ;;  %v20726_v14 = vld [vmem:[%s24305_s6 + $0x98] sm:$0xff]  }
 0x961   : > { %13745 = vmatpush1.bf16.msra.mxu1 %v20662_v18 }
 0x962   : > { %13746 = vmatprep.subr.bf16.mxu1 %v20670_v6  ;;  %v13479_v19 = vsel %vm11024_vm7, %v13477_v13, %v13478_v24  ;;  %v20723_v13 = vld [vmem:[%s24305_s6 + $0x20] sm:$0xff]  }
 0x963   : > { %13333 = vmatpush2.bf16.msra.mxu0 %v20665_v1 }
 0x964   : > { %13783 = vmatprep.subr.bf16.mxu0 %v20673_v10 }
 0x965   : > { %13747 = vmatpush1.bf16.msra.mxu1 %v20668_v9 }
 0x966   : > { %13335 = vmatmul.mubr.bf16.vlgmr.msra.gmra.mxu0 %v13021_v48  ;;  %13748 = vmatprep.subr.bf16.mxu1 %v20676_v36 }
 0x967   : > { %13344 = vmatprep.mubr.bf16.mxu0 %v23480_v50  ;;  %13784 = vmatpush1.bf16.msra.mxu0 %v20671_v23  ;;  %v20688_v50 = vld [vmem:[%s24304_s5 + $0x6d4] ss:$8 sps:$4 sm:$0xff]  }
 0x968   : > { %13785 = vmatprep.subr.bf16.mxu0 %v20679_v28 }
 0x969   : > { %13749 = vmatpush2.bf16.msra.mxu1 %v20674_v29 }
 0x96a   : > { %13750 = vmatprep.subr.bf16.mxu1 %v20682_v63 }
 0x96b   : > { %13786 = vmatpush1.bf16.msra.mxu0 %v20677_v49 }
 0x96c   : > { %13787 = vmatprep.subr.bf16.mxu0 %v20685_v34 }
 0x96d   : > { %13751 = vmatpush2.bf16.msra.mxu1 %v20680_v27 }
 0x96e   : > { %13345 = vmatmul.mubr.bf16.gmra.mxu0 %v13020_v2  ;;  %13752 = vmatprep.subr.bf16.mxu1 %v20688_v50 }
 0x96f   : > { %13788 = vmatpush1.bf16.msra.mxu0 %v20683_v38  ;;  %13815 = vmatprep.mubr.bf16.mxu0 %v24323_v47 }
 0x970   : > { %13789 = vmatprep.subr.bf16.mxu0 %v20691_v30 }
 0x971   : > { %13753 = vmatpush2.bf16.msra.mxu1 %v20686_v3 }
 0x972   : > { %13754 = vmatprep.subr.bf16.mxu1 %v20694_v60 }
 0x973   : > { %13790 = vmatpush1.bf16.msra.mxu0 %v20689_v40 }
 0x974   : > { %13791 = vmatprep.subr.bf16.mxu0 %v20697_v16 }
 0x975   : > { %13755 = vmatpush2.bf16.msra.mxu1 %v20692_v35 }
 0x976   : > { %13756 = vmatprep.subr.bf16.mxu1 %v20700_v21 }
 0x977   : > { %13792 = vmatpush1.bf16.msra.mxu0 %v20695_v62 }
 0x978   : > { %13793 = vmatprep.subr.bf16.mxu0 %v20703_v5 }
 0x979   : > { %13757 = vmatpush2.bf16.msra.mxu1 %v20698_v11 }
 0x97a   : > { %13758 = vmatprep.subr.bf16.mxu1 %v20706_v59 }
 0x97b   : > { %13794 = vmatpush1.bf16.msra.mxu0 %v20701_v32 }
 0x97c   : > { %13795 = vmatprep.subr.bf16.mxu0 %v20709_v39 }
 0x97d   : > { %13759 = vmatpush2.bf16.msra.mxu1 %v20704_v17 }
 0x97e   : > { %13760 = vmatprep.subr.bf16.mxu1 %v20712_v57 }
 0x97f   : > { %13796 = vmatpush1.bf16.msra.mxu0 %v20707_v26 }
 0x980   : > { %13797 = vmatprep.subr.bf16.mxu0 %v20715_v4 }
 0x981   : > { %13761 = vmatpush2.bf16.msra.mxu1 %v20710_v22 }
 0x982   : > { %13762 = vmatprep.subr.bf16.mxu1 %v20718_v54 }
 0x983   : > { %13798 = vmatpush1.bf16.msra.mxu0 %v20713_v42 }
 0x984   : > { %14117 = vmatprep.subr.bf16.mxu0 %v24323_v47 }
 0x985   : > { %13763 = vmatpush2.bf16.msra.mxu1 %v20716_v41  ;;  %v20720_v41 = vld [vmem:[%s24305_s6 + $0x30] sm:$0xff]  }
 0x986   : > { %13816 = vmatmul.mubr.bf16.vlgmr.msra.gmra.mxu0 %v13485_v7  ;;  %v12155_v44 = vpop.f32.mrf.mxu0  ;;  %14255 = vmatprep.subr.bf16.mxu1 %v24323_v47 }
 0x987   : > { %13825 = vmatprep.mubr.bf16.mxu0 %v24323_v47  ;;  %14118 = vmatpush1.bf16.msra.mxu0 %v20722_v20 }
 0x988   : > { %13765 = vmatmul.mubr.bf16.vlgmr.msra.gmra.mxu1 %v13479_v19  ;;  %v12104_v18 = vpop.f32.mrf.mxu1  ;;  %v12157_v8 = vpop.f32.mrf.mxu0  ;;  %14119 = vmatprep.subr.bf16.mxu0 %v24323_v47  ;;  %v20728_v19 = vld [vmem:[%s24305_s6 + $0x90] sm:$0xff]  }
 0x989   : > { %v12156_v12 = vadd.f32 %v12155_v44, %v12104_v18  ;;  %13774 = vmatprep.mubr.bf16.mxu1 %v23591_v61  ;;  %14256 = vmatpush1.bf16.msra.mxu1 %v20719_v52 }
 0x98a   : > { %v12106_v6 = vpop.f32.mrf.mxu1  ;;  %v12159_v1 = vpop.f32.mrf.mxu0  ;;  %14257 = vmatprep.subr.bf16.mxu1 %v24323_v47 }
 0x98b   : > { %v12158_v45 = vadd.f32 %v12157_v8, %v12106_v6 }
 0x98c   : > { %v12108_v15 = vpop.f32.mrf.mxu1  ;;  %v12161_v10 = vpop.f32.mrf.mxu0 }
 0x98d   : > { %v12160_v9 = vadd.f32 %v12159_v1, %v12108_v15  ;;  %14258 = vmatpush1.bf16.msra.mxu1 %v20720_v41  ;;  %v20725_v15 = vld [vmem:[%s24305_s6 + $0x18] sm:$0xff]   ;;  %v13840_v41 = vld [vmem:[%s24311_s12] sm:$0x3] }
 0x98e   : > { %13826 = vmatmul.mubr.bf16.gmra.mxu0 %v13484_v25  ;;  %v12110_v2 = vpop.f32.mrf.mxu1  ;;  %v12165_v36 = vpop.f32.mrf.mxu0  ;;  %v20724_v25 = vld [vmem:[%s24305_s6 + $0xa0] sm:$0xff]   ;;  %14259 = vmatprep.subr.bf16.mxu1 %v24323_v47 }
 0x98f   : > { %v12162_v55 = vadd.f32 %v12161_v10, %v12110_v2  ;;  %14120 = vmatpush1.bf16.msra.mxu0 %v20724_v25  ;;  %v20730_v2 = vld [vmem:[%s24305_s6 + $0x88] sm:$0xff]   ;;  %v20736_v25 = vld [vmem:[%s24305_s6 + $0x70] sm:$0xff]  }
 0x990   : > { %13775 = vmatmul.mubr.bf16.gmra.mxu1 %v13478_v24  ;;  %v12114_v23 = vpop.f32.mrf.mxu1  ;;  %v12167_v28 = vpop.f32.mrf.mxu0  ;;  %14121 = vmatprep.subr.bf16.mxu0 %v24323_v47 }
 0x991   : > { %v12166_v48 = vadd.f32 %v12165_v36, %v12114_v23  ;;  %14260 = vmatpush1.bf16.msra.mxu1 %v20721_v53 }
 0x992   : > { %v12116_v29 = vpop.f32.mrf.mxu1  ;;  %v12169_v63 = vpop.f32.mrf.mxu0  ;;  %14261 = vmatprep.subr.bf16.mxu1 %v24323_v47 }
 0x993   : > { %v12168_v49 = vadd.f32 %v12167_v28, %v12116_v29  ;;  %14122 = vmatpush1.bf16.msra.mxu0 %v20726_v14  ;;  %v20727_v63 = vld [vmem:[%s24305_s6 + $0x10] sm:$0xff]   ;;  %v23850_v14 = vld [vmem:[#allocation3 + $0x28] sm:$0xff] }
 0x994   : > { %v12118_v34 = vpop.f32.mrf.mxu1  ;;  %v12170_v27 = vpop.f32.mrf.mxu0  ;;  %14123 = vmatprep.subr.bf16.mxu0 %v24323_v47  ;;  %13866 = vst.msk [vmem:[#allocation7 + $0x8] sm:$0xff] %vm13865_vm13, %v23850_v14  ;;  %13868 = vst.msk [vmem:[#allocation7 + $0x18] sm:$0xff] %vm13865_vm13, %v23850_v14 }
 0x995   : > { %14262 = vmatpush1.bf16.msra.mxu1 %v20723_v13  ;;  %v20732_v27 = vld [vmem:[%s24305_s6 + $0x80] sm:$0xff]   ;;  %13870 = vst.msk [vmem:[#allocation7 + $0x28] sm:$0xff] %vm13865_vm13, %v23850_v14 }
 0x996   : > { %v12119_v61 = vpop.f32.mrf.mxu1  ;;  %14263 = vmatprep.subr.bf16.mxu1 %v24323_v47  ;;  %13873 = vst.msk [vmem:[#allocation7 + $0x38] sm:$0xf] %vm13872_vm14, %v23850_v14 }
 0x997   : > { %14124 = vmatpush1.bf16.msra.mxu0 %v20728_v19  ;;  %v23860_v19 = vrot.slane %v13840_v41, %v21424_v56  ;;  %v13849_v56 = vrot.slane %v13840_v41, %v24322_v33 }
 0x998   : > { %14125 = vmatprep.subr.bf16.mxu0 %v24323_v47 }
 0x999   : > { %14264 = vmatpush1.bf16.msra.mxu1 %v20725_v15 }
 0x99a   : > { %14265 = vmatprep.subr.bf16.mxu1 %v24323_v47 }
 0x99b   : > { %14126 = vmatpush1.bf16.msra.mxu0 %v20730_v2 }
 0x99c   : > { %14127 = vmatprep.subr.bf16.mxu0 %v24323_v47 }
 0x99d   : > { %14266 = vmatpush1.bf16.msra.mxu1 %v20727_v63 }
 0x99e   : > { %14267 = vmatprep.subr.bf16.mxu1 %v24323_v47 }
 0x99f   : > { %14128 = vmatpush1.bf16.msra.mxu0 %v20732_v27 }
 0x9a0   : > { %14129 = vmatprep.subr.bf16.mxu0 %v24323_v47 }
 0x9a8   : > { %v12497_v50 = vpop.f32.mrf.mxu1 }
 0x9aa   : > { %v12499_v38 = vpop.f32.mrf.mxu1 }
 0x9ac   : > { %v12501_v30 = vpop.f32.mrf.mxu1 }
 0x9ae   : > { %v12503_v3 = vpop.f32.mrf.mxu1 }
 0x9b0   : > { %v12507_v60 = vpop.f32.mrf.mxu1 }
 0x9b2   : > { %v12509_v40 = vpop.f32.mrf.mxu1 }
 0x9b4   : > { %v12511_v16 = vpop.f32.mrf.mxu1 }
 0x9b6   : > { %v12512_v35 = vpop.f32.mrf.mxu1 }
 0x9b7   : > { %v20734_v35 = vld [vmem:[%s24305_s6 + $0x78] sm:$0xff]  }
 0x9b8   : > { %14130 = vmatpush1.bf16.msra.mxu0 %v20734_v35 }
 0x9b9   : > { %14131 = vmatprep.subr.bf16.mxu0 %v24323_v47 }
 0x9bc   : > { %14132 = vmatpush1.bf16.msra.mxu0 %v20736_v25 }
 0x9bd   : > { %14137 = vmatprep.subr.bf16.mxu0 %v24323_v47 }
 0x9c6   : > { %v12446_v21 = vpop.f32.mrf.mxu0 }
 0x9c7   : > { %v12447_v62 = vadd.f32 %v12446_v21, %v12156_v12 }
 0x9c8   : > { %v12448_v5 = vpop.f32.mrf.mxu0 }
 0x9c9   : > { %v12498_v11 = vadd.f32 %v12497_v50, %v12447_v62  ;;  %v12449_v59 = vadd.f32 %v12448_v5, %v12158_v45  ;;  %v20731_v62 = vld [vmem:[%s24305_s6] sm:$0xff]   ;;  %v20733_v5 = vld [vmem:[%s24305_s6 + $0x68] sm:$0xff]  }
 0x9ca   : > { %v12450_v32 = vpop.f32.mrf.mxu0 }
 0x9cb   : > { %v12500_v39 = vadd.f32 %v12499_v38, %v12449_v59  ;;  %v12451_v17 = vadd.f32 %v12450_v32, %v12160_v9 }
 0x9cc   : > { %v12452_v57 = vpop.f32.mrf.mxu0 }
 0x9cd   : > { %v12502_v58 = vadd.f32 %v12501_v30, %v12451_v17  ;;  %v12453_v26 = vadd.f32 %v12452_v57, %v12162_v55 }
 0x9ce   : > { %v12456_v4 = vpop.f32.mrf.mxu0 }
 0x9cf   : > { %v12504_v31 = vadd.f32 %v12503_v3, %v12453_v26  ;;  %v12457_v22 = vadd.f32 %v12456_v4, %v12166_v48 }
 0x9d0   : > { %v12458_v0 = vpop.f32.mrf.mxu0 }
 0x9d1   : > { %v12508_v54 = vadd.f32 %v12507_v60, %v12457_v22  ;;  %v12459_v51 = vadd.f32 %v12458_v0, %v12168_v49 }
 0x9d2   : > { %v12460_v42 = vpop.f32.mrf.mxu0 }
 0x9d3   : > { %v12510_v37 = vadd.f32 %v12509_v40, %v12459_v51  ;;  %v20729_v40 = vld [vmem:[%s24305_s6 + $0x8] sm:$0xff]  }
 0x9d4   : > { %v12461_v46 = vpop.f32.mrf.mxu0  ;;  %14268 = vmatpush1.bf16.msra.mxu1 %v20729_v40 }
 0x9d5   : > { %14269 = vmatprep.subr.bf16.mxu1 %v24323_v47 }
 0x9d8   : > { %14270 = vmatpush1.bf16.msra.mxu1 %v20731_v62 }
 0x9d9   : > { %14275 = vmatprep.subr.bf16.mxu1 %v24323_v47 }
 0x9dc   : > { %14276 = vmatpush2.bf16.msra.mxu1 %v20733_v5 }
 0x9dd   : > { %14277 = vmatprep.subr.bf16.mxu1 %v24323_v47 }
 0x9e6   : > { %v12921_v43 = vpop.f32.mrf.mxu0 }
 0x9e8   : > { %v12870_v24 = vpop.f32.mrf.mxu1  ;;  %v12923_v7 = vpop.f32.mrf.mxu0 }
 0x9e9   : > { %v12922_v44 = vadd.f32 %v12921_v43, %v12870_v24 }
 0x9ea   : > { %v12872_v18 = vpop.f32.mrf.mxu1  ;;  %v12925_v8 = vpop.f32.mrf.mxu0 }
 0x9eb   : > { %v23794_v12 = vadd.f32 %v12922_v44, %v12498_v11  ;;  %v12924_v6 = vadd.f32 %v12923_v7, %v12872_v18  ;;  %v20735_v11 = vld [vmem:[%s24305_s6 + $0x60] sm:$0xff]  }
 0x9ec   : > { %v12874_v1 = vpop.f32.mrf.mxu1  ;;  %v12927_v45 = vpop.f32.mrf.mxu0  ;;  %14278 = vmatpush2.bf16.msra.mxu1 %v20735_v11 }
 0x9ed   : > { %v23799_v10 = vadd.f32 %v12924_v6, %v12500_v39  ;;  %v12926_v9 = vadd.f32 %v12925_v8, %v12874_v1  ;;  %14279 = vmatprep.subr.bf16.mxu1 %v24323_v47  ;;  %v20737_v1 = vld [vmem:[%s24305_s6 + $0x58] sm:$0xff]  }
 0x9ee   : > { %v12876_v36 = vpop.f32.mrf.mxu1  ;;  %v12931_v55 = vpop.f32.mrf.mxu0 }
 0x9ef   : > { %v23806_v23 = vadd.f32 %v12926_v9, %v12502_v58  ;;  %v12928_v28 = vadd.f32 %v12927_v45, %v12876_v36  ;;  %v20738_v45 = vld [vmem:[%s24305_s6 + $0xd8] sm:$0xff]  }
 0x9f0   : > { %v12880_v48 = vpop.f32.mrf.mxu1  ;;  %v12933_v29 = vpop.f32.mrf.mxu0  ;;  %14280 = vmatpush2.bf16.msra.mxu1 %v20737_v1  ;;  %14138 = vmatpush2.bf16.msra.mxu0 %v20738_v45 }
 0x9f1   : > { %v23811_v49 = vadd.f32 %v12928_v28, %v12504_v31  ;;  %v12932_v34 = vadd.f32 %v12931_v55, %v12880_v48  ;;  %14281 = vmatprep.subr.bf16.mxu1 %v24323_v47  ;;  %14139 = vmatprep.subr.bf16.mxu0 %v24323_v47 }
 0x9f2   : > { %v12882_v61 = vpop.f32.mrf.mxu1  ;;  %v12935_v50 = vpop.f32.mrf.mxu0 }
 0x9f3   : > { %v23818_v38 = vadd.f32 %v12932_v34, %v12508_v54  ;;  %v12934_v30 = vadd.f32 %v12933_v29, %v12882_v61  ;;  %v20740_v61 = vld [vmem:[%s24305_s6 + $0xd0] sm:$0xff]  }
 0x9f4   : > { %v12884_v3 = vpop.f32.mrf.mxu1  ;;  %v12936_v60 = vpop.f32.mrf.mxu0  ;;  %14140 = vmatpush2.bf16.msra.mxu0 %v20740_v61  ;;  %v20745_v61 = vld [vmem:[%s24305_s6 + $0x188] sm:$0xff]  }
 0x9f5   : > { %v23823_v16 = vadd.f32 %v12934_v30, %v12510_v37  ;;  %14141 = vmatprep.subr.bf16.mxu0 %v24323_v47 }
 0x9f6   : > { %v12885_v21 = vpop.f32.mrf.mxu1 }
 0xa08   : > { %v13387_v59 = vpop.f32.mrf.mxu1 }
 0xa0a   : > { %v13389_v32 = vpop.f32.mrf.mxu1 }
 0xa0c   : > { %v13391_v39 = vpop.f32.mrf.mxu1 }
 0xa0e   : > { %v13393_v17 = vpop.f32.mrf.mxu1 }
 0xa10   : > { %v13397_v57 = vpop.f32.mrf.mxu1 }
 0xa12   : > { %v13399_v58 = vpop.f32.mrf.mxu1 }
 0xa14   : > { %v13401_v26 = vpop.f32.mrf.mxu1 }
 0xa16   : > { %v13402_v4 = vpop.f32.mrf.mxu1 }
 0xa26   : > { %v13336_v31 = vpop.f32.mrf.mxu0 }
 0xa27   : > { %v13388_v52 = vadd.f32 %v13387_v59, %v13336_v31 }
 0xa28   : > { %v13338_v22 = vpop.f32.mrf.mxu0 }
 0xa29   : > { %v13390_v53 = vadd.f32 %v13389_v32, %v13338_v22  ;;  %v13404_v13 = vadd.f32 %v13388_v52, %v23794_v12  ;;  %v20744_v52 = vld [vmem:[%s24305_s6 + $0xc0] sm:$0xff]  }
 0xa2a   : > { %v13340_v0 = vpop.f32.mrf.mxu0 }
 0xa2b   : > { %v13392_v43 = vadd.f32 %v13391_v39, %v13340_v0  ;;  %v13405_v15 = vadd.f32 %v13390_v53, %v23799_v10 }
 0xa2c   : > { %v13342_v54 = vpop.f32.mrf.mxu0 }
 0xa2d   : > { %v13394_v18 = vadd.f32 %v13393_v17, %v13342_v54  ;;  %v13406_v2 = vadd.f32 %v13392_v43, %v23806_v23  ;;  %v20739_v23 = vld [vmem:[%s24305_s6 + $0x50] sm:$0xff]   ;;  %v20743_v54 = vld [vmem:[%s24305_s6 + $0x40] sm:$0xff]  }
 0xa2e   : > { %v13346_v51 = vpop.f32.mrf.mxu0  ;;  %14282 = vmatpush2.bf16.msra.mxu1 %v20739_v23 }
 0xa2f   : > { %v13398_v36 = vadd.f32 %v13397_v57, %v13346_v51  ;;  %v13407_v10 = vadd.f32 %v13394_v18, %v23811_v49  ;;  %14283 = vmatprep.subr.bf16.mxu1 %v24323_v47  ;;  %v20742_v57 = vld [vmem:[%s24305_s6 + $0xc8] sm:$0xff]  }
 0xa30   : > { %v13348_v42 = vpop.f32.mrf.mxu0  ;;  %14142 = vmatpush2.bf16.msra.mxu0 %v20742_v57 }
 0xa31   : > { %v13400_v34 = vadd.f32 %v13399_v58, %v13348_v42  ;;  %v13408_v40 = vadd.f32 %v13398_v36, %v23818_v38  ;;  %v20741_v38 = vld [vmem:[%s24305_s6 + $0x48] sm:$0xff]   ;;  %14143 = vmatprep.subr.bf16.mxu0 %v24323_v47 }
 0xa32   : > { %v13350_v37 = vpop.f32.mrf.mxu0  ;;  %14284 = vmatpush2.bf16.msra.mxu1 %v20741_v38 }
 0xa33   : > { %v13409_v59 = vadd.f32 %v13400_v34, %v23823_v16  ;;  %14285 = vmatprep.subr.bf16.mxu1 %v24323_v47 }
 0xa34   : > { %v13351_v46 = vpop.f32.mrf.mxu0  ;;  %14144 = vmatpush2.bf16.msra.mxu0 %v20744_v52  ;;  %v20749_v52 = vld [vmem:[%s24305_s6 + $0x178] sm:$0xff]  }
 0xa35   : > { %14145 = vmatprep.subr.bf16.mxu0 %v24323_v47 }
 0xa36   : > { %14286 = vmatpush2.bf16.msra.mxu1 %v20743_v54 }
 0xa37   : > { %14656 = vmatprep.subr.bf16.mxu1 %v24323_v47 }
 0xa46   : > { %v13817_v20 = vpop.f32.mrf.mxu0 }
 0xa48   : > { %v13766_v24 = vpop.f32.mrf.mxu1  ;;  %v13819_v7 = vpop.f32.mrf.mxu0 }
 0xa49   : > { %v13818_v44 = vadd.f32 %v13817_v20, %v13766_v24 }
 0xa4a   : > { %v13768_v8 = vpop.f32.mrf.mxu1  ;;  %v13821_v6 = vpop.f32.mrf.mxu0 }
 0xa4b   : > { %v13834_v12 = vadd.f32 %v13818_v44, %v13404_v13  ;;  %v13820_v9 = vadd.f32 %v13819_v7, %v13768_v8  ;;  %v20746_v44 = vld [vmem:[%s24305_s6 + $0xb8] sm:$0xff]  }
 0xa4c   : > { %v13770_v55 = vpop.f32.mrf.mxu1  ;;  %v13823_v28 = vpop.f32.mrf.mxu0  ;;  %14146 = vmatpush2.bf16.msra.mxu0 %v20746_v44 }
 0xa4d   : > { %v13852_v48 = vadd.f32 %v23860_v19, %v13834_v12  ;;  %v13835_v29 = vadd.f32 %v13820_v9, %v13405_v15  ;;  %v13822_v63 = vadd.f32 %v13821_v6, %v13770_v55  ;;  %14147 = vmatprep.subr.bf16.mxu0 %v24323_v47  ;;  %v20748_v6 = vld [vmem:[%s24305_s6 + $0xb0] sm:$0xff]  }
 0xa4e   : > { %v13772_v27 = vpop.f32.mrf.mxu1  ;;  %v13827_v33 = vpop.f32.mrf.mxu0 }
 0xa4f   : > { %v13853_v50 = vadd.f32 %v13849_v56, %v13835_v29  ;;  %v13836_v30 = vadd.f32 %v13822_v63, %v13406_v2  ;;  %v13824_v3 = vadd.f32 %v13823_v28, %v13772_v27  ;;  %v13858_v60 = vmax.f32 %v13852_v48, 0.0  ;;  %v13960_v63 = vld [vmem:[#allocation7 + $0x30] sm:$0x1] }
 0xa50   : > { %v13776_v35 = vpop.f32.mrf.mxu1  ;;  %v13829_v21 = vpop.f32.mrf.mxu0  ;;  %14148 = vmatpush2.bf16.msra.mxu0 %v20748_v6 }
 0xa51   : > { %v13854_v49 = vadd.f32 %v23860_v19, %v13836_v30  ;;  %v13837_v62 = vadd.f32 %v13824_v3, %v13407_v10  ;;  %v13828_v5 = vadd.f32 %v13827_v33, %v13776_v35  ;;  %v13880_v11 = vrot.slane %v13858_v60, 4  ;;  %14442 = vmatprep.subr.bf16.mxu0 %v24323_v47 }
 0xa52   : > { %v13778_v32 = vpop.f32.mrf.mxu1  ;;  %v13831_v39 = vpop.f32.mrf.mxu0  ;;  %v13859_v17 = vmax.f32 %v13853_v50, 0.0 }
 0xa53   : > { %v13860_v58 = vmax.f32 %v13854_v49, 0.0  ;;  %v13855_v26 = vadd.f32 %v13849_v56, %v13837_v62  ;;  %v13838_v4 = vadd.f32 %v13828_v5, %v13408_v40  ;;  %v13830_v31 = vadd.f32 %v13829_v21, %v13778_v32  ;;  %13890 = vrot.lane.b32.xlu1 %v13880_v11, %s20952_s29  ;;  %v13961_v40 = vld [vmem:[#allocation7 + $0x38] sm:$0x1] }
 0xa54   : > { %v13780_v22 = vpop.f32.mrf.mxu1  ;;  %v13832_v16 = vpop.f32.mrf.mxu0  ;;  %v13881_v0 = vrot.slane %v13859_v17, 4  ;;  %v14496_v49 = vld [vmem:[#allocation7 + $0x38] sm:$0x7]  ;;  %v20747_v17 = vld [vmem:[%s24305_s6 + $0x180] sm:$0xff]  }
 0xa55   : > { %v13882_v51 = vrot.slane %v13860_v58, 4  ;;  %v13861_v42 = vmax.f32 %v13855_v26, 0.0  ;;  %v13856_v37 = vadd.f32 %v23860_v19, %v13838_v4  ;;  %v13839_v46 = vadd.f32 %v13830_v31, %v13409_v59 }
 0xa56   : > { %13892 = vrot.lane.b32.xlu0 %v13881_v0, %s20952_s29  ;;  %v13781_v20 = vpop.f32.mrf.mxu1 }
 0xa57   : > { %v13884_v41 = vrot.slane %v13861_v42, 4  ;;  %v13862_v25 = vmax.f32 %v13856_v37, 0.0  ;;  %v13857_v53 = vadd.f32 %v13849_v56, %v13839_v46  ;;  %v13883_v43 = vsel %vm8181_vm3, %v13880_v11, %v13882_v51 }
 0xa58   : > { %13894 = vrot.lane.b32.xlu1 %v13883_v43, %s20952_s29 }
 0xa59   : > { %v13886_v24 = vrot.slane %v13862_v25, 4  ;;  %v13863_v7 = vmax.f32 %v13857_v53, 0.0  ;;  %v13885_v13 = vsel %vm8181_vm3, %v13881_v0, %v13884_v41  ;;  %v14306_v25 = vld [vmem:[#allocation7 + $0x38] sm:$0x3] }
 0xa5a   : > { %13896 = vrot.lane.b32.xlu0 %v13885_v13, %s20952_s29  ;;  %v14710_v13 = vld [vmem:[#allocation7 + $0x38] sm:$0xf] }
 0xa5b   : > { %v13888_v19 = vrot.slane %v13863_v7, 4  ;;  %v13887_v18 = vsel %vm8181_vm3, %v13882_v51, %v13886_v24  ;;  %v20750_v24 = vld [vmem:[%s24305_s6 + $0x118] sm:$0xff]  }
 0xa5c   : > { %13898 = vrot.lane.b32.xlu1 %v13887_v18, %s20952_s29 }
 0xa5d   : > { %v13889_v8 = vsel %vm8181_vm3, %v13884_v41, %v13888_v19  ;;  %vm15556_vm3 = vcmask 228352  }
 0xa5e   : > { %13900 = vrot.lane.b32.xlu0 %v13889_v8, %s20952_s29  ;;  %v14709_v8 = vld [vmem:[#allocation7 + $0x30] sm:$0xf] }
 0xac5   : > { %v13891_v1 = vpop.permute.xlu1 %13890 }
 0xac6   : > { %13913 = vst.msk [vmem:[#allocation7] sm:$0xf0] %vm13912_vm15, %v13891_v1 }
 0xac8   : > { %v13893_v45 = vpop.permute.xlu0 %13892 }
 0xac9   : > { %v13903_v15 = vsel %vm13902_vm0, %v13891_v1, %v13893_v45 }
 0xaca   : > { %13914 = vst.msk [vmem:[#allocation7 + $0x8] sm:$0xf0] %vm11644_vm9, %v13903_v15  ;;  %v13895_v12 = vpop.permute.xlu1 %13894 }
 0xacb   : > { %13916 = vst.msk [vmem:[#allocation7 + $0x10] sm:$0xff] %vm13915_vm2, %v13895_v12 }
 0xacc   : > { %v13897_v9 = vpop.permute.xlu0 %13896 }
 0xacd   : > { %v13904_v56 = vsel %vm13902_vm0, %v13895_v12, %v13897_v9  ;;  %v13958_v28 = vld [vmem:[#allocation7] sm:$0xfe] }
 0xace   : > { %13917 = vst.msk [vmem:[#allocation7 + $0x18] sm:$0xff] %vm878_vm1, %v13904_v56  ;;  %v13899_v2 = vpop.permute.xlu1 %13898  ;;  %v13920_v23 = vld [vmem:[#allocation7] sm:$0xff] }
 0xacf   : > { %13918 = vst.msk [vmem:[#allocation7 + $0x20] sm:$0xff] %vm13915_vm2, %v13899_v2  ;;  %v14707_v44 = vld [vmem:[#allocation7] sm:$0xf0] }
 0xad0   : > { %v13901_v14 = vpop.permute.xlu0 %13900  ;;  %v20751_v9 = vld [vmem:[%s24305_s6 + $0x170] sm:$0xff]  }
 0xad1   : > { %v13905_v36 = vsel %vm13902_vm0, %v13899_v2, %v13901_v14  ;;  %v13921_v29 = vld [vmem:[#allocation7 + $0x8] sm:$0xff] }
 0xad2   : > { %13919 = vst.msk [vmem:[#allocation7 + $0x28] sm:$0xff] %vm878_vm1, %v13905_v36  ;;  %v23926_v55 = vld [vmem:[#allocation7 + $0x10] sm:$0xff]  ;;  %v13959_v34 = vld [vmem:[#allocation7 + $0x8] sm:$0xfe]  ;;  %vm14926_vm1 = vcmask 916608  }
 0xad3   : > { %v13962_v48 = vpack.c.bf16 %v23926_v55, %v13958_v28  ;;  %v14494_v27 = vld [vmem:[#allocation7 + $0x8] sm:$0xf8]  ;;  %v13926_v60 = vpack.c.bf16 %v23926_v55, %v13920_v23  ;;  %v14711_v6 = vpack.c.bf16 %v23926_v55, %v14707_v44  ;;  %v20752_v28 = vld [vmem:[%s24305_s6 + $0x110] sm:$0xff]  }
 0xad4   : > { %v14708_v12 = vld [vmem:[#allocation7 + $0x8] sm:$0xf0] }
 0xad5   : > { %v23929_v10 = vld [vmem:[#allocation7 + $0x18] sm:$0xff]  ;;  %v13998_v21 = vshll.u32 %v13962_v48, 16  ;;  %v13996_v22 = vshrl.u32 %v13962_v48, 16  ;;  %v14304_v48 = vld [vmem:[#allocation7 + $0x8] sm:$0xfc] }
 0xad6   : > { %v13927_v33 = vpack.c.bf16 %v23929_v10, %v13921_v29  ;;  %v13963_v50 = vpack.c.bf16 %v23929_v10, %v13959_v34  ;;  %v23936_v30 = vld [vmem:[#allocation7 + $0x20] sm:$0xff]  ;;  %v14498_v3 = vpack.c.bf16 %v23929_v10, %v14494_v27  ;;  %v14712_v2 = vpack.c.bf16 %v23929_v10, %v14708_v12  ;;  %v20774_v12 = vld [vmem:[%s24305_s6 + $0x120] sm:$0xff]  }
 0xad7   : > { %v23941_v35 = vpack.c.bf16 %v13960_v63, %v23936_v30  ;;  %v14000_v26 = vrot.slane %v13998_v21, 1  ;;  %v13928_v53 = vpack.c.bf16 %v23936_v30, %v23936_v30  ;;  %v14713_v29 = vpack.c.bf16 %v14709_v8, %v23936_v30  ;;  %v20773_v8 = vld [vmem:[%s24305_s6 + $0x128] sm:$0xff]  }
 0xad8   : > { %17898 = vmatprep.mubr.msk.bf16.mxu1 %vm13865_vm13, %v13927_v33  ;;  %v14010_v62 = vshll.u32 %v13963_v50, 16  ;;  %v14548_v59 = vshrl.u32 %v14498_v3, 16  ;;  %v14551_v32 = vshll.u32 %v14498_v3, 16  ;;  %v14008_v4 = vshrl.u32 %v13963_v50, 16 }
 0xad9   : > { %14288 = vmatmul.mubr.bf16.vlgmr.msra.gmra.mxu1 %v13926_v60  ;;  %v23944_v5 = vld [vmem:[#allocation7 + $0x28] sm:$0xff]  ;;  %v14003_v11 = vshll.u32 %v23941_v35, 16  ;;  %v14001_v43 = vor.u32 %v14000_v26, %v13996_v22  ;;  %v14308_v63 = vpack.c.bf16 %v23929_v10, %v14304_v48  ;;  %v14751_v34 = vrot.slane %v14712_v2, 2  ;;  %v20754_v60 = vld [vmem:[%s24305_s6 + $0x108] sm:$0xff]   ;;  %v14495_v26 = vld [vmem:[#allocation7 + $0x30] sm:$0x7] }
 0xada   : > { %14657 = vmatpush1.bf16.msra.mxu1 %v20745_v61  ;;  %v13929_v39 = vpack.c.bf16 %v23944_v5, %v23944_v5  ;;  %v13965_v38 = vpack.c.bf16 %v13961_v40, %v23944_v5  ;;  %v14012_v57 = vrot.slane %v14010_v62, 1  ;;  %v14500_v58 = vpack.c.bf16 %v14496_v49, %v23944_v5  ;;  %v20753_v61 = vld [vmem:[%s24305_s6 + $0x168] sm:$0xff]   ;;  %v20755_v62 = vld [vmem:[%s24305_s6 + $0x160] sm:$0xff]   ;;  %v20780_v48 = vld [vmem:[%s24305_s6 + $0x1d0] sm:$0xff]  }
 0xadb   : > { %14658 = vmatprep.subr.bf16.mxu1 %v24323_v47  ;;  %v14005_v0 = vrot.slane %v14003_v11, 1  ;;  %v14550_v54 = vrot.slane %v14548_v59, 1  ;;  %v14553_v51 = vrot.slane %v14551_v32, 2  ;;  %v14310_v56 = vpack.c.bf16 %v14306_v25, %v23944_v5  ;;  %v20757_v11 = vld [vmem:[%s24305_s6 + $0x158] sm:$0xff]   ;;  %v20759_v32 = vld [vmem:[%s24305_s6 + $0x150] sm:$0xff]  }
 0xadc   : > { %17899 = vmatprep.mubr.msk.bf16.mxu1 %vm13865_vm13, %v13929_v39  ;;  %v14015_v31 = vshll.u32 %v13965_v38, 16  ;;  %v14556_v16 = vshrl.u32 %v14500_v58, 16  ;;  %v14559_v42 = vshll.u32 %v14500_v58, 16  ;;  %v14013_v37 = vor.u32 %v14012_v57, %v14008_v4  ;;  %v20758_v59 = vld [vmem:[%s24305_s6 + $0xf8] sm:$0xff]   ;;  %v20760_v39 = vld [vmem:[%s24305_s6 + $0xf0] sm:$0xff]   ;;  %v20764_v58 = vld [vmem:[%s24305_s6 + $0xe0] sm:$0xff]  }
 0xadd   : > { %v14022_v20 = vshrl.u32 %v13965_v38, 16  ;;  %v14006_v1 = vsel %vm8399_vm4, %v14001_v43, %v14005_v0  ;;  %v14554_v45 = vor.u32 %v14553_v51, %v14550_v54  ;;  %v14714_v14 = vpack.c.bf16 %v14710_v13, %v23944_v5  ;;  %v20756_v5 = vld [vmem:[%s24305_s6 + $0x100] sm:$0xff]   ;;  %v20762_v38 = vld [vmem:[%s24305_s6 + $0xe8] sm:$0xff]   ;;  %v20763_v57 = vld [vmem:[%s24305_s6 + $0x1b0] sm:$0xff]  }
 0xade   : > { %14659 = vmatpush1.bf16.msra.mxu1 %v20747_v17  ;;  %v14017_v46 = vrot.slane %v14015_v31, 1  ;;  %v14558_v41 = vrot.slane %v14556_v16, 1  ;;  %v14561_v7 = vrot.slane %v14559_v42, 2  ;;  %v14748_v33 = vrot.slane %v14711_v6, 2  ;;  %v20761_v17 = vld [vmem:[%s24305_s6 + $0x1b8] sm:$0xff]   ;;  %v20765_v4 = vld [vmem:[%s24305_s6 + $0x1a8] sm:$0xff]  }
 0xadf   : > { %14660 = vmatprep.subr.bf16.mxu1 %v24323_v47  ;;  %v23987_v27 = vrot.slane %v14714_v14, 2  ;;  %v23990_v23 = vrot.slane %v14713_v29, 2  ;;  %v14019_v50 = vshrl.u32 %v23941_v35, 16  ;;  %v23996_v3 = vrot.slane %v14310_v56, 1  ;;  %v20766_v31 = vld [vmem:[%s24305_s6 + $0x148] sm:$0xff]   ;;  %v20768_v51 = vld [vmem:[%s24305_s6 + $0x140] sm:$0xff]  }
 0xae0   : > { %v14018_v19 = vsel %vm8399_vm4, %v14013_v37, %v14017_v46  ;;  %v14024_v18 = vor.u32 %v14022_v20, %v14017_v46  ;;  %v23969_v15 = vor.u32 %v14561_v7, %v14558_v41  ;;  %v14347_v21 = vrot.slane %v14308_v63, 1  ;;  %v14493_v16 = vld [vmem:[#allocation7] sm:$0xf8]  ;;  %v20769_v46 = vld [vmem:[%s24305_s6 + $0x198] sm:$0xff]   ;;  %v20777_v14 = vld [vmem:[%s24305_s6 + $0x1e8] sm:$0xff]  }
 0xae1   : > { %17882 = vmatprep.mubr.msk.bf16.mxu0 %vm13865_vm13, %v14018_v19  ;;  %14296 = vmatmul.mubr.bf16.gmra.mxu1 %v13928_v53  ;;  %v24000_v10 = vsel %vm11024_vm7, %v14751_v34, %v23987_v27  ;;  %v24008_v40 = vsel %vm11024_vm7, %v14748_v33, %v23990_v23  ;;  %v14021_v35 = vor.u32 %v14019_v50, %v14005_v0  ;;  %v20767_v0 = vld [vmem:[%s24305_s6 + $0x1a0] sm:$0xff]   ;;  %v20770_v41 = vld [vmem:[%s24305_s6 + $0x138] sm:$0xff]   ;;  %v20771_v43 = vld [vmem:[%s24305_s6 + $0x190] sm:$0xff]   ;;  %vm15560_vm4 = vcmask 224256  }
 0xae2   : > { %14661 = vmatpush1.bf16.msra.mxu1 %v20749_v52  ;;  %14150 = vmatmul.mubr.bf16.vlgmr.msra.gmra.mxu0 %v14006_v1  ;;  %v14563_v36 = vsel %vm10289_vm6, %v14554_v45, %v23969_v15  ;;  %v14349_v49 = vsel %vm9634_vm5, %v14347_v21, %v23996_v3  ;;  %v14499_v22 = vpack.c.bf16 %v14495_v26, %v23936_v30  ;;  %v20772_v13 = vld [vmem:[%s24305_s6 + $0x130] sm:$0xff]   ;;  %v20781_v29 = vld [vmem:[%s24305_s6 + $0x1c8] sm:$0xff]   ;;  %v20782_v63 = vld [vmem:[%s24305_s6 + $0x1c0] sm:$0xff]  }
 0xae3   : > { %14443 = vmatpush1.bf16.msra.mxu0 %v20750_v24  ;;  %17883 = vmatprep.mubr.msk.bf16.mxu0 %vm13865_vm13, %v14024_v18  ;;  %v14497_v54 = vpack.c.bf16 %v23926_v55, %v14493_v16  ;;  %v14305_v18 = vld [vmem:[#allocation7 + $0x30] sm:$0x3]  ;;  %v14303_v45 = vld [vmem:[#allocation7] sm:$0xfc]  ;;  %v20783_v34 = vld [vmem:[%s24305_s6 + $0x228] sm:$0xff]  }
 0xae4   : > { %17986 = vmatprep.mubr.msk.bf16.mxu1 %vm13865_vm13, %v14563_v36  ;;  %14662 = vmatprep.subr.bf16.mxu1 %v24323_v47  ;;  %v14539_v42 = vshrl.u32 %v14499_v22, 16  ;;  %v14542_v37 = vshll.u32 %v14499_v22, 16  ;;  %v14309_v1 = vpack.c.bf16 %v14305_v18, %v23936_v30  ;;  %v20775_v30 = vld [vmem:[%s24305_s6 + $0x1f8] sm:$0xff]   ;;  %v20778_v36 = vld [vmem:[%s24305_s6 + $0x1e0] sm:$0xff]   ;;  %v20786_v50 = vld [vmem:[%s24305_s6 + $0x210] sm:$0xff]  }
 0xae5   : > { %14444 = vmatprep.subr.bf16.mxu0 %v24323_v47  ;;  %v14531_v52 = vshrl.u32 %v14497_v54, 16  ;;  %v14534_v20 = vshll.u32 %v14497_v54, 16  ;;  %v20784_v33 = vld [vmem:[%s24305_s6 + $0x220] sm:$0xff]  }
 0xae6   : > { %14663 = vmatpush1.bf16.msra.mxu1 %v20751_v9  ;;  %v14541_v25 = vrot.slane %v14539_v42, 1  ;;  %v14544_v53 = vrot.slane %v14542_v37, 2  ;;  %v14307_v9 = vpack.c.bf16 %v23926_v55, %v14303_v45  ;;  %v14345_v56 = vrot.slane %v14309_v1, 1  ;;  %v20776_v55 = vld [vmem:[%s24305_s6 + $0x1f0] sm:$0xff]   ;;  %v20796_v22 = vld [vmem:[%s24306_s7 + $0xa0] sm:$0xff]   ;;  %v20797_v1 = vld [vmem:[%s24306_s7 + $0x58] sm:$0xff]  }
 0xae7   : > { %14445 = vmatpush1.bf16.msra.mxu0 %v20752_v28  ;;  %14664 = vmatprep.subr.bf16.mxu1 %v24323_v47  ;;  %v14533_v24 = vrot.slane %v14531_v52, 1  ;;  %v14536_v7 = vrot.slane %v14534_v20, 2  ;;  %v20779_v28 = vld [vmem:[%s24305_s6 + $0x1d8] sm:$0xff]  }
 0xae8   : > { %14446 = vmatprep.subr.bf16.mxu0 %v24323_v47  ;;  %v14545_v44 = vor.u32 %v14544_v53, %v14541_v25  ;;  %v14344_v2 = vrot.slane %v14307_v9, 1  ;;  %v20798_v45 = vld [vmem:[%s24306_s7 + $0x98] sm:$0xff]   ;;  %v20799_v9 = vld [vmem:[%s24306_s7 + $0x50] sm:$0xff]  }
 0xae9   : > { %v14537_v19 = vor.u32 %v14536_v7, %v14533_v24 }
 0xaea   : > { %14665 = vmatpush1.bf16.msra.mxu1 %v20753_v61  ;;  %14158 = vmatmul.mubr.bf16.gmra.mxu0 %v14021_v35  ;;  %v20785_v61 = vld [vmem:[%s24305_s6 + $0x218] sm:$0xff]  }
 0xaeb   : > { %14447 = vmatpush1.bf16.msra.mxu0 %v20754_v60  ;;  %17942 = vmatprep.mubr.msk.bf16.mxu0 %vm13865_vm13, %v14349_v49  ;;  %v14546_v6 = vsel %vm10289_vm6, %v14537_v19, %v14545_v44 }
 0xaec   : > { %14666 = vmatprep.subr.bf16.mxu1 %v24323_v47  ;;  %14448 = vmatprep.subr.bf16.mxu0 %v24323_v47 }
 0xaee   : > { %14667 = vmatpush1.bf16.msra.mxu1 %v20755_v62 }
 0xaef   : > { %14449 = vmatpush1.bf16.msra.mxu0 %v20756_v5  ;;  %14668 = vmatprep.subr.bf16.mxu1 %v24323_v47  ;;  %v20789_v5 = vld [vmem:[%s24306_s7 + $0x78] sm:$0xff]  }
 0xaf0   : > { %14450 = vmatprep.subr.bf16.mxu0 %v24323_v47 }
 0xaf2   : > { %14669 = vmatpush1.bf16.msra.mxu1 %v20757_v11 }
 0xaf3   : > { %14451 = vmatpush1.bf16.msra.mxu0 %v20758_v59  ;;  %14670 = vmatprep.subr.bf16.mxu1 %v24323_v47 }
 0xaf4   : > { %14452 = vmatprep.subr.bf16.mxu0 %v24323_v47 }
 0xaf6   : > { %14671 = vmatpush1.bf16.msra.mxu1 %v20759_v32 }
 0xaf7   : > { %14453 = vmatpush1.bf16.msra.mxu0 %v20760_v39  ;;  %14676 = vmatprep.subr.bf16.mxu1 %v24323_v47 }
 0xaf8   : > { %14454 = vmatprep.subr.bf16.mxu0 %v24323_v47 }
 0xafa   : > { %14677 = vmatpush2.bf16.msra.mxu1 %v20761_v17  ;;  %v20793_v17 = vld [vmem:[%s24306_s7 + $0x68] sm:$0xff]  }
 0xafb   : > { %14455 = vmatpush1.bf16.msra.mxu0 %v20762_v38  ;;  %14678 = vmatprep.subr.bf16.mxu1 %v24323_v47  ;;  %v20794_v38 = vld [vmem:[%s24306_s7 + $0xa8] sm:$0xff]  }
 0xafc   : > { %14456 = vmatprep.subr.bf16.mxu0 %v24323_v47 }
 0xafe   : > { %14679 = vmatpush2.bf16.msra.mxu1 %v20763_v57 }
 0xaff   : > { %14457 = vmatpush1.bf16.msra.mxu0 %v20764_v58  ;;  %14680 = vmatprep.subr.bf16.mxu1 %v24323_v47 }
 0xb00   : > { %14462 = vmatprep.subr.bf16.mxu0 %v24323_v47 }
 0xb02   : > { %14681 = vmatpush2.bf16.msra.mxu1 %v20765_v4 }
 0xb03   : > { %14463 = vmatpush2.bf16.msra.mxu0 %v20766_v31  ;;  %14682 = vmatprep.subr.bf16.mxu1 %v24323_v47  ;;  %v20795_v31 = vld [vmem:[%s24306_s7 + $0x60] sm:$0xff]  }
 0xb04   : > { %14464 = vmatprep.subr.bf16.mxu0 %v24323_v47 }
 0xb06   : > { %14683 = vmatpush2.bf16.msra.mxu1 %v20767_v0 }
 0xb07   : > { %14465 = vmatpush2.bf16.msra.mxu0 %v20768_v51  ;;  %14684 = vmatprep.subr.bf16.mxu1 %v24323_v47 }
 0xb08   : > { %14466 = vmatprep.subr.bf16.mxu0 %v24323_v47 }
 0xb0a   : > { %14685 = vmatpush2.bf16.msra.mxu1 %v20769_v46 }
 0xb0b   : > { %14467 = vmatpush2.bf16.msra.mxu0 %v20770_v41  ;;  %14686 = vmatprep.subr.bf16.mxu1 %v24323_v47 }
 0xb0c   : > { %14468 = vmatprep.subr.bf16.mxu0 %v24323_v47 }
 0xb0e   : > { %14687 = vmatpush2.bf16.msra.mxu1 %v20771_v43 }
 0xb0f   : > { %14469 = vmatpush2.bf16.msra.mxu0 %v20772_v13  ;;  %18499 = vmatprep.subr.bf16.mxu1 %v20789_v5 }
 0xb10   : > { %14470 = vmatprep.subr.bf16.mxu0 %v24323_v47 }
 0xb11   : > { %14689 = vmatmul.mubr.bf16.vlgmr.msra.gmra.mxu1 %v14546_v6 }
 0xb12   : > { %17987 = vmatprep.mubr.msk.bf16.mxu1 %vm13865_vm13, %v23969_v15  ;;  %v14346_v15 = vsel %vm9634_vm5, %v14344_v2, %v14345_v56  ;;  %18500 = vmatpush3.bf16.msra.mxu1 %v20789_v5  ;;  %v20806_v5 = vld [vmem:[%s24306_s7 + $0x138] sm:$0xff]  }
 0xb13   : > { %14471 = vmatpush2.bf16.msra.mxu0 %v20773_v8 }
 0xb14   : > { %14472 = vmatprep.subr.bf16.mxu0 %v24323_v47 }
 0xb17   : > { %14473 = vmatpush2.bf16.msra.mxu0 %v20774_v12 }
 0xb18   : > { %14846 = vmatprep.subr.bf16.mxu0 %v24323_v47 }
 0xb19   : > { %14697 = vmatmul.mubr.bf16.gmra.mxu1 %v14545_v44 }
 0xb1a   : > { %14475 = vmatmul.mubr.bf16.vlgmr.msra.gmra.mxu0 %v14346_v15 }
 0xb1b   : > { %17943 = vmatprep.mubr.msk.bf16.mxu0 %vm13865_vm13, %v23996_v3  ;;  %14847 = vmatpush1.bf16.msra.mxu0 %v20775_v30  ;;  %v20787_v3 = vld [vmem:[%s24305_s6 + $0x208] sm:$0xff]  }
 0xb1c   : > { %14848 = vmatprep.subr.bf16.mxu0 %v24323_v47 }
 0xb1f   : > { %14849 = vmatpush1.bf16.msra.mxu0 %v20776_v55  ;;  %v18032_v55 = vld [vmem:[%s24312_s13] ss:$0 sm:$0xff] }
 0xb20   : > { %14850 = vmatprep.subr.bf16.mxu0 %v24323_v47 }
 0xb22   : > { %14483 = vmatmul.mubr.bf16.gmra.mxu0 %v14345_v56  ;;  %v20800_v56 = vld [vmem:[%s24306_s7 + $0x90] sm:$0xff]  }
 0xb23   : > { %14851 = vmatpush1.bf16.msra.mxu0 %v20777_v14  ;;  %18030 = vmatprep.mubr.msk.bf16.mxu0 %vm13865_vm13, %v24000_v10  ;;  %v20788_v10 = vld [vmem:[%s24305_s6 + $0x200] sm:$0xff]  }
 0xb24   : > { %14852 = vmatprep.subr.bf16.mxu0 %v24323_v47 }
 0xb27   : > { %14853 = vmatpush1.bf16.msra.mxu0 %v20778_v36 }
 0xb28   : > { %14854 = vmatprep.subr.bf16.mxu0 %v24323_v47 }
 0xb2b   : > { %14855 = vmatpush1.bf16.msra.mxu0 %v20779_v28  ;;  %v20801_v28 = vld [vmem:[%s24306_s7 + $0x48] sm:$0xff]  }
 0xb2c   : > { %14856 = vmatprep.subr.bf16.mxu0 %v24323_v47 }
 0xb2f   : > { %14857 = vmatpush1.bf16.msra.mxu0 %v20780_v48  ;;  %v20802_v48 = vld [vmem:[%s24306_s7 + $0x88] sm:$0xff]  }
 0xb30   : > { %14858 = vmatprep.subr.bf16.mxu0 %v24323_v47 }
 0xb33   : > { %14859 = vmatpush1.bf16.msra.mxu0 %v20781_v29  ;;  %v20803_v29 = vld [vmem:[%s24306_s7 + $0x40] sm:$0xff]  }
 0xb34   : > { %14860 = vmatprep.subr.bf16.mxu0 %v24323_v47 }
 0xb37   : > { %14861 = vmatpush1.bf16.msra.mxu0 %v20782_v63 }
 0xb38   : > { %14866 = vmatprep.subr.bf16.mxu0 %v24323_v47 }
 0xb3b   : > { %14867 = vmatpush2.bf16.msra.mxu0 %v20783_v34 }
 0xb3c   : > { %14868 = vmatprep.subr.bf16.mxu0 %v24323_v47 }
 0xb3f   : > { %14869 = vmatpush2.bf16.msra.mxu0 %v20784_v33 }
 0xb40   : > { %14870 = vmatprep.subr.bf16.mxu0 %v24323_v47 }
 0xb43   : > { %14871 = vmatpush2.bf16.msra.mxu0 %v20785_v61  ;;  %v20804_v61 = vld [vmem:[%s24306_s7 + $0x80] sm:$0xff]  }
 0xb44   : > { %14872 = vmatprep.subr.bf16.mxu0 %v24323_v47 }
 0xb47   : > { %14873 = vmatpush2.bf16.msra.mxu0 %v20786_v50 }
 0xb48   : > { %14874 = vmatprep.subr.bf16.mxu0 %v24323_v47 }
 0xb4b   : > { %14875 = vmatpush2.bf16.msra.mxu0 %v20787_v3 }
 0xb4c   : > { %14876 = vmatprep.subr.bf16.mxu0 %v24323_v47  ;;  %v20790_v47 = vld [vmem:[%s24306_s7 + $0xb8] sm:$0xff]  }
 0xb4f   : > { %14877 = vmatpush2.bf16.msra.mxu0 %v20788_v10 }
 0xb50   : > { %18539 = vmatprep.subr.bf16.mxu0 %v20790_v47 }
 0xb52   : > { %14879 = vmatmul.mubr.bf16.vlgmr.msra.gmra.mxu0 %v24008_v40  ;;  %v20791_v40 = vld [vmem:[%s24306_s7 + $0x70] sm:$0xff]  }
 0xb53   : > { %18031 = vmatprep.mubr.msk.bf16.mxu0 %vm13865_vm13, %v23987_v27  ;;  %18540 = vmatpush3.bf16.msra.mxu0 %v20790_v47 }
 0xb54   : > { %18501 = vmatprep.subr.bf16.mxu1 %v20791_v40 }
 0xb55   : > { %18502 = vmatpush3.bf16.msra.mxu1 %v20791_v40 }
 0xb56   : > { %18503 = vmatprep.subr.bf16.mxu1 %v20793_v17 }
 0xb59   : > { %18504 = vmatpush3.bf16.msra.mxu1 %v20793_v17 }
 0xb5a   : > { %14887 = vmatmul.mubr.bf16.gmra.mxu0 %v23990_v23  ;;  %v20792_v23 = vld [vmem:[%s24306_s7 + $0xb0] sm:$0xff]   ;;  %18505 = vmatprep.subr.bf16.mxu1 %v20795_v31 }
 0xb5b   : > { %18541 = vmatprep.subr.bf16.mxu0 %v20792_v23 }
 0xb5c   : > { %18542 = vmatpush3.bf16.msra.mxu0 %v20792_v23 }
 0xb5d   : > { %18543 = vmatprep.subr.bf16.mxu0 %v20794_v38  ;;  %18506 = vmatpush3.bf16.msra.mxu1 %v20795_v31 }
 0xb5e   : > { %18507 = vmatprep.subr.bf16.mxu1 %v20797_v1 }
 0xb60   : > { %18544 = vmatpush3.bf16.msra.mxu0 %v20794_v38 }
 0xb61   : > { %18545 = vmatprep.subr.bf16.mxu0 %v20796_v22  ;;  %18508 = vmatpush3.bf16.msra.mxu1 %v20797_v1  ;;  %v20816_v1 = vld [vmem:[%s24306_s7 + $0x110] sm:$0xff]  }
 0xb62   : > { %18509 = vmatprep.subr.bf16.mxu1 %v20799_v9 }
 0xb64   : > { %18546 = vmatpush3.bf16.msra.mxu0 %v20796_v22 }
 0xb65   : > { %18547 = vmatprep.subr.bf16.mxu0 %v20798_v45  ;;  %18510 = vmatpush3.bf16.msra.mxu1 %v20799_v9  ;;  %v20819_v9 = vld [vmem:[%s24306_s7] sm:$0xff]  }
 0xb66   : > { %18511 = vmatprep.subr.bf16.mxu1 %v20801_v28 }
 0xb68   : > { %18548 = vmatpush3.bf16.msra.mxu0 %v20798_v45  ;;  %v20817_v45 = vld [vmem:[%s24306_s7 + $0x8] sm:$0xff]  }
 0xb69   : > { %18549 = vmatprep.subr.bf16.mxu0 %v20800_v56  ;;  %18512 = vmatpush3.bf16.msra.mxu1 %v20801_v28 }
 0xb6a   : > { %18513 = vmatprep.subr.bf16.mxu1 %v20803_v29 }
 0xb6c   : > { %18550 = vmatpush3.bf16.msra.mxu0 %v20800_v56  ;;  %v20820_v56 = vld [vmem:[%s24306_s7 + $0x100] sm:$0xff]  }
 0xb6d   : > { %18551 = vmatprep.subr.bf16.mxu0 %v20802_v48  ;;  %18514 = vmatpush3.bf16.msra.mxu1 %v20803_v29 }
 0xb70   : > { %18552 = vmatpush3.bf16.msra.mxu0 %v20802_v48  ;;  %v20822_v48 = vld [vmem:[%s24306_s7 + $0xf0] sm:$0xff]  }
 0xb71   : > { %18553 = vmatprep.subr.bf16.mxu0 %v20804_v61 }
 0xb74   : > { %18554 = vmatpush3.bf16.msra.mxu0 %v20804_v61  ;;  %v20824_v61 = vld [vmem:[%s24306_s7 + $0xe0] sm:$0xff]  }
 0xb75   : > { %18579 = vmatprep.subr.bf16.mxu0 %v20806_v5 }
 0xb99   : > { %v14289_v60 = vpop.f32.mrf.mxu1 }
 0xb9b   : > { %v14291_v35 = vpop.f32.mrf.mxu1 }
 0xb9d   : > { %v14292_v21 = vpop.f32.mrf.mxu1 }
 0xb9f   : > { %v14294_v49 = vpop.f32.mrf.mxu1 }
 0xba1   : > { %v14297_v62 = vpop.f32.mrf.mxu1 }
 0xba2   : > { %v14151_v27 = vpop.f32.mrf.mxu0 }
 0xba3   : > { %v14290_v11 = vadd.f32 %v14289_v60, %v14151_v27  ;;  %v14299_v59 = vpop.f32.mrf.mxu1 }
 0xba4   : > { %v14153_v32 = vpop.f32.mrf.mxu0 }
 0xba5   : > { %v14300_v39 = vpop.f32.mrf.mxu1 }
 0xba6   : > { %v14154_v57 = vpop.f32.mrf.mxu0 }
 0xba7   : > { %v14293_v58 = vadd.f32 %v14292_v21, %v14154_v57  ;;  %v14301_v26 = vpop.f32.mrf.mxu1 }
 0xba8   : > { %v14156_v4 = vpop.f32.mrf.mxu0 }
 0xbaa   : > { %v14159_v16 = vpop.f32.mrf.mxu0 }
 0xbab   : > { %v14298_v0 = vadd.f32 %v14297_v62, %v14159_v16  ;;  %v20805_v62 = vld [vmem:[%s24306_s7 + $0x38] sm:$0xff]  }
 0xbac   : > { %v14161_v54 = vpop.f32.mrf.mxu0  ;;  %18519 = vmatprep.subr.bf16.mxu1 %v20805_v62 }
 0xbae   : > { %v14162_v51 = vpop.f32.mrf.mxu0 }
 0xbb0   : > { %v14163_v42 = vpop.f32.mrf.mxu0 }
 0xbd1   : > { %v14690_v37 = vpop.f32.mrf.mxu1 }
 0xbd3   : > { %v14692_v46 = vpop.f32.mrf.mxu1 }
 0xbd5   : > { %v14693_v52 = vpop.f32.mrf.mxu1 }
 0xbd7   : > { %v14695_v20 = vpop.f32.mrf.mxu1 }
 0xbd9   : > { %v14698_v41 = vpop.f32.mrf.mxu1 }
 0xbda   : > { %v14476_v25 = vpop.f32.mrf.mxu0 }
 0xbdb   : > { %v14700_v53 = vpop.f32.mrf.mxu1  ;;  %v14490_v12 = vadd.f32 %v14476_v25, %v14290_v11 }
 0xbdc   : > { %v14478_v43 = vpop.f32.mrf.mxu0 }
 0xbdd   : > { %v14701_v24 = vpop.f32.mrf.mxu1  ;;  %v14704_v30 = vadd.f32 %v14690_v37, %v14490_v12  ;;  %v20808_v43 = vld [vmem:[%s24306_s7 + $0x130] sm:$0xff]   ;;  %v20818_v12 = vld [vmem:[%s24306_s7 + $0x108] sm:$0xff]  }
 0xbde   : > { %v14479_v7 = vpop.f32.mrf.mxu0 }
 0xbdf   : > { %v14702_v13 = vpop.f32.mrf.mxu1  ;;  %v14491_v2 = vadd.f32 %v14479_v7, %v14293_v58  ;;  %v20809_v7 = vld [vmem:[%s24306_s7 + $0x28] sm:$0xff]  }
 0xbe0   : > { %v14481_v44 = vpop.f32.mrf.mxu0  ;;  %v20810_v13 = vld [vmem:[%s24306_s7 + $0x128] sm:$0xff]  }
 0xbe1   : > { %v14705_v33 = vadd.f32 %v14693_v52, %v14491_v2  ;;  %v20811_v44 = vld [vmem:[%s24306_s7 + $0x20] sm:$0xff]   ;;  %v20821_v2 = vld [vmem:[%s24306_s7 + $0xf8] sm:$0xff]  }
 0xbe2   : > { %v14484_v19 = vpop.f32.mrf.mxu0 }
 0xbe3   : > { %v14492_v63 = vadd.f32 %v14484_v19, %v14298_v0  ;;  %v20812_v19 = vld [vmem:[%s24306_s7 + $0x120] sm:$0xff]  }
 0xbe4   : > { %v14486_v18 = vpop.f32.mrf.mxu0 }
 0xbe5   : > { %v14706_v21 = vadd.f32 %v14698_v41, %v14492_v63  ;;  %v20807_v41 = vld [vmem:[%s24306_s7 + $0x30] sm:$0xff]   ;;  %v20813_v18 = vld [vmem:[%s24306_s7 + $0x18] sm:$0xff]  }
 0xbe6   : > { %v14487_v8 = vpop.f32.mrf.mxu0 }
 0xbe7   : > { %v20814_v8 = vld [vmem:[%s24306_s7 + $0x118] sm:$0xff]  }
 0xbe8   : > { %v14488_v6 = vpop.f32.mrf.mxu0 }
 0xbe9   : > { %v20815_v6 = vld [vmem:[%s24306_s7 + $0x10] sm:$0xff]  }
 0xc12   : > { %v14880_v15 = vpop.f32.mrf.mxu0 }
 0xc13   : > { %v14894_v14 = vadd.f32 %v14880_v15, %v14704_v30 }
 0xc14   : > { %v14882_v36 = vpop.f32.mrf.mxu0 }
 0xc15   : > { %v14904_v34 = vadd.f32 %v18032_v55, %v14894_v14  ;;  %v15420_v14 = vld [vmem:[#allocation8 + $0x1c] sm:$0xf] }
 0xc16   : > { %v14883_v50 = vpop.f32.mrf.mxu0 }
 0xc17   : > { %v14907_v3 = vmax.f32 %v14904_v34, 0.0  ;;  %v14895_v10 = vadd.f32 %v14883_v50, %v14705_v33  ;;  %v20823_v33 = vld [vmem:[%s24306_s7 + $0xe8] sm:$0xff]   ;;  %v20825_v50 = vld [vmem:[%s24306_s7 + $0xd8] sm:$0xff]  }
 0xc18   : > { %v14885_v60 = vpop.f32.mrf.mxu0 }
 0xc19   : > { %v14905_v35 = vadd.f32 %v18032_v55, %v14895_v10  ;;  %14917 = vrot.lane.b32.xlu1 %v14907_v3, %s20953_s24  ;;  %v20826_v3 = vld [vmem:[%s24306_s7 + $0xd0] sm:$0xff]   ;;  %v20827_v10 = vld [vmem:[%s24306_s7 + $0xc8] sm:$0xff]   ;;  %v20828_v60 = vld [vmem:[%s24306_s7 + $0xc0] sm:$0xff]  }
 0xc1a   : > { %v14888_v49 = vpop.f32.mrf.mxu0 }
 0xc1b   : > { %v14908_v47 = vmax.f32 %v14905_v35, 0.0  ;;  %v14896_v40 = vadd.f32 %v14888_v49, %v14706_v21 }
 0xc1c   : > { %v14890_v27 = vpop.f32.mrf.mxu0 }
 0xc1d   : > { %v14906_v23 = vadd.f32 %v18032_v55, %v14896_v40  ;;  %14919 = vrot.lane.b32.xlu0 %v14908_v47, %s20953_s24 }
 0xc1e   : > { %v14891_v11 = vpop.f32.mrf.mxu0 }
 0xc1f   : > { %v14909_v59 = vmax.f32 %v14906_v23, 0.0 }
 0xc20   : > { %v14892_v32 = vpop.f32.mrf.mxu0 }
 0xc21   : > { %14921 = vrot.lane.b32.xlu1 %v14909_v59, %s20953_s24 }
 0xc8b   : > { %v14918_v39 = vpop.permute.xlu1 %14917 }
 0xc8c   : > { %14927 = vst.msk [vmem:[#allocation8 + $0x4] sm:$0xff] %vm14926_vm1, %v14918_v39 }
 0xc8f   : > { %v14920_v17 = vpop.permute.xlu0 %14919 }
 0xc90   : > { %14928 = vst.msk [vmem:[#allocation8 + $0xc] sm:$0xff] %vm14926_vm1, %v14920_v17 }
 0xc93   : > { %v14922_v38 = vpop.permute.xlu1 %14921  ;;  %v14952_v57 = vld [vmem:[#allocation8 + $0x1] sm:$0xff] }
 0xc94   : > { %14929 = vst.msk [vmem:[#allocation8 + $0x14] sm:$0xff] %vm14926_vm1, %v14922_v38  ;;  %v15169_v26 = vld [vmem:[#allocation8 + $0x2] sm:$0xff] }
 0xc95   : > { %v14930_v20 = vld [vmem:[#allocation8] sm:$0xff] }
 0xc96   : > { %v15417_v53 = vld [vmem:[#allocation8 + $0x4] sm:$0xff] }
 0xc97   : > { %v14953_v58 = vld [vmem:[#allocation8 + $0x9] sm:$0xff] }
 0xc98   : > { %v15170_v4 = vld [vmem:[#allocation8 + $0xa] sm:$0xff]  ;;  %v14956_v31 = vpack.c.bf16 %v14953_v58, %v14952_v57 }
 0xc99   : > { %v15173_v22 = vpack.c.bf16 %v15170_v4, %v15169_v26  ;;  %v14931_v16 = vld [vmem:[#allocation8 + $0x8] sm:$0xff] }
 0xc9a   : > { %18515 = vmatprep.mubr.bf16.mxu1 %v14956_v31  ;;  %v15418_v46 = vld [vmem:[#allocation8 + $0xc] sm:$0xff]  ;;  %v14934_v25 = vpack.c.bf16 %v14931_v16, %v14930_v20  ;;  %v15293_v63 = vld [vmem:[#allocation8 + $0x3] sm:$0xff] }
 0xc9b   : > { %18555 = vmatprep.mubr.bf16.mxu0 %v15173_v22  ;;  %v14954_v0 = vld [vmem:[#allocation8 + $0x11] sm:$0xff]  ;;  %v14955_v54 = vld [vmem:[#allocation8 + $0x19] sm:$0xf]  ;;  %v15421_v24 = vpack.c.bf16 %v15418_v46, %v15417_v53 }
 0xc9c   : > { %v15171_v51 = vld [vmem:[#allocation8 + $0x12] sm:$0xff]  ;;  %v14957_v42 = vpack.c.bf16 %v14955_v54, %v14954_v0  ;;  %v15172_v37 = vld [vmem:[#allocation8 + $0x1a] sm:$0xf] }
 0xc9d   : > { %v15174_v52 = vpack.c.bf16 %v15172_v37, %v15171_v51  ;;  %v14932_v30 = vld [vmem:[#allocation8 + $0x10] sm:$0xff]  ;;  %v14933_v15 = vld [vmem:[#allocation8 + $0x18] sm:$0xf] }
 0xc9e   : > { %18516 = vmatmul.mubr.bf16.vlgmr.msra.gmra.mxu1 %v14957_v42  ;;  %v15419_v55 = vld [vmem:[#allocation8 + $0x14] sm:$0xff]  ;;  %v15294_v36 = vld [vmem:[#allocation8 + $0xb] sm:$0xff]  ;;  %v14935_v28 = vpack.c.bf16 %v14933_v15, %v14932_v30 }
 0xc9f   : > { %18520 = vmatpush3.bf16.msra.mxu1 %v20805_v62  ;;  %18556 = vmatmul.mubr.bf16.vlgmr.msra.gmra.mxu0 %v15174_v52  ;;  %v15422_v29 = vpack.c.bf16 %v15420_v14, %v15419_v55  ;;  %v15297_v34 = vpack.c.bf16 %v15294_v36, %v15293_v63  ;;  %v15295_v35 = vld [vmem:[#allocation8 + $0x13] sm:$0xff]  ;;  %v15296_v21 = vld [vmem:[#allocation8 + $0x1b] sm:$0xf]  ;;  %v18137_v42 = vld [vmem:[%s24313_s14] ss:$0 sm:$0xff] }
 0xca0   : > { %18580 = vmatpush3.bf16.msra.mxu0 %v20806_v5  ;;  %18535 = vmatprep.mubr.bf16.mxu1 %v14934_v25  ;;  %v15298_v49 = vpack.c.bf16 %v15296_v21, %v15295_v35 }
 0xca1   : > { %18595 = vmatprep.mubr.bf16.mxu0 %v15421_v24  ;;  %18521 = vmatprep.subr.bf16.mxu1 %v20807_v41 }
 0xca2   : > { %18581 = vmatprep.subr.bf16.mxu0 %v20808_v43 }
 0xca3   : > { %18522 = vmatpush3.bf16.msra.mxu1 %v20807_v41 }
 0xca4   : > { %18582 = vmatpush3.bf16.msra.mxu0 %v20808_v43  ;;  %18523 = vmatprep.subr.bf16.mxu1 %v20809_v7 }
 0xca5   : > { %18583 = vmatprep.subr.bf16.mxu0 %v20810_v13 }
 0xca7   : > { %18524 = vmatpush3.bf16.msra.mxu1 %v20809_v7 }
 0xca8   : > { %18584 = vmatpush3.bf16.msra.mxu0 %v20810_v13  ;;  %18525 = vmatprep.subr.bf16.mxu1 %v20811_v44 }
 0xca9   : > { %18585 = vmatprep.subr.bf16.mxu0 %v20812_v19 }
 0xcab   : > { %18526 = vmatpush3.bf16.msra.mxu1 %v20811_v44 }
 0xcac   : > { %18586 = vmatpush3.bf16.msra.mxu0 %v20812_v19  ;;  %18527 = vmatprep.subr.bf16.mxu1 %v20813_v18 }
 0xcad   : > { %18587 = vmatprep.subr.bf16.mxu0 %v20814_v8 }
 0xcaf   : > { %18528 = vmatpush3.bf16.msra.mxu1 %v20813_v18 }
 0xcb0   : > { %18588 = vmatpush3.bf16.msra.mxu0 %v20814_v8  ;;  %18529 = vmatprep.subr.bf16.mxu1 %v20815_v6 }
 0xcb1   : > { %18589 = vmatprep.subr.bf16.mxu0 %v20816_v1 }
 0xcb3   : > { %18530 = vmatpush3.bf16.msra.mxu1 %v20815_v6 }
 0xcb4   : > { %18590 = vmatpush3.bf16.msra.mxu0 %v20816_v1  ;;  %18531 = vmatprep.subr.bf16.mxu1 %v20817_v45 }
 0xcb5   : > { %18591 = vmatprep.subr.bf16.mxu0 %v20818_v12 }
 0xcb7   : > { %18532 = vmatpush3.bf16.msra.mxu1 %v20817_v45 }
 0xcb8   : > { %18592 = vmatpush3.bf16.msra.mxu0 %v20818_v12  ;;  %18533 = vmatprep.subr.bf16.mxu1 %v20819_v9 }
 0xcb9   : > { %18593 = vmatprep.subr.bf16.mxu0 %v20820_v56 }
 0xcbb   : > { %18534 = vmatpush3.bf16.msra.mxu1 %v20819_v9 }
 0xcbc   : > { %18594 = vmatpush3.bf16.msra.mxu0 %v20820_v56  ;;  %18559 = vmatprep.subr.bf16.mxu1 %v20821_v2 }
 0xcbe   : > { %18536 = vmatmul.mubr.bf16.vlgmr.msra.gmra.mxu1 %v14935_v28 }
 0xcbf   : > { %18596 = vmatmul.mubr.bf16.vlgmr.msra.gmra.mxu0 %v15422_v29  ;;  %18560 = vmatpush3.bf16.msra.mxu1 %v20821_v2 }
 0xcc0   : > { %18575 = vmatprep.mubr.bf16.mxu1 %v15297_v34  ;;  %18561 = vmatprep.subr.bf16.mxu1 %v20822_v48 }
 0xcc3   : > { %18562 = vmatpush3.bf16.msra.mxu1 %v20822_v48 }
 0xcc4   : > { %18563 = vmatprep.subr.bf16.mxu1 %v20823_v33 }
 0xcc7   : > { %18564 = vmatpush3.bf16.msra.mxu1 %v20823_v33 }
 0xcc8   : > { %18565 = vmatprep.subr.bf16.mxu1 %v20824_v61 }
 0xccb   : > { %18566 = vmatpush3.bf16.msra.mxu1 %v20824_v61 }
 0xccc   : > { %18567 = vmatprep.subr.bf16.mxu1 %v20825_v50 }
 0xccf   : > { %18568 = vmatpush3.bf16.msra.mxu1 %v20825_v50 }
 0xcd0   : > { %18569 = vmatprep.subr.bf16.mxu1 %v20826_v3 }
 0xcd3   : > { %18570 = vmatpush3.bf16.msra.mxu1 %v20826_v3 }
 0xcd4   : > { %18571 = vmatprep.subr.bf16.mxu1 %v20827_v10 }
 0xcd7   : > { %18572 = vmatpush3.bf16.msra.mxu1 %v20827_v10 }
 0xcd8   : > { %18573 = vmatprep.subr.bf16.mxu1 %v20828_v60 }
 0xcdb   : > { %18574 = vmatpush3.bf16.msra.mxu1 %v20828_v60 }
 0xcde   : > { %18576 = vmatmul.mubr.bf16.vlgmr.msra.gmra.mxu1 %v15298_v49 }
 0xd5e   : > { %v18517_v62 = vpop.f32.mrf.mxu1 }
 0xd5f   : > { %v18557_v40 = vpop.f32.mrf.mxu0 }
 0xd60   : > { %v15057_v5 = vpop.f32.mrf.mxu1 }
 0xd61   : > { %v15274_v23 = vpop.f32.mrf.mxu0 }
 0xd62   : > { %v18518_v47 = vpop.f32.mrf.mxu1 }
 0xd63   : > { %v18558_v59 = vpop.f32.mrf.mxu0 }
 0xd64   : > { %v15060_v27 = vpop.f32.mrf.mxu1 }
 0xd65   : > { %v15277_v39 = vpop.f32.mrf.mxu0 }
 0xd7e   : > { %v18537_v11 = vpop.f32.mrf.mxu1 }
 0xd7f   : > { %v15163_v38 = vadd.f32 %v18537_v11, %v18517_v62  ;;  %v18597_v57 = vpop.f32.mrf.mxu0 }
 0xd80   : > { %v15154_v32 = vpop.f32.mrf.mxu1 }
 0xd81   : > { %v15155_v58 = vadd.f32 %v15154_v32, %v15057_v5  ;;  %v15291_v31 = vadd.f32 %v18557_v40, %v15163_v38  ;;  %v15522_v22 = vpop.f32.mrf.mxu0 }
 0xd82   : > { %v18538_v17 = vpop.f32.mrf.mxu1 }
 0xd83   : > { %v15166_v4 = vadd.f32 %v18538_v17, %v18518_v47  ;;  %v15289_v51 = vadd.f32 %v15274_v23, %v15155_v58  ;;  %v18598_v41 = vpop.f32.mrf.mxu0 }
 0xd84   : > { %v15157_v26 = vpop.f32.mrf.mxu1 }
 0xd85   : > { %v15158_v0 = vadd.f32 %v15157_v26, %v15060_v27  ;;  %v15292_v20 = vadd.f32 %v18558_v59, %v15166_v4  ;;  %v15525_v8 = vpop.f32.mrf.mxu0 }
 0xd87   : > { %v15290_v7 = vadd.f32 %v15277_v39, %v15158_v0 }
 0xd9e   : > { %v18577_v16 = vpop.f32.mrf.mxu1 }
 0xd9f   : > { %v15415_v54 = vadd.f32 %v18577_v16, %v15291_v31 }
 0xda0   : > { %v15398_v37 = vpop.f32.mrf.mxu1 }
 0xda1   : > { %v15539_v46 = vadd.f32 %v18597_v57, %v15415_v54  ;;  %v15413_v52 = vadd.f32 %v15398_v37, %v15289_v51 }
 0xda2   : > { %v18578_v25 = vpop.f32.mrf.mxu1 }
 0xda3   : > { %v15550_v53 = vadd.f32 %v18137_v42, %v15539_v46  ;;  %v15537_v43 = vadd.f32 %v15522_v22, %v15413_v52  ;;  %v15416_v24 = vadd.f32 %v18578_v25, %v15292_v20 }
 0xda4   : > { %v15401_v13 = vpop.f32.mrf.mxu1 }
 0xda5   : > { %20829 = vtanh.f32 %v15550_v53  ;;  %v15548_v44 = vadd.f32 %v18137_v42, %v15537_v43  ;;  %v15540_v19 = vadd.f32 %v18598_v41, %v15416_v24  ;;  %v15414_v18 = vadd.f32 %v15401_v13, %v15290_v7 }
 0xda7   : > { %20831 = vtanh.f32 %v15548_v44  ;;  %v15551_v6 = vadd.f32 %v18137_v42, %v15540_v19  ;;  %v15538_v1 = vadd.f32 %v15525_v8, %v15414_v18 }
 0xda9   : > { %20833 = vtanh.f32 %v15551_v6  ;;  %v15549_v45 = vadd.f32 %v18137_v42, %v15538_v1 }
 0xdab   : > { %20835 = vtanh.f32 %v15549_v45 }
 0xdb2   : > { %v20830_v12 = vpop.eup %20829 }
 0xdb3   : > { %15559 = vst.msk [vmem:[%s532_s27 + $0x10] sm:$0xff] %vm15556_vm3, %v20830_v12 }
 0xdb4   : > { %v20832_v9 = vpop.eup %20831 }
 0xdb5   : > { %15557 = vst.msk [vmem:[%s532_s27] sm:$0xff] %vm15556_vm3, %v20832_v9 }
 0xdb6   : > { %v20834_v56 = vpop.eup %20833 }
 0xdb7   : > { %15561 = vst.msk [vmem:[%s532_s27 + $0x18] sm:$0xf] %vm15560_vm4, %v20834_v56 }
 0xdb8   : > { %v20836_v2 = vpop.eup %20835 }
 0xdb9   : > { %15558 = vst.msk [vmem:[%s532_s27 + $0x8] sm:$0xff] %vm15556_vm3, %v20836_v2 }
 0xdba PF: > { %s27_s18 = sadd.s32 1, %s20940_s18  }
 0xdbb   : > { %p24_p2 = scmp.ge.s32.totalorder %s27_s18, 4  }
 0xdbd   :  { %26 = sbr.rel (!%p24_p2) target bundleno = 2 (0x2), region = 150 }
 0xdc2   :  { %15583 = vsyncpa [#allocation10], 1 }
 0xdc3   :  { %15585 = vsyncpa [#allocation10 + $0x1], 1 }
 0xdc4   :  { %15586 = vsyncpa [#allocation12], 1 }

</bundles_post_ra>
